<compile_context>
chip_gen: v5e
topology: v5e:2x2
jax: 0.10.0
libtpu: 0.0.40
codegen_flags: <defaults>
</compile_context>

<pallas_src>
import jax
import jax.numpy as jnp
from jax.experimental import pallas as pl
from jax.experimental.pallas import tpu as pltpu

INPUT_CH = 67
INPUT_CH_PAD = 128       # first matmul K padded to lane width
FEATURE_CH = 512
MLP_CH = 1024
EDGE_NUM = 1
SEQ = EDGE_NUM + 1       # conv spatial length = 2
BLOCK_NUM = 3
VMEM_LIMIT_BYTES = 32 * 1024 * 1024


def _round_up(x, m):
    return (x + m - 1) // m * m


def _cdiv(a, b):
    return (a + b - 1) // b


def _device_kind():
    try:
        return jax.devices()[0].device_kind.lower()
    except Exception:
        return ""


def _is_new_gen(kind):
    return ("v6" in kind) or ("v7" in kind) or ("7x" in kind)


def _select_batch_tile(batch, kind):
    """Snug, chip-aware batch tile (multiple of 16 for bf16 sublane packing)."""
    max_tb = 256 if _is_new_gen(kind) else 128
    # v7x: 2 TensorCores shard the "parallel" grid axis -> keep >=2 grid steps
    # once the batch is big enough to be compute-bound.
    min_steps = 2 if (("v7" in kind or "7x" in kind) and batch >= 64) else 1
    steps = max(min_steps, _cdiv(batch, max_tb))
    return _round_up(_cdiv(batch, steps), 16)


# ---------------------------------------------------------------------------
# Fused critic kernel: one grid step = `tb` batch rows, whole network.
# ---------------------------------------------------------------------------
def _bias_relu(acc_f32, b_ref):
    # Epilogue dtype is driven by the bias dtype (bf16 on v6e/v7x, f32 on v5e);
    # result is cast to bf16 as the next MXU matmul's input either way.
    b = b_ref[...]
    return jnp.maximum(acc_f32.astype(b.dtype) + b, 0.0).astype(jnp.bfloat16)


def _critic_kernel(x_ref,
                   wc0_ref, bc0_ref, wc1_ref, bc1_ref, wc2_ref, bc2_ref,
                   w1_ref, b1_ref, w2_ref, b2_ref, w3_ref, b3_ref,
                   o_ref):
    tb = x_ref.shape[1]

    # Conv stage: 1x1 convs are per-row linears.  Merge the SEQ=2 spatial
    # positions into one M=2*tb matmul chain (single weight push per layer).
    x = x_ref[...].reshape(SEQ * tb, INPUT_CH_PAD)                      # bf16
    h = _bias_relu(jnp.dot(x, wc0_ref[...],
                           preferred_element_type=jnp.float32), bc0_ref)
    h = _bias_relu(jnp.dot(h, wc1_ref[...],
                           preferred_element_type=jnp.float32), bc1_ref)
    h = _bias_relu(jnp.dot(h, wc2_ref[...],
                           preferred_element_type=jnp.float32), bc2_ref)  # (2*tb, 512)

    # PyTorch NCL flatten (feature = channel*SEQ + pos) pre-folded into w1
    # (pos-major rows): per batch row the feature vector is the lane concat of
    # the two per-position conv outputs -> single K=1024 matmul.
    h = jnp.concatenate([h[:tb], h[tb:]], axis=-1)                      # (tb, 1024)

    h = _bias_relu(jnp.dot(h, w1_ref[...],
                           preferred_element_type=jnp.float32), b1_ref)
    h = jnp.maximum(jnp.dot(h, w2_ref[...],
                            preferred_element_type=jnp.float32)
                    + b2_ref[...], 0.0)                                 # (tb, 1024) f32

    # Final out_ch=1 layer: VPU multiply + XLU lane reduction instead of a
    # padded 1024x128 MXU matmul; tiny (tb, 1) output.
    out = jnp.sum(h * w3_ref[...], axis=-1, keepdims=True) + b3_ref[...]
    o_ref[...] = out.astype(o_ref.dtype)


# ---------------------------------------------------------------------------
# Parameter construction (deterministic, synthetic, PyTorch layout semantics).
# ---------------------------------------------------------------------------
def init_params(key):
    def linear(key, fan_in, fan_out):
        kw, kb = jax.random.split(key)
        scale = 1.0 / jnp.sqrt(jnp.float32(fan_in))
        w = jax.random.uniform(kw, (fan_in, fan_out), jnp.float32, -scale, scale)
        b = jax.random.uniform(kb, (fan_out,), jnp.float32, -scale, scale)
        return w, b

    keys = jax.random.split(key, BLOCK_NUM + 3)
    params = {"conv": [], "mlp": []}
    c_in = INPUT_CH
    for i in range(BLOCK_NUM):
        params["conv"].append(linear(keys[i], c_in, FEATURE_CH))
        c_in = FEATURE_CH
    mlp_in = SEQ * FEATURE_CH  # 1024, rows indexed by channel*SEQ + pos
    params["mlp"].append(linear(keys[BLOCK_NUM + 0], mlp_in, MLP_CH))
    params["mlp"].append(linear(keys[BLOCK_NUM + 1], MLP_CH, MLP_CH))
    params["mlp"].append(linear(keys[BLOCK_NUM + 2], MLP_CH, 1))
    return params


def prepare_params(params, bf16_epilogue=False):
    """Pad / permute / cast once (outside the hot path) into kernel layout."""
    (wc0, bc0), (wc1, bc1), (wc2, bc2) = params["conv"]
    (w1, b1), (w2, b2), (w3, b3) = params["mlp"]

    # pad first conv K: 67 -> 128 with zero rows
    wc0p = jnp.zeros((INPUT_CH_PAD, FEATURE_CH), jnp.float32).at[:INPUT_CH].set(wc0)
    # fold the NCL flatten (feature = channel*SEQ + pos) into w1: pos-major rows
    w1p = (w1.reshape(FEATURE_CH, SEQ, MLP_CH).transpose(1, 0, 2)
              .reshape(SEQ * FEATURE_CH, MLP_CH))

    ep = jnp.bfloat16 if bf16_epilogue else jnp.float32
    bf = lambda a: a.astype(jnp.bfloat16)
    erow = lambda a: a.reshape(1, -1).astype(ep)
    return dict(
        wc0=bf(wc0p), bc0=erow(bc0),
        wc1=bf(wc1), bc1=erow(bc1),
        wc2=bf(wc2), bc2=erow(bc2),
        w1=bf(w1p), b1=erow(b1),
        w2=bf(w2), b2=b2.reshape(1, -1).astype(jnp.float32),
        w3=w3.reshape(1, MLP_CH).astype(jnp.float32),   # final layer stays f32 on VPU
        b3=b3.reshape(1, 1).astype(jnp.float32),
    )


# ---------------------------------------------------------------------------
# Critic forward: obs (B, 67, edge_num+1) -> value (B, 1)
# ---------------------------------------------------------------------------
@jax.jit
def critic_forward(prepared, obs):
    obs = obs.astype(jnp.float32)                   # torch.tensor(state).float()
    batch = obs.shape[0]
    kind = _device_kind()

    # NCL -> (SEQ, B, C); pad channels 67 -> 128; cast matmul input to bf16
    x = jnp.transpose(obs, (2, 0, 1))
    x = jnp.pad(x, ((0, 0), (0, 0), (0, INPUT_CH_PAD - INPUT_CH)))

    tb = _select_batch_tile(batch, kind)
    bpad = _round_up(batch, tb)
    if bpad != batch:
        x = jnp.pad(x, ((0, 0), (0, bpad - batch), (0, 0)))
    x = x.astype(jnp.bfloat16)
    grid = (bpad // tb,)

    def const_spec(arr):
        nd = arr.ndim
        return pl.BlockSpec(arr.shape, lambda i, nd=nd: (0,) * nd)

    p = prepared
    weights = (p["wc0"], p["bc0"], p["wc1"], p["bc1"], p["wc2"], p["bc2"],
               p["w1"], p["b1"], p["w2"], p["b2"], p["w3"], p["b3"])

    flops = 2 * bpad * (SEQ * (INPUT_CH_PAD * FEATURE_CH
                               + 2 * FEATURE_CH * FEATURE_CH)
                        + SEQ * FEATURE_CH * MLP_CH
                        + MLP_CH * MLP_CH
                        + MLP_CH)
    weight_bytes = sum(int(w.size) * w.dtype.itemsize for w in weights)
    bytes_accessed = weight_bytes + int(x.size) * 2 + bpad * 4

    out = pl.pallas_call(
        _critic_kernel,
        out_shape=jax.ShapeDtypeStruct((bpad, 1), jnp.float32),
        grid_spec=pltpu.PrefetchScalarGridSpec(
            num_scalar_prefetch=0,
            grid=grid,
            in_specs=[pl.BlockSpec((SEQ, tb, INPUT_CH_PAD), lambda i: (0, i, 0))]
                     + [const_spec(w) for w in weights],
            out_specs=pl.BlockSpec((tb, 1), lambda i: (i, 0)),
        ),
        compiler_params=pltpu.CompilerParams(
            dimension_semantics=("parallel",),
            vmem_limit_bytes=VMEM_LIMIT_BYTES),
        cost_estimate=pl.CostEstimate(flops=flops, transcendentals=0,
                                      bytes_accessed=bytes_accessed),
    )(x, *weights)

    # padded batch rows produce garbage (bias+ReLU) and are sliced off here
    return out[:batch]


# Pure-JAX f32 reference (PyTorch semantics) for a correctness check.
def critic_forward_ref(params, obs):
    obs = obs.astype(jnp.float32)
    batch = obs.shape[0]
    h = jnp.transpose(obs, (0, 2, 1)).reshape(batch * SEQ, INPUT_CH)
    for w, b in params["conv"]:
        h = jnp.maximum(h @ w + b, 0.0)
    h = h.reshape(batch, SEQ, FEATURE_CH)
    h = jnp.transpose(h, (0, 2, 1)).reshape(batch, FEATURE_CH * SEQ)
    (w1, b1), (w2, b2), (w3, b3) = params["mlp"]
    h = jnp.maximum(h @ w1 + b1, 0.0)
    h = jnp.maximum(h @ w2 + b2, 0.0)
    return h @ w3 + b3


if __name__ == "__main__":
    key = jax.random.PRNGKey(0)
    k_obs, k_params = jax.random.split(key)

    # small deterministic example input: (batch=2, channels=67, length=2)
    obs = jax.random.normal(k_obs, (2, INPUT_CH, SEQ), dtype=jnp.float32)
    params = init_params(k_params)
    prepared = prepare_params(params, bf16_epilogue=_is_new_gen(_device_kind()))

    v = critic_forward(prepared, obs)
    v = jax.block_until_ready(v)
    assert v.shape == (2, 1) and v.dtype == jnp.float32

    ref = critic_forward_ref(params, obs)
    assert jnp.allclose(v, ref, rtol=5e-2, atol=5e-2), (v, ref)
    print("KERNEL_OK")
</pallas_src>

<mosaic_0001>
module attributes {stable_mosaic.version = 11 : i64} {
  func.func @_critic_kernel(%arg0: i32, %arg1: memref<2x16x128xbf16, #tpu.memory_space<vmem>>, %arg2: memref<128x512xbf16, #tpu.memory_space<vmem>>, %arg3: memref<1x512xf32, #tpu.memory_space<vmem>>, %arg4: memref<512x512xbf16, #tpu.memory_space<vmem>>, %arg5: memref<1x512xf32, #tpu.memory_space<vmem>>, %arg6: memref<512x512xbf16, #tpu.memory_space<vmem>>, %arg7: memref<1x512xf32, #tpu.memory_space<vmem>>, %arg8: memref<1024x1024xbf16, #tpu.memory_space<vmem>>, %arg9: memref<1x1024xf32, #tpu.memory_space<vmem>>, %arg10: memref<1024x1024xbf16, #tpu.memory_space<vmem>>, %arg11: memref<1x1024xf32, #tpu.memory_space<vmem>>, %arg12: memref<1x1024xf32, #tpu.memory_space<vmem>>, %arg13: memref<1x1xf32, #tpu.memory_space<vmem>>, %arg14: memref<16x1xf32, #tpu.memory_space<vmem>>) attributes {dimension_semantics = [#tpu.dimension_semantics<parallel>], iteration_bounds = array<i64: 1>, scalar_prefetch = 0 : i64, scratch_operands = 0 : i64, tpu.core_type = #tpu.core_type<tc>, window_params = [{transform_indices = @transform_0, window_bounds = array<i64: 2, 16, 128>}, {pipeline_mode = #tpu.pipeline_mode<synchronous>, transform_indices = @transform_1, window_bounds = array<i64: 128, 512>}, {pipeline_mode = #tpu.pipeline_mode<synchronous>, transform_indices = @transform_2, window_bounds = array<i64: 1, 512>}, {pipeline_mode = #tpu.pipeline_mode<synchronous>, transform_indices = @transform_3, window_bounds = array<i64: 512, 512>}, {pipeline_mode = #tpu.pipeline_mode<synchronous>, transform_indices = @transform_4, window_bounds = array<i64: 1, 512>}, {pipeline_mode = #tpu.pipeline_mode<synchronous>, transform_indices = @transform_5, window_bounds = array<i64: 512, 512>}, {pipeline_mode = #tpu.pipeline_mode<synchronous>, transform_indices = @transform_6, window_bounds = array<i64: 1, 512>}, {pipeline_mode = #tpu.pipeline_mode<synchronous>, transform_indices = @transform_7, window_bounds = array<i64: 1024, 1024>}, {pipeline_mode = #tpu.pipeline_mode<synchronous>, transform_indices = @transform_8, window_bounds = array<i64: 1, 1024>}, {pipeline_mode = #tpu.pipeline_mode<synchronous>, transform_indices = @transform_9, window_bounds = array<i64: 1024, 1024>}, {pipeline_mode = #tpu.pipeline_mode<synchronous>, transform_indices = @transform_10, window_bounds = array<i64: 1, 1024>}, {pipeline_mode = #tpu.pipeline_mode<synchronous>, transform_indices = @transform_11, window_bounds = array<i64: 1, 1024>}, {pipeline_mode = #tpu.pipeline_mode<synchronous>, transform_indices = @transform_12, window_bounds = array<i64: 1, 1>}, {transform_indices = @transform_13, window_bounds = array<i64: 16, 1>}]} {
    %c0 = arith.constant 0 : index
    %c0_0 = arith.constant 0 : index
    %c0_1 = arith.constant 0 : index
    %0 = vector.load %arg1[%c0, %c0_0, %c0_1] : memref<2x16x128xbf16, #tpu.memory_space<vmem>>, vector<2x16x128xbf16>
    %1 = vector.shape_cast %0 : vector<2x16x128xbf16> to vector<32x128xbf16>
    %c0_2 = arith.constant 0 : index
    %c0_3 = arith.constant 0 : index
    %2 = vector.load %arg2[%c0_2, %c0_3] : memref<128x512xbf16, #tpu.memory_space<vmem>>, vector<128x512xbf16>
    %cst = arith.constant dense<0.000000e+00> : vector<32x512xf32>
    %3 = tpu.matmul %1, %2, %cst {dimension_numbers = #tpu.dot_dimension_numbers<[1], [0], [0], [1], [0, 0, 1, 1], [], []>} : vector<32x128xbf16>, vector<128x512xbf16>, vector<32x512xf32> -> vector<32x512xf32>
    %c0_4 = arith.constant 0 : index
    %c0_5 = arith.constant 0 : index
    %4 = vector.load %arg3[%c0_4, %c0_5] : memref<1x512xf32, #tpu.memory_space<vmem>>, vector<1x512xf32>
    %5 = vector.broadcast %4 : vector<1x512xf32> to vector<32x512xf32>
    %6 = arith.addf %3, %5 : vector<32x512xf32>
    %cst_6 = arith.constant 0.000000e+00 : f32
    %7 = vector.broadcast %cst_6 : f32 to vector<32x512xf32>
    %8 = arith.maximumf %6, %7 : vector<32x512xf32>
    %9 = arith.truncf %8 : vector<32x512xf32> to vector<32x512xbf16>
    %c0_7 = arith.constant 0 : index
    %c0_8 = arith.constant 0 : index
    %10 = vector.load %arg4[%c0_7, %c0_8] : memref<512x512xbf16, #tpu.memory_space<vmem>>, vector<512x512xbf16>
    %cst_9 = arith.constant dense<0.000000e+00> : vector<32x512xf32>
    %11 = tpu.matmul %9, %10, %cst_9 {dimension_numbers = #tpu.dot_dimension_numbers<[1], [0], [0], [1], [0, 0, 1, 1], [], []>} : vector<32x512xbf16>, vector<512x512xbf16>, vector<32x512xf32> -> vector<32x512xf32>
    %c0_10 = arith.constant 0 : index
    %c0_11 = arith.constant 0 : index
    %12 = vector.load %arg5[%c0_10, %c0_11] : memref<1x512xf32, #tpu.memory_space<vmem>>, vector<1x512xf32>
    %13 = vector.broadcast %12 : vector<1x512xf32> to vector<32x512xf32>
    %14 = arith.addf %11, %13 : vector<32x512xf32>
    %cst_12 = arith.constant 0.000000e+00 : f32
    %15 = vector.broadcast %cst_12 : f32 to vector<32x512xf32>
    %16 = arith.maximumf %14, %15 : vector<32x512xf32>
    %17 = arith.truncf %16 : vector<32x512xf32> to vector<32x512xbf16>
    %c0_13 = arith.constant 0 : index
    %c0_14 = arith.constant 0 : index
    %18 = vector.load %arg6[%c0_13, %c0_14] : memref<512x512xbf16, #tpu.memory_space<vmem>>, vector<512x512xbf16>
    %cst_15 = arith.constant dense<0.000000e+00> : vector<32x512xf32>
    %19 = tpu.matmul %17, %18, %cst_15 {dimension_numbers = #tpu.dot_dimension_numbers<[1], [0], [0], [1], [0, 0, 1, 1], [], []>} : vector<32x512xbf16>, vector<512x512xbf16>, vector<32x512xf32> -> vector<32x512xf32>
    %c0_16 = arith.constant 0 : index
    %c0_17 = arith.constant 0 : index
    %20 = vector.load %arg7[%c0_16, %c0_17] : memref<1x512xf32, #tpu.memory_space<vmem>>, vector<1x512xf32>
    %21 = vector.broadcast %20 : vector<1x512xf32> to vector<32x512xf32>
    %22 = arith.addf %19, %21 : vector<32x512xf32>
    %cst_18 = arith.constant 0.000000e+00 : f32
    %23 = vector.broadcast %cst_18 : f32 to vector<32x512xf32>
    %24 = arith.maximumf %22, %23 : vector<32x512xf32>
    %25 = arith.truncf %24 : vector<32x512xf32> to vector<32x512xbf16>
    %26 = vector.extract_strided_slice %25 {offsets = [0, 0], sizes = [16, 512], strides = [1, 1]} : vector<32x512xbf16> to vector<16x512xbf16>
    %27 = vector.extract_strided_slice %25 {offsets = [16, 0], sizes = [16, 512], strides = [1, 1]} : vector<32x512xbf16> to vector<16x512xbf16>
    %28 = tpu.concatenate %26, %27 in 1 : vector<16x512xbf16>, vector<16x512xbf16> -> vector<16x1024xbf16>
    %c0_19 = arith.constant 0 : index
    %c0_20 = arith.constant 0 : index
    %29 = vector.load %arg8[%c0_19, %c0_20] : memref<1024x1024xbf16, #tpu.memory_space<vmem>>, vector<1024x1024xbf16>
    %cst_21 = arith.constant dense<0.000000e+00> : vector<16x1024xf32>
    %30 = tpu.matmul %28, %29, %cst_21 {dimension_numbers = #tpu.dot_dimension_numbers<[1], [0], [0], [1], [0, 0, 1, 1], [], []>} : vector<16x1024xbf16>, vector<1024x1024xbf16>, vector<16x1024xf32> -> vector<16x1024xf32>
    %c0_22 = arith.constant 0 : index
    %c0_23 = arith.constant 0 : index
    %31 = vector.load %arg9[%c0_22, %c0_23] : memref<1x1024xf32, #tpu.memory_space<vmem>>, vector<1x1024xf32>
    %32 = vector.broadcast %31 : vector<1x1024xf32> to vector<16x1024xf32>
    %33 = arith.addf %30, %32 : vector<16x1024xf32>
    %cst_24 = arith.constant 0.000000e+00 : f32
    %34 = vector.broadcast %cst_24 : f32 to vector<16x1024xf32>
    %35 = arith.maximumf %33, %34 : vector<16x1024xf32>
    %36 = arith.truncf %35 : vector<16x1024xf32> to vector<16x1024xbf16>
    %c0_25 = arith.constant 0 : index
    %c0_26 = arith.constant 0 : index
    %37 = vector.load %arg10[%c0_25, %c0_26] : memref<1024x1024xbf16, #tpu.memory_space<vmem>>, vector<1024x1024xbf16>
    %cst_27 = arith.constant dense<0.000000e+00> : vector<16x1024xf32>
    %38 = tpu.matmul %36, %37, %cst_27 {dimension_numbers = #tpu.dot_dimension_numbers<[1], [0], [0], [1], [0, 0, 1, 1], [], []>} : vector<16x1024xbf16>, vector<1024x1024xbf16>, vector<16x1024xf32> -> vector<16x1024xf32>
    %c0_28 = arith.constant 0 : index
    %c0_29 = arith.constant 0 : index
    %39 = vector.load %arg11[%c0_28, %c0_29] : memref<1x1024xf32, #tpu.memory_space<vmem>>, vector<1x1024xf32>
    %40 = vector.broadcast %39 : vector<1x1024xf32> to vector<16x1024xf32>
    %41 = arith.addf %38, %40 : vector<16x1024xf32>
    %cst_30 = arith.constant 0.000000e+00 : f32
    %42 = vector.broadcast %cst_30 : f32 to vector<16x1024xf32>
    %43 = arith.maximumf %41, %42 : vector<16x1024xf32>
    %c0_31 = arith.constant 0 : index
    %c0_32 = arith.constant 0 : index
    %44 = vector.load %arg12[%c0_31, %c0_32] : memref<1x1024xf32, #tpu.memory_space<vmem>>, vector<1x1024xf32>
    %45 = vector.broadcast %44 : vector<1x1024xf32> to vector<16x1024xf32>
    %46 = arith.mulf %43, %45 : vector<16x1024xf32>
    %cst_33 = arith.constant dense<0.000000e+00> : vector<16xf32>
    %47 = vector.multi_reduction <add>, %46, %cst_33 [1] : vector<16x1024xf32> to vector<16xf32>
    %48 = vector.shape_cast %47 : vector<16xf32> to vector<16x1xf32>
    %c0_34 = arith.constant 0 : index
    %c0_35 = arith.constant 0 : index
    %49 = vector.load %arg13[%c0_34, %c0_35] : memref<1x1xf32, #tpu.memory_space<vmem>>, vector<1x1xf32>
    %50 = vector.broadcast %49 : vector<1x1xf32> to vector<16x1xf32>
    %51 = arith.addf %48, %50 : vector<16x1xf32>
    %c0_36 = arith.constant 0 : index
    %c0_37 = arith.constant 0 : index
    %52 = vector.load %arg14[%c0_36, %c0_37] : memref<16x1xf32, #tpu.memory_space<vmem>>, vector<16x1xf32>
    tpu.vector_store %arg14[%c0_36, %c0_37], %51 {strides = array<i32>} : memref<16x1xf32, #tpu.memory_space<vmem>>, vector<16x1xf32>,
    return
  }
  func.func @transform_0(%arg0: i32) -> (i32, i32, i32) {
    %c0_i32 = arith.constant 0 : i32
    %c0_i32_0 = arith.constant 0 : i32
    %c0_i32_1 = arith.constant 0 : i32
    return %c0_i32, %arg0, %c0_i32_0 : i32, i32, i32
  }
  func.func @transform_1(%arg0: i32) -> (i32, i32) {
    %c0_i32 = arith.constant 0 : i32
    %c0_i32_0 = arith.constant 0 : i32
    %c0_i32_1 = arith.constant 0 : i32
    return %c0_i32, %c0_i32_0 : i32, i32
  }
  func.func @transform_2(%arg0: i32) -> (i32, i32) {
    %c0_i32 = arith.constant 0 : i32
    %c0_i32_0 = arith.constant 0 : i32
    %c0_i32_1 = arith.constant 0 : i32
    return %c0_i32, %c0_i32_0 : i32, i32
  }
  func.func @transform_3(%arg0: i32) -> (i32, i32) {
    %c0_i32 = arith.constant 0 : i32
    %c0_i32_0 = arith.constant 0 : i32
    %c0_i32_1 = arith.constant 0 : i32
    return %c0_i32, %c0_i32_0 : i32, i32
  }
  func.func @transform_4(%arg0: i32) -> (i32, i32) {
    %c0_i32 = arith.constant 0 : i32
    %c0_i32_0 = arith.constant 0 : i32
    %c0_i32_1 = arith.constant 0 : i32
    return %c0_i32, %c0_i32_0 : i32, i32
  }
  func.func @transform_5(%arg0: i32) -> (i32, i32) {
    %c0_i32 = arith.constant 0 : i32
    %c0_i32_0 = arith.constant 0 : i32
    %c0_i32_1 = arith.constant 0 : i32
    return %c0_i32, %c0_i32_0 : i32, i32
  }
  func.func @transform_6(%arg0: i32) -> (i32, i32) {
    %c0_i32 = arith.constant 0 : i32
    %c0_i32_0 = arith.constant 0 : i32
    %c0_i32_1 = arith.constant 0 : i32
    return %c0_i32, %c0_i32_0 : i32, i32
  }
  func.func @transform_7(%arg0: i32) -> (i32, i32) {
    %c0_i32 = arith.constant 0 : i32
    %c0_i32_0 = arith.constant 0 : i32
    %c0_i32_1 = arith.constant 0 : i32
    return %c0_i32, %c0_i32_0 : i32, i32
  }
  func.func @transform_8(%arg0: i32) -> (i32, i32) {
    %c0_i32 = arith.constant 0 : i32
    %c0_i32_0 = arith.constant 0 : i32
    %c0_i32_1 = arith.constant 0 : i32
    return %c0_i32, %c0_i32_0 : i32, i32
  }
  func.func @transform_9(%arg0: i32) -> (i32, i32) {
    %c0_i32 = arith.constant 0 : i32
    %c0_i32_0 = arith.constant 0 : i32
    %c0_i32_1 = arith.constant 0 : i32
    return %c0_i32, %c0_i32_0 : i32, i32
  }
  func.func @transform_10(%arg0: i32) -> (i32, i32) {
    %c0_i32 = arith.constant 0 : i32
    %c0_i32_0 = arith.constant 0 : i32
    %c0_i32_1 = arith.constant 0 : i32
    return %c0_i32, %c0_i32_0 : i32, i32
  }
  func.func @transform_11(%arg0: i32) -> (i32, i32) {
    %c0_i32 = arith.constant 0 : i32
    %c0_i32_0 = arith.constant 0 : i32
    %c0_i32_1 = arith.constant 0 : i32
    return %c0_i32, %c0_i32_0 : i32, i32
  }
  func.func @transform_12(%arg0: i32) -> (i32, i32) {
    %c0_i32 = arith.constant 0 : i32
    %c0_i32_0 = arith.constant 0 : i32
    %c0_i32_1 = arith.constant 0 : i32
    return %c0_i32, %c0_i32_0 : i32, i32
  }
  func.func @transform_13(%arg0: i32) -> (i32, i32) {
    %c0_i32 = arith.constant 0 : i32
    %c0_i32_0 = arith.constant 0 : i32
    return %arg0, %c0_i32 : i32, i32
  }
}

</mosaic_0001>

<bundles_post_ra>
// kernel: critic_forward.1
= control target key start
LH: loop header
LB: loop body
LE: loop exit
PB: predicated region body
PF: predicated region fallthrough
CT: control target
= control target key end

     0   :  { %s18865_s0 = inlined_call_operand.vmem [shape: bf16[2,16,128], index: 0, kind: input, shape index: {}]   ;;  %s18866_s1 = inlined_call_operand.hbm [shape: bf16[128,512], index: 1, kind: input, shape index: {}]   ;;  %s18867_s2 = inlined_call_operand.hbm [shape: f32[1,512], index: 2, kind: input, shape index: {}]   ;;  %s18868_s3 = inlined_call_operand.hbm [shape: bf16[512,512], index: 3, kind: input, shape index: {}]   ;;  %s18869_s4 = inlined_call_operand.hbm [shape: f32[1,512], index: 4, kind: input, shape index: {}]   ;;  %s18870_s5 = inlined_call_operand.hbm [shape: bf16[512,512], index: 5, kind: input, shape index: {}]   ;;  %s18871_s6 = inlined_call_operand.hbm [shape: f32[1,512], index: 6, kind: input, shape index: {}]   ;;  %s18872_s7 = inlined_call_operand.hbm [shape: bf16[1024,1024], index: 7, kind: input, shape index: {}]   ;;  %s18873_s8 = inlined_call_operand.hbm [shape: f32[1,1024], index: 8, kind: input, shape index: {}]   ;;  %s18874_s9 = inlined_call_operand.hbm [shape: bf16[1024,1024], index: 9, kind: input, shape index: {}]   ;;  %s18875_s10 = inlined_call_operand.hbm [shape: f32[1,1024], index: 10, kind: input, shape index: {}]   ;;  %s18876_s11 = inlined_call_operand.hbm [shape: f32[1,1024], index: 11, kind: input, shape index: {}]   ;;  %s18877_s12 = inlined_call_operand.<no memory space> [shape: f32[1,1], index: 12, kind: input, shape index: {}]   ;;  %s18878_s13 = inlined_call_operand.vmem [shape: f32[16,1], index: 13, kind: output, shape index: {}]  }
   0x1   :  { %v18_v0 = vstv %s18877_s12 }
   0x2   :  { %19 = vst [vmem:[#allocation2] sm:$0x1] %v18_v0 }
   0x3   :  { %20 = vsyncpa [#allocation4], 0 }
   0x4   :  { %21 = vsyncpa [#allocation6], 0 }
   0x5   :  { %22 = vsyncpa [#allocation9], 0 }
   0x6   :  { %23 = vsyncpa [#allocation12], 0 }
   0x7   :  { %24 = vsyncpa [#allocation15], 0  ;;  %s46_s29 = sshll.u32 %s18867_s2, 4  ;;  %s47_s29 = int_to_ptr.hbm [resolvable:$true] %s46_s29 }
   0x8   :  { %25 = vsyncpa [#allocation18], 0  ;;  %s17727_s30 = smov [#allocation5]   ;;  %s70_s17 = sshll.u32 %s18869_s4, 4  ;;  %s71_s17 = int_to_ptr.hbm [resolvable:$true] %s70_s17 }
   0x9   :  { %s48_s14 = sshll.u32 %s17727_s30, 4  ;;  %s17728_s12 = smov [#allocation8]   ;;  %s49_s14 = int_to_ptr.vmem [resolvable:$true] %s48_s14 }
   0xa   :  { %51 = dma.hbm_to_vmem [thread:$0]  %s47_s29, 64, %s49_s14, [#allocation6]  }
   0xb   :  { %s72_s18 = sshll.u32 %s17728_s12, 4  ;;  %s94_s21 = sshll.u32 %s18871_s6, 4  ;;  %s73_s18 = int_to_ptr.vmem [resolvable:$true] %s72_s18  ;;  %s95_s21 = int_to_ptr.hbm [resolvable:$true] %s94_s21 }
   0xc   :  { %75 = dma.hbm_to_vmem [thread:$0]  %s71_s17, 64, %s73_s18, [#allocation9]  }
   0xd   :  { %s118_s23 = sshll.u32 %s18873_s8, 4  ;;  %s17729_s24 = smov [#allocation11]   ;;  %s119_s23 = int_to_ptr.hbm [resolvable:$true] %s118_s23 }
   0xe   :  { %s96_s25 = sshll.u32 %s17729_s24, 4  ;;  %s17730_s4 = smov [#allocation14]   ;;  %s97_s25 = int_to_ptr.vmem [resolvable:$true] %s96_s25 }
   0xf   :  { %99 = dma.hbm_to_vmem [thread:$0]  %s95_s21, 64, %s97_s25, [#allocation12]  }
  0x10   :  { %s120_s26 = sshll.u32 %s17730_s4, 4  ;;  %s142_s29 = sshll.u32 %s18875_s10, 4  ;;  %s121_s26 = int_to_ptr.vmem [resolvable:$true] %s120_s26  ;;  %s143_s29 = int_to_ptr.hbm [resolvable:$true] %s142_s29 }
  0x11   :  { %123 = dma.hbm_to_vmem [thread:$0]  %s119_s23, 128, %s121_s26, [#allocation15]  }
  0x12   :  { %s32_s14 = sshll.u32 %s18866_s1, 4  ;;  %s17731_s15 = smov [#allocation17]   ;;  %s33_s14 = int_to_ptr.hbm [resolvable:$true] %s32_s14 }
  0x13   :  { %s144_s8 = sshll.u32 %s17731_s15, 4  ;;  %s17732_s16 = smov [#allocation3]   ;;  %s145_s8 = int_to_ptr.vmem [resolvable:$true] %s144_s8 }
  0x14   :  { %147 = dma.hbm_to_vmem [thread:$0]  %s143_s29, 128, %s145_s8, [#allocation18]  }
  0x15   :  { %s34_s17 = sshll.u32 %s17732_s16, 4  ;;  %s17733_s12 = smov 256   ;;  %s35_s17 = int_to_ptr.vmem [resolvable:$true] %s34_s17 }
  0x16   :  { %s17734_s18 = smov 16   ;;  %s56_s20 = sshll.u32 %s18868_s3, 4  ;;  %s57_s20 = int_to_ptr.hbm [resolvable:$true] %s56_s20 }
  0x17   :  { %40 = dma.hbm_to_vmem [thread:$0]  %s33_s14, 4096, %s35_s17, [#allocation4], %s17733_s12, %s17733_s12, %s17734_s18  }
  0x18   :  { %s17735_s21 = smov [#allocation7]   ;;  %s80_s23 = sshll.u32 %s18870_s5, 4  ;;  %s81_s23 = int_to_ptr.hbm [resolvable:$true] %s80_s23 }
  0x19   :  { %s58_s2 = sshll.u32 %s17735_s21, 4  ;;  %s17736_s24 = smov [#allocation10]   ;;  %s59_s2 = int_to_ptr.vmem [resolvable:$true] %s58_s2 }
  0x1a   :  { %64 = dma.hbm_to_vmem [thread:$0]  %s57_s20, 16384, %s59_s2, [#allocation6], %s17733_s12, %s17733_s12, %s17734_s18  }
  0x1b   :  { %s82_s25 = sshll.u32 %s17736_s24, 4  ;;  %s104_s27 = sshll.u32 %s18872_s7, 4  ;;  %s83_s25 = int_to_ptr.vmem [resolvable:$true] %s82_s25  ;;  %s105_s27 = int_to_ptr.hbm [resolvable:$true] %s104_s27 }
  0x1c   :  { %88 = dma.hbm_to_vmem [thread:$0]  %s81_s23, 16384, %s83_s25, [#allocation9], %s17733_s12, %s17733_s12, %s17734_s18  }
  0x1d   :  { %s17737_s3 = smov [#allocation13]   ;;  %s128_s30 = sshll.u32 %s18874_s9, 4  ;;  %s129_s30 = int_to_ptr.hbm [resolvable:$true] %s128_s30 }
  0x1e   :  { %s106_s28 = sshll.u32 %s17737_s3, 4  ;;  %s17738_s14 = smov 512   ;;  %s107_s28 = int_to_ptr.vmem [resolvable:$true] %s106_s28 }
  0x1f   :  { %s17739_s5 = smov 32   ;;  %s17740_s15 = smov [#allocation16]  }
  0x20   :  { %112 = dma.hbm_to_vmem [thread:$0]  %s105_s27, 65536, %s107_s28, [#allocation12], %s17738_s14, %s17738_s14, %s17739_s5  }
  0x21   :  { %s130_s8 = sshll.u32 %s17740_s15, 4  ;;  %s153_s7 = sshll.u32 %s18876_s11, 4  ;;  %s131_s8 = int_to_ptr.vmem [resolvable:$true] %s130_s8  ;;  %s154_s7 = int_to_ptr.hbm [resolvable:$true] %s153_s7 }
  0x22   :  { %136 = dma.hbm_to_vmem [thread:$0]  %s129_s30, 65536, %s131_s8, [#allocation15], %s17738_s14, %s17738_s14, %s17739_s5  }
  0x23   :  { %s17741_s12 = smov [#allocation19]  }
  0x24   :  { %s155_s18 = sshll.u32 %s17741_s12, 4  ;;  %s156_s18 = int_to_ptr.vmem [resolvable:$true] %s155_s18 }
  0x25   :  { %158 = dma.hbm_to_vmem [thread:$0]  %s154_s7, 128, %s156_s18, [#allocation18]  }
  0x26   :  { %17715 = dma.done.wait [#allocation4], 4096  }
  0x27   :  { %17716 = vsyncadd [#allocation4], 4294963200 }
  0x28   :  { %17717 = dma.done.wait [#allocation6], 16448  }
  0x29   :  { %17718 = vsyncadd [#allocation6], 4294950848 }
  0x2a   :  { %17719 = dma.done.wait [#allocation9], 16448  }
  0x2b   :  { %17720 = vsyncadd [#allocation9], 4294950848 }
  0x2c   :  { %17721 = dma.done.wait [#allocation12], 65600  }
  0x2d   :  { %17722 = vsyncadd [#allocation12], 4294901696 }
  0x2e   :  { %17723 = dma.done.wait [#allocation15], 65664  }
  0x2f   :  { %17724 = vsyncadd [#allocation15], 4294901632 }
  0x30   :  { %17725 = dma.done.wait [#allocation18], 256  }
  0x31   :  { %17726 = vsyncadd [#allocation18], 4294967040  ;;  %v10980_v1 = vld [vmem:[#allocation3 + $0xe0] sm:$0xf]  ;;  %v16146_v2 = vld [vmem:[#allocation3 + $0xec] sm:$0xf0] }
  0x32   :  { %v16144_v3 = vld [vmem:[#allocation3 + $0xe4] sm:$0xf]  ;;  %v10981_v4 = vor.u32 %v16146_v2, %v10980_v1  ;;  %v10982_v5 = vld [vmem:[#allocation3 + $0xf0] sm:$0xf0]  ;;  %v10988_v6 = vld [vmem:[#allocation3 + $0xe8] sm:$0xf] }
  0x33   :  { %v16147_v7 = vld [vmem:[#allocation3 + $0xf4] sm:$0xf0]  ;;  %v10985_v8 = vor.u32 %v16144_v3, %v10982_v5  ;;  %v16145_v10 = vld [vmem:[#allocation3 + $0xec] sm:$0xf]  ;;  %v10990_v11 = vld [vmem:[#allocation3 + $0xf8] sm:$0xf0] }
  0x34   :  { %v10989_v9 = vor.u32 %v16147_v7, %v10988_v6  ;;  %v10964_v12 = vld [vmem:[#allocation3 + $0xc0] sm:$0xf]  ;;  %423 = vmatpush.bf16.msra.mxu0 %v10981_v4  ;;  %v10993_v13 = vor.u32 %v16145_v10, %v10990_v11  ;;  %v16142_v14 = vld [vmem:[#allocation3 + $0xcc] sm:$0xf0]  ;;  %v16140_v15 = vld [vmem:[#allocation3 + $0xc4] sm:$0xf] }
  0x35   :  { %v10966_v16 = vld [vmem:[#allocation3 + $0xd0] sm:$0xf0]  ;;  %442 = vmatpush.bf16.msra.mxu1 %v10985_v8  ;;  %v10965_v17 = vor.u32 %v16142_v14, %v10964_v12  ;;  %v10972_v19 = vld [vmem:[#allocation3 + $0xc8] sm:$0xf]  ;;  %v16143_v20 = vld [vmem:[#allocation3 + $0xd4] sm:$0xf0] }
  0x36   :  { %461 = vmatpush.bf16.msra.mxu2 %v10989_v9  ;;  %v10969_v18 = vor.u32 %v16140_v15, %v10966_v16  ;;  %v16141_v21 = vld [vmem:[#allocation3 + $0xcc] sm:$0xf]  ;;  %480 = vmatpush.bf16.msra.mxu3 %v10993_v13  ;;  %v10973_v22 = vor.u32 %v16143_v20, %v10972_v19  ;;  %v10974_v23 = vld [vmem:[#allocation3 + $0xd8] sm:$0xf0]  ;;  %v10948_v24 = vld [vmem:[#allocation3 + $0xa0] sm:$0xf] }
  0x37   :  { %v16138_v25 = vld [vmem:[#allocation3 + $0xac] sm:$0xf0]  ;;  %v10977_v26 = vor.u32 %v16141_v21, %v10974_v23  ;;  %v16136_v27 = vld [vmem:[#allocation3 + $0xa4] sm:$0xf]  ;;  %v10950_v28 = vld [vmem:[#allocation3 + $0xb0] sm:$0xf0] }
  0x38   :  { %v10956_v29 = vld [vmem:[#allocation3 + $0xa8] sm:$0xf]  ;;  %424 = vmatpush.bf16.msra.mxu0 %v10965_v17  ;;  %v10949_v30 = vor.u32 %v16138_v25, %v10948_v24  ;;  %v16139_v31 = vld [vmem:[#allocation3 + $0xb4] sm:$0xf0]  ;;  %v16137_v32 = vld [vmem:[#allocation3 + $0xac] sm:$0xf]  ;;  %v10953_v34 = vor.u32 %v16136_v27, %v10950_v28 }
  0x39   :  { %v10958_v33 = vld [vmem:[#allocation3 + $0xb8] sm:$0xf0]  ;;  %443 = vmatpush.bf16.msra.mxu1 %v10969_v18  ;;  %v10957_v35 = vor.u32 %v16139_v31, %v10956_v29  ;;  %v10932_v36 = vld [vmem:[#allocation3 + $0x80] sm:$0xf]  ;;  %v16134_v37 = vld [vmem:[#allocation3 + $0x8c] sm:$0xf0] }
  0x3a   :  { %462 = vmatpush.bf16.msra.mxu2 %v10973_v22  ;;  %v16132_v38 = vld [vmem:[#allocation3 + $0x84] sm:$0xf]  ;;  %481 = vmatpush.bf16.msra.mxu3 %v10977_v26  ;;  %v10961_v39 = vor.u32 %v16137_v32, %v10958_v33  ;;  %v10934_v40 = vld [vmem:[#allocation3 + $0x90] sm:$0xf0]  ;;  %v10940_v41 = vld [vmem:[#allocation3 + $0x88] sm:$0xf]  ;;  %v10933_v45 = vor.u32 %v16134_v37, %v10932_v36 }
  0x3b   :  { %v16135_v42 = vld [vmem:[#allocation3 + $0x94] sm:$0xf0]  ;;  %v16133_v43 = vld [vmem:[#allocation3 + $0x8c] sm:$0xf]  ;;  %v10942_v44 = vld [vmem:[#allocation3 + $0x98] sm:$0xf0]  ;;  %v10937_v46 = vor.u32 %v16132_v38, %v10934_v40 }
  0x3c   :  { %425 = vmatpush.bf16.msra.mxu0 %v10949_v30  ;;  %v10941_v47 = vor.u32 %v16135_v42, %v10940_v41  ;;  %v10916_v48 = vld [vmem:[#allocation3 + $0x60] sm:$0xf]  ;;  %v16130_v49 = vld [vmem:[#allocation3 + $0x6c] sm:$0xf0]  ;;  %v16128_v50 = vld [vmem:[#allocation3 + $0x64] sm:$0xf]  ;;  %v10945_v51 = vor.u32 %v16133_v43, %v10942_v44 }
  0x3d   :  { %444 = vmatpush.bf16.msra.mxu1 %v10953_v34  ;;  %v10918_v52 = vld [vmem:[#allocation3 + $0x70] sm:$0xf0]  ;;  %v10924_v53 = vld [vmem:[#allocation3 + $0x68] sm:$0xf]  ;;  %v16131_v54 = vld [vmem:[#allocation3 + $0x74] sm:$0xf0]  ;;  %v10917_v57 = vor.u32 %v16130_v49, %v10916_v48 }
  0x3e   :  { %463 = vmatpush.bf16.msra.mxu2 %v10957_v35  ;;  %482 = vmatpush.bf16.msra.mxu3 %v10961_v39  ;;  %v16129_v55 = vld [vmem:[#allocation3 + $0x6c] sm:$0xf]  ;;  %v10926_v56 = vld [vmem:[#allocation3 + $0x78] sm:$0xf0]  ;;  %v10921_v58 = vor.u32 %v16128_v50, %v10918_v52  ;;  %v10925_v59 = vor.u32 %v16131_v54, %v10924_v53  ;;  %v10900_v60 = vld [vmem:[#allocation3 + $0x40] sm:$0xf] }
  0x3f   :  { %v16126_v61 = vld [vmem:[#allocation3 + $0x4c] sm:$0xf0]  ;;  %v16124_v62 = vld [vmem:[#allocation3 + $0x44] sm:$0xf]  ;;  %v10929_v63 = vor.u32 %v16129_v55, %v10926_v56  ;;  %v10902_v0 = vld [vmem:[#allocation3 + $0x50] sm:$0xf0] }
  0x40   :  { %426 = vmatpush.bf16.msra.mxu0 %v10933_v45  ;;  %v10908_v1 = vld [vmem:[#allocation3 + $0x48] sm:$0xf]  ;;  %v16127_v2 = vld [vmem:[#allocation3 + $0x54] sm:$0xf0]  ;;  %v16125_v3 = vld [vmem:[#allocation3 + $0x4c] sm:$0xf]  ;;  %v10901_v5 = vor.u32 %v16126_v61, %v10900_v60  ;;  %v10905_v6 = vor.u32 %v16124_v62, %v10902_v0 }
  0x41   :  { %445 = vmatpush.bf16.msra.mxu1 %v10937_v46  ;;  %v10910_v4 = vld [vmem:[#allocation3 + $0x58] sm:$0xf0]  ;;  %v10909_v7 = vor.u32 %v16127_v2, %v10908_v1  ;;  %v10884_v8 = vld [vmem:[#allocation3 + $0x20] sm:$0xf]  ;;  %v16122_v9 = vld [vmem:[#allocation3 + $0x2c] sm:$0xf0] }
  0x42   :  { %464 = vmatpush.bf16.msra.mxu2 %v10941_v47  ;;  %483 = vmatpush.bf16.msra.mxu3 %v10945_v51  ;;  %v16120_v10 = vld [vmem:[#allocation3 + $0x24] sm:$0xf]  ;;  %v10913_v11 = vor.u32 %v16125_v3, %v10910_v4  ;;  %v10886_v12 = vld [vmem:[#allocation3 + $0x30] sm:$0xf0]  ;;  %v10892_v13 = vld [vmem:[#allocation3 + $0x28] sm:$0xf]  ;;  %v10885_v17 = vor.u32 %v16122_v9, %v10884_v8 }
  0x43   :  { %v16123_v14 = vld [vmem:[#allocation3 + $0x34] sm:$0xf0]  ;;  %v16121_v15 = vld [vmem:[#allocation3 + $0x2c] sm:$0xf]  ;;  %v10894_v16 = vld [vmem:[#allocation3 + $0x38] sm:$0xf0]  ;;  %v10889_v19 = vor.u32 %v16120_v10, %v10886_v12 }
  0x44   :  { %427 = vmatpush.bf16.msra.mxu0 %v10917_v57  ;;  %v10868_v18 = vld [vmem:[#allocation3] sm:$0xf]  ;;  %v10893_v20 = vor.u32 %v16123_v14, %v10892_v13  ;;  %v16118_v21 = vld [vmem:[#allocation3 + $0xc] sm:$0xf0]  ;;  %v16116_v22 = vld [vmem:[#allocation3 + $0x4] sm:$0xf]  ;;  %v10897_v24 = vor.u32 %v16121_v15, %v10894_v16 }
  0x45   :  { %446 = vmatpush.bf16.msra.mxu1 %v10921_v58  ;;  %v10870_v23 = vld [vmem:[#allocation3 + $0x10] sm:$0xf0]  ;;  %v10876_v25 = vld [vmem:[#allocation3 + $0x8] sm:$0xf]  ;;  %v16119_v26 = vld [vmem:[#allocation3 + $0x14] sm:$0xf0]  ;;  %v10869_v31 = vor.u32 %v16118_v21, %v10868_v18 }
  0x46   :  { %465 = vmatpush.bf16.msra.mxu2 %v10925_v59  ;;  %484 = vmatpush.bf16.msra.mxu3 %v10929_v63  ;;  %v16117_v27 = vld [vmem:[#allocation3 + $0xc] sm:$0xf]  ;;  %v10878_v28 = vld [vmem:[#allocation3 + $0x18] sm:$0xf0]  ;;  %v11108_v29 = vld [vmem:[#allocation7 + $0xe0] sm:$0xf]  ;;  %v10873_v34 = vor.u32 %v16116_v22, %v10870_v23  ;;  %v10877_v35 = vor.u32 %v16119_v26, %v10876_v25 }
  0x47   :  { %v16178_v30 = vld [vmem:[#allocation7 + $0xec] sm:$0xf0]  ;;  %v11236_v32 = vld [vmem:[#allocation7 + $0x1e0] sm:$0xf]  ;;  %v10881_v37 = vor.u32 %v16117_v27, %v10878_v28  ;;  %vm10845_vm0 = vcmask 7168  }
  0x48   :  { %428 = vmatpush.bf16.msra.mxu0 %v10901_v5  ;;  %v16210_v33 = vld [vmem:[#allocation7 + $0x1ec] sm:$0xf0]  ;;  %v16114_v36 = vld [vmem:[%s18865_s0] sm:$0xff]  ;;  %v11109_v38 = vor.u32 %v16178_v30, %v11108_v29  ;;  %v16115_v12 = vld [vmem:[%s18865_s0 + $0x8] sm:$0xff] }
  0x49   :  { %447 = vmatpush.bf16.msra.mxu1 %v10905_v6  ;;  %v11092_v39 = vld [vmem:[#allocation7 + $0xc0] sm:$0xf]  ;;  %v16242_v41 = vld [vmem:[#allocation7 + $0x2ec] sm:$0xf0]  ;;  %v11237_v42 = vor.u32 %v16210_v33, %v11236_v32 }
  0x4a   :  { %466 = vmatpush.bf16.msra.mxu2 %v10909_v7  ;;  %485 = vmatpush.bf16.msra.mxu3 %v10913_v11  ;;  %v11364_v40 = vld [vmem:[#allocation7 + $0x2e0] sm:$0xf]  ;;  %v16174_v43 = vld [vmem:[#allocation7 + $0xcc] sm:$0xf0] }
  0x4b   :  { %v11492_v44 = vld [vmem:[#allocation7 + $0x3e0] sm:$0xf]  ;;  %v16274_v45 = vld [vmem:[#allocation7 + $0x3ec] sm:$0xf0]  ;;  %v11365_v48 = vor.u32 %v16242_v41, %v11364_v40  ;;  %v11093_v49 = vor.u32 %v16174_v43, %v11092_v39 }
  0x4c   :  { %429 = vmatpush.bf16.msra.mxu0 %v10885_v17  ;;  %v11220_v46 = vld [vmem:[#allocation7 + $0x1c0] sm:$0xf]  ;;  %v16206_v47 = vld [vmem:[#allocation7 + $0x1cc] sm:$0xf0]  ;;  %v11493_v50 = vor.u32 %v16274_v45, %v11492_v44 }
  0x4d   :  { %448 = vmatpush.bf16.msra.mxu1 %v10889_v19  ;;  %v11076_v51 = vld [vmem:[#allocation7 + $0xa0] sm:$0xf]  ;;  %v16238_v53 = vld [vmem:[#allocation7 + $0x2cc] sm:$0xf0]  ;;  %v11221_v54 = vor.u32 %v16206_v47, %v11220_v46 }
  0x4e   :  { %467 = vmatpush.bf16.msra.mxu2 %v10893_v20  ;;  %486 = vmatpush.bf16.msra.mxu3 %v10897_v24  ;;  %v11348_v52 = vld [vmem:[#allocation7 + $0x2c0] sm:$0xf]  ;;  %v16170_v55 = vld [vmem:[#allocation7 + $0xac] sm:$0xf0] }
  0x4f   :  { %v11476_v56 = vld [vmem:[#allocation7 + $0x3c0] sm:$0xf]  ;;  %v16270_v57 = vld [vmem:[#allocation7 + $0x3cc] sm:$0xf0]  ;;  %v11349_v60 = vor.u32 %v16238_v53, %v11348_v52  ;;  %v11077_v61 = vor.u32 %v16170_v55, %v11076_v51 }
  0x50   :  { %430 = vmatpush.bf16.msra.mxu0 %v10869_v31  ;;  %v11204_v58 = vld [vmem:[#allocation7 + $0x1a0] sm:$0xf]  ;;  %v16202_v59 = vld [vmem:[#allocation7 + $0x1ac] sm:$0xf0]  ;;  %v11477_v62 = vor.u32 %v16270_v57, %v11476_v56 }
  0x51   :  { %449 = vmatpush.bf16.msra.mxu1 %v10873_v34  ;;  %v11060_v63 = vld [vmem:[#allocation7 + $0x80] sm:$0xf]  ;;  %v16234_v1 = vld [vmem:[#allocation7 + $0x2ac] sm:$0xf0]  ;;  %v11205_v2 = vor.u32 %v16202_v59, %v11204_v58 }
  0x52   :  { %468 = vmatpush.bf16.msra.mxu2 %v10877_v35  ;;  %487 = vmatpush.bf16.msra.mxu3 %v10881_v37  ;;  %v11332_v0 = vld [vmem:[#allocation7 + $0x2a0] sm:$0xf]  ;;  %v16166_v3 = vld [vmem:[#allocation7 + $0x8c] sm:$0xf0] }
  0x53   :  { %431 = vmatmul.bf16.vlgmr.msra.gmra.mxu0 %v16114_v36  ;;  %v11460_v4 = vld [vmem:[#allocation7 + $0x3a0] sm:$0xf]  ;;  %v16266_v5 = vld [vmem:[#allocation7 + $0x3ac] sm:$0xf0]  ;;  %v11333_v8 = vor.u32 %v16234_v1, %v11332_v0  ;;  %v11061_v9 = vor.u32 %v16166_v3, %v11060_v63  ;;  %v16208_v63 = vld [vmem:[#allocation7 + $0x1e4] sm:$0xf] }
  0x54   :  { %1301 = vmatpush.bf16.msrb.mxu0 %v11109_v38  ;;  %450 = vmatmul.bf16.vlgmr.msra.gmra.mxu1 %v16114_v36  ;;  %v11188_v6 = vld [vmem:[#allocation7 + $0x180] sm:$0xf]  ;;  %v16198_v7 = vld [vmem:[#allocation7 + $0x18c] sm:$0xf0]  ;;  %v11461_v10 = vor.u32 %v16266_v5, %v11460_v4  ;;  %v11238_v1 = vld [vmem:[#allocation7 + $0x1f0] sm:$0xf0] }
  0x55   :  { %1320 = vmatpush.bf16.msrb.mxu1 %v11237_v42  ;;  %469 = vmatmul.bf16.vlgmr.msra.gmra.mxu2 %v16114_v36  ;;  %v11189_v11 = vor.u32 %v16198_v7, %v11188_v6  ;;  %v11044_v13 = vld [vmem:[#allocation7 + $0x60] sm:$0xf]  ;;  %v16162_v14 = vld [vmem:[#allocation7 + $0x6c] sm:$0xf0] }
  0x56   :  { %488 = vmatmul.bf16.vlgmr.msra.gmra.mxu3 %v16114_v36  ;;  %1339 = vmatpush.bf16.msrb.mxu2 %v11365_v48  ;;  %v11172_v15 = vld [vmem:[#allocation7 + $0x160] sm:$0xf]  ;;  %v11045_v16 = vor.u32 %v16162_v14, %v11044_v13  ;;  %v16194_v17 = vld [vmem:[#allocation7 + $0x16c] sm:$0xf0]  ;;  %v11222_v13 = vld [vmem:[#allocation7 + $0x1d0] sm:$0xf0] }
  0x57   :  { %1358 = vmatpush.bf16.msrb.mxu3 %v11493_v50  ;;  %v11173_v18 = vor.u32 %v16194_v17, %v11172_v15  ;;  %v11316_v19 = vld [vmem:[#allocation7 + $0x280] sm:$0xf]  ;;  %v16230_v20 = vld [vmem:[#allocation7 + $0x28c] sm:$0xf0]  ;;  %v16240_v15 = vld [vmem:[#allocation7 + $0x2e4] sm:$0xf] }
  0x58   :  { %1302 = vmatpush.bf16.msrb.mxu0 %v11093_v49  ;;  %v11444_v21 = vld [vmem:[#allocation7 + $0x380] sm:$0xf]  ;;  %v11317_v22 = vor.u32 %v16230_v20, %v11316_v19  ;;  %v16262_v23 = vld [vmem:[#allocation7 + $0x38c] sm:$0xf0]  ;;  %v16272_v17 = vld [vmem:[#allocation7 + $0x3e4] sm:$0xf] }
  0x59   :  { %1321 = vmatpush.bf16.msrb.mxu1 %v11221_v54  ;;  %v11445_v24 = vor.u32 %v16262_v23, %v11444_v21  ;;  %v11028_v25 = vld [vmem:[#allocation7 + $0x40] sm:$0xf]  ;;  %v16158_v26 = vld [vmem:[#allocation7 + $0x4c] sm:$0xf0]  ;;  %v11494_v19 = vld [vmem:[#allocation7 + $0x3f0] sm:$0xf0] }
  0x5a   :  { %1340 = vmatpush.bf16.msrb.mxu2 %v11349_v60  ;;  %v11029_v27 = vor.u32 %v16158_v26, %v11028_v25  ;;  %v11156_v28 = vld [vmem:[#allocation7 + $0x140] sm:$0xf]  ;;  %v16190_v29 = vld [vmem:[#allocation7 + $0x14c] sm:$0xf0]  ;;  %v11497_v20 = vor.u32 %v16272_v17, %v11494_v19  ;;  %v16168_v21 = vld [vmem:[#allocation7 + $0xa4] sm:$0xf] }
  0x5b   :  { %1359 = vmatpush.bf16.msrb.mxu3 %v11477_v62  ;;  %v11157_v30 = vor.u32 %v16190_v29, %v11156_v28  ;;  %v11300_v31 = vld [vmem:[#allocation7 + $0x260] sm:$0xf]  ;;  %v16226_v32 = vld [vmem:[#allocation7 + $0x26c] sm:$0xf0]  ;;  %v11110_v62 = vld [vmem:[#allocation7 + $0xf0] sm:$0xf0] }
  0x5c   :  { %1303 = vmatpush.bf16.msrb.mxu0 %v11077_v61  ;;  %v11428_v33 = vld [vmem:[#allocation7 + $0x360] sm:$0xf]  ;;  %v11301_v34 = vor.u32 %v16226_v32, %v11300_v31  ;;  %v16258_v35 = vld [vmem:[#allocation7 + $0x36c] sm:$0xf0]  ;;  %v16176_v61 = vld [vmem:[#allocation7 + $0xe4] sm:$0xf] }
  0x5d   :  { %1322 = vmatpush.bf16.msrb.mxu1 %v11205_v2  ;;  %v11429_v36 = vor.u32 %v16258_v35, %v11428_v33  ;;  %v11012_v37 = vld [vmem:[#allocation7 + $0x20] sm:$0xf]  ;;  %v16154_v38 = vld [vmem:[#allocation7 + $0x2c] sm:$0xf0]  ;;  %v11113_v0 = vor.u32 %v16176_v61, %v11110_v62  ;;  %v11241_v2 = vor.u32 %v16208_v63, %v11238_v1  ;;  %v16200_v23 = vld [vmem:[#allocation7 + $0x1a4] sm:$0xf] }
  0x5e   :  { %1341 = vmatpush.bf16.msrb.mxu2 %v11333_v8  ;;  %v11140_v39 = vld [vmem:[#allocation7 + $0x120] sm:$0xf]  ;;  %v11013_v40 = vor.u32 %v16154_v38, %v11012_v37  ;;  %v16186_v41 = vld [vmem:[#allocation7 + $0x12c] sm:$0xf0]  ;;  %v11206_v25 = vld [vmem:[#allocation7 + $0x1b0] sm:$0xf0] }
  0x5f   :  { %1360 = vmatpush.bf16.msrb.mxu3 %v11461_v10  ;;  %v11141_v42 = vor.u32 %v16186_v41, %v11140_v39  ;;  %v11284_v43 = vld [vmem:[#allocation7 + $0x240] sm:$0xf]  ;;  %v16222_v44 = vld [vmem:[#allocation7 + $0x24c] sm:$0xf0]  ;;  %v11094_v10 = vld [vmem:[#allocation7 + $0xd0] sm:$0xf0]  ;;  %v11209_v26 = vor.u32 %v16200_v23, %v11206_v25 }
  0x60   :  { %1304 = vmatpush.bf16.msrb.mxu0 %v11061_v9  ;;  %v11285_v45 = vor.u32 %v16222_v44, %v11284_v43  ;;  %v11412_v46 = vld [vmem:[#allocation7 + $0x340] sm:$0xf]  ;;  %v16254_v47 = vld [vmem:[#allocation7 + $0x34c] sm:$0xf0]  ;;  %v16172_v9 = vld [vmem:[#allocation7 + $0xc4] sm:$0xf] }
  0x61   :  { %1323 = vmatpush.bf16.msrb.mxu1 %v11189_v11  ;;  %v11413_v48 = vor.u32 %v16254_v47, %v11412_v46  ;;  %v10996_v49 = vld [vmem:[#allocation7] sm:$0xf]  ;;  %v16150_v50 = vld [vmem:[#allocation7 + $0xc] sm:$0xf0]  ;;  %v16204_v11 = vld [vmem:[#allocation7 + $0x1c4] sm:$0xf] }
  0x62   :  { %1342 = vmatpush.bf16.msrb.mxu2 %v11317_v22  ;;  %v11124_v51 = vld [vmem:[#allocation7 + $0x100] sm:$0xf]  ;;  %v10997_v52 = vor.u32 %v16150_v50, %v10996_v49  ;;  %v16182_v53 = vld [vmem:[#allocation7 + $0x10c] sm:$0xf0]  ;;  %v11225_v14 = vor.u32 %v16204_v11, %v11222_v13  ;;  %v11078_v22 = vld [vmem:[#allocation7 + $0xb0] sm:$0xf0] }
  0x63   :  { %436 = vmatmul.bf16.gmra.mxu0 %v16115_v12  ;;  %1361 = vmatpush.bf16.msrb.mxu3 %v11445_v24  ;;  %v11125_v54 = vor.u32 %v16182_v53, %v11124_v51  ;;  %v11268_v55 = vld [vmem:[#allocation7 + $0x220] sm:$0xf]  ;;  %v16218_v56 = vld [vmem:[#allocation7 + $0x22c] sm:$0xf0]  ;;  %v11081_v24 = vor.u32 %v16168_v21, %v11078_v22  ;;  %v11350_v28 = vld [vmem:[#allocation7 + $0x2d0] sm:$0xf0] }
  0x64   :  { %455 = vmatmul.bf16.gmra.mxu1 %v16115_v12  ;;  %1305 = vmatpush.bf16.msrb.mxu0 %v11045_v16  ;;  %v11396_v57 = vld [vmem:[#allocation7 + $0x320] sm:$0xf]  ;;  %v11269_v58 = vor.u32 %v16218_v56, %v11268_v55  ;;  %v16250_v59 = vld [vmem:[#allocation7 + $0x32c] sm:$0xf0]  ;;  %v11366_v16 = vld [vmem:[#allocation7 + $0x2f0] sm:$0xf0] }
  0x65   :  { %474 = vmatmul.bf16.gmra.mxu2 %v16115_v12  ;;  %1324 = vmatpush.bf16.msrb.mxu1 %v11173_v18  ;;  %v11397_v60 = vor.u32 %v16250_v59, %v11396_v57  ;;  %v11252_v3 = vld [vmem:[#allocation7 + $0x200] sm:$0xf]  ;;  %v16214_v4 = vld [vmem:[#allocation7 + $0x20c] sm:$0xf0]  ;;  %v11369_v18 = vor.u32 %v16240_v15, %v11366_v16  ;;  %v16268_v29 = vld [vmem:[#allocation7 + $0x3c4] sm:$0xf] }
  0x66   :  { %493 = vmatmul.bf16.gmra.mxu3 %v16115_v12  ;;  %1343 = vmatpush.bf16.msrb.mxu2 %v11301_v34  ;;  %v11380_v5 = vld [vmem:[#allocation7 + $0x300] sm:$0xf]  ;;  %v11253_v6 = vor.u32 %v16214_v4, %v11252_v3  ;;  %v16246_v7 = vld [vmem:[#allocation7 + $0x30c] sm:$0xf0]  ;;  %v11097_v12 = vor.u32 %v16172_v9, %v11094_v10  ;;  %v11478_v31 = vld [vmem:[#allocation7 + $0x3d0] sm:$0xf0] }
  0x67   :  { %1362 = vmatpush.bf16.msrb.mxu3 %v11429_v36  ;;  %v11381_v8 = vor.u32 %v16246_v7, %v11380_v5  ;;  %v11481_v32 = vor.u32 %v16268_v29, %v11478_v31  ;;  %v16164_v33 = vld [vmem:[#allocation7 + $0x84] sm:$0xf]  ;;  %v11062_v34 = vld [vmem:[#allocation7 + $0x90] sm:$0xf0]  ;;  %v17854_v36 = vld [vmem:[#allocation5] sm:$0xf] }
  0x68   :  { %1306 = vmatpush.bf16.msrb.mxu0 %v11029_v27  ;;  %v16236_v27 = vld [vmem:[#allocation7 + $0x2c4] sm:$0xf]  ;;  %v11065_v37 = vor.u32 %v16164_v33, %v11062_v34  ;;  %v11190_v38 = vld [vmem:[#allocation7 + $0x190] sm:$0xf0]  ;;  %v17857_v43 = vperm.slane %v17854_v36, 0  ;;  %v17863_v59 = vperm.slane %v17854_v36, 1 }
  0x69   :  { %1325 = vmatpush.bf16.msrb.mxu1 %v11157_v30  ;;  %v11353_v30 = vor.u32 %v16236_v27, %v11350_v28  ;;  %v16196_v35 = vld [vmem:[#allocation7 + $0x184] sm:$0xf]  ;;  %v11334_v41 = vld [vmem:[#allocation7 + $0x2b0] sm:$0xf0]  ;;  %v17869_v31 = vperm.slane %v17854_v36, 2 }
  0x6a   :  { %1344 = vmatpush.bf16.msrb.mxu2 %v11285_v45  ;;  %v11193_v39 = vor.u32 %v16196_v35, %v11190_v38  ;;  %v11462_v45 = vld [vmem:[#allocation7 + $0x3b0] sm:$0xf0]  ;;  %v16160_v47 = vld [vmem:[#allocation7 + $0x64] sm:$0xf] }
  0x6b   :  { %1363 = vmatpush.bf16.msrb.mxu3 %v11413_v48  ;;  %v11046_v48 = vld [vmem:[#allocation7 + $0x70] sm:$0xf0]  ;;  %v16192_v49 = vld [vmem:[#allocation7 + $0x164] sm:$0xf] }
  0x6c   :  { %1307 = vmatpush.bf16.msrb.mxu0 %v11013_v40  ;;  %v16232_v40 = vld [vmem:[#allocation7 + $0x2a4] sm:$0xf]  ;;  %v11049_v51 = vor.u32 %v16160_v47, %v11046_v48  ;;  %v11318_v56 = vld [vmem:[#allocation7 + $0x290] sm:$0xf0] }
  0x6d   :  { %1326 = vmatpush.bf16.msrb.mxu1 %v11141_v42  ;;  %v16264_v42 = vld [vmem:[#allocation7 + $0x3a4] sm:$0xf]  ;;  %v11337_v44 = vor.u32 %v16232_v40, %v11334_v41  ;;  %v11446_v61 = vld [vmem:[#allocation7 + $0x390] sm:$0xf0] }
  0x6e   :  { %1345 = vmatpush.bf16.msrb.mxu2 %v11269_v58  ;;  %v11465_v46 = vor.u32 %v16264_v42, %v11462_v45  ;;  %v16228_v55 = vld [vmem:[#allocation7 + $0x284] sm:$0xf]  ;;  %v11158_v3 = vld [vmem:[#allocation7 + $0x150] sm:$0xf0] }
  0x6f   :  { %1364 = vmatpush.bf16.msrb.mxu3 %v11397_v60  ;;  %v16260_v57 = vld [vmem:[#allocation7 + $0x384] sm:$0xf]  ;;  %v11321_v60 = vor.u32 %v16228_v55, %v11318_v56  ;;  %v11430_v11 = vld [vmem:[#allocation7 + $0x370] sm:$0xf0]  ;;  %v16179_v55 = vld [vmem:[#allocation7 + $0xf4] sm:$0xf0] }
  0x70   :  { %1308 = vmatpush.bf16.msrb.mxu0 %v10997_v52  ;;  %v11174_v52 = vld [vmem:[#allocation7 + $0x170] sm:$0xf0]  ;;  %v11449_v62 = vor.u32 %v16260_v57, %v11446_v61  ;;  %v16156_v63 = vld [vmem:[#allocation7 + $0x44] sm:$0xf]  ;;  %v11244_v56 = vld [vmem:[#allocation7 + $0x1e8] sm:$0xf] }
  0x71   :  { %1327 = vmatpush.bf16.msrb.mxu1 %v11125_v54  ;;  %v11177_v54 = vor.u32 %v16192_v49, %v11174_v52  ;;  %v16224_v5 = vld [vmem:[#allocation7 + $0x264] sm:$0xf]  ;;  %v11014_v15 = vld [vmem:[#allocation7 + $0x30] sm:$0xf0] }
  0x72   :  { %1346 = vmatpush.bf16.msrb.mxu2 %v11253_v6  ;;  %v11302_v6 = vld [vmem:[#allocation7 + $0x270] sm:$0xf0]  ;;  %v16256_v7 = vld [vmem:[#allocation7 + $0x364] sm:$0xf] }
  0x73   :  { %1365 = vmatpush.bf16.msrb.mxu3 %v11381_v8  ;;  %v11305_v10 = vor.u32 %v16224_v5, %v11302_v6  ;;  %v11433_v13 = vor.u32 %v16256_v7, %v11430_v11  ;;  %v16184_v16 = vld [vmem:[#allocation7 + $0x124] sm:$0xf]  ;;  %v11286_v22 = vld [vmem:[#allocation7 + $0x250] sm:$0xf0]  ;;  %v11100_v7 = vld [vmem:[#allocation7 + $0xc8] sm:$0xf] }
  0x74   :  { %1377 = vmatpush.bf16.msra.mxu0 %v11113_v0  ;;  %v11030_v0 = vld [vmem:[#allocation7 + $0x50] sm:$0xf0]  ;;  %v16220_v21 = vld [vmem:[#allocation7 + $0x244] sm:$0xf] }
  0x75   :  { %1396 = vmatpush.bf16.msra.mxu1 %v11241_v2  ;;  %v11033_v1 = vor.u32 %v16156_v63, %v11030_v0  ;;  %v16188_v2 = vld [vmem:[#allocation7 + $0x144] sm:$0xf]  ;;  %v11414_v28 = vld [vmem:[#allocation7 + $0x350] sm:$0xf0] }
  0x76   :  { %1415 = vmatpush.bf16.msra.mxu2 %v11369_v18  ;;  %v11161_v4 = vor.u32 %v16188_v2, %v11158_v3  ;;  %v16252_v27 = vld [vmem:[#allocation7 + $0x344] sm:$0xf]  ;;  %v10998_v34 = vld [vmem:[#allocation7 + $0x10] sm:$0xf0] }
  0x77   :  { %1434 = vmatpush.bf16.msra.mxu3 %v11497_v20  ;;  %v11142_v20 = vld [vmem:[#allocation7 + $0x130] sm:$0xf0]  ;;  %v16148_v29 = vld [vmem:[#allocation7 + $0x4] sm:$0xf]  ;;  %v11417_v33 = vor.u32 %v16252_v27, %v11414_v28  ;;  %v16275_v27 = vld [vmem:[#allocation7 + $0x3f4] sm:$0xf0] }
  0x78   :  { %1378 = vmatpush.bf16.msra.mxu0 %v11097_v12  ;;  %v11145_v25 = vor.u32 %v16184_v16, %v11142_v20  ;;  %v16180_v35 = vld [vmem:[#allocation7 + $0x104] sm:$0xf]  ;;  %v11126_v40 = vld [vmem:[#allocation7 + $0x110] sm:$0xf0] }
  0x79   :  { %1397 = vmatpush.bf16.msra.mxu1 %v11225_v14  ;;  %v16152_v14 = vld [vmem:[#allocation7 + $0x24] sm:$0xf]  ;;  %v11270_v45 = vld [vmem:[#allocation7 + $0x230] sm:$0xf0] }
  0x7a   :  { %1416 = vmatpush.bf16.msra.mxu2 %v11353_v30  ;;  %v11017_v19 = vor.u32 %v16152_v14, %v11014_v15  ;;  %v16216_v41 = vld [vmem:[#allocation7 + $0x224] sm:$0xf]  ;;  %v11398_v49 = vld [vmem:[#allocation7 + $0x330] sm:$0xf0] }
  0x7b   :  { %1435 = vmatpush.bf16.msra.mxu3 %v11481_v32  ;;  %v11273_v48 = vor.u32 %v16216_v41, %v11270_v45  ;;  %v16212_v63 = vld [vmem:[#allocation7 + $0x204] sm:$0xf]  ;;  %v11254_v0 = vld [vmem:[#allocation7 + $0x210] sm:$0xf0]  ;;  %v16239_v41 = vld [vmem:[#allocation7 + $0x2d4] sm:$0xf0] }
  0x7c   :  { %1379 = vmatpush.bf16.msra.mxu0 %v11081_v24  ;;  %v16244_v5 = vld [vmem:[#allocation7 + $0x304] sm:$0xf]  ;;  %v11382_v6 = vld [vmem:[#allocation7 + $0x310] sm:$0xf0] }
  0x7d   :  { %1398 = vmatpush.bf16.msra.mxu1 %v11209_v26  ;;  %v11289_v26 = vor.u32 %v16220_v21, %v11286_v22  ;;  %v11385_v11 = vor.u32 %v16244_v5, %v11382_v6  ;;  %v11372_v21 = vld [vmem:[#allocation7 + $0x2e8] sm:$0xf]  ;;  %v16243_v22 = vld [vmem:[#allocation7 + $0x2f4] sm:$0xf0] }
  0x7e   :  { %1417 = vmatpush.bf16.msra.mxu2 %v11337_v44  ;;  %v11129_v44 = vor.u32 %v16180_v35, %v11126_v40  ;;  %v11356_v40 = vld [vmem:[#allocation7 + $0x2c8] sm:$0xf] }
  0x7f   :  { %1436 = vmatpush.bf16.msra.mxu3 %v11465_v46  ;;  %v16248_v46 = vld [vmem:[#allocation7 + $0x324] sm:$0xf] }
  0x80   :  { %1380 = vmatpush.bf16.msra.mxu0 %v11065_v37  ;;  %v17873_v37 = vperm.slane %v17854_v36, 3  ;;  %v11401_v36 = vor.u32 %v16248_v46, %v11398_v49  ;;  %v11357_v46 = vor.u32 %v16239_v41, %v11356_v40  ;;  %v16271_v49 = vld [vmem:[#allocation7 + $0x3d4] sm:$0xf0] }
  0x81   :  { %1399 = vmatpush.bf16.msra.mxu1 %v11193_v39  ;;  %v11001_v39 = vor.u32 %v16148_v29, %v10998_v34  ;;  %v16259_v41 = vld [vmem:[#allocation7 + $0x374] sm:$0xf0] }
  0x82   :  { %1418 = vmatpush.bf16.msra.mxu2 %v11321_v60 }
  0x83   :  { %1437 = vmatpush.bf16.msra.mxu3 %v11449_v62  ;;  %v16211_v62 = vld [vmem:[#allocation7 + $0x1f4] sm:$0xf0] }
  0x84   :  { %1381 = vmatpush.bf16.msra.mxu0 %v11049_v51  ;;  %v11245_v3 = vor.u32 %v16211_v62, %v11244_v56  ;;  %v16235_v62 = vld [vmem:[#allocation7 + $0x2b4] sm:$0xf0] }
  0x85   :  { %1400 = vmatpush.bf16.msra.mxu1 %v11177_v54  ;;  %v11116_v54 = vld [vmem:[#allocation7 + $0xe8] sm:$0xf] }
  0x86   :  { %1419 = vmatpush.bf16.msra.mxu2 %v11305_v10  ;;  %v11117_v61 = vor.u32 %v16179_v55, %v11116_v54  ;;  %v16167_v54 = vld [vmem:[#allocation7 + $0x94] sm:$0xf0]  ;;  %v11196_v55 = vld [vmem:[#allocation7 + $0x188] sm:$0xf] }
  0x87   :  { %1438 = vmatpush.bf16.msra.mxu3 %v11433_v13  ;;  %v11228_v13 = vld [vmem:[#allocation7 + $0x1c8] sm:$0xf] }
  0x88   :  { %1382 = vmatpush.bf16.msra.mxu0 %v11033_v1 }
  0x89   :  { %1401 = vmatpush.bf16.msra.mxu1 %v11161_v4  ;;  %v11257_v4 = vor.u32 %v16212_v63, %v11254_v0  ;;  %v11468_v63 = vld [vmem:[#allocation7 + $0x3a8] sm:$0xf] }
  0x8a   :  { %1420 = vmatpush.bf16.msra.mxu2 %v11289_v26  ;;  %v11373_v26 = vor.u32 %v16243_v22, %v11372_v21  ;;  %v11452_v21 = vld [vmem:[#allocation7 + $0x388] sm:$0xf]  ;;  %v16263_v22 = vld [vmem:[#allocation7 + $0x394] sm:$0xf0] }
  0x8b   :  { %1439 = vmatpush.bf16.msra.mxu3 %v11417_v33  ;;  %v11212_v33 = vld [vmem:[#allocation7 + $0x1a8] sm:$0xf] }
  0x8c   :  { %1383 = vmatpush.bf16.msra.mxu0 %v11017_v19 }
  0x8d   :  { %1402 = vmatpush.bf16.msra.mxu1 %v11145_v25 }
  0x8e   :  { %1421 = vmatpush.bf16.msra.mxu2 %v11273_v48  ;;  %v11484_v48 = vld [vmem:[#allocation7 + $0x3c8] sm:$0xf] }
  0x8f   :  { %1440 = vmatpush.bf16.msra.mxu3 %v11401_v36 }
  0x90   :  { %1384 = vmatpush.bf16.msra.mxu0 %v11001_v39  ;;  %v16203_v39 = vld [vmem:[#allocation7 + $0x1b4] sm:$0xf0] }
  0x91   :  { %1403 = vmatpush.bf16.msra.mxu1 %v11129_v44  ;;  %v11213_v45 = vor.u32 %v16203_v39, %v11212_v33  ;;  %v11436_v39 = vld [vmem:[#allocation7 + $0x368] sm:$0xf] }
  0x92   :  { %1422 = vmatpush.bf16.msra.mxu2 %v11257_v4 }
  0x93   :  { %1441 = vmatpush.bf16.msra.mxu3 %v11385_v11 }
  0xd0   :  { %v432_v50 = vpop.f32.mrf.mxu0 }
  0xd1   :  { %v451_v53 = vpop.f32.mrf.mxu1  ;;  %v17860_v58 = vadd.f32 %v432_v50, %v17857_v43 }
  0xd2   :  { %v452_v9 = vadd.f32 %v451_v53, %v17863_v59 }
  0xd3   :  { %v499_v8 = vmax.f32 %v17860_v58, 0.0 }
  0xd4   :  { %v500_v30 = vmax.f32 %v452_v9, 0.0 }
  0xd8   :  { %v470_v12 = vpop.f32.mrf.mxu2  ;;  %v434_v18 = vpop.f32.mrf.mxu0 }
  0xd9   :  { %v489_v17 = vpop.f32.mrf.mxu3  ;;  %v435_v23 = vadd.f32 %v434_v18, %v17857_v43  ;;  %v453_v24 = vpop.f32.mrf.mxu1  ;;  %v471_v50 = vadd.f32 %v470_v12, %v17869_v31  ;;  %v16175_v12 = vld [vmem:[#allocation7 + $0xd4] sm:$0xf0] }
  0xda   :  { %v454_v32 = vadd.f32 %v453_v24, %v17863_v59  ;;  %v490_v52 = vadd.f32 %v489_v17, %v17873_v37  ;;  %v11101_v16 = vor.u32 %v16175_v12, %v11100_v7  ;;  %v16207_v17 = vld [vmem:[#allocation7 + $0x1d4] sm:$0xf0]  ;;  %v11052_v7 = vld [vmem:[#allocation7 + $0x68] sm:$0xf] }
  0xdb   :  { %v503_v38 = vmax.f32 %v435_v23, 0.0  ;;  %v11229_v19 = vor.u32 %v16207_v17, %v11228_v13  ;;  %v11500_v23 = vld [vmem:[#allocation7 + $0x3e8] sm:$0xf]  ;;  %v16195_v13 = vld [vmem:[#allocation7 + $0x174] sm:$0xf0] }
  0xdc   :  { %v504_v42 = vmax.f32 %v454_v32, 0.0  ;;  %v502_v14 = vmax.f32 %v490_v52, 0.0  ;;  %v11501_v29 = vor.u32 %v16275_v27, %v11500_v23  ;;  %v16171_v32 = vld [vmem:[#allocation7 + $0xb4] sm:$0xf0]  ;;  %v11036_v23 = vld [vmem:[#allocation7 + $0x48] sm:$0xf] }
  0xdd   :  { %v17875_v47 = vpack.c.bf16 %v503_v38, %v499_v8  ;;  %v501_v8 = vmax.f32 %v471_v50, 0.0  ;;  %v11068_v50 = vld [vmem:[#allocation7 + $0x88] sm:$0xf] }
  0xde   :  { %v17878_v51 = vpack.c.bf16 %v504_v42, %v500_v30  ;;  %v11084_v30 = vld [vmem:[#allocation7 + $0xa8] sm:$0xf] }
  0xdf   :  { %1309 = vmatmul.bf16.vlgmr.msrb.gmra.mxu0 %v17875_v47  ;;  %v11085_v38 = vor.u32 %v16171_v32, %v11084_v30  ;;  %v11164_v27 = vld [vmem:[#allocation7 + $0x148] sm:$0xf]  ;;  %v16191_v32 = vld [vmem:[#allocation7 + $0x154] sm:$0xf0] }
  0xe0   :  { %v472_v53 = vpop.f32.mrf.mxu2  ;;  %1328 = vmatmul.bf16.vlgmr.msrb.gmra.mxu1 %v17878_v51  ;;  %v437_v60 = vpop.f32.mrf.mxu0  ;;  %1453 = vmatpush.bf16.msrb.mxu0 %v11117_v61 }
  0xe1   :  { %v473_v57 = vadd.f32 %v472_v53, %v17869_v31  ;;  %v491_v58 = vpop.f32.mrf.mxu3  ;;  %v456_v2 = vpop.f32.mrf.mxu1  ;;  %v17886_v10 = vadd.f32 %v437_v60, %v17857_v43  ;;  %1472 = vmatpush.bf16.msrb.mxu1 %v11245_v3  ;;  %v11485_v53 = vor.u32 %v16271_v49, %v11484_v48  ;;  %v11340_v60 = vld [vmem:[#allocation7 + $0x2a8] sm:$0xf]  ;;  %v16187_v49 = vld [vmem:[#allocation7 + $0x134] sm:$0xf0] }
  0xe2   :  { %v492_v1 = vadd.f32 %v491_v58, %v17873_v37  ;;  %v457_v25 = vadd.f32 %v456_v2, %v17863_v59  ;;  %v16199_v58 = vld [vmem:[#allocation7 + $0x194] sm:$0xf0] }
  0xe3   :  { %v505_v9 = vmax.f32 %v473_v57, 0.0  ;;  %v507_v24 = vmax.f32 %v17886_v10, 0.0  ;;  %v11069_v57 = vor.u32 %v16167_v54, %v11068_v50  ;;  %v11197_v61 = vor.u32 %v16199_v58, %v11196_v55  ;;  %v16267_v2 = vld [vmem:[#allocation7 + $0x3b4] sm:$0xf0]  ;;  %v11292_v50 = vld [vmem:[#allocation7 + $0x248] sm:$0xf] }
  0xe4   :  { %v506_v15 = vmax.f32 %v492_v1, 0.0  ;;  %1454 = vmatpush.bf16.msrb.mxu0 %v11101_v16  ;;  %v508_v36 = vmax.f32 %v457_v25, 0.0  ;;  %v11341_v1 = vor.u32 %v16235_v62, %v11340_v60  ;;  %v11469_v4 = vor.u32 %v16267_v2, %v11468_v63  ;;  %v11420_v54 = vld [vmem:[#allocation7 + $0x348] sm:$0xf]  ;;  %v16255_v55 = vld [vmem:[#allocation7 + $0x354] sm:$0xf0] }
  0xe5   :  { %v17888_v18 = vpack.c.bf16 %v505_v9, %v501_v8  ;;  %1473 = vmatpush.bf16.msrb.mxu1 %v11229_v19  ;;  %v16163_v8 = vld [vmem:[#allocation7 + $0x74] sm:$0xf0]  ;;  %v11180_v9 = vld [vmem:[#allocation7 + $0x168] sm:$0xf] }
  0xe6   :  { %v17890_v20 = vpack.c.bf16 %v506_v15, %v502_v14  ;;  %v11053_v12 = vor.u32 %v16163_v8, %v11052_v7  ;;  %v11324_v14 = vld [vmem:[#allocation7 + $0x288] sm:$0xf]  ;;  %v16231_v15 = vld [vmem:[#allocation7 + $0x294] sm:$0xf0]  ;;  %v11181_v17 = vor.u32 %v16195_v13, %v11180_v9  ;;  %v11118_v7 = vld [vmem:[#allocation7 + $0xf8] sm:$0xf0] }
  0xe7   :  { %1347 = vmatmul.bf16.vlgmr.msrb.gmra.mxu2 %v17888_v18  ;;  %v11325_v19 = vor.u32 %v16231_v15, %v11324_v14  ;;  %v16151_v58 = vld [vmem:[#allocation7 + $0x14] sm:$0xf0]  ;;  %v11132_v60 = vld [vmem:[#allocation7 + $0x108] sm:$0xf]  ;;  %v16209_v8 = vld [vmem:[#allocation7 + $0x1ec] sm:$0xf] }
  0xe8   :  { %1366 = vmatmul.bf16.vlgmr.msrb.gmra.mxu3 %v17890_v20  ;;  %v475_v28 = vpop.f32.mrf.mxu2  ;;  %v439_v35 = vpop.f32.mrf.mxu0  ;;  %1491 = vmatpush.bf16.msrb.mxu2 %v11373_v26  ;;  %v16159_v26 = vld [vmem:[#allocation7 + $0x54] sm:$0xf0]  ;;  %v11276_v63 = vld [vmem:[#allocation7 + $0x228] sm:$0xf] }
  0xe9   :  { %v494_v34 = vpop.f32.mrf.mxu3  ;;  %v440_v42 = vadd.f32 %v439_v35, %v17857_v43  ;;  %v458_v44 = vpop.f32.mrf.mxu1  ;;  %1510 = vmatpush.bf16.msrb.mxu3 %v11501_v29  ;;  %1455 = vmatpush.bf16.msrb.mxu0 %v11085_v38  ;;  %v11037_v30 = vor.u32 %v16159_v26, %v11036_v23  ;;  %v11308_v35 = vld [vmem:[#allocation7 + $0x268] sm:$0xf]  ;;  %v16227_v38 = vld [vmem:[#allocation7 + $0x274] sm:$0xf0]  ;;  %v11230_v23 = vld [vmem:[#allocation7 + $0x1d8] sm:$0xf0] }
  0xea   :  { %v459_v52 = vadd.f32 %v458_v44, %v17863_v59  ;;  %1474 = vmatpush.bf16.msrb.mxu1 %v11213_v45  ;;  %v476_v59 = vadd.f32 %v475_v28, %v17869_v31  ;;  %v495_v5 = vadd.f32 %v494_v34, %v17873_v37  ;;  %v11309_v40 = vor.u32 %v16227_v38, %v11308_v35  ;;  %v11020_v44 = vld [vmem:[#allocation7 + $0x28] sm:$0xf]  ;;  %v16155_v45 = vld [vmem:[#allocation7 + $0x34] sm:$0xf0]  ;;  %v11374_v26 = vld [vmem:[#allocation7 + $0x2f8] sm:$0xf0] }
  0xeb   :  { %v511_v56 = vmax.f32 %v440_v42, 0.0  ;;  %v11437_v42 = vor.u32 %v16259_v41, %v11436_v39  ;;  %v11021_v48 = vor.u32 %v16155_v45, %v11020_v44  ;;  %v11404_v2 = vld [vmem:[#allocation7 + $0x328] sm:$0xf]  ;;  %v16201_v35 = vld [vmem:[#allocation7 + $0x1ac] sm:$0xf] }
  0xec   :  { %v512_v43 = vmax.f32 %v459_v52, 0.0  ;;  %1492 = vmatpush.bf16.msrb.mxu2 %v11357_v46  ;;  %v510_v28 = vmax.f32 %v495_v5, 0.0  ;;  %v11148_v46 = vld [vmem:[#allocation7 + $0x128] sm:$0xf]  ;;  %v11214_v39 = vld [vmem:[#allocation7 + $0x1b8] sm:$0xf0] }
  0xed   :  { %v17898_v0 = vpack.c.bf16 %v511_v56, %v507_v24  ;;  %1511 = vmatpush.bf16.msrb.mxu3 %v11485_v53  ;;  %1456 = vmatpush.bf16.msrb.mxu0 %v11069_v57  ;;  %v509_v24 = vmax.f32 %v476_v59, 0.0  ;;  %v11149_v52 = vor.u32 %v16187_v49, %v11148_v46  ;;  %v11004_v56 = vld [vmem:[#allocation7 + $0x8] sm:$0xf]  ;;  %v11421_v57 = vor.u32 %v16255_v55, %v11420_v54  ;;  %v11358_v41 = vld [vmem:[#allocation7 + $0x2d8] sm:$0xf0] }
  0xee   :  { %v17901_v3 = vpack.c.bf16 %v512_v43, %v508_v36  ;;  %1475 = vmatpush.bf16.msrb.mxu1 %v11197_v61  ;;  %v16223_v36 = vld [vmem:[#allocation7 + $0x254] sm:$0xf0]  ;;  %v11005_v61 = vor.u32 %v16151_v58, %v11004_v56  ;;  %v11388_v15 = vld [vmem:[#allocation7 + $0x308] sm:$0xf]  ;;  %v16269_v45 = vld [vmem:[#allocation7 + $0x3cc] sm:$0xf] }
  0xef   :  { %1314 = vmatmul.bf16.gmra.mxu0 %v17898_v0  ;;  %v11293_v53 = vor.u32 %v16223_v36, %v11292_v50  ;;  %v16183_v43 = vld [vmem:[#allocation7 + $0x114] sm:$0xf0]  ;;  %v11486_v46 = vld [vmem:[#allocation7 + $0x3d8] sm:$0xf0]  ;;  %v16197_v36 = vld [vmem:[#allocation7 + $0x18c] sm:$0xf] }
  0xf0   :  { %v477_v6 = vpop.f32.mrf.mxu2  ;;  %1333 = vmatmul.bf16.gmra.mxu1 %v17901_v3  ;;  %1493 = vmatpush.bf16.msrb.mxu2 %v11341_v1  ;;  %v11133_v62 = vor.u32 %v16183_v43, %v11132_v60  ;;  %v16219_v1 = vld [vmem:[#allocation7 + $0x234] sm:$0xf0]  ;;  %v11489_v49 = vor.u32 %v16269_v45, %v11486_v46  ;;  %v11070_v50 = vld [vmem:[#allocation7 + $0x98] sm:$0xf0]  ;;  %v16233_v55 = vld [vmem:[#allocation7 + $0x2ac] sm:$0xf] }
  0xf1   :  { %v478_v10 = vadd.f32 %v477_v6, %v17869_v31  ;;  %v496_v11 = vpop.f32.mrf.mxu3  ;;  %1512 = vmatpush.bf16.msrb.mxu3 %v11469_v4  ;;  %1457 = vmatpush.bf16.msrb.mxu0 %v11053_v12  ;;  %v11453_v31 = vor.u32 %v16263_v22, %v11452_v21  ;;  %v11277_v59 = vor.u32 %v16219_v1, %v11276_v63  ;;  %v16251_v4 = vld [vmem:[#allocation7 + $0x334] sm:$0xf0]  ;;  %v16177_v6 = vld [vmem:[#allocation7 + $0xec] sm:$0xf]  ;;  %v11102_v21 = vld [vmem:[#allocation7 + $0xd8] sm:$0xf0] }
  0xf2   :  { %v497_v16 = vadd.f32 %v496_v11, %v17873_v37  ;;  %1476 = vmatpush.bf16.msrb.mxu1 %v11181_v17  ;;  %v11165_v37 = vor.u32 %v16191_v32, %v11164_v27  ;;  %v11405_v5 = vor.u32 %v16251_v4, %v11404_v2  ;;  %v11121_v9 = vor.u32 %v16177_v6, %v11118_v7  ;;  %v11260_v11 = vld [vmem:[#allocation7 + $0x208] sm:$0xf]  ;;  %v16215_v12 = vld [vmem:[#allocation7 + $0x214] sm:$0xf0]  ;;  %v16173_v17 = vld [vmem:[#allocation7 + $0xcc] sm:$0xf] }
  0xf3   :  { %v513_v25 = vmax.f32 %v478_v10, 0.0  ;;  %v11246_v10 = vld [vmem:[#allocation7 + $0x1f8] sm:$0xf0]  ;;  %v11261_v14 = vor.u32 %v16215_v12, %v11260_v11  ;;  %v16205_v22 = vld [vmem:[#allocation7 + $0x1cc] sm:$0xf] }
  0xf4   :  { %v514_v29 = vmax.f32 %v497_v16, 0.0  ;;  %1494 = vmatpush.bf16.msrb.mxu2 %v11325_v19  ;;  %v11249_v13 = vor.u32 %v16209_v8, %v11246_v10  ;;  %v16247_v16 = vld [vmem:[#allocation7 + $0x314] sm:$0xf0]  ;;  %v16273_v27 = vld [vmem:[#allocation7 + $0x3ec] sm:$0xf] }
  0xf5   :  { %v17908_v33 = vpack.c.bf16 %v513_v25, %v509_v24  ;;  %1513 = vmatpush.bf16.msrb.mxu3 %v11453_v31  ;;  %1458 = vmatpush.bf16.msrb.mxu0 %v11037_v30  ;;  %v11389_v19 = vor.u32 %v16247_v16, %v11388_v15  ;;  %v11105_v24 = vor.u32 %v16173_v17, %v11102_v21  ;;  %v16241_v31 = vld [vmem:[#allocation7 + $0x2ec] sm:$0xf]  ;;  %v11342_v56 = vld [vmem:[#allocation7 + $0x2b8] sm:$0xf0] }
  0xf6   :  { %v17910_v34 = vpack.c.bf16 %v514_v29, %v510_v28  ;;  %1477 = vmatpush.bf16.msrb.mxu1 %v11165_v37  ;;  %v11233_v25 = vor.u32 %v16205_v22, %v11230_v23  ;;  %v11377_v28 = vor.u32 %v16241_v31, %v11374_v26  ;;  %v11502_v29 = vld [vmem:[#allocation7 + $0x3f8] sm:$0xf0]  ;;  %v16169_v32 = vld [vmem:[#allocation7 + $0xac] sm:$0xf]  ;;  %v11345_v58 = vor.u32 %v16233_v55, %v11342_v56 }
  0xf7   :  { %1352 = vmatmul.bf16.gmra.mxu2 %v17908_v33  ;;  %v11505_v30 = vor.u32 %v16273_v27, %v11502_v29  ;;  %v11086_v37 = vld [vmem:[#allocation7 + $0xb8] sm:$0xf0]  ;;  %v16193_v63 = vld [vmem:[#allocation7 + $0x16c] sm:$0xf] }
  0xf8   :  { %1371 = vmatmul.bf16.gmra.mxu3 %v17910_v34  ;;  %1495 = vmatpush.bf16.msrb.mxu2 %v11309_v40  ;;  %v11089_v38 = vor.u32 %v16169_v32, %v11086_v37  ;;  %v16237_v40 = vld [vmem:[#allocation7 + $0x2cc] sm:$0xf]  ;;  %v11470_v60 = vld [vmem:[#allocation7 + $0x3b8] sm:$0xf0] }
  0xf9   :  { %1514 = vmatpush.bf16.msrb.mxu3 %v11437_v42  ;;  %1459 = vmatpush.bf16.msrb.mxu0 %v11021_v48  ;;  %v11217_v42 = vor.u32 %v16201_v35, %v11214_v39  ;;  %v11361_v44 = vor.u32 %v16237_v40, %v11358_v41  ;;  %v16165_v48 = vld [vmem:[#allocation7 + $0x8c] sm:$0xf]  ;;  %v11182_v2 = vld [vmem:[#allocation7 + $0x178] sm:$0xf0] }
  0xfa   :  { %1478 = vmatpush.bf16.msrb.mxu1 %v11149_v52  ;;  %v11198_v52 = vld [vmem:[#allocation7 + $0x198] sm:$0xf0]  ;;  %v16261_v7 = vld [vmem:[#allocation7 + $0x38c] sm:$0xf] }
  0xfb   :  { %v11201_v54 = vor.u32 %v16197_v36, %v11198_v52  ;;  %v11326_v4 = vld [vmem:[#allocation7 + $0x298] sm:$0xf0]  ;;  %v16189_v12 = vld [vmem:[#allocation7 + $0x14c] sm:$0xf] }
  0xfc   :  { %1496 = vmatpush.bf16.msrb.mxu2 %v11293_v53  ;;  %v11073_v53 = vor.u32 %v16165_v48, %v11070_v50  ;;  %v11454_v8 = vld [vmem:[#allocation7 + $0x398] sm:$0xf0]  ;;  %v16225_v16 = vld [vmem:[#allocation7 + $0x26c] sm:$0xf] }
  0xfd   :  { %1515 = vmatpush.bf16.msrb.mxu3 %v11421_v57  ;;  %1460 = vmatpush.bf16.msrb.mxu0 %v11005_v61  ;;  %v16265_v57 = vld [vmem:[#allocation7 + $0x3ac] sm:$0xf]  ;;  %v11457_v10 = vor.u32 %v16261_v7, %v11454_v8  ;;  %v11038_v11 = vld [vmem:[#allocation7 + $0x58] sm:$0xf0]  ;;  %v11556_v8 = vld [vmem:[#allocation10 + $0x60] sm:$0xf] }
  0xfe   :  { %1479 = vmatpush.bf16.msrb.mxu1 %v11133_v62  ;;  %v11473_v43 = vor.u32 %v16265_v57, %v11470_v60  ;;  %v16161_v61 = vld [vmem:[#allocation7 + $0x6c] sm:$0xf]  ;;  %v11054_v62 = vld [vmem:[#allocation7 + $0x78] sm:$0xf0]  ;;  %v11620_v60 = vld [vmem:[#allocation10 + $0xe0] sm:$0xf] }
  0xff   :  { %1385 = vmatmul.bf16.vlgmr.msra.gmra.mxu0 %v17875_v47  ;;  %v11057_v1 = vor.u32 %v16161_v61, %v11054_v62  ;;  %v11310_v17 = vld [vmem:[#allocation7 + $0x278] sm:$0xf0]  ;;  %v16185_v31 = vld [vmem:[#allocation7 + $0x12c] sm:$0xf]  ;;  %v11604_v62 = vld [vmem:[#allocation10 + $0xc0] sm:$0xf] }
 0x100   :  { %1404 = vmatmul.bf16.vlgmr.msra.gmra.mxu1 %v17878_v51  ;;  %1497 = vmatpush.bf16.msrb.mxu2 %v11277_v59  ;;  %v16229_v59 = vld [vmem:[#allocation7 + $0x28c] sm:$0xf]  ;;  %v11313_v21 = vor.u32 %v16225_v16, %v11310_v17  ;;  %v11438_v22 = vld [vmem:[#allocation7 + $0x378] sm:$0xf0]  ;;  %v11748_v16 = vld [vmem:[#allocation10 + $0x1e0] sm:$0xf] }
 0x101   :  { %1516 = vmatpush.bf16.msrb.mxu3 %v11405_v5  ;;  %1529 = vmatpush.bf16.msra.mxu0 %v11121_v9  ;;  %v11185_v5 = vor.u32 %v16193_v63, %v11182_v2  ;;  %v11329_v6 = vor.u32 %v16229_v59, %v11326_v4  ;;  %v16157_v9 = vld [vmem:[#allocation7 + $0x4c] sm:$0xf]  ;;  %v11150_v27 = vld [vmem:[#allocation7 + $0x138] sm:$0xf0]  ;;  %v16302_v63 = vld [vmem:[#allocation10 + $0xcc] sm:$0xf0] }
 0x102   :  { %1548 = vmatpush.bf16.msra.mxu1 %v11249_v13  ;;  %v11166_v13 = vld [vmem:[#allocation7 + $0x158] sm:$0xf0]  ;;  %v16253_v37 = vld [vmem:[#allocation7 + $0x34c] sm:$0xf]  ;;  %v11588_v2 = vld [vmem:[#allocation10 + $0xa0] sm:$0xf] }
 0x103   :  { %v11169_v15 = vor.u32 %v16189_v12, %v11166_v13  ;;  %v11294_v29 = vld [vmem:[#allocation7 + $0x258] sm:$0xf0]  ;;  %v16181_v41 = vld [vmem:[#allocation7 + $0x10c] sm:$0xf]  ;;  %v16298_v59 = vld [vmem:[#allocation10 + $0xac] sm:$0xf0] }
 0x104   :  { %1498 = vmatpush.bf16.msrb.mxu2 %v11261_v14  ;;  %v11041_v14 = vor.u32 %v16157_v9, %v11038_v11  ;;  %v11422_v35 = vld [vmem:[#allocation7 + $0x358] sm:$0xf0]  ;;  %v16217_v46 = vld [vmem:[#allocation7 + $0x22c] sm:$0xf]  ;;  %v11589_v4 = vor.u32 %v16298_v59, %v11588_v2  ;;  %v16290_v9 = vld [vmem:[#allocation10 + $0x6c] sm:$0xf0] }
 0x105   :  { %1517 = vmatpush.bf16.msrb.mxu3 %v11389_v19  ;;  %1530 = vmatpush.bf16.msra.mxu0 %v11105_v24  ;;  %v16257_v19 = vld [vmem:[#allocation7 + $0x36c] sm:$0xf]  ;;  %v11425_v39 = vor.u32 %v16253_v37, %v11422_v35  ;;  %v11006_v40 = vld [vmem:[#allocation7 + $0x18] sm:$0xf0]  ;;  %v16286_v11 = vld [vmem:[#allocation10 + $0x4c] sm:$0xf0] }
 0x106   :  { %1549 = vmatpush.bf16.msra.mxu1 %v11233_v25  ;;  %v11441_v23 = vor.u32 %v16257_v19, %v11438_v22  ;;  %v16153_v24 = vld [vmem:[#allocation7 + $0x2c] sm:$0xf]  ;;  %v11022_v25 = vld [vmem:[#allocation7 + $0x38] sm:$0xf0]  ;;  %v16282_v13 = vld [vmem:[#allocation10 + $0x2c] sm:$0xf0] }
 0x107   :  { %1423 = vmatmul.bf16.vlgmr.msra.gmra.mxu2 %v17888_v18  ;;  %v11025_v26 = vor.u32 %v16153_v24, %v11022_v25  ;;  %v11278_v48 = vld [vmem:[#allocation7 + $0x238] sm:$0xf0]  ;;  %v16245_v55 = vld [vmem:[#allocation7 + $0x30c] sm:$0xf]  ;;  %v16338_v17 = vld [vmem:[#allocation10 + $0x1ec] sm:$0xf0] }
 0x108   :  { %1442 = vmatmul.bf16.vlgmr.msra.gmra.mxu3 %v17890_v20  ;;  %1567 = vmatpush.bf16.msra.mxu2 %v11377_v28  ;;  %v16221_v28 = vld [vmem:[#allocation7 + $0x24c] sm:$0xf]  ;;  %v11281_v50 = vor.u32 %v16217_v46, %v11278_v48  ;;  %v11406_v36 = vld [vmem:[#allocation7 + $0x338] sm:$0xf0]  ;;  %v16304_v19 = vld [vmem:[#allocation10 + $0xe4] sm:$0xf] }
 0x109   :  { %1586 = vmatpush.bf16.msra.mxu3 %v11505_v30  ;;  %1531 = vmatpush.bf16.msra.mxu0 %v11089_v38  ;;  %v11153_v30 = vor.u32 %v16185_v31, %v11150_v27  ;;  %v11297_v32 = vor.u32 %v16221_v28, %v11294_v29  ;;  %v16149_v38 = vld [vmem:[#allocation7 + $0xc] sm:$0xf]  ;;  %v11390_v57 = vld [vmem:[#allocation7 + $0x318] sm:$0xf0]  ;;  %v11732_v24 = vld [vmem:[#allocation10 + $0x1c0] sm:$0xf] }
 0x10a   :  { %1550 = vmatpush.bf16.msra.mxu1 %v11217_v42  ;;  %v11134_v42 = vld [vmem:[#allocation7 + $0x118] sm:$0xf0]  ;;  %v16334_v25 = vld [vmem:[#allocation10 + $0x1cc] sm:$0xf0]  ;;  %v11606_v27 = vld [vmem:[#allocation10 + $0xd0] sm:$0xf0] }
 0x10b   :  { %v11137_v45 = vor.u32 %v16181_v41, %v11134_v42  ;;  %v11733_v31 = vor.u32 %v16334_v25, %v11732_v24  ;;  %v17938_v28 = vld [vmem:[#allocation8] sm:$0xf]  ;;  %v16330_v29 = vld [vmem:[#allocation10 + $0x1ac] sm:$0xf0]  ;;  %v11590_v37 = vld [vmem:[#allocation10 + $0xb0] sm:$0xf0] }
 0x10c   :  { %1568 = vmatpush.bf16.msra.mxu2 %v11361_v44  ;;  %v11009_v44 = vor.u32 %v16149_v38, %v11006_v40  ;;  %v17941_v38 = vperm.slane %v17938_v28, 0  ;;  %v11700_v41 = vld [vmem:[#allocation10 + $0x180] sm:$0xf]  ;;  %v16326_v42 = vld [vmem:[#allocation10 + $0x18c] sm:$0xf0] }
 0x10d   :  { %1587 = vmatpush.bf16.msra.mxu3 %v11489_v49  ;;  %1532 = vmatpush.bf16.msra.mxu0 %v11073_v53  ;;  %v16249_v49 = vld [vmem:[#allocation7 + $0x32c] sm:$0xf]  ;;  %v11574_v46 = vld [vmem:[#allocation10 + $0x90] sm:$0xf0] }
 0x10e   :  { %1551 = vmatpush.bf16.msra.mxu1 %v11201_v54  ;;  %v11409_v52 = vor.u32 %v16249_v49, %v11406_v36  ;;  %v16213_v53 = vld [vmem:[#allocation7 + $0x20c] sm:$0xf]  ;;  %v11262_v54 = vld [vmem:[#allocation7 + $0x218] sm:$0xf0]  ;;  %v11684_v36 = vld [vmem:[#allocation10 + $0x160] sm:$0xf] }
 0x10f   :  { %1390 = vmatmul.bf16.gmra.mxu0 %v17898_v0  ;;  %v11265_v56 = vor.u32 %v16213_v53, %v11262_v54  ;;  %v16288_v53 = vld [vmem:[#allocation10 + $0x64] sm:$0xf] }
 0x110   :  { %1409 = vmatmul.bf16.gmra.mxu1 %v17901_v3  ;;  %1569 = vmatpush.bf16.msra.mxu2 %v11345_v58  ;;  %v11393_v58 = vor.u32 %v16245_v55, %v11390_v57 }
 0x111   :  { %1588 = vmatpush.bf16.msra.mxu3 %v11473_v43  ;;  %1533 = vmatpush.bf16.msra.mxu0 %v11057_v1  ;;  %v16306_v43 = vld [vmem:[#allocation10 + $0xec] sm:$0xf0]  ;;  %v11605_v1 = vor.u32 %v16302_v63, %v11604_v62  ;;  %v11668_v62 = vld [vmem:[#allocation10 + $0x140] sm:$0xf] }
 0x112   :  { %1552 = vmatpush.bf16.msra.mxu1 %v11185_v5  ;;  %v11621_v61 = vor.u32 %v16306_v43, %v11620_v60  ;;  %v11572_v5 = vld [vmem:[#allocation10 + $0x80] sm:$0xf]  ;;  %v16318_v63 = vld [vmem:[#allocation10 + $0x14c] sm:$0xf0] }
 0x113   :  { %v11669_v59 = vor.u32 %v16318_v63, %v11668_v62 }
 0x114   :  { %1570 = vmatpush.bf16.msra.mxu2 %v11329_v6  ;;  %v16294_v6 = vld [vmem:[#allocation10 + $0x8c] sm:$0xf0] }
 0x115   :  { %1589 = vmatpush.bf16.msra.mxu3 %v11457_v10  ;;  %1534 = vmatpush.bf16.msra.mxu0 %v11041_v14  ;;  %v11573_v7 = vor.u32 %v16294_v6, %v11572_v5  ;;  %v11557_v10 = vor.u32 %v16290_v9, %v11556_v8  ;;  %v11652_v8 = vld [vmem:[#allocation10 + $0x120] sm:$0xf]  ;;  %v16314_v9 = vld [vmem:[#allocation10 + $0x12c] sm:$0xf0] }
 0x116   :  { %1553 = vmatpush.bf16.msra.mxu1 %v11169_v15  ;;  %v16278_v15 = vld [vmem:[#allocation10 + $0xc] sm:$0xf0] }
 0x117   :  { %1428 = vmatmul.bf16.gmra.mxu2 %v17908_v33 }
 0x118   :  { %1447 = vmatmul.bf16.gmra.mxu3 %v17910_v34  ;;  %1571 = vmatpush.bf16.msra.mxu2 %v11313_v21  ;;  %v11749_v21 = vor.u32 %v16338_v17, %v11748_v16  ;;  %v11636_v16 = vld [vmem:[#allocation10 + $0x100] sm:$0xf]  ;;  %v16310_v17 = vld [vmem:[#allocation10 + $0x10c] sm:$0xf0] }
 0x119   :  { %1590 = vmatpush.bf16.msra.mxu3 %v11441_v23  ;;  %1535 = vmatpush.bf16.msra.mxu0 %v11025_v26  ;;  %v16300_v26 = vld [vmem:[#allocation10 + $0xc4] sm:$0xf] }
 0x11a   :  { %1554 = vmatpush.bf16.msra.mxu1 %v11153_v30  ;;  %v16296_v30 = vld [vmem:[#allocation10 + $0xa4] sm:$0xf] }
 0x11b   :  { %v11593_v35 = vor.u32 %v16296_v30, %v11590_v37  ;;  %v11750_v30 = vld [vmem:[#allocation10 + $0x1f0] sm:$0xf0]  ;;  %v16307_v37 = vld [vmem:[#allocation10 + $0xf4] sm:$0xf0] }
 0x11c   :  { %1572 = vmatpush.bf16.msra.mxu2 %v11297_v32 }
 0x11d   :  { %1591 = vmatpush.bf16.msra.mxu3 %v11425_v39  ;;  %1536 = vmatpush.bf16.msra.mxu0 %v11009_v44  ;;  %v16292_v44 = vld [vmem:[#allocation10 + $0x84] sm:$0xf] }
 0x11e   :  { %1555 = vmatpush.bf16.msra.mxu1 %v11137_v45  ;;  %v11701_v45 = vor.u32 %v16326_v42, %v11700_v41  ;;  %v11577_v48 = vor.u32 %v16292_v44, %v11574_v46  ;;  %v16366_v46 = vld [vmem:[#allocation10 + $0x2cc] sm:$0xf0] }
 0x11f   :  { %1461 = vmatmul.bf16.vlgmr.msrb.gmra.mxu0 %v17875_v47 }
 0x120   :  { %1480 = vmatmul.bf16.vlgmr.msrb.gmra.mxu1 %v17878_v51  ;;  %1573 = vmatpush.bf16.msra.mxu2 %v11281_v50 }
 0x121   :  { %1592 = vmatpush.bf16.msra.mxu3 %v11409_v52  ;;  %2407 = vmatpush.bf16.msrb.mxu0 %v11621_v61  ;;  %v16322_v52 = vld [vmem:[#allocation10 + $0x16c] sm:$0xf0] }
 0x122   :  { %2426 = vmatpush.bf16.msrb.mxu1 %v11749_v21  ;;  %v11685_v55 = vor.u32 %v16322_v52, %v11684_v36  ;;  %v11734_v36 = vld [vmem:[#allocation10 + $0x1d0] sm:$0xf0] }
 0x124   :  { %1574 = vmatpush.bf16.msra.mxu2 %v11265_v56  ;;  %v11558_v56 = vld [vmem:[#allocation10 + $0x70] sm:$0xf0] }
 0x125   :  { %1593 = vmatpush.bf16.msra.mxu3 %v11393_v58  ;;  %2408 = vmatpush.bf16.msrb.mxu0 %v11605_v1  ;;  %v11561_v57 = vor.u32 %v16288_v53, %v11558_v56  ;;  %v16284_v1 = vld [vmem:[#allocation10 + $0x44] sm:$0xf]  ;;  %v11612_v53 = vld [vmem:[#allocation10 + $0xc8] sm:$0xf] }
 0x126   :  { %2427 = vmatpush.bf16.msrb.mxu1 %v11733_v31 }
 0x127   :  { %1499 = vmatmul.bf16.vlgmr.msrb.gmra.mxu2 %v17888_v18 }
 0x128   :  { %1518 = vmatmul.bf16.vlgmr.msrb.gmra.mxu3 %v17890_v20 }
 0x129   :  { %2409 = vmatpush.bf16.msrb.mxu0 %v11589_v4  ;;  %v11542_v4 = vld [vmem:[#allocation10 + $0x50] sm:$0xf0] }
 0x12a   :  { %v11545_v5 = vor.u32 %v16284_v1, %v11542_v4  ;;  %v11718_v1 = vld [vmem:[#allocation10 + $0x1b0] sm:$0xf0] }
 0x12d   :  { %2410 = vmatpush.bf16.msrb.mxu0 %v11573_v7 }
 0x12f   :  { %1466 = vmatmul.bf16.gmra.mxu0 %v17898_v0 }
 0x130   :  { %1485 = vmatmul.bf16.gmra.mxu1 %v17901_v3 }
 0x131   :  { %2411 = vmatpush.bf16.msrb.mxu0 %v11557_v10  ;;  %v16280_v10 = vld [vmem:[#allocation10 + $0x24] sm:$0xf] }
 0x137   :  { %1504 = vmatmul.bf16.gmra.mxu2 %v17908_v33 }
 0x138   :  { %1523 = vmatmul.bf16.gmra.mxu3 %v17910_v34 }
 0x13f   :  { %1537 = vmatmul.bf16.vlgmr.msra.gmra.mxu0 %v17875_v47  ;;  %v11540_v47 = vld [vmem:[#allocation10 + $0x40] sm:$0xf] }
 0x140   :  { %1556 = vmatmul.bf16.vlgmr.msra.gmra.mxu1 %v17878_v51  ;;  %v11541_v12 = vor.u32 %v16286_v11, %v11540_v47  ;;  %v11524_v51 = vld [vmem:[#allocation10 + $0x20] sm:$0xf] }
 0x141   :  { %v11525_v14 = vor.u32 %v16282_v13, %v11524_v51  ;;  %v11653_v51 = vor.u32 %v16314_v9, %v11652_v8  ;;  %v11526_v13 = vld [vmem:[#allocation10 + $0x30] sm:$0xf0] }
 0x142   :  { %2412 = vmatpush.bf16.msrb.mxu0 %v11541_v12 }
 0x146   :  { %2413 = vmatpush.bf16.msrb.mxu0 %v11525_v14  ;;  %v11529_v14 = vor.u32 %v16280_v10, %v11526_v13  ;;  %v11828_v10 = vld [vmem:[#allocation10 + $0x280] sm:$0xf] }
 0x147   :  { %1575 = vmatmul.bf16.vlgmr.msra.gmra.mxu2 %v17888_v18  ;;  %v11508_v18 = vld [vmem:[#allocation10] sm:$0xf] }
 0x148   :  { %1594 = vmatmul.bf16.vlgmr.msra.gmra.mxu3 %v17890_v20  ;;  %v11509_v20 = vor.u32 %v16278_v15, %v11508_v18 }
 0x14a   :  { %2414 = vmatpush.bf16.msrb.mxu0 %v11509_v20 }
 0x14f   :  { %1542 = vmatmul.bf16.gmra.mxu0 %v17898_v0  ;;  %v11622_v0 = vld [vmem:[#allocation10 + $0xf0] sm:$0xf0] }
 0x150   :  { %1561 = vmatmul.bf16.gmra.mxu1 %v17901_v3  ;;  %v11625_v22 = vor.u32 %v16304_v19, %v11622_v0  ;;  %v16276_v19 = vld [vmem:[#allocation10 + $0x4] sm:$0xf] }
 0x152   :  { %2483 = vmatpush.bf16.msra.mxu0 %v11625_v22  ;;  %v11637_v22 = vor.u32 %v16310_v17, %v11636_v16 }
 0x157   :  { %1580 = vmatmul.bf16.gmra.mxu2 %v17908_v33  ;;  %v11609_v33 = vor.u32 %v16300_v26, %v11606_v27  ;;  %v11876_v26 = vld [vmem:[#allocation10 + $0x2e0] sm:$0xf]  ;;  %v16370_v27 = vld [vmem:[#allocation10 + $0x2ec] sm:$0xf0] }
 0x158   :  { %1599 = vmatmul.bf16.gmra.mxu3 %v17910_v34  ;;  %v11716_v34 = vld [vmem:[#allocation10 + $0x1a0] sm:$0xf] }
 0x159   :  { %2484 = vmatpush.bf16.msra.mxu0 %v11609_v33  ;;  %v11717_v32 = vor.u32 %v16330_v29, %v11716_v34  ;;  %v16336_v33 = vld [vmem:[#allocation10 + $0x1e4] sm:$0xf]  ;;  %v11877_v29 = vor.u32 %v16370_v27, %v11876_v26  ;;  %v11564_v26 = vld [vmem:[#allocation10 + $0x68] sm:$0xf]  ;;  %v16291_v27 = vld [vmem:[#allocation10 + $0x74] sm:$0xf0] }
 0x15b   :  { %2428 = vmatpush.bf16.msrb.mxu1 %v11717_v32  ;;  %v11628_v32 = vld [vmem:[#allocation10 + $0xe8] sm:$0xf]  ;;  %2445 = vmatpush.bf16.msrb.mxu2 %v11877_v29 }
 0x15c   :  { %v1310_v3 = vpop.f32.mrf.mxu0 }
 0x15d   :  { %v1329_v23 = vpop.f32.mrf.mxu1  ;;  %2485 = vmatpush.bf16.msra.mxu0 %v11593_v35  ;;  %v1311_v49 = vadd.f32 %v1310_v3, %v17941_v38  ;;  %v11510_v3 = vld [vmem:[#allocation10 + $0x10] sm:$0xf0]  ;;  %v11753_v35 = vor.u32 %v16336_v33, %v11750_v30 }
 0x15f   :  { %2429 = vmatpush.bf16.msrb.mxu1 %v11701_v45  ;;  %v1330_v58 = vadd.f32 %v1329_v23, %v1311_v49  ;;  %v11513_v23 = vor.u32 %v16276_v19, %v11510_v3  ;;  %v11860_v45 = vld [vmem:[#allocation10 + $0x2c0] sm:$0xf]  ;;  %v16320_v3 = vld [vmem:[#allocation10 + $0x164] sm:$0xf] }
 0x160   :  { %v11861_v49 = vor.u32 %v16366_v46, %v11860_v45  ;;  %v11670_v45 = vld [vmem:[#allocation10 + $0x150] sm:$0xf0]  ;;  %v11548_v46 = vld [vmem:[#allocation10 + $0x48] sm:$0xf] }
 0x161   :  { %2486 = vmatpush.bf16.msra.mxu0 %v11577_v48 }
 0x162   :  { %2446 = vmatpush.bf16.msrb.mxu2 %v11861_v49  ;;  %v16287_v49 = vld [vmem:[#allocation10 + $0x54] sm:$0xf0] }
 0x163   :  { %2430 = vmatpush.bf16.msrb.mxu1 %v11685_v55 }
 0x164   :  { %v1312_v39 = vpop.f32.mrf.mxu0 }
 0x165   :  { %v1331_v40 = vpop.f32.mrf.mxu1  ;;  %v1313_v60 = vadd.f32 %v1312_v39, %v17941_v38  ;;  %2487 = vmatpush.bf16.msra.mxu0 %v11561_v57  ;;  %v11629_v39 = vor.u32 %v16307_v37, %v11628_v32 }
 0x167   :  { %v1332_v6 = vadd.f32 %v1331_v40, %v1313_v60  ;;  %2431 = vmatpush.bf16.msrb.mxu1 %v11669_v59  ;;  %v16328_v60 = vld [vmem:[#allocation10 + $0x1a4] sm:$0xf]  ;;  %v16299_v59 = vld [vmem:[#allocation10 + $0xb4] sm:$0xf0] }
 0x168   :  { %v11721_v4 = vor.u32 %v16328_v60, %v11718_v1  ;;  %v11532_v60 = vld [vmem:[#allocation10 + $0x28] sm:$0xf] }
 0x169   :  { %2488 = vmatpush.bf16.msra.mxu0 %v11545_v5 }
 0x16a   :  { %v1348_v50 = vpop.f32.mrf.mxu2 }
 0x16b   :  { %v1367_v54 = vpop.f32.mrf.mxu3  ;;  %v1349_v2 = vadd.f32 %v1348_v50, %v1330_v58  ;;  %2432 = vmatpush.bf16.msrb.mxu1 %v11653_v51  ;;  %v16332_v50 = vld [vmem:[#allocation10 + $0x1c4] sm:$0xf]  ;;  %v16362_v58 = vld [vmem:[#allocation10 + $0x2ac] sm:$0xf0] }
 0x16c   :  { %v1315_v43 = vpop.f32.mrf.mxu0  ;;  %v11737_v52 = vor.u32 %v16332_v50, %v11734_v36 }
 0x16d   :  { %v1334_v61 = vpop.f32.mrf.mxu1  ;;  %v1368_v47 = vadd.f32 %v1367_v54, %v1349_v2  ;;  %2489 = vmatpush.bf16.msra.mxu0 %v11529_v14  ;;  %v1316_v24 = vadd.f32 %v1315_v43, %v17941_v38  ;;  %v16303_v54 = vld [vmem:[#allocation10 + $0xd4] sm:$0xf0]  ;;  %v11596_v2 = vld [vmem:[#allocation10 + $0xa8] sm:$0xf]  ;;  %v11702_v14 = vld [vmem:[#allocation10 + $0x190] sm:$0xf0] }
 0x16e   :  { %v11613_v56 = vor.u32 %v16303_v54, %v11612_v53  ;;  %v11597_v5 = vor.u32 %v16299_v59, %v11596_v2  ;;  %v16346_v53 = vld [vmem:[#allocation10 + $0x22c] sm:$0xf0]  ;;  %v16312_v54 = vld [vmem:[#allocation10 + $0x124] sm:$0xf]  ;;  %v11764_v59 = vld [vmem:[#allocation10 + $0x200] sm:$0xf] }
 0x16f   :  { %v1605_v21 = vmax.f32 %v1368_v47, 0.0  ;;  %2433 = vmatpush.bf16.msrb.mxu1 %v11637_v22  ;;  %v1335_v40 = vadd.f32 %v1334_v61, %v1316_v24  ;;  %v16358_v47 = vld [vmem:[#allocation10 + $0x28c] sm:$0xf0] }
 0x170   :  { %v11829_v13 = vor.u32 %v16358_v47, %v11828_v10  ;;  %v16354_v22 = vld [vmem:[#allocation10 + $0x26c] sm:$0xf0]  ;;  %v11638_v10 = vld [vmem:[#allocation10 + $0x110] sm:$0xf0]  ;;  %v11516_v47 = vld [vmem:[#allocation10 + $0x8] sm:$0xf] }
 0x171   :  { %2490 = vmatpush.bf16.msra.mxu0 %v11513_v23 }
 0x172   :  { %v1350_v7 = vpop.f32.mrf.mxu2 }
 0x173   :  { %v1351_v11 = vadd.f32 %v1350_v7, %v1332_v6  ;;  %v1369_v12 = vpop.f32.mrf.mxu3  ;;  %2502 = vmatpush.bf16.msra.mxu1 %v11753_v35  ;;  %v17953_v6 = vperm.slane %v17938_v28, 1  ;;  %v11796_v35 = vld [vmem:[#allocation10 + $0x240] sm:$0xf] }
 0x174   :  { %v1317_v15 = vpop.f32.mrf.mxu0 }
 0x175   :  { %v1370_v18 = vadd.f32 %v1369_v12, %v1351_v11  ;;  %v1336_v20 = vpop.f32.mrf.mxu1  ;;  %v1318_v41 = vadd.f32 %v1317_v15, %v17941_v38  ;;  %v11844_v38 = vld [vmem:[#allocation10 + $0x2a0] sm:$0xf]  ;;  %v16324_v11 = vld [vmem:[#allocation10 + $0x184] sm:$0xf] }
 0x176   :  { %v11845_v63 = vor.u32 %v16362_v58, %v11844_v38  ;;  %v11705_v15 = vor.u32 %v16324_v11, %v11702_v14  ;;  %v11654_v58 = vld [vmem:[#allocation10 + $0x130] sm:$0xf0] }
 0x177   :  { %v1609_v0 = vmax.f32 %v1370_v18, 0.0  ;;  %v1337_v55 = vadd.f32 %v1336_v20, %v1318_v41  ;;  %2503 = vmatpush.bf16.msra.mxu1 %v11737_v52  ;;  %v11580_v18 = vld [vmem:[#allocation10 + $0x88] sm:$0xf]  ;;  %v16295_v20 = vld [vmem:[#allocation10 + $0x94] sm:$0xf0] }
 0x178   :  { %2447 = vmatpush.bf16.msrb.mxu2 %v11845_v63  ;;  %v11581_v19 = vor.u32 %v16295_v20, %v11580_v18  ;;  %v11780_v52 = vld [vmem:[#allocation10 + $0x220] sm:$0xf]  ;;  %v16402_v20 = vld [vmem:[#allocation10 + $0x3ec] sm:$0xf0] }
 0x179   :  { %v17946_v25 = vpack.c.bf16 %v1609_v0, %v1605_v21  ;;  %v11812_v0 = vld [vmem:[#allocation10 + $0x260] sm:$0xf]  ;;  %v11781_v38 = vor.u32 %v16346_v53, %v11780_v52  ;;  %v16394_v53 = vld [vmem:[#allocation10 + $0x3ac] sm:$0xf0] }
 0x17a   :  { %v1353_v31 = vpop.f32.mrf.mxu2  ;;  %v11813_v24 = vor.u32 %v16354_v22, %v11812_v0  ;;  %v11878_v0 = vld [vmem:[#allocation10 + $0x2f0] sm:$0xf0]  ;;  %v11756_v22 = vld [vmem:[#allocation10 + $0x1e8] sm:$0xf]  ;;  %v11972_v52 = vld [vmem:[#allocation10 + $0x3a0] sm:$0xf] }
 0x17b   :  { %v1372_v34 = vpop.f32.mrf.mxu3  ;;  %2415 = vmatmul.bf16.vlgmr.msrb.gmra.mxu0 %v17946_v25  ;;  %v1354_v48 = vadd.f32 %v1353_v31, %v1335_v40  ;;  %2504 = vmatpush.bf16.msra.mxu1 %v11721_v4  ;;  %v11686_v31 = vld [vmem:[#allocation10 + $0x170] sm:$0xf0]  ;;  %v16316_v40 = vld [vmem:[#allocation10 + $0x144] sm:$0xf]  ;;  %v16342_v4 = vld [vmem:[#allocation10 + $0x20c] sm:$0xf0] }
 0x17c   :  { %v1386_v42 = vpop.f32.mrf.mxu0  ;;  %2559 = vmatpush.bf16.msrb.mxu0 %v11629_v39  ;;  %2448 = vmatpush.bf16.msrb.mxu2 %v11829_v13  ;;  %v11689_v33 = vor.u32 %v16320_v3, %v11686_v31  ;;  %v16350_v39 = vld [vmem:[#allocation10 + $0x24c] sm:$0xf0]  ;;  %v16339_v3 = vld [vmem:[#allocation10 + $0x1f4] sm:$0xf0]  ;;  %v16305_v31 = vld [vmem:[#allocation10 + $0xec] sm:$0xf] }
 0x17d   :  { %v17950_v44 = vpop.f32.mrf.mxu1  ;;  %v1373_v43 = vadd.f32 %v1372_v34, %v1354_v48  ;;  %v1387_v16 = vadd.f32 %v1386_v42, %v17953_v6  ;;  %v11565_v34 = vor.u32 %v16291_v27, %v11564_v26  ;;  %v11797_v42 = vor.u32 %v16350_v39, %v11796_v35  ;;  %v11630_v26 = vld [vmem:[#allocation10 + $0xf8] sm:$0xf0]  ;;  %v16398_v35 = vld [vmem:[#allocation10 + $0x3cc] sm:$0xf0] }
 0x17e   :  { %v11673_v48 = vor.u32 %v16316_v40, %v11670_v45 }
 0x17f   :  { %v1613_v12 = vmax.f32 %v1373_v43, 0.0  ;;  %2505 = vmatpush.bf16.msra.mxu1 %v11705_v15  ;;  %v1406_v29 = vadd.f32 %v17950_v44, %v1387_v16  ;;  %v11549_v44 = vor.u32 %v16287_v49, %v11548_v46  ;;  %v16283_v43 = vld [vmem:[#allocation10 + $0x34] sm:$0xf0]  ;;  %v12004_v15 = vld [vmem:[#allocation10 + $0x3e0] sm:$0xf] }
 0x180   :  { %2560 = vmatpush.bf16.msrb.mxu0 %v11613_v56  ;;  %2449 = vmatpush.bf16.msrb.mxu2 %v11813_v24  ;;  %v16368_v16 = vld [vmem:[#allocation10 + $0x2e4] sm:$0xf]  ;;  %v11757_v24 = vor.u32 %v16339_v3, %v11756_v22  ;;  %v11740_v46 = vld [vmem:[#allocation10 + $0x1c8] sm:$0xf] }
 0x182   :  { %v1355_v57 = vpop.f32.mrf.mxu2 }
 0x183   :  { %v1356_v61 = vadd.f32 %v1355_v57, %v1337_v55  ;;  %v1374_v62 = vpop.f32.mrf.mxu3  ;;  %2506 = vmatpush.bf16.msra.mxu1 %v11689_v33 }
 0x184   :  { %v1388_v8 = vpop.f32.mrf.mxu0  ;;  %2561 = vmatpush.bf16.msrb.mxu0 %v11597_v5  ;;  %2450 = vmatpush.bf16.msrb.mxu2 %v11797_v42  ;;  %v16308_v5 = vld [vmem:[#allocation10 + $0x104] sm:$0xf]  ;;  %v11862_v42 = vld [vmem:[#allocation10 + $0x2d0] sm:$0xf0] }
 0x185   :  { %v1375_v7 = vadd.f32 %v1374_v62, %v1356_v61  ;;  %v1407_v9 = vpop.f32.mrf.mxu1  ;;  %v1389_v30 = vadd.f32 %v1388_v8, %v17953_v6  ;;  %v11657_v61 = vor.u32 %v16312_v54, %v11654_v58  ;;  %v11533_v62 = vor.u32 %v16283_v43, %v11532_v60  ;;  %v16360_v54 = vld [vmem:[#allocation10 + $0x2a4] sm:$0xf]  ;;  %v11846_v58 = vld [vmem:[#allocation10 + $0x2b0] sm:$0xf0]  ;;  %v11724_v60 = vld [vmem:[#allocation10 + $0x1a8] sm:$0xf] }
 0x186   :  { %v11641_v11 = vor.u32 %v16308_v5, %v11638_v10  ;;  %v16331_v43 = vld [vmem:[#allocation10 + $0x1b4] sm:$0xf0]  ;;  %v16356_v10 = vld [vmem:[#allocation10 + $0x284] sm:$0xf] }
 0x187   :  { %v1617_v51 = vmax.f32 %v1375_v7, 0.0  ;;  %v1408_v50 = vadd.f32 %v1407_v9, %v1389_v30  ;;  %2507 = vmatpush.bf16.msra.mxu1 %v11673_v48  ;;  %v11765_v9 = vor.u32 %v16342_v4, %v11764_v59  ;;  %v16335_v48 = vld [vmem:[#allocation10 + $0x1d4] sm:$0xf0] }
 0x188   :  { %2562 = vmatpush.bf16.msrb.mxu0 %v11581_v19  ;;  %2451 = vmatpush.bf16.msrb.mxu2 %v11781_v38  ;;  %v11973_v38 = vor.u32 %v16394_v53, %v11972_v52  ;;  %v11676_v52 = vld [vmem:[#allocation10 + $0x148] sm:$0xf] }
 0x189   :  { %v17956_v17 = vpack.c.bf16 %v1617_v51, %v1613_v12  ;;  %v16279_v12 = vld [vmem:[#allocation10 + $0x14] sm:$0xf0] }
 0x18a   :  { %v1424_v21 = vpop.f32.mrf.mxu2  ;;  %v11517_v14 = vor.u32 %v16279_v12, %v11516_v47 }
 0x18b   :  { %v1443_v23 = vpop.f32.mrf.mxu3  ;;  %2420 = vmatmul.bf16.gmra.mxu0 %v17956_v17  ;;  %v1425_v41 = vadd.f32 %v1424_v21, %v1406_v29  ;;  %2508 = vmatpush.bf16.msra.mxu1 %v11657_v61  ;;  %v12005_v21 = vor.u32 %v16402_v20, %v12004_v15  ;;  %v11633_v29 = vor.u32 %v16305_v31, %v11630_v26  ;;  %v16327_v15 = vld [vmem:[#allocation10 + $0x194] sm:$0xf0]  ;;  %v16293_v20 = vld [vmem:[#allocation10 + $0x8c] sm:$0xf]  ;;  %v16352_v31 = vld [vmem:[#allocation10 + $0x264] sm:$0xf] }
 0x18c   :  { %v1391_v32 = vpop.f32.mrf.mxu0  ;;  %2563 = vmatpush.bf16.msrb.mxu0 %v11565_v34  ;;  %2452 = vmatpush.bf16.msrb.mxu2 %v11765_v9  ;;  %v11849_v61 = vor.u32 %v16360_v54, %v11846_v58  ;;  %v16390_v9 = vld [vmem:[#allocation10 + $0x38c] sm:$0xf0]  ;;  %v16319_v54 = vld [vmem:[#allocation10 + $0x154] sm:$0xf0] }
 0x18d   :  { %v17961_v37 = vpop.f32.mrf.mxu1  ;;  %v1444_v55 = vadd.f32 %v1443_v23, %v1425_v41  ;;  %v1392_v51 = vadd.f32 %v1391_v32, %v17953_v6  ;;  %v11881_v23 = vor.u32 %v16368_v16, %v11878_v0  ;;  %2464 = vmatpush.bf16.msrb.mxu3 %v12005_v21  ;;  %v11988_v32 = vld [vmem:[#allocation10 + $0x3c0] sm:$0xf]  ;;  %v16364_v41 = vld [vmem:[#allocation10 + $0x2c4] sm:$0xf]  ;;  %v11582_v16 = vld [vmem:[#allocation10 + $0x98] sm:$0xf0] }
 0x18e   :  { %v11989_v40 = vor.u32 %v16398_v35, %v11988_v32  ;;  %v11865_v45 = vor.u32 %v16364_v41, %v11862_v42  ;;  %v11585_v22 = vor.u32 %v16293_v20, %v11582_v16  ;;  %v16323_v32 = vld [vmem:[#allocation10 + $0x174] sm:$0xf0] }
 0x18f   :  { %v1606_v7 = vmax.f32 %v1444_v55, 0.0  ;;  %2509 = vmatpush.bf16.msra.mxu1 %v11641_v11  ;;  %v1411_v27 = vadd.f32 %v17961_v37, %v1392_v51  ;;  %v16301_v37 = vld [vmem:[#allocation10 + $0xcc] sm:$0xf]  ;;  %v11830_v51 = vld [vmem:[#allocation10 + $0x290] sm:$0xf0] }
 0x190   :  { %2564 = vmatpush.bf16.msrb.mxu0 %v11549_v44  ;;  %2521 = vmatpush.bf16.msra.mxu2 %v11881_v23  ;;  %v11940_v23 = vld [vmem:[#allocation10 + $0x360] sm:$0xf] }
 0x191   :  { %2465 = vmatpush.bf16.msrb.mxu3 %v11989_v40  ;;  %v11566_v40 = vld [vmem:[#allocation10 + $0x78] sm:$0xf0] }
 0x192   :  { %v1426_v36 = vpop.f32.mrf.mxu2 }
 0x193   :  { %v1427_v56 = vadd.f32 %v1426_v36, %v1408_v50  ;;  %v1445_v57 = vpop.f32.mrf.mxu3  ;;  %v11614_v50 = vld [vmem:[#allocation10 + $0xd8] sm:$0xf0] }
 0x194   :  { %v1393_v1 = vpop.f32.mrf.mxu0  ;;  %2565 = vmatpush.bf16.msrb.mxu0 %v11533_v62  ;;  %2522 = vmatpush.bf16.msra.mxu2 %v11865_v45  ;;  %v11617_v36 = vor.u32 %v16301_v37, %v11614_v50  ;;  %v11725_v62 = vor.u32 %v16331_v43, %v11724_v60  ;;  %v11924_v37 = vld [vmem:[#allocation10 + $0x340] sm:$0xf]  ;;  %v16378_v43 = vld [vmem:[#allocation10 + $0x32c] sm:$0xf0] }
 0x195   :  { %v1446_v63 = vadd.f32 %v1445_v57, %v1427_v56  ;;  %v1412_v2 = vpop.f32.mrf.mxu1  ;;  %v1394_v33 = vadd.f32 %v1393_v1, %v17953_v6  ;;  %v11741_v6 = vor.u32 %v16335_v48, %v11740_v46  ;;  %v11598_v1 = vld [vmem:[#allocation10 + $0xb8] sm:$0xf0]  ;;  %2466 = vmatpush.bf16.msrb.mxu3 %v11973_v38  ;;  %v11908_v60 = vld [vmem:[#allocation10 + $0x320] sm:$0xf] }
 0x197   :  { %v1610_v8 = vmax.f32 %v1446_v63, 0.0  ;;  %v1413_v49 = vadd.f32 %v1412_v2, %v1394_v33  ;;  %v16297_v63 = vld [vmem:[#allocation10 + $0xac] sm:$0xf]  ;;  %v17973_v2 = vperm.slane %v17938_v28, 2  ;;  %v11814_v33 = vld [vmem:[#allocation10 + $0x270] sm:$0xf0] }
 0x198   :  { %2566 = vmatpush.bf16.msrb.mxu0 %v11517_v14  ;;  %v11601_v5 = vor.u32 %v16297_v63, %v11598_v1  ;;  %2523 = vmatpush.bf16.msra.mxu2 %v11849_v61  ;;  %v11708_v14 = vld [vmem:[#allocation10 + $0x188] sm:$0xf]  ;;  %v16344_v61 = vld [vmem:[#allocation10 + $0x224] sm:$0xf] }
 0x199   :  { %v17964_v13 = vpack.c.bf16 %v1610_v8, %v1606_v7  ;;  %v11956_v8 = vld [vmem:[#allocation10 + $0x380] sm:$0xf]  ;;  %v11709_v0 = vor.u32 %v16327_v15, %v11708_v14  ;;  %v16340_v15 = vld [vmem:[#allocation10 + $0x204] sm:$0xf] }
 0x19a   :  { %v1429_v18 = vpop.f32.mrf.mxu2  ;;  %v11957_v12 = vor.u32 %v16390_v9, %v11956_v8  ;;  %v16315_v8 = vld [vmem:[#allocation10 + $0x134] sm:$0xf0]  ;;  %v11892_v14 = vld [vmem:[#allocation10 + $0x300] sm:$0xf] }
 0x19b   :  { %v1448_v19 = vpop.f32.mrf.mxu3  ;;  %2434 = vmatmul.bf16.vlgmr.msrb.gmra.mxu1 %v17964_v13  ;;  %2491 = vmatmul.bf16.vlgmr.msra.gmra.mxu0 %v17946_v25  ;;  %v1430_v39 = vadd.f32 %v1429_v18, %v1411_v27  ;;  %v11833_v18 = vor.u32 %v16356_v10, %v11830_v51 }
 0x19c   :  { %v1462_v34 = vpop.f32.mrf.mxu0  ;;  %2578 = vmatpush.bf16.msrb.mxu1 %v11757_v24  ;;  %2635 = vmatpush.bf16.msra.mxu0 %v11633_v29  ;;  %v16386_v24 = vld [vmem:[#allocation10 + $0x36c] sm:$0xf0]  ;;  %v11692_v29 = vld [vmem:[#allocation10 + $0x168] sm:$0xf] }
 0x19d   :  { %v17970_v30 = vpop.f32.mrf.mxu1  ;;  %v1449_v55 = vadd.f32 %v1448_v19, %v1430_v39  ;;  %v1463_v19 = vadd.f32 %v1462_v34, %v17973_v2  ;;  %2467 = vmatpush.bf16.msrb.mxu3 %v11957_v12  ;;  %2524 = vmatpush.bf16.msra.mxu2 %v11833_v18  ;;  %v11941_v27 = vor.u32 %v16386_v24, %v11940_v23  ;;  %v16289_v39 = vld [vmem:[#allocation10 + $0x6c] sm:$0xf]  ;;  %v16374_v18 = vld [vmem:[#allocation10 + $0x30c] sm:$0xf0]  ;;  %v16311_v24 = vld [vmem:[#allocation10 + $0x114] sm:$0xf0] }
 0x19e   :  { %v11817_v34 = vor.u32 %v16352_v31, %v11814_v33  ;;  %v11693_v35 = vor.u32 %v16323_v32, %v11692_v29  ;;  %v11569_v46 = vor.u32 %v16289_v39, %v11566_v40  ;;  %v16277_v31 = vld [vmem:[#allocation10 + $0xc] sm:$0xf]  ;;  %v12006_v39 = vld [vmem:[#allocation10 + $0x3f0] sm:$0xf0]  ;;  %v11884_v40 = vld [vmem:[#allocation10 + $0x2e8] sm:$0xf] }
 0x19f   :  { %v1614_v47 = vmax.f32 %v1449_v55, 0.0  ;;  %v1482_v41 = vadd.f32 %v17970_v30, %v1463_v19  ;;  %v16285_v30 = vld [vmem:[#allocation10 + $0x4c] sm:$0xf]  ;;  %v11550_v55 = vld [vmem:[#allocation10 + $0x58] sm:$0xf0]  ;;  %v11893_v19 = vor.u32 %v16374_v18, %v11892_v14 }
 0x1a0   :  { %2579 = vmatpush.bf16.msrb.mxu1 %v11741_v6  ;;  %2636 = vmatpush.bf16.msra.mxu0 %v11617_v36  ;;  %v16348_v6 = vld [vmem:[#allocation10 + $0x244] sm:$0xf]  ;;  %v11798_v36 = vld [vmem:[#allocation10 + $0x250] sm:$0xf0]  ;;  %v11553_v38 = vor.u32 %v16285_v30, %v11550_v55 }
 0x1a1   :  { %2468 = vmatpush.bf16.msrb.mxu3 %v11941_v27  ;;  %2525 = vmatpush.bf16.msra.mxu2 %v11817_v34  ;;  %v11801_v53 = vor.u32 %v16348_v6, %v11798_v36  ;;  %v16388_v14 = vld [vmem:[#allocation10 + $0x384] sm:$0xf]  ;;  %v11958_v18 = vld [vmem:[#allocation10 + $0x390] sm:$0xf0] }
 0x1a2   :  { %v1431_v44 = vpop.f32.mrf.mxu2 }
 0x1a3   :  { %v1432_v56 = vadd.f32 %v1431_v44, %v1413_v49  ;;  %v1450_v57 = vpop.f32.mrf.mxu3  ;;  %v16382_v49 = vld [vmem:[#allocation10 + $0x34c] sm:$0xf0] }
 0x1a4   :  { %v1464_v4 = vpop.f32.mrf.mxu0  ;;  %2580 = vmatpush.bf16.msrb.mxu1 %v11725_v62  ;;  %2637 = vmatpush.bf16.msra.mxu0 %v11601_v5  ;;  %v11925_v44 = vor.u32 %v16382_v49, %v11924_v37  ;;  %v11660_v5 = vld [vmem:[#allocation10 + $0x128] sm:$0xf]  ;;  %v16337_v37 = vld [vmem:[#allocation10 + $0x1ec] sm:$0xf]  ;;  %v11758_v49 = vld [vmem:[#allocation10 + $0x1f8] sm:$0xf0] }
 0x1a5   :  { %v1451_v59 = vadd.f32 %v1450_v57, %v1432_v56  ;;  %v1483_v7 = vpop.f32.mrf.mxu1  ;;  %v1465_v42 = vadd.f32 %v1464_v4, %v17973_v2  ;;  %v11677_v57 = vor.u32 %v16319_v54, %v11676_v52  ;;  %2526 = vmatpush.bf16.msra.mxu2 %v11801_v53  ;;  %v11782_v4 = vld [vmem:[#allocation10 + $0x230] sm:$0xf0]  ;;  %v11661_v10 = vor.u32 %v16315_v8, %v11660_v5  ;;  %v16396_v52 = vld [vmem:[#allocation10 + $0x3c4] sm:$0xf]  ;;  %v11868_v54 = vld [vmem:[#allocation10 + $0x2c8] sm:$0xf] }
 0x1a6   :  { %2469 = vmatpush.bf16.msrb.mxu3 %v11925_v44  ;;  %v11785_v9 = vor.u32 %v16344_v61, %v11782_v4  ;;  %v11761_v6 = vor.u32 %v16337_v37, %v11758_v49  ;;  %v11990_v53 = vld [vmem:[#allocation10 + $0x3d0] sm:$0xf0]  ;;  %v16363_v8 = vld [vmem:[#allocation10 + $0x2b4] sm:$0xf0]  ;;  %v16380_v49 = vld [vmem:[#allocation10 + $0x344] sm:$0xf] }
 0x1a7   :  { %v1618_v11 = vmax.f32 %v1451_v59, 0.0  ;;  %v1484_v56 = vadd.f32 %v1483_v7, %v1465_v42  ;;  %v11909_v59 = vor.u32 %v16378_v43, %v11908_v60  ;;  %v16281_v7 = vld [vmem:[#allocation10 + $0x2c] sm:$0xf]  ;;  %v11993_v55 = vor.u32 %v16396_v52, %v11990_v53  ;;  %v16351_v52 = vld [vmem:[#allocation10 + $0x254] sm:$0xf0] }
 0x1a8   :  { %2581 = vmatpush.bf16.msrb.mxu1 %v11709_v0  ;;  %2638 = vmatpush.bf16.msra.mxu0 %v11585_v22  ;;  %v11766_v0 = vld [vmem:[#allocation10 + $0x210] sm:$0xf0]  ;;  %v11644_v22 = vld [vmem:[#allocation10 + $0x108] sm:$0xf]  ;;  %v16317_v53 = vld [vmem:[#allocation10 + $0x14c] sm:$0xf] }
 0x1a9   :  { %v17976_v21 = vpack.c.bf16 %v1618_v11, %v1614_v47  ;;  %v11534_v47 = vld [vmem:[#allocation10 + $0x38] sm:$0xf0]  ;;  %2527 = vmatpush.bf16.msra.mxu2 %v11785_v9  ;;  %v11769_v23 = vor.u32 %v16340_v15, %v11766_v0  ;;  %v11645_v29 = vor.u32 %v16311_v24, %v11644_v22  ;;  %v16329_v9 = vld [vmem:[#allocation10 + $0x1ac] sm:$0xf]  ;;  %v11836_v15 = vld [vmem:[#allocation10 + $0x288] sm:$0xf] }
 0x1aa   :  { %v1500_v3 = vpop.f32.mrf.mxu2  ;;  %2470 = vmatpush.bf16.msrb.mxu3 %v11909_v59  ;;  %v11537_v51 = vor.u32 %v16281_v7, %v11534_v47  ;;  %v16359_v0 = vld [vmem:[#allocation10 + $0x294] sm:$0xf0]  ;;  %v16325_v22 = vld [vmem:[#allocation10 + $0x18c] sm:$0xf] }
 0x1ab   :  { %v1519_v26 = vpop.f32.mrf.mxu3  ;;  %2439 = vmatmul.bf16.gmra.mxu1 %v17976_v21  ;;  %2496 = vmatmul.bf16.gmra.mxu0 %v17956_v17  ;;  %v1501_v50 = vadd.f32 %v1500_v3, %v1482_v41 }
 0x1ac   :  { %v1467_v45 = vpop.f32.mrf.mxu0  ;;  %2582 = vmatpush.bf16.msrb.mxu1 %v11693_v35  ;;  %2639 = vmatpush.bf16.msra.mxu0 %v11569_v46  ;;  %v16400_v35 = vld [vmem:[#allocation10 + $0x3e4] sm:$0xf]  ;;  %v16371_v46 = vld [vmem:[#allocation10 + $0x2f4] sm:$0xf0] }
 0x1ad   :  { %v17982_v48 = vpop.f32.mrf.mxu1  ;;  %v1520_v62 = vadd.f32 %v1519_v26, %v1501_v50  ;;  %v11518_v26 = vld [vmem:[#allocation10 + $0x18] sm:$0xf0]  ;;  %v1468_v27 = vadd.f32 %v1467_v45, %v17973_v2  ;;  %2528 = vmatpush.bf16.msra.mxu2 %v11769_v23  ;;  %v12009_v42 = vor.u32 %v16400_v35, %v12006_v39  ;;  %v11885_v45 = vor.u32 %v16371_v46, %v11884_v40  ;;  %v16355_v39 = vld [vmem:[#allocation10 + $0x274] sm:$0xf0]  ;;  %v16321_v40 = vld [vmem:[#allocation10 + $0x16c] sm:$0xf] }
 0x1ae   :  { %2471 = vmatpush.bf16.msrb.mxu3 %v11893_v19  ;;  %v11521_v32 = vor.u32 %v16277_v31, %v11518_v26  ;;  %v11961_v19 = vor.u32 %v16388_v14, %v11958_v18  ;;  %v11710_v23 = vld [vmem:[#allocation10 + $0x198] sm:$0xf0] }
 0x1af   :  { %v1607_v20 = vmax.f32 %v1520_v62, 0.0  ;;  %v1487_v50 = vadd.f32 %v17982_v48, %v1468_v27  ;;  %v11974_v62 = vld [vmem:[#allocation10 + $0x3b0] sm:$0xf0]  ;;  %v16384_v27 = vld [vmem:[#allocation10 + $0x364] sm:$0xf] }
 0x1b0   :  { %2583 = vmatpush.bf16.msrb.mxu1 %v11677_v57  ;;  %2640 = vmatpush.bf16.msra.mxu0 %v11553_v38  ;;  %v16333_v57 = vld [vmem:[#allocation10 + $0x1cc] sm:$0xf] }
 0x1b2   :  { %v1502_v58 = vpop.f32.mrf.mxu2  ;;  %2540 = vmatpush.bf16.msra.mxu3 %v12009_v42 }
 0x1b3   :  { %v1503_v63 = vadd.f32 %v1502_v58, %v1484_v56  ;;  %v1521_v1 = vpop.f32.mrf.mxu3  ;;  %v16367_v56 = vld [vmem:[#allocation10 + $0x2d4] sm:$0xf0]  ;;  %v11742_v58 = vld [vmem:[#allocation10 + $0x1d8] sm:$0xf0] }
 0x1b4   :  { %v1469_v12 = vpop.f32.mrf.mxu0  ;;  %2584 = vmatpush.bf16.msrb.mxu1 %v11661_v10  ;;  %2641 = vmatpush.bf16.msra.mxu0 %v11537_v51  ;;  %v11869_v38 = vor.u32 %v16367_v56, %v11868_v54  ;;  %v11745_v43 = vor.u32 %v16333_v57, %v11742_v58  ;;  %v11726_v10 = vld [vmem:[#allocation10 + $0x1b8] sm:$0xf0]  ;;  %v11910_v56 = vld [vmem:[#allocation10 + $0x330] sm:$0xf0]  ;;  %v16347_v58 = vld [vmem:[#allocation10 + $0x234] sm:$0xf0] }
 0x1b5   :  { %v1522_v11 = vadd.f32 %v1521_v1, %v1503_v63  ;;  %v1488_v3 = vpop.f32.mrf.mxu1  ;;  %v1470_v44 = vadd.f32 %v1469_v12, %v17973_v2  ;;  %v16392_v2 = vld [vmem:[#allocation10 + $0x3a4] sm:$0xf]  ;;  %v11852_v63 = vld [vmem:[#allocation10 + $0x2a8] sm:$0xf]  ;;  %v11729_v47 = vor.u32 %v16329_v9, %v11726_v10  ;;  %v11678_v54 = vld [vmem:[#allocation10 + $0x158] sm:$0xf0] }
 0x1b6   :  { %2541 = vmatpush.bf16.msra.mxu3 %v11993_v55  ;;  %v11977_v5 = vor.u32 %v16392_v2, %v11974_v62  ;;  %v11853_v7 = vor.u32 %v16363_v8, %v11852_v63  ;;  %v16376_v55 = vld [vmem:[#allocation10 + $0x324] sm:$0xf]  ;;  %v16313_v2 = vld [vmem:[#allocation10 + $0x12c] sm:$0xf]  ;;  %v11662_v62 = vld [vmem:[#allocation10 + $0x138] sm:$0xf0] }
 0x1b7   :  { %v1611_v16 = vmax.f32 %v1522_v11, 0.0  ;;  %v1489_v60 = vadd.f32 %v1488_v3, %v1470_v44  ;;  %v17993_v11 = vperm.slane %v17938_v28, 3  ;;  %v11837_v3 = vor.u32 %v16359_v0, %v11836_v15  ;;  %v16343_v15 = vld [vmem:[#allocation10 + $0x214] sm:$0xf0] }
 0x1b8   :  { %2585 = vmatpush.bf16.msrb.mxu1 %v11645_v29  ;;  %2642 = vmatpush.bf16.msra.mxu0 %v11521_v32  ;;  %v11713_v28 = vor.u32 %v16325_v22, %v11710_v23  ;;  %v11942_v29 = vld [vmem:[#allocation10 + $0x370] sm:$0xf0]  ;;  %v11820_v32 = vld [vmem:[#allocation10 + $0x268] sm:$0xf]  ;;  %v11665_v8 = vor.u32 %v16313_v2, %v11662_v62  ;;  %v11838_v62 = vld [vmem:[#allocation10 + $0x298] sm:$0xf0] }
 0x1b9   :  { %v17985_v33 = vpack.c.bf16 %v1611_v16, %v1607_v20  ;;  %v11945_v35 = vor.u32 %v16384_v27, %v11942_v29  ;;  %v11821_v46 = vor.u32 %v16355_v39, %v11820_v32  ;;  %v16369_v27 = vld [vmem:[#allocation10 + $0x2ec] sm:$0xf] }
 0x1ba   :  { %v1505_v34 = vpop.f32.mrf.mxu2  ;;  %2542 = vmatpush.bf16.msra.mxu3 %v11977_v5 }
 0x1bb   :  { %v1524_v41 = vpop.f32.mrf.mxu3  ;;  %2453 = vmatmul.bf16.vlgmr.msrb.gmra.mxu2 %v17985_v33  ;;  %2510 = vmatmul.bf16.vlgmr.msra.gmra.mxu1 %v17964_v13  ;;  %v1506_v30 = vadd.f32 %v1505_v34, %v1487_v50 }
 0x1bc   :  { %2567 = vmatmul.bf16.vlgmr.msrb.gmra.mxu0 %v17946_v25  ;;  %v1538_v36 = vpop.f32.mrf.mxu0  ;;  %2597 = vmatpush.bf16.msrb.mxu2 %v11885_v45  ;;  %v11926_v45 = vld [vmem:[#allocation10 + $0x350] sm:$0xf0] }
 0x1bd   :  { %2654 = vmatpush.bf16.msra.mxu1 %v11761_v6  ;;  %v1557_v48 = vpop.f32.mrf.mxu1  ;;  %v1525_v1 = vadd.f32 %v1524_v41, %v1506_v30  ;;  %v1539_v24 = vadd.f32 %v1538_v36, %v17993_v11  ;;  %v11694_v41 = vld [vmem:[#allocation10 + $0x178] sm:$0xf0]  ;;  %v11804_v6 = vld [vmem:[#allocation10 + $0x248] sm:$0xf]  ;;  %v11929_v36 = vor.u32 %v16380_v49, %v11926_v45 }
 0x1be   :  { %2543 = vmatpush.bf16.msra.mxu3 %v11961_v19  ;;  %v11697_v37 = vor.u32 %v16321_v40, %v11694_v41  ;;  %v11805_v30 = vor.u32 %v16351_v52, %v11804_v6  ;;  %v11646_v19 = vld [vmem:[#allocation10 + $0x118] sm:$0xf0]  ;;  %v11996_v41 = vld [vmem:[#allocation10 + $0x3c8] sm:$0xf]  ;;  %v16395_v52 = vld [vmem:[#allocation10 + $0x3b4] sm:$0xf0] }
 0x1bf   :  { %v1615_v20 = vmax.f32 %v1525_v1, 0.0  ;;  %v1558_v50 = vadd.f32 %v1557_v48, %v1539_v24  ;;  %v11913_v48 = vor.u32 %v16376_v55, %v11910_v56  ;;  %v11870_v45 = vld [vmem:[#allocation10 + $0x2d8] sm:$0xf0] }
 0x1c0   :  { %2598 = vmatpush.bf16.msrb.mxu2 %v11869_v38  ;;  %v11788_v38 = vld [vmem:[#allocation10 + $0x228] sm:$0xf] }
 0x1c1   :  { %2655 = vmatpush.bf16.msra.mxu1 %v11745_v43  ;;  %v11681_v43 = vor.u32 %v16317_v53, %v11678_v54  ;;  %v11789_v1 = vor.u32 %v16347_v58, %v11788_v38  ;;  %v11964_v58 = vld [vmem:[#allocation10 + $0x388] sm:$0xf] }
 0x1c2   :  { %v1507_v61 = vpop.f32.mrf.mxu2  ;;  %2544 = vmatpush.bf16.msra.mxu3 %v11945_v35 }
 0x1c3   :  { %v1508_v59 = vadd.f32 %v1507_v61, %v1489_v60  ;;  %v1526_v4 = vpop.f32.mrf.mxu3 }
 0x1c4   :  { %v1540_v51 = vpop.f32.mrf.mxu0  ;;  %2599 = vmatpush.bf16.msrb.mxu2 %v11853_v7  ;;  %v16372_v7 = vld [vmem:[#allocation10 + $0x304] sm:$0xf] }
 0x1c5   :  { %v1527_v12 = vadd.f32 %v1526_v4, %v1508_v59  ;;  %2656 = vmatpush.bf16.msra.mxu1 %v11729_v47  ;;  %v1559_v42 = vpop.f32.mrf.mxu1  ;;  %v1541_v44 = vadd.f32 %v1540_v51, %v17993_v11  ;;  %v11894_v47 = vld [vmem:[#allocation10 + $0x310] sm:$0xf0] }
 0x1c6   :  { %2545 = vmatpush.bf16.msra.mxu3 %v11929_v36  ;;  %v11897_v18 = vor.u32 %v16372_v7, %v11894_v47  ;;  %v11980_v36 = vld [vmem:[#allocation10 + $0x3a8] sm:$0xf]  ;;  %v16383_v47 = vld [vmem:[#allocation10 + $0x354] sm:$0xf0] }
 0x1c7   :  { %v1619_v16 = vmax.f32 %v1527_v12, 0.0  ;;  %v1560_v61 = vadd.f32 %v1559_v42, %v1541_v44  ;;  %v11772_v12 = vld [vmem:[#allocation10 + $0x208] sm:$0xf]  ;;  %v16399_v42 = vld [vmem:[#allocation10 + $0x3d4] sm:$0xf0]  ;;  %v11981_v54 = vor.u32 %v16395_v52, %v11980_v36 }
 0x1c8   :  { %2600 = vmatpush.bf16.msrb.mxu2 %v11837_v3  ;;  %v11997_v49 = vor.u32 %v16399_v42, %v11996_v41  ;;  %v11932_v7 = vld [vmem:[#allocation10 + $0x348] sm:$0xf]  ;;  %v16393_v41 = vld [vmem:[#allocation10 + $0x3ac] sm:$0xf]  ;;  %v11982_v42 = vld [vmem:[#allocation10 + $0x3b8] sm:$0xf0] }
 0x1c9   :  { %v17996_v31 = vpack.c.bf16 %v1619_v16, %v1615_v20  ;;  %2657 = vmatpush.bf16.msra.mxu1 %v11713_v28  ;;  %v16309_v20 = vld [vmem:[#allocation10 + $0x10c] sm:$0xf]  ;;  %v11773_v16 = vor.u32 %v16343_v15, %v11772_v12  ;;  %v12012_v28 = vld [vmem:[#allocation10 + $0x3e8] sm:$0xf]  ;;  %v11934_v36 = vld [vmem:[#allocation10 + $0x358] sm:$0xf0] }
 0x1ca   :  { %v1576_v26 = vpop.f32.mrf.mxu2  ;;  %2546 = vmatpush.bf16.msra.mxu3 %v11913_v48  ;;  %v11649_v3 = vor.u32 %v16309_v20, %v11646_v19  ;;  %v16349_v12 = vld [vmem:[#allocation10 + $0x24c] sm:$0xf]  ;;  %v11916_v15 = vld [vmem:[#allocation10 + $0x328] sm:$0xf]  ;;  %v16379_v20 = vld [vmem:[#allocation10 + $0x334] sm:$0xf0] }
 0x1cb   :  { %v1595_v34 = vpop.f32.mrf.mxu3  ;;  %2458 = vmatmul.bf16.gmra.mxu2 %v17996_v31  ;;  %2515 = vmatmul.bf16.gmra.mxu1 %v17976_v21  ;;  %v1577_v57 = vadd.f32 %v1576_v26, %v1558_v50  ;;  %v16403_v26 = vld [vmem:[#allocation10 + $0x3f4] sm:$0xf0]  ;;  %v11917_v19 = vor.u32 %v16379_v20, %v11916_v15 }
 0x1cc   :  { %2572 = vmatmul.bf16.gmra.mxu0 %v17956_v17  ;;  %2601 = vmatpush.bf16.msrb.mxu2 %v11821_v46  ;;  %v1543_v60 = vpop.f32.mrf.mxu0  ;;  %v12013_v32 = vor.u32 %v16403_v26, %v12012_v28  ;;  %v16365_v46 = vld [vmem:[#allocation10 + $0x2cc] sm:$0xf]  ;;  %v11774_v26 = vld [vmem:[#allocation10 + $0x218] sm:$0xf0] }
 0x1cd   :  { %2658 = vmatpush.bf16.msra.mxu1 %v11697_v37  ;;  %v1596_v59 = vadd.f32 %v1595_v34, %v1577_v57  ;;  %v1562_v10 = vpop.f32.mrf.mxu1  ;;  %v1544_v0 = vadd.f32 %v1543_v60, %v17993_v11  ;;  %v11886_v34 = vld [vmem:[#allocation10 + $0x2f8] sm:$0xf0]  ;;  %v11873_v50 = vor.u32 %v16365_v46, %v11870_v45  ;;  %v16391_v60 = vld [vmem:[#allocation10 + $0x394] sm:$0xf0]  ;;  %v11985_v46 = vor.u32 %v16393_v41, %v11982_v42  ;;  %v12308_v41 = vld [vmem:[#allocation13 + $0x240] sm:$0xf] }
 0x1ce   :  { %2547 = vmatpush.bf16.msra.mxu3 %v11897_v18  ;;  %v11889_v35 = vor.u32 %v16369_v27, %v11886_v34  ;;  %v11965_v2 = vor.u32 %v16391_v60, %v11964_v58  ;;  %v16528_v58 = vld [vmem:[#allocation13 + $0x3dc] sm:$0xf0] }
 0x1cf   :  { %v1608_v51 = vmax.f32 %v1596_v59, 0.0  ;;  %v1563_v39 = vadd.f32 %v1562_v10, %v1544_v0  ;;  %v11948_v59 = vld [vmem:[#allocation10 + $0x368] sm:$0xf]  ;;  %v11790_v0 = vld [vmem:[#allocation10 + $0x238] sm:$0xf0] }
 0x1d0   :  { %2602 = vmatpush.bf16.msrb.mxu2 %v11805_v30 }
 0x1d1   :  { %2659 = vmatpush.bf16.msra.mxu1 %v11681_v43  ;;  %v16357_v43 = vld [vmem:[#allocation10 + $0x28c] sm:$0xf] }
 0x1d2   :  { %v1578_v63 = vpop.f32.mrf.mxu2 }
 0x1d3   :  { %v1579_v4 = vadd.f32 %v1578_v63, %v1560_v61  ;;  %v1597_v5 = vpop.f32.mrf.mxu3  ;;  %v11841_v63 = vor.u32 %v16357_v43, %v11838_v62 }
 0x1d4   :  { %2603 = vmatpush.bf16.msrb.mxu2 %v11789_v1  ;;  %v1545_v23 = vpop.f32.mrf.mxu0 }
 0x1d5   :  { %v1598_v9 = vadd.f32 %v1597_v5, %v1579_v4  ;;  %2660 = vmatpush.bf16.msra.mxu1 %v11665_v8  ;;  %v1546_v40 = vadd.f32 %v1545_v23, %v17993_v11  ;;  %v1564_v6 = vpop.f32.mrf.mxu1  ;;  %v11854_v11 = vld [vmem:[#allocation10 + $0x2b8] sm:$0xf0]  ;;  %v16387_v4 = vld [vmem:[#allocation10 + $0x374] sm:$0xf0]  ;;  %v16353_v5 = vld [vmem:[#allocation10 + $0x26c] sm:$0xf] }
 0x1d6   :  { %v11949_v8 = vor.u32 %v16387_v4, %v11948_v59  ;;  %v16375_v23 = vld [vmem:[#allocation10 + $0x314] sm:$0xf0]  ;;  %v12180_v59 = vld [vmem:[#allocation13 + $0x140] sm:$0xf] }
 0x1d7   :  { %v1612_v14 = vmax.f32 %v1598_v9, 0.0  ;;  %v1565_v44 = vadd.f32 %v1564_v6, %v1546_v40  ;;  %v11822_v9 = vld [vmem:[#allocation10 + $0x278] sm:$0xf0]  ;;  %v16385_v6 = vld [vmem:[#allocation10 + $0x36c] sm:$0xf] }
 0x1d8   :  { %2604 = vmatpush.bf16.msrb.mxu2 %v11773_v16  ;;  %v11825_v10 = vor.u32 %v16353_v5, %v11822_v9  ;;  %v16345_v16 = vld [vmem:[#allocation10 + $0x22c] sm:$0xf]  ;;  %v16448_v4 = vld [vmem:[#allocation13 + $0x15c] sm:$0xf0] }
 0x1d9   :  { %v18003_v22 = vpack.c.bf16 %v1612_v14, %v1608_v51  ;;  %2661 = vmatpush.bf16.msra.mxu1 %v11649_v3  ;;  %v11933_v51 = vor.u32 %v16383_v47, %v11932_v7  ;;  %v11806_v14 = vld [vmem:[#allocation10 + $0x258] sm:$0xf0]  ;;  %v11793_v3 = vor.u32 %v16345_v16, %v11790_v0  ;;  %v12436_v5 = vld [vmem:[#allocation13 + $0x340] sm:$0xf]  ;;  %v12181_v9 = vor.u32 %v16448_v4, %v12180_v59 }
 0x1da   :  { %v1581_v24 = vpop.f32.mrf.mxu2  ;;  %v11809_v18 = vor.u32 %v16349_v12, %v11806_v14  ;;  %v12148_v47 = vld [vmem:[#allocation13 + $0x100] sm:$0xf] }
 0x1db   :  { %v1600_v29 = vpop.f32.mrf.mxu3  ;;  %2472 = vmatmul.bf16.vlgmr.msrb.gmra.mxu3 %v18003_v22  ;;  %2529 = vmatmul.bf16.vlgmr.msra.gmra.mxu2 %v17985_v33  ;;  %v1582_v37 = vadd.f32 %v1581_v24, %v1563_v39  ;;  %v16341_v24 = vld [vmem:[#allocation10 + $0x20c] sm:$0xf]  ;;  %v11998_v39 = vld [vmem:[#allocation10 + $0x3d8] sm:$0xf0]  ;;  %v16440_v12 = vld [vmem:[#allocation13 + $0x11c] sm:$0xf0] }
 0x1dc   :  { %2586 = vmatmul.bf16.vlgmr.msrb.gmra.mxu1 %v17964_v13  ;;  %2643 = vmatmul.bf16.vlgmr.msra.gmra.mxu0 %v17946_v25  ;;  %v16361_v25 = vld [vmem:[#allocation10 + $0x2ac] sm:$0xf]  ;;  %v11777_v27 = vor.u32 %v16341_v24, %v11774_v26  ;;  %v12116_v16 = vld [vmem:[#allocation13 + $0xc0] sm:$0xf] }
 0x1dd   :  { %2616 = vmatpush.bf16.msrb.mxu3 %v12013_v32  ;;  %2673 = vmatpush.bf16.msra.mxu2 %v11889_v35  ;;  %v1601_v30 = vadd.f32 %v1600_v29, %v1582_v37  ;;  %v11857_v56 = vor.u32 %v16361_v25, %v11854_v11  ;;  %v16401_v29 = vld [vmem:[#allocation10 + $0x3ec] sm:$0xf]  ;;  %v12014_v32 = vld [vmem:[#allocation10 + $0x3f8] sm:$0xf0]  ;;  %v12372_v0 = vld [vmem:[#allocation13 + $0x2c0] sm:$0xf] }
 0x1de   :  { %v12017_v34 = vor.u32 %v16401_v29, %v12014_v32  ;;  %v16397_v35 = vld [vmem:[#allocation10 + $0x3cc] sm:$0xf]  ;;  %v16424_v26 = vld [vmem:[#allocation13 + $0x9c] sm:$0xf0] }
 0x1df   :  { %v1616_v61 = vmax.f32 %v1601_v30, 0.0  ;;  %v12001_v40 = vor.u32 %v16397_v35, %v11998_v39  ;;  %v16389_v37 = vld [vmem:[#allocation10 + $0x38c] sm:$0xf]  ;;  %v11902_v30 = vld [vmem:[#allocation10 + $0x318] sm:$0xf0] }
 0x1e0   :  { %v16377_v25 = vld [vmem:[#allocation10 + $0x32c] sm:$0xf]  ;;  %v16488_v32 = vld [vmem:[#allocation13 + $0x29c] sm:$0xf0] }
 0x1e1   :  { %2617 = vmatpush.bf16.msrb.mxu3 %v11997_v49  ;;  %2674 = vmatpush.bf16.msra.mxu2 %v11873_v50  ;;  %v11966_v49 = vld [vmem:[#allocation10 + $0x398] sm:$0xf0]  ;;  %v16373_v11 = vld [vmem:[#allocation10 + $0x30c] sm:$0xf]  ;;  %v12052_v39 = vld [vmem:[#allocation13 + $0x40] sm:$0xf] }
 0x1e2   :  { %v1583_v53 = vpop.f32.mrf.mxu2  ;;  %v11969_v45 = vor.u32 %v16389_v37, %v11966_v49  ;;  %v11950_v50 = vld [vmem:[#allocation10 + $0x378] sm:$0xf0]  ;;  %v16480_v37 = vld [vmem:[#allocation13 + $0x25c] sm:$0xf0] }
 0x1e3   :  { %v1584_v55 = vadd.f32 %v1583_v53, %v1565_v44  ;;  %v1602_v57 = vpop.f32.mrf.mxu3  ;;  %v16381_v44 = vld [vmem:[#allocation10 + $0x34c] sm:$0xf]  ;;  %v11918_v53 = vld [vmem:[#allocation10 + $0x338] sm:$0xf0]  ;;  %v12309_v49 = vor.u32 %v16480_v37, %v12308_v41  ;;  %v16768_v59 = vld [vmem:[#allocation13 + $0xb5c] sm:$0xf0] }
 0x1e4   :  { %v11937_v52 = vor.u32 %v16381_v44, %v11934_v36  ;;  %v16472_v44 = vld [vmem:[#allocation13 + $0x21c] sm:$0xf0] }
 0x1e5   :  { %v1603_v38 = vadd.f32 %v1602_v57, %v1584_v55  ;;  %2618 = vmatpush.bf16.msrb.mxu3 %v11981_v54  ;;  %2675 = vmatpush.bf16.msra.mxu2 %v11857_v56  ;;  %v11921_v54 = vor.u32 %v16377_v25, %v11918_v53  ;;  %v11905_v55 = vor.u32 %v16373_v11, %v11902_v30  ;;  %v16464_v56 = vld [vmem:[#allocation13 + $0x1dc] sm:$0xf0] }
 0x1e6   :  { %v12500_v57 = vld [vmem:[#allocation13 + $0x3c0] sm:$0xf] }
 0x1e7   :  { %v1620_v48 = vmax.f32 %v1603_v38, 0.0  ;;  %v12501_v60 = vor.u32 %v16528_v58, %v12500_v57  ;;  %v13268_v36 = vld [vmem:[#allocation13 + $0x9c0] sm:$0xf] }
 0x1e8   :  { %v16784_v11 = vld [vmem:[#allocation13 + $0xbdc] sm:$0xf0] }
 0x1e9   :  { %v18010_v1 = vpack.c.bf16 %v1620_v48, %v1616_v61  ;;  %2619 = vmatpush.bf16.msrb.mxu3 %v11965_v2  ;;  %2676 = vmatpush.bf16.msra.mxu2 %v11841_v63  ;;  %v12212_v61 = vld [vmem:[#allocation13 + $0x180] sm:$0xf] }
 0x1ea   :  { %5879 = vmatpush.bf16.msrb.mxu1 %v12501_v60  ;;  %v16456_v48 = vld [vmem:[#allocation13 + $0x19c] sm:$0xf0] }
 0x1eb   :  { %2477 = vmatmul.bf16.gmra.mxu3 %v18010_v1  ;;  %2534 = vmatmul.bf16.gmra.mxu2 %v17996_v31  ;;  %v12468_v2 = vld [vmem:[#allocation13 + $0x380] sm:$0xf] }
 0x1ec   :  { %2591 = vmatmul.bf16.gmra.mxu1 %v17976_v21  ;;  %2648 = vmatmul.bf16.gmra.mxu0 %v17956_v17  ;;  %v11900_v17 = vld [vmem:[#allocation10 + $0x308] sm:$0xf]  ;;  %v16520_v63 = vld [vmem:[#allocation13 + $0x39c] sm:$0xf0] }
 0x1ed   :  { %2620 = vmatpush.bf16.msrb.mxu3 %v11949_v8  ;;  %2677 = vmatpush.bf16.msra.mxu2 %v11825_v10  ;;  %v11901_v28 = vor.u32 %v16375_v23, %v11900_v17  ;;  %v16512_v10 = vld [vmem:[#allocation13 + $0x35c] sm:$0xf0] }
 0x1ee   :  { %v12437_v7 = vor.u32 %v16512_v10, %v12436_v5  ;;  %v16496_v23 = vld [vmem:[#allocation13 + $0x2dc] sm:$0xf0] }
 0x1ef   :  { %v12373_v24 = vor.u32 %v16496_v23, %v12372_v0  ;;  %v13492_v57 = vld [vmem:[#allocation13 + $0xb80] sm:$0xf] }
 0x1f0   :  { %v16776_v58 = vld [vmem:[#allocation13 + $0xb9c] sm:$0xf0] }
 0x1f1   :  { %2621 = vmatpush.bf16.msrb.mxu3 %v11933_v51  ;;  %2678 = vmatpush.bf16.msra.mxu2 %v11809_v18  ;;  %v12404_v51 = vld [vmem:[#allocation13 + $0x300] sm:$0xf]  ;;  %v12149_v18 = vor.u32 %v16440_v12, %v12148_v47 }
 0x1f2   :  { %v16696_v10 = vld [vmem:[#allocation13 + $0x91c] sm:$0xf0] }
 0x1f3   :  { %v16760_v12 = vld [vmem:[#allocation13 + $0xb1c] sm:$0xf0] }
 0x1f4   :  { %v13076_v41 = vld [vmem:[#allocation13 + $0x840] sm:$0xf] }
 0x1f5   :  { %2622 = vmatpush.bf16.msrb.mxu3 %v11917_v19  ;;  %2679 = vmatpush.bf16.msra.mxu2 %v11793_v3  ;;  %v16432_v19 = vld [vmem:[#allocation13 + $0xdc] sm:$0xf0] }
 0x1f6   :  { %v12117_v17 = vor.u32 %v16432_v19, %v12116_v16  ;;  %v16688_v16 = vld [vmem:[#allocation13 + $0x8dc] sm:$0xf0] }
 0x1f7   :  { %v13396_v19 = vld [vmem:[#allocation13 + $0xac0] sm:$0xf] }
 0x1f8   :  { %v18026_v43 = vpop.f32.mrf.mxu0  ;;  %v13332_v37 = vld [vmem:[#allocation13 + $0xa40] sm:$0xf] }
 0x1f9   :  { %2623 = vmatpush.bf16.msrb.mxu3 %v11901_v28  ;;  %2680 = vmatpush.bf16.msra.mxu2 %v11777_v27  ;;  %v12084_v28 = vld [vmem:[#allocation13 + $0x80] sm:$0xf] }
 0x1fa   :  { %v12340_v27 = vld [vmem:[#allocation13 + $0x280] sm:$0xf]  ;;  %v12085_v29 = vor.u32 %v16424_v26, %v12084_v28 }
 0x1fb   :  { %2548 = vmatmul.bf16.vlgmr.msra.gmra.mxu3 %v18003_v22  ;;  %2605 = vmatmul.bf16.vlgmr.msrb.gmra.mxu2 %v17985_v33  ;;  %v13108_v26 = vld [vmem:[#allocation13 + $0x880] sm:$0xf] }
 0x1fc   :  { %2662 = vmatmul.bf16.vlgmr.msra.gmra.mxu1 %v17964_v13  ;;  %v11953_v13 = vor.u32 %v16385_v6, %v11950_v50  ;;  %v12020_v6 = vld [vmem:[#allocation13] sm:$0xf] }
 0x1fd   :  { %2692 = vmatpush.bf16.msra.mxu3 %v12017_v34  ;;  %v12341_v34 = vor.u32 %v16488_v32, %v12340_v27  ;;  %v16408_v50 = vld [vmem:[#allocation13 + $0x1c] sm:$0xf0] }
 0x1fe   :  { %v16680_v27 = vld [vmem:[#allocation13 + $0x89c] sm:$0xf0] }
 0x1ff   :  { %v13109_v32 = vor.u32 %v16680_v27, %v13108_v26 }
 0x200   :  { %v18033_v14 = vpop.f32.mrf.mxu0 }
 0x201   :  { %2693 = vmatpush.bf16.msra.mxu3 %v12001_v40  ;;  %v16416_v40 = vld [vmem:[#allocation13 + $0x5c] sm:$0xf0] }
 0x205   :  { %2694 = vmatpush.bf16.msra.mxu3 %v11985_v46  ;;  %v12053_v46 = vor.u32 %v16416_v40, %v12052_v39 }
 0x208   :  { %v18040_v35 = vpop.f32.mrf.mxu0 }
 0x209   :  { %2695 = vmatpush.bf16.msra.mxu3 %v11969_v45 }
 0x20b   :  { %2553 = vmatmul.bf16.gmra.mxu3 %v18010_v1  ;;  %2610 = vmatmul.bf16.gmra.mxu2 %v17996_v31 }
 0x20c   :  { %2667 = vmatmul.bf16.gmra.mxu1 %v17976_v21  ;;  %v12244_v21 = vld [vmem:[#allocation13 + $0x1c0] sm:$0xf] }
 0x20d   :  { %2696 = vmatpush.bf16.msra.mxu3 %v11953_v13  ;;  %v12245_v38 = vor.u32 %v16464_v56, %v12244_v21  ;;  %v12021_v13 = vor.u32 %v16408_v50, %v12020_v6  ;;  %v13236_v21 = vld [vmem:[#allocation13 + $0x980] sm:$0xf] }
 0x20e   :  { %v16712_v56 = vld [vmem:[#allocation13 + $0x99c] sm:$0xf0] }
 0x20f   :  { %5865 = vmatpush.bf16.msrb.mxu0 %v12245_v38  ;;  %v13237_v38 = vor.u32 %v16712_v56, %v13236_v21  ;;  %v16736_v6 = vld [vmem:[#allocation13 + $0xa5c] sm:$0xf0] }
 0x210   :  { %v12756_v56 = vld [vmem:[#allocation13 + $0x5c0] sm:$0xf] }
 0x211   :  { %2697 = vmatpush.bf16.msra.mxu3 %v11937_v52  ;;  %v16720_v52 = vld [vmem:[#allocation13 + $0x9dc] sm:$0xf0] }
 0x212   :  { %v13269_v53 = vor.u32 %v16720_v52, %v13268_v36  ;;  %v13044_v36 = vld [vmem:[#allocation13 + $0x800] sm:$0xf] }
 0x213   :  { %v16664_v52 = vld [vmem:[#allocation13 + $0x81c] sm:$0xf0] }
 0x215   :  { %2698 = vmatpush.bf16.msra.mxu3 %v11921_v54  ;;  %v13524_v54 = vld [vmem:[#allocation13 + $0xbc0] sm:$0xf] }
 0x216   :  { %v13525_v30 = vor.u32 %v16784_v11, %v13524_v54  ;;  %v16728_v54 = vld [vmem:[#allocation13 + $0xa1c] sm:$0xf0] }
 0x218   :  { %v18028_v62 = vpop.f32.mrf.mxu1 }
 0x219   :  { %2699 = vmatpush.bf16.msra.mxu3 %v11905_v55  ;;  %v18046_v55 = vpop.f32.mrf.mxu0 }
 0x21b   :  { %2624 = vmatmul.bf16.vlgmr.msrb.gmra.mxu3 %v18003_v22  ;;  %2681 = vmatmul.bf16.vlgmr.msra.gmra.mxu2 %v17985_v33  ;;  %v12213_v33 = vor.u32 %v16456_v48, %v12212_v61  ;;  %v13493_v61 = vor.u32 %v16776_v58, %v13492_v57  ;;  %v16592_v57 = vld [vmem:[#allocation13 + $0x5dc] sm:$0xf0] }
 0x21d   :  { %5866 = vmatpush.bf16.msrb.mxu0 %v12213_v33  ;;  %v16704_v33 = vld [vmem:[#allocation13 + $0x95c] sm:$0xf0] }
 0x220   :  { %v18035_v20 = vpop.f32.mrf.mxu1 }
 0x221   :  { %5867 = vmatpush.bf16.msrb.mxu0 %v12181_v9  ;;  %v13172_v9 = vld [vmem:[#allocation13 + $0x900] sm:$0xf] }
 0x222   :  { %v13173_v47 = vor.u32 %v16696_v10, %v13172_v9  ;;  %v12724_v9 = vld [vmem:[#allocation13 + $0x580] sm:$0xf] }
 0x223   :  { %v16584_v10 = vld [vmem:[#allocation13 + $0x59c] sm:$0xf0] }
 0x225   :  { %5868 = vmatpush.bf16.msrb.mxu0 %v12149_v18 }
 0x228   :  { %v18042_v42 = vpop.f32.mrf.mxu1 }
 0x229   :  { %5869 = vmatpush.bf16.msrb.mxu0 %v12117_v17  ;;  %v16752_v17 = vld [vmem:[#allocation13 + $0xadc] sm:$0xf0] }
 0x22b   :  { %2629 = vmatmul.bf16.gmra.mxu3 %v18010_v1  ;;  %2686 = vmatmul.bf16.gmra.mxu2 %v17996_v31  ;;  %v12469_v31 = vor.u32 %v16520_v63, %v12468_v2  ;;  %v13204_v2 = vld [vmem:[#allocation13 + $0x940] sm:$0xf] }
 0x22c   :  { %v13460_v63 = vld [vmem:[#allocation13 + $0xb40] sm:$0xf] }
 0x22d   :  { %5880 = vmatpush.bf16.msrb.mxu1 %v12469_v31  ;;  %5870 = vmatpush.bf16.msrb.mxu0 %v12085_v29  ;;  %v13205_v31 = vor.u32 %v16704_v33, %v13204_v2  ;;  %v13461_v4 = vor.u32 %v16768_v59, %v13460_v63  ;;  %v13364_v29 = vld [vmem:[#allocation13 + $0xa80] sm:$0xf]  ;;  %v12757_v33 = vor.u32 %v16592_v57, %v12756_v56 }
 0x22e   :  { %v16656_v63 = vld [vmem:[#allocation13 + $0x7dc] sm:$0xf0] }
 0x22f   :  { %5893 = vmatpush.bf16.msrb.mxu2 %v12757_v33  ;;  %v16560_v56 = vld [vmem:[#allocation13 + $0x4dc] sm:$0xf0] }
 0x230   :  { %v18048_v60 = vpop.f32.mrf.mxu1  ;;  %v12884_v57 = vld [vmem:[#allocation13 + $0x6c0] sm:$0xf] }
 0x231   :  { %5881 = vmatpush.bf16.msrb.mxu1 %v12437_v7  ;;  %5871 = vmatpush.bf16.msrb.mxu0 %v12053_v46  ;;  %v13428_v7 = vld [vmem:[#allocation13 + $0xb00] sm:$0xf] }
 0x232   :  { %v13429_v18 = vor.u32 %v16760_v12, %v13428_v7  ;;  %v16672_v46 = vld [vmem:[#allocation13 + $0x85c] sm:$0xf0] }
 0x233   :  { %v12980_v12 = vld [vmem:[#allocation13 + $0x780] sm:$0xf] }
 0x235   :  { %5872 = vmatpush.bf16.msrb.mxu0 %v12021_v13 }
 0x239   :  { %5921 = vmatpush.bf16.msra.mxu0 %v13269_v53  ;;  %v13045_v53 = vor.u32 %v16664_v52, %v13044_v36  ;;  %v16632_v52 = vld [vmem:[#allocation13 + $0x71c] sm:$0xf0] }
 0x23b   :  { %2700 = vmatmul.bf16.vlgmr.msra.gmra.mxu3 %v18003_v22  ;;  %v16504_v22 = vld [vmem:[#allocation13 + $0x31c] sm:$0xf0] }
 0x23c   :  { %v12405_v15 = vor.u32 %v16504_v22, %v12404_v51  ;;  %v2492_v51 = vpop.f32.mrf.mxu0  ;;  %v2511_v22 = vpop.f32.mrf.mxu1 }
 0x23d   :  { %5922 = vmatpush.bf16.msra.mxu0 %v13237_v38  ;;  %v13012_v38 = vld [vmem:[#allocation13 + $0x7c0] sm:$0xf] }
 0x23e   :  { %v18031_v8 = vpop.f32.mrf.mxu2  ;;  %5882 = vmatpush.bf16.msrb.mxu1 %v12405_v15  ;;  %v13140_v15 = vld [vmem:[#allocation13 + $0x8c0] sm:$0xf] }
 0x23f   :  { %v13141_v0 = vor.u32 %v16688_v16, %v13140_v15 }
 0x241   :  { %5923 = vmatpush.bf16.msra.mxu0 %v13205_v31  ;;  %v13013_v31 = vor.u32 %v16656_v63, %v13012_v38  ;;  %v16624_v63 = vld [vmem:[#allocation13 + $0x6dc] sm:$0xf0] }
 0x242   :  { %5883 = vmatpush.bf16.msrb.mxu1 %v12373_v24  ;;  %v13397_v24 = vor.u32 %v16752_v17, %v13396_v19  ;;  %v16576_v17 = vld [vmem:[#allocation13 + $0x55c] sm:$0xf0] }
 0x243   :  { %5907 = vmatpush.bf16.msrb.mxu3 %v13013_v31 }
 0x244   :  { %v2494_v40 = vpop.f32.mrf.mxu0  ;;  %v18058_v50 = vpop.f32.mrf.mxu1 }
 0x245   :  { %5924 = vmatpush.bf16.msra.mxu0 %v13173_v47  ;;  %v12725_v47 = vor.u32 %v16584_v10, %v12724_v9  ;;  %v12885_v9 = vor.u32 %v16624_v63, %v12884_v57  ;;  %v12532_v63 = vld [vmem:[#allocation13 + $0x400] sm:$0xf] }
 0x246   :  { %v18037_v3 = vpop.f32.mrf.mxu2  ;;  %5884 = vmatpush.bf16.msrb.mxu1 %v12341_v34  ;;  %v16744_v34 = vld [vmem:[#allocation13 + $0xa9c] sm:$0xf0] }
 0x247   :  { %v13365_v39 = vor.u32 %v16744_v34, %v13364_v29  ;;  %5894 = vmatpush.bf16.msrb.mxu2 %v12725_v47  ;;  %v16552_v47 = vld [vmem:[#allocation13 + $0x49c] sm:$0xf0] }
 0x249   :  { %5925 = vmatpush.bf16.msra.mxu0 %v13141_v0  ;;  %v12692_v0 = vld [vmem:[#allocation13 + $0x540] sm:$0xf] }
 0x24a   :  { %5885 = vmatpush.bf16.msrb.mxu1 %v12309_v49  ;;  %v13077_v49 = vor.u32 %v16672_v46, %v13076_v41 }
 0x24b   :  { %2705 = vmatmul.bf16.gmra.mxu3 %v18010_v1  ;;  %v12276_v1 = vld [vmem:[#allocation13 + $0x200] sm:$0xf] }
 0x24c   :  { %v12277_v25 = vor.u32 %v16472_v44, %v12276_v1  ;;  %v13333_v1 = vor.u32 %v16736_v6, %v13332_v37  ;;  %v18066_v21 = vpop.f32.mrf.mxu0  ;;  %v16568_v6 = vld [vmem:[#allocation13 + $0x51c] sm:$0xf0] }
 0x24d   :  { %5926 = vmatpush.bf16.msra.mxu0 %v13109_v32  ;;  %v12693_v32 = vor.u32 %v16576_v17, %v12692_v0  ;;  %v16616_v0 = vld [vmem:[#allocation13 + $0x69c] sm:$0xf0] }
 0x24e   :  { %v18044_v45 = vpop.f32.mrf.mxu2  ;;  %5886 = vmatpush.bf16.msrb.mxu1 %v12277_v25  ;;  %v13300_v25 = vld [vmem:[#allocation13 + $0xa00] sm:$0xf] }
 0x24f   :  { %v13301_v11 = vor.u32 %v16728_v54, %v13300_v25  ;;  %5895 = vmatpush.bf16.msrb.mxu2 %v12693_v32 }
 0x251   :  { %5927 = vmatpush.bf16.msra.mxu0 %v13077_v49 }
 0x252   :  { %5935 = vmatpush.bf16.msra.mxu1 %v13525_v30  ;;  %v18064_v30 = vld [vmem:[#allocation11] sm:$0xf] }
 0x253   :  { %v18069_v58 = vperm.slane %v18064_v30, 1 }
 0x254   :  { %v18083_v26 = vpop.f32.mrf.mxu0 }
 0x255   :  { %5928 = vmatpush.bf16.msra.mxu0 %v13045_v53  ;;  %v2493_v7 = vadd.f32 %v2492_v51, %v18069_v58  ;;  %v16640_v51 = vld [vmem:[#allocation13 + $0x75c] sm:$0xf0]  ;;  %v2495_v37 = vadd.f32 %v2494_v40, %v18069_v58  ;;  %v2500_v57 = vadd.f32 %v18083_v26, %v18069_v58 }
 0x256   :  { %v18050_v48 = vpop.f32.mrf.mxu2  ;;  %5936 = vmatpush.bf16.msra.mxu1 %v13493_v61  ;;  %v18071_v61 = vpop.f32.mrf.mxu1 }
 0x257   :  { %v2512_v16 = vadd.f32 %v2511_v22, %v2493_v7 }
 0x25a   :  { %5937 = vmatpush.bf16.msra.mxu1 %v13461_v4  ;;  %v18078_v4 = vperm.slane %v18064_v30, 0 }
 0x25c   :  { %v2417_v19 = vadd.f32 %v18026_v43, %v18078_v4  ;;  %v2419_v34 = vadd.f32 %v18033_v14, %v18078_v4  ;;  %v12916_v14 = vld [vmem:[#allocation13 + $0x700] sm:$0xf] }
 0x25d   :  { %v12917_v54 = vor.u32 %v16632_v52, %v12916_v14  ;;  %v16452_v14 = vld [vmem:[#allocation13 + $0x184] sm:$0xf] }
 0x25e   :  { %v18052_v5 = vpop.f32.mrf.mxu3  ;;  %5938 = vmatpush.bf16.msra.mxu1 %v13429_v18  ;;  %v18054_v23 = vpop.f32.mrf.mxu2  ;;  %v16648_v18 = vld [vmem:[#allocation13 + $0x79c] sm:$0xf0]  ;;  %v2436_v22 = vadd.f32 %v18028_v62, %v2417_v19  ;;  %v2438_v46 = vadd.f32 %v18035_v20, %v2419_v34  ;;  %v2514_v62 = vadd.f32 %v18058_v50, %v2495_v37 }
 0x25f   :  { %v12981_v15 = vor.u32 %v16648_v18, %v12980_v12  ;;  %v2531_v27 = vadd.f32 %v18054_v23, %v2512_v16  ;;  %v18089_v41 = vpop.f32.mrf.mxu1  ;;  %v12660_v23 = vld [vmem:[#allocation13 + $0x500] sm:$0xf]  ;;  %v2498_v12 = vadd.f32 %v18066_v21, %v18069_v58 }
 0x260   :  { %v2455_v49 = vadd.f32 %v18031_v8, %v2436_v22  ;;  %v12661_v36 = vor.u32 %v16568_v6, %v12660_v23  ;;  %v2457_v25 = vadd.f32 %v18037_v3, %v2438_v46  ;;  %v18101_v3 = vpop.f32.mrf.mxu0  ;;  %v12852_v19 = vld [vmem:[#allocation13 + $0x680] sm:$0xf]  ;;  %v2519_v58 = vadd.f32 %v18089_v41, %v2500_v57  ;;  %v12150_v41 = vld [vmem:[#allocation13 + $0x120] sm:$0xf0] }
 0x261   :  { %5908 = vmatpush.bf16.msrb.mxu3 %v12981_v15  ;;  %v16460_v15 = vld [vmem:[#allocation13 + $0x1c4] sm:$0xf]  ;;  %v12853_v32 = vor.u32 %v16616_v0, %v12852_v19  ;;  %v2517_v34 = vadd.f32 %v18071_v61, %v2498_v12  ;;  %v12564_v46 = vld [vmem:[#allocation13 + $0x440] sm:$0xf]  ;;  %v2424_v61 = vadd.f32 %v18046_v55, %v18078_v4 }
 0x262   :  { %5939 = vmatpush.bf16.msra.mxu1 %v13397_v24  ;;  %v12948_v24 = vld [vmem:[#allocation13 + $0x740] sm:$0xf]  ;;  %v2474_v53 = vadd.f32 %v18052_v5, %v2455_v49  ;;  %5896 = vmatpush.bf16.msrb.mxu2 %v12661_v36  ;;  %v16444_v55 = vld [vmem:[#allocation13 + $0x144] sm:$0xf] }
 0x263   :  { %v16544_v37 = vld [vmem:[#allocation13 + $0x45c] sm:$0xf0] }
 0x264   :  { %v2711_v31 = vmax.f32 %v2474_v53, 0.0  ;;  %v12565_v52 = vor.u32 %v16544_v37, %v12564_v46  ;;  %v16912_v19 = vld [vmem:[#allocation13 + $0xfdc] sm:$0xf0]  ;;  %v16500_v46 = vld [vmem:[#allocation13 + $0x304] sm:$0xf] }
 0x265   :  { %v16904_v37 = vld [vmem:[#allocation13 + $0xf9c] sm:$0xf0] }
 0x266   :  { %v18056_v28 = vpop.f32.mrf.mxu3  ;;  %5940 = vmatpush.bf16.msra.mxu1 %v13365_v39  ;;  %v18060_v13 = vpop.f32.mrf.mxu2  ;;  %v12949_v39 = vor.u32 %v16640_v51, %v12948_v24  ;;  %v12246_v24 = vld [vmem:[#allocation13 + $0x1e0] sm:$0xf0] }
 0x267   :  { %v2476_v40 = vadd.f32 %v18056_v28, %v2457_v25  ;;  %v2533_v8 = vadd.f32 %v18060_v13, %v2514_v62  ;;  %v12596_v28 = vld [vmem:[#allocation13 + $0x480] sm:$0xf]  ;;  %v2422_v13 = vadd.f32 %v18040_v35, %v18078_v4  ;;  %v18107_v18 = vpop.f32.mrf.mxu1  ;;  %v12249_v6 = vor.u32 %v16460_v15, %v12246_v24  ;;  %v16508_v4 = vld [vmem:[#allocation13 + $0x344] sm:$0xf] }
 0x268   :  { %5909 = vmatpush.bf16.msrb.mxu3 %v12949_v39  ;;  %v12597_v16 = vor.u32 %v16552_v47, %v12596_v28  ;;  %v16608_v62 = vld [vmem:[#allocation13 + $0x65c] sm:$0xf0] }
 0x269   :  { %v2715_v5 = vmax.f32 %v2476_v40, 0.0  ;;  %v2441_v51 = vadd.f32 %v18042_v42, %v2422_v13  ;;  %v12820_v42 = vld [vmem:[#allocation13 + $0x640] sm:$0xf]  ;;  %v16516_v40 = vld [vmem:[#allocation13 + $0x384] sm:$0xf] }
 0x26a   :  { %5941 = vmatpush.bf16.msra.mxu1 %v13333_v1  ;;  %v13780_v28 = vld [vmem:[#allocation13 + $0xdc0] sm:$0xf] }
 0x26b   :  { %v2460_v49 = vadd.f32 %v18044_v45, %v2441_v51  ;;  %v16848_v47 = vld [vmem:[#allocation13 + $0xddc] sm:$0xf0] }
 0x26c   :  { %5910 = vmatpush.bf16.msrb.mxu3 %v12917_v54  ;;  %v14036_v13 = vld [vmem:[#allocation13 + $0xfc0] sm:$0xf] }
 0x26e   :  { %v18062_v44 = vpop.f32.mrf.mxu3  ;;  %5942 = vmatpush.bf16.msra.mxu1 %v13301_v11  ;;  %v18075_v59 = vpop.f32.mrf.mxu2  ;;  %v12628_v11 = vld [vmem:[#allocation13 + $0x4c0] sm:$0xf] }
 0x26f   :  { %v12629_v33 = vor.u32 %v16560_v56, %v12628_v11  ;;  %v2536_v25 = vadd.f32 %v18075_v59, %v2517_v34  ;;  %v2479_v45 = vadd.f32 %v18062_v44, %v2460_v49  ;;  %v12821_v11 = vor.u32 %v16608_v62, %v12820_v42  ;;  %v12182_v59 = vld [vmem:[#allocation13 + $0x160] sm:$0xf0]  ;;  %v18131_v12 = vpop.f32.mrf.mxu1 }
 0x270   :  { %5911 = vmatpush.bf16.msrb.mxu3 %v12885_v9  ;;  %v2443_v56 = vadd.f32 %v18048_v60, %v2424_v61  ;;  %v16536_v60 = vld [vmem:[#allocation13 + $0x41c] sm:$0xf0]  ;;  %v12185_v51 = vor.u32 %v16444_v55, %v12182_v59 }
 0x271   :  { %5897 = vmatpush.bf16.msrb.mxu2 %v12629_v33  ;;  %v12438_v33 = vld [vmem:[#allocation13 + $0x360] sm:$0xf0]  ;;  %v12788_v9 = vld [vmem:[#allocation13 + $0x600] sm:$0xf]  ;;  %v2719_v15 = vmax.f32 %v2479_v45, 0.0 }
 0x272   :  { %v2462_v26 = vadd.f32 %v18050_v48, %v2443_v56  ;;  %v14037_v48 = vor.u32 %v16912_v19, %v14036_v13  ;;  %v12441_v34 = vor.u32 %v16508_v4, %v12438_v33  ;;  %v13716_v61 = vld [vmem:[#allocation13 + $0xd40] sm:$0xf]  ;;  %v12374_v45 = vld [vmem:[#allocation13 + $0x2e0] sm:$0xf0] }
 0x273   :  { %v16896_v56 = vld [vmem:[#allocation13 + $0xf5c] sm:$0xf0]  ;;  %v12342_v13 = vld [vmem:[#allocation13 + $0x2a0] sm:$0xf0] }
 0x274   :  { %5912 = vmatpush.bf16.msrb.mxu3 %v12853_v32 }
 0x275   :  { %5898 = vmatpush.bf16.msrb.mxu2 %v12597_v16  ;;  %v13781_v16 = vor.u32 %v16848_v47, %v13780_v28  ;;  %v16484_v47 = vld [vmem:[#allocation13 + $0x284] sm:$0xf] }
 0x276   :  { %v18073_v2 = vpop.f32.mrf.mxu3  ;;  %v18094_v1 = vpop.f32.mrf.mxu2 }
 0x277   :  { %v2481_v0 = vadd.f32 %v18073_v2, %v2462_v26  ;;  %v12406_v2 = vld [vmem:[#allocation13 + $0x320] sm:$0xf0]  ;;  %v16824_v26 = vld [vmem:[#allocation13 + $0xd1c] sm:$0xf0] }
 0x278   :  { %5913 = vmatpush.bf16.msrb.mxu3 %v12821_v11  ;;  %v12409_v62 = vor.u32 %v16500_v46, %v12406_v2  ;;  %v16404_v46 = vld [vmem:[#allocation13 + $0x4] sm:$0xf] }
 0x279   :  { %5899 = vmatpush.bf16.msrb.mxu2 %v12565_v52  ;;  %v12118_v52 = vld [vmem:[#allocation13 + $0xe0] sm:$0xf0] }
 0x27a   :  { %v12022_v2 = vld [vmem:[#allocation13 + $0x20] sm:$0xf0] }
 0x27e   :  { %v2549_v29 = vpop.f32.mrf.mxu3  ;;  %v18111_v22 = vpop.f32.mrf.mxu2 }
 0x27f   :  { %v2550_v43 = vadd.f32 %v2549_v29, %v2531_v27  ;;  %v16524_v27 = vld [vmem:[#allocation13 + $0x3c4] sm:$0xf] }
 0x280   :  { %v12502_v29 = vld [vmem:[#allocation13 + $0x3e0] sm:$0xf0] }
 0x281   :  { %v2712_v20 = vmax.f32 %v2550_v43, 0.0  ;;  %v12505_v36 = vor.u32 %v16524_v27, %v12502_v29  ;;  %v16436_v27 = vld [vmem:[#allocation13 + $0x104] sm:$0xf] }
 0x282   :  { %v12153_v42 = vor.u32 %v16436_v27, %v12150_v41  ;;  %v12345_v41 = vor.u32 %v16484_v47, %v12342_v13  ;;  %v16864_v47 = vld [vmem:[#allocation13 + $0xe5c] sm:$0xf0] }
 0x283   :  { %v2727_v10 = vpack.c.bf16 %v2712_v20, %v2711_v31  ;;  %v12214_v20 = vld [vmem:[#allocation13 + $0x1a0] sm:$0xf0]  ;;  %v18127_v31 = vpop.f32.mrf.mxu0 }
 0x284   :  { %v12217_v44 = vor.u32 %v16452_v14, %v12214_v20  ;;  %v16428_v14 = vld [vmem:[#allocation13 + $0xc4] sm:$0xf]  ;;  %v13972_v20 = vld [vmem:[#allocation13 + $0xf40] sm:$0xf] }
 0x285   :  { %v2739_v35 = vunpack.c.l.b16 %v2727_v10  ;;  %v2740_v21 = vunpack.c.h.b16 %v2727_v10  ;;  %v12533_v10 = vor.u32 %v16536_v60, %v12532_v63  ;;  %v16420_v63 = vld [vmem:[#allocation13 + $0x84] sm:$0xf] }
 0x286   :  { %v2551_v38 = vpop.f32.mrf.mxu3  ;;  %v18135_v29 = vpop.f32.mrf.mxu2 }
 0x287   :  { %v2552_v50 = vadd.f32 %v2551_v38, %v2533_v8  ;;  %v12470_v8 = vld [vmem:[#allocation13 + $0x3a0] sm:$0xf0]  ;;  %5900 = vmatpush.bf16.msrb.mxu2 %v12533_v10  ;;  %v13940_v10 = vld [vmem:[#allocation13 + $0xf00] sm:$0xf] }
 0x289   :  { %v2716_v7 = vmax.f32 %v2552_v50, 0.0  ;;  %v12473_v50 = vor.u32 %v16516_v40, %v12470_v8  ;;  %v16492_v8 = vld [vmem:[#allocation13 + $0x2c4] sm:$0xf] }
 0x28b   :  { %v2729_v17 = vpack.c.bf16 %v2716_v7, %v2715_v5  ;;  %v16600_v5 = vld [vmem:[#allocation13 + $0x61c] sm:$0xf0]  ;;  %5949 = vmatpush.bf16.msra.mxu2 %v13781_v16  ;;  %v18137_v57 = vpop.f32.mrf.mxu0 }
 0x28c   :  { %v12789_v7 = vor.u32 %v16600_v5, %v12788_v9  ;;  %v12121_v9 = vor.u32 %v16428_v14, %v12118_v52  ;;  %v12377_v5 = vor.u32 %v16492_v8, %v12374_v45  ;;  %v16808_v14 = vld [vmem:[#allocation13 + $0xc9c] sm:$0xf0]  ;;  %v16780_v8 = vld [vmem:[#allocation13 + $0xbc4] sm:$0xf] }
 0x28d   :  { %v2743_v39 = vunpack.c.l.b16 %v2729_v17  ;;  %v2744_v43 = vunpack.c.h.b16 %v2729_v17  ;;  %v2538_v17 = vadd.f32 %v18094_v1, %v2519_v58  ;;  %v13684_v58 = vld [vmem:[#allocation13 + $0xd00] sm:$0xf]  ;;  %v13526_v45 = vld [vmem:[#allocation13 + $0xbe0] sm:$0xf0] }
 0x28e   :  { %v2554_v23 = vpop.f32.mrf.mxu3  ;;  %5914 = vmatpush.bf16.msrb.mxu3 %v12789_v7  ;;  %v18147_v16 = vpop.f32.mrf.mxu2  ;;  %v13685_v19 = vor.u32 %v16824_v26, %v13684_v58  ;;  %v13876_v52 = vld [vmem:[#allocation13 + $0xe80] sm:$0xf]  ;;  %v16772_v58 = vld [vmem:[#allocation13 + $0xb84] sm:$0xf] }
 0x28f   :  { %v18117_v53 = vpack.c.b16 %v2743_v39, %v2739_v35  ;;  %v18119_v54 = vpack.c.b16 %v2744_v43, %v2740_v21  ;;  %v2555_v38 = vadd.f32 %v2554_v23, %v2536_v25  ;;  %v13748_v35 = vld [vmem:[#allocation13 + $0xd80] sm:$0xf]  ;;  %v2723_v23 = vmax.f32 %v2481_v0, 0.0  ;;  %v13494_v26 = vld [vmem:[#allocation13 + $0xba0] sm:$0xf0] }
 0x290   :  { %v16840_v21 = vld [vmem:[#allocation13 + $0xd9c] sm:$0xf0] }
 0x291   :  { %5873 = vmatmul.bf16.vlgmr.msrb.gmra.mxu0 %v18117_v53  ;;  %5887 = vmatmul.bf16.vlgmr.msrb.gmra.mxu1 %v18119_v54  ;;  %v2720_v24 = vmax.f32 %v2555_v38, 0.0  ;;  %v14004_v39 = vld [vmem:[#allocation13 + $0xf80] sm:$0xf]  ;;  %v13749_v1 = vor.u32 %v16840_v21, %v13748_v35  ;;  %v13973_v38 = vor.u32 %v16896_v56, %v13972_v20  ;;  %v12310_v35 = vld [vmem:[#allocation13 + $0x260] sm:$0xf0] }
 0x292   :  { %5977 = vmatpush.bf16.msrb.mxu0 %v12249_v6  ;;  %5991 = vmatpush.bf16.msrb.mxu1 %v12505_v36  ;;  %v14005_v49 = vor.u32 %v16904_v37, %v14004_v39  ;;  %v16832_v25 = vld [vmem:[#allocation13 + $0xd5c] sm:$0xf0] }
 0x293   :  { %5963 = vmatpush.bf16.msra.mxu3 %v14037_v48  ;;  %v2731_v6 = vpack.c.bf16 %v2720_v24, %v2719_v15  ;;  %5950 = vmatpush.bf16.msra.mxu2 %v13749_v1  ;;  %v13717_v11 = vor.u32 %v16832_v25, %v13716_v61  ;;  %v16888_v15 = vld [vmem:[#allocation13 + $0xf1c] sm:$0xf0]  ;;  %v12054_v24 = vld [vmem:[#allocation13 + $0x60] sm:$0xf0]  ;;  %v18151_v37 = vpop.f32.mrf.mxu0 }
 0x294   :  { %v13941_v0 = vor.u32 %v16888_v15, %v13940_v10  ;;  %v13652_v48 = vld [vmem:[#allocation13 + $0xcc0] sm:$0xf]  ;;  %v16468_v1 = vld [vmem:[#allocation13 + $0x204] sm:$0xf] }
 0x295   :  { %v2759_v55 = vunpack.c.l.b16 %v2731_v6  ;;  %v2760_v59 = vunpack.c.h.b16 %v2731_v6  ;;  %v16880_v39 = vld [vmem:[#allocation13 + $0xedc] sm:$0xf0] }
 0x296   :  { %5978 = vmatpush.bf16.msrb.mxu0 %v12217_v44  ;;  %5992 = vmatpush.bf16.msrb.mxu1 %v12473_v50  ;;  %v2556_v32 = vpop.f32.mrf.mxu3  ;;  %v12086_v44 = vld [vmem:[#allocation13 + $0xa0] sm:$0xf0]  ;;  %v18139_v50 = vpop.f32.mrf.mxu1  ;;  %v16872_v25 = vld [vmem:[#allocation13 + $0xe9c] sm:$0xf0] }
 0x297   :  { %v2557_v43 = vadd.f32 %v2556_v32, %v2538_v17  ;;  %5964 = vmatpush.bf16.msra.mxu3 %v14005_v49  ;;  %5951 = vmatpush.bf16.msra.mxu2 %v13717_v11  ;;  %v16412_v17 = vld [vmem:[#allocation13 + $0x44] sm:$0xf]  ;;  %v12089_v27 = vor.u32 %v16420_v63, %v12086_v44  ;;  %v16816_v32 = vld [vmem:[#allocation13 + $0xcdc] sm:$0xf0]  ;;  %v13877_v11 = vor.u32 %v16872_v25, %v13876_v52  ;;  %v18157_v56 = vpop.f32.mrf.mxu2 }
 0x298   :  { %v13653_v21 = vor.u32 %v16816_v32, %v13652_v48  ;;  %v13529_v63 = vor.u32 %v16780_v8, %v13526_v45  ;;  %v13588_v44 = vld [vmem:[#allocation13 + $0xc40] sm:$0xf]  ;;  %v13142_v8 = vld [vmem:[#allocation13 + $0x8e0] sm:$0xf0] }
 0x299   :  { %v2724_v36 = vmax.f32 %v2557_v43, 0.0  ;;  %v16856_v48 = vld [vmem:[#allocation13 + $0xe1c] sm:$0xf0]  ;;  %v16748_v45 = vld [vmem:[#allocation13 + $0xac4] sm:$0xf] }
 0x29a   :  { %5979 = vmatpush.bf16.msrb.mxu0 %v12185_v51  ;;  %5993 = vmatpush.bf16.msrb.mxu1 %v12441_v34  ;;  %v13908_v51 = vld [vmem:[#allocation13 + $0xec0] sm:$0xf]  ;;  %v16476_v34 = vld [vmem:[#allocation13 + $0x244] sm:$0xf] }
 0x29b   :  { %v2733_v40 = vpack.c.bf16 %v2724_v36, %v2723_v23  ;;  %5965 = vmatpush.bf16.msra.mxu3 %v13973_v38  ;;  %5952 = vmatpush.bf16.msra.mxu2 %v13685_v19  ;;  %v13909_v43 = vor.u32 %v16880_v39, %v13908_v51  ;;  %v12057_v23 = vor.u32 %v16412_v17, %v12054_v24  ;;  %v13620_v36 = vld [vmem:[#allocation13 + $0xc80] sm:$0xf]  ;;  %v2644_v32 = vpop.f32.mrf.mxu0  ;;  %v13206_v51 = vld [vmem:[#allocation13 + $0x960] sm:$0xf0] }
 0x29c   :  { %v12313_v6 = vor.u32 %v16476_v34, %v12310_v35  ;;  %v13621_v61 = vor.u32 %v16808_v14, %v13620_v36  ;;  %v12025_v38 = vor.u32 %v16404_v46, %v12022_v2  ;;  %v13556_v19 = vld [vmem:[#allocation13 + $0xc00] sm:$0xf]  ;;  %v13497_v24 = vor.u32 %v16772_v58, %v13494_v26  ;;  %v16764_v34 = vld [vmem:[#allocation13 + $0xb44] sm:$0xf] }
 0x29d   :  { %v2763_v4 = vunpack.c.l.b16 %v2733_v40  ;;  %v2764_v33 = vunpack.c.h.b16 %v2733_v40  ;;  %v13270_v40 = vld [vmem:[#allocation13 + $0x9e0] sm:$0xf0] }
 0x29e   :  { %5980 = vmatpush.bf16.msrb.mxu0 %v12153_v42  ;;  %5994 = vmatpush.bf16.msrb.mxu1 %v12409_v62  ;;  %v18141_v60 = vpop.f32.mrf.mxu3  ;;  %v12278_v42 = vld [vmem:[#allocation13 + $0x220] sm:$0xf0]  ;;  %v18155_v20 = vpop.f32.mrf.mxu1 }
 0x29f   :  { %v18143_v7 = vpack.c.b16 %v2763_v4, %v2759_v55  ;;  %v18145_v28 = vpack.c.b16 %v2764_v33, %v2760_v59  ;;  %5966 = vmatpush.bf16.msra.mxu3 %v13941_v0  ;;  %v16716_v62 = vld [vmem:[#allocation13 + $0x9c4] sm:$0xf]  ;;  %5953 = vmatpush.bf16.msra.mxu2 %v13653_v21  ;;  %v12281_v55 = vor.u32 %v16468_v1, %v12278_v42  ;;  %v16792_v0 = vld [vmem:[#allocation13 + $0xc1c] sm:$0xf0]  ;;  %v18166_v42 = vperm.slane %v18064_v30, 2 }
 0x2a0   :  { %v16708_v59 = vld [vmem:[#allocation13 + $0x984] sm:$0xf]  ;;  %v13273_v33 = vor.u32 %v16716_v62, %v13270_v40  ;;  %v13557_v21 = vor.u32 %v16792_v0, %v13556_v19  ;;  %v18169_v62 = vperm.slane %v18064_v30, 3 }
 0x2a1   :  { %5929 = vmatmul.bf16.vlgmr.msra.gmra.mxu0 %v18143_v7  ;;  %5943 = vmatmul.bf16.vlgmr.msra.gmra.mxu1 %v18145_v28  ;;  %v13238_v4 = vld [vmem:[#allocation13 + $0x9a0] sm:$0xf0]  ;;  %v2569_v30 = vadd.f32 %v18101_v3, %v18166_v42  ;;  %v2571_v26 = vadd.f32 %v18127_v31, %v18166_v42 }
 0x2a2   :  { %5981 = vmatpush.bf16.msrb.mxu0 %v12121_v9  ;;  %5995 = vmatpush.bf16.msrb.mxu1 %v12377_v5  ;;  %v16800_v9 = vld [vmem:[#allocation13 + $0xc5c] sm:$0xf0]  ;;  %v13241_v17 = vor.u32 %v16708_v59, %v13238_v4  ;;  %v13462_v35 = vld [vmem:[#allocation13 + $0xb60] sm:$0xf0] }
 0x2a3   :  { %5967 = vmatpush.bf16.msra.mxu3 %v13909_v43  ;;  %5954 = vmatpush.bf16.msra.mxu2 %v13621_v61  ;;  %v13844_v5 = vld [vmem:[#allocation13 + $0xe40] sm:$0xf]  ;;  %v13589_v10 = vor.u32 %v16800_v9, %v13588_v44  ;;  %v13465_v2 = vor.u32 %v16764_v34, %v13462_v35  ;;  %v16692_v1 = vld [vmem:[#allocation13 + $0x904] sm:$0xf]  ;;  %v2590_v3 = vadd.f32 %v18131_v12, %v2571_v26 }
 0x2a4   :  { %v13845_v13 = vor.u32 %v16864_v47, %v13844_v5  ;;  %v16756_v36 = vld [vmem:[#allocation13 + $0xb04] sm:$0xf]  ;;  %v2574_v26 = vadd.f32 %v18137_v57, %v18166_v42 }
 0x2a5   :  { %v13430_v14 = vld [vmem:[#allocation13 + $0xb20] sm:$0xf0] }
 0x2a6   :  { %5982 = vmatpush.bf16.msrb.mxu0 %v12089_v27  ;;  %5996 = vmatpush.bf16.msrb.mxu1 %v12345_v41  ;;  %v18153_v49 = vpop.f32.mrf.mxu3  ;;  %v16700_v27 = vld [vmem:[#allocation13 + $0x944] sm:$0xf]  ;;  %v13812_v41 = vld [vmem:[#allocation13 + $0xe00] sm:$0xf]  ;;  %v2663_v43 = vpop.f32.mrf.mxu1  ;;  %v13433_v25 = vor.u32 %v16756_v36, %v13430_v14  ;;  %v2593_v57 = vadd.f32 %v18139_v50, %v2574_v26  ;;  %v16497_v26 = vld [vmem:[#allocation13 + $0x2e4] sm:$0xf0] }
 0x2a7   :  { %5968 = vmatpush.bf16.msra.mxu3 %v13877_v11  ;;  %5955 = vmatpush.bf16.msra.mxu2 %v13589_v10  ;;  %v13813_v39 = vor.u32 %v16856_v48, %v13812_v41  ;;  %v13209_v46 = vor.u32 %v16700_v27, %v13206_v51  ;;  %v16684_v40 = vld [vmem:[#allocation13 + $0x8c4] sm:$0xf]  ;;  %v2588_v10 = vadd.f32 %v18107_v18, %v2569_v30 }
 0x2a8   :  { %v13398_v11 = vld [vmem:[#allocation13 + $0xae0] sm:$0xf0]  ;;  %v13145_v59 = vor.u32 %v16684_v40, %v13142_v8  ;;  %v2609_v18 = vadd.f32 %v18135_v29, %v2590_v3  ;;  %v12188_v3 = vld [vmem:[#allocation13 + $0x148] sm:$0xf] }
 0x2a9   :  { %v13401_v4 = vor.u32 %v16748_v45, %v13398_v11  ;;  %v13110_v44 = vld [vmem:[#allocation13 + $0x8a0] sm:$0xf0]  ;;  %v2607_v51 = vadd.f32 %v18111_v22, %v2588_v10 }
 0x2aa   :  { %5983 = vmatpush.bf16.msrb.mxu0 %v12057_v23  ;;  %5997 = vmatpush.bf16.msrb.mxu1 %v12313_v6  ;;  %v2682_v23 = vpop.f32.mrf.mxu2  ;;  %v13174_v6 = vld [vmem:[#allocation13 + $0x920] sm:$0xf0]  ;;  %v2628_v36 = vadd.f32 %v18153_v49, %v2609_v18 }
 0x2ab   :  { %5969 = vmatpush.bf16.msra.mxu3 %v13845_v13  ;;  %5956 = vmatpush.bf16.msra.mxu2 %v13557_v21  ;;  %v13177_v61 = vor.u32 %v16692_v1, %v13174_v6  ;;  %v16740_v9 = vld [vmem:[#allocation13 + $0xa84] sm:$0xf]  ;;  %v2626_v35 = vadd.f32 %v18141_v60, %v2607_v51  ;;  %v16465_v6 = vld [vmem:[#allocation13 + $0x1e4] sm:$0xf0] }
 0x2ac   :  { %v13366_v5 = vld [vmem:[#allocation13 + $0xaa0] sm:$0xf0]  ;;  %v2717_v30 = vmax.f32 %v2628_v36, 0.0  ;;  %v16449_v51 = vld [vmem:[#allocation13 + $0x164] sm:$0xf0]  ;;  %v2612_v36 = vadd.f32 %v18147_v16, %v2593_v57 }
 0x2ad   :  { %v13078_v41 = vld [vmem:[#allocation13 + $0x860] sm:$0xf0]  ;;  %v2713_v60 = vmax.f32 %v2626_v35, 0.0  ;;  %v16489_v57 = vld [vmem:[#allocation13 + $0x2a4] sm:$0xf0] }
 0x2ae   :  { %5984 = vmatpush.bf16.msrb.mxu0 %v12025_v38  ;;  %5998 = vmatpush.bf16.msrb.mxu1 %v12281_v55  ;;  %v18159_v15 = vpop.f32.mrf.mxu3  ;;  %v2646_v38 = vpop.f32.mrf.mxu0  ;;  %v2645_v55 = vadd.f32 %v2644_v32, %v18169_v62  ;;  %v16732_v48 = vld [vmem:[#allocation13 + $0xa44] sm:$0xf] }
 0x2af   :  { %5970 = vmatpush.bf16.msra.mxu3 %v13813_v39  ;;  %v2647_v27 = vadd.f32 %v2646_v38, %v18169_v62  ;;  %v13334_v32 = vld [vmem:[#allocation13 + $0xa60] sm:$0xf0]  ;;  %v2631_v16 = vadd.f32 %v18159_v15, %v2612_v36 }
 0x2b0   :  { %v2664_v58 = vadd.f32 %v2663_v43, %v2645_v55  ;;  %v13337_v39 = vor.u32 %v16732_v48, %v13334_v32  ;;  %v16660_v43 = vld [vmem:[#allocation13 + $0x804] sm:$0xf] }
 0x2b1   :  { %5985 = vmatmul.bf16.vlgmr.msrb.gmra.mxu0 %v18117_v53  ;;  %5999 = vmatmul.bf16.vlgmr.msrb.gmra.mxu1 %v18119_v54  ;;  %v16724_v12 = vld [vmem:[#allocation13 + $0xa04] sm:$0xf] }
 0x2b2   :  { %6033 = vmatpush.bf16.msra.mxu0 %v13273_v33  ;;  %6047 = vmatpush.bf16.msra.mxu1 %v13529_v63  ;;  %v16676_v33 = vld [vmem:[#allocation13 + $0x884] sm:$0xf]  ;;  %v2665_v63 = vpop.f32.mrf.mxu1  ;;  %v2684_v47 = vpop.f32.mrf.mxu2  ;;  %v2683_v19 = vadd.f32 %v2682_v23, %v2664_v58  ;;  %v12252_v23 = vld [vmem:[#allocation13 + $0x1c8] sm:$0xf] }
 0x2b3   :  { %v13113_v0 = vor.u32 %v16676_v33, %v13110_v44  ;;  %v2666_v34 = vadd.f32 %v2665_v63, %v2647_v27  ;;  %v13302_v1 = vld [vmem:[#allocation13 + $0xa20] sm:$0xf0]  ;;  %v12253_v55 = vor.u32 %v16465_v6, %v12252_v23  ;;  %v16457_v33 = vld [vmem:[#allocation13 + $0x1a4] sm:$0xf0] }
 0x2b4   :  { %v13305_v11 = vor.u32 %v16724_v12, %v13302_v1  ;;  %v12476_v44 = vld [vmem:[#allocation13 + $0x388] sm:$0xf]  ;;  %v16588_v58 = vld [vmem:[#allocation13 + $0x5c4] sm:$0xf] }
 0x2b5   :  { %v2685_v22 = vadd.f32 %v2684_v47, %v2666_v34  ;;  %v12758_v47 = vld [vmem:[#allocation13 + $0x5e0] sm:$0xf0]  ;;  %v16513_v34 = vld [vmem:[#allocation13 + $0x364] sm:$0xf0] }
 0x2b6   :  { %6034 = vmatpush.bf16.msra.mxu0 %v13241_v17  ;;  %6048 = vmatpush.bf16.msra.mxu1 %v13497_v24  ;;  %v18163_v52 = vpop.f32.mrf.mxu3  ;;  %v13369_v17 = vor.u32 %v16740_v9, %v13366_v5  ;;  %v16668_v24 = vld [vmem:[#allocation13 + $0x844] sm:$0xf]  ;;  %v16521_v9 = vld [vmem:[#allocation13 + $0x3a4] sm:$0xf0] }
 0x2b7   :  { %v13081_v21 = vor.u32 %v16668_v24, %v13078_v41  ;;  %v12477_v24 = vor.u32 %v16521_v9, %v12476_v44  ;;  %v12726_v23 = vld [vmem:[#allocation13 + $0x5a0] sm:$0xf0]  ;;  %v16433_v44 = vld [vmem:[#allocation13 + $0xe4] sm:$0xf0] }
 0x2b8   :  { %v16644_v6 = vld [vmem:[#allocation13 + $0x784] sm:$0xf] }
 0x2b9   :  { %v12982_v50 = vld [vmem:[#allocation13 + $0x7a0] sm:$0xf0] }
 0x2ba   :  { %6035 = vmatpush.bf16.msra.mxu0 %v13209_v46  ;;  %6049 = vmatpush.bf16.msra.mxu1 %v13465_v2  ;;  %v13046_v46 = vld [vmem:[#allocation13 + $0x820] sm:$0xf0]  ;;  %v2649_v2 = vpop.f32.mrf.mxu0  ;;  %v2668_v29 = vpop.f32.mrf.mxu1 }
 0x2bb   :  { %v13049_v45 = vor.u32 %v16660_v43, %v13046_v46  ;;  %v2687_v38 = vpop.f32.mrf.mxu2  ;;  %v2650_v5 = vadd.f32 %v2649_v2, %v18169_v62  ;;  %v16580_v43 = vld [vmem:[#allocation13 + $0x584] sm:$0xf]  ;;  %v2576_v46 = vadd.f32 %v18151_v37, %v18166_v42 }
 0x2be   :  { %6036 = vmatpush.bf16.msra.mxu0 %v13177_v61  ;;  %6050 = vmatpush.bf16.msra.mxu1 %v13433_v25  ;;  %v2701_v13 = vpop.f32.mrf.mxu3  ;;  %v12508_v61 = vld [vmem:[#allocation13 + $0x3c8] sm:$0xf] }
 0x2bf   :  { %v2702_v31 = vadd.f32 %v2701_v13, %v2683_v19  ;;  %v16529_v25 = vld [vmem:[#allocation13 + $0x3e4] sm:$0xf0]  ;;  %v16652_v13 = vld [vmem:[#allocation13 + $0x7c4] sm:$0xf] }
 0x2c0   :  { %v13014_v19 = vld [vmem:[#allocation13 + $0x7e0] sm:$0xf0] }
 0x2c1   :  { %v2714_v14 = vmax.f32 %v2702_v31, 0.0  ;;  %v12444_v31 = vld [vmem:[#allocation13 + $0x348] sm:$0xf] }
 0x2c2   :  { %6037 = vmatpush.bf16.msra.mxu0 %v13145_v59  ;;  %6051 = vmatpush.bf16.msra.mxu1 %v13401_v4  ;;  %v12509_v59 = vor.u32 %v16529_v25, %v12508_v61  ;;  %v12220_v4 = vld [vmem:[#allocation13 + $0x188] sm:$0xf]  ;;  %v2651_v18 = vpop.f32.mrf.mxu0  ;;  %v12445_v61 = vor.u32 %v16513_v34, %v12444_v31 }
 0x2c3   :  { %v2728_v63 = vpack.c.bf16 %v2714_v14, %v2713_v60  ;;  %v12189_v14 = vor.u32 %v16449_v51, %v12188_v3  ;;  %v12156_v25 = vld [vmem:[#allocation13 + $0x108] sm:$0xf]  ;;  %v2652_v37 = vadd.f32 %v2651_v18, %v18169_v62  ;;  %v12694_v62 = vld [vmem:[#allocation13 + $0x560] sm:$0xf0] }
 0x2c4   :  { %v12412_v60 = vld [vmem:[#allocation13 + $0x308] sm:$0xf]  ;;  %v12918_v3 = vld [vmem:[#allocation13 + $0x720] sm:$0xf0] }
 0x2c5   :  { %v2741_v27 = vunpack.c.l.b16 %v2728_v63  ;;  %v2742_v41 = vunpack.c.h.b16 %v2728_v63  ;;  %v12348_v34 = vld [vmem:[#allocation13 + $0x288] sm:$0xf] }
 0x2c6   :  { %6038 = vmatpush.bf16.msra.mxu0 %v13113_v0  ;;  %6052 = vmatpush.bf16.msra.mxu1 %v13369_v17  ;;  %v2703_v40 = vpop.f32.mrf.mxu3  ;;  %v2669_v0 = vadd.f32 %v2668_v29, %v2650_v5  ;;  %v12221_v17 = vor.u32 %v16457_v33, %v12220_v4  ;;  %v2595_v29 = vadd.f32 %v18155_v20, %v2576_v46  ;;  %v16636_v4 = vld [vmem:[#allocation13 + $0x744] sm:$0xf] }
 0x2c7   :  { %v2704_v8 = vadd.f32 %v2703_v40, %v2685_v22  ;;  %v2670_v22 = vpop.f32.mrf.mxu1  ;;  %v16441_v40 = vld [vmem:[#allocation13 + $0x124] sm:$0xf0]  ;;  %v12950_v33 = vld [vmem:[#allocation13 + $0x760] sm:$0xf0] }
 0x2c8   :  { %v2688_v12 = vadd.f32 %v2687_v38, %v2669_v0  ;;  %v12985_v38 = vor.u32 %v16644_v6, %v12982_v50  ;;  %v2614_v20 = vadd.f32 %v18157_v56, %v2595_v29  ;;  %v16620_v46 = vld [vmem:[#allocation13 + $0x6c4] sm:$0xf]  ;;  %v12349_v6 = vor.u32 %v16489_v57, %v12348_v34  ;;  %v12060_v50 = vld [vmem:[#allocation13 + $0x48] sm:$0xf] }
 0x2c9   :  { %v2718_v49 = vmax.f32 %v2704_v8, 0.0  ;;  %v16505_v8 = vld [vmem:[#allocation13 + $0x324] sm:$0xf0]  ;;  %v13782_v34 = vld [vmem:[#allocation13 + $0xde0] sm:$0xf0] }
 0x2ca   :  { %6039 = vmatpush.bf16.msra.mxu0 %v13081_v21  ;;  %6053 = vmatpush.bf16.msra.mxu1 %v13337_v39  ;;  %v12761_v21 = vor.u32 %v16588_v58, %v12758_v47  ;;  %v13017_v39 = vor.u32 %v16652_v13, %v13014_v19  ;;  %v12413_v63 = vor.u32 %v16505_v8, %v12412_v60  ;;  %v12380_v58 = vld [vmem:[#allocation13 + $0x2c8] sm:$0xf]  ;;  %v16564_v19 = vld [vmem:[#allocation13 + $0x504] sm:$0xf] }
 0x2cb   :  { %v2730_v10 = vpack.c.bf16 %v2718_v49, %v2717_v30  ;;  %v12157_v30 = vor.u32 %v16441_v40, %v12156_v25  ;;  %v12124_v49 = vld [vmem:[#allocation13 + $0xc8] sm:$0xf]  ;;  %v2633_v15 = vadd.f32 %v18163_v52, %v2614_v20  ;;  %v12953_v13 = vor.u32 %v16636_v4, %v12950_v33  ;;  %v16548_v60 = vld [vmem:[#allocation13 + $0x484] sm:$0xf] }
 0x2cc   :  { %v12092_v52 = vld [vmem:[#allocation13 + $0x88] sm:$0xf]  ;;  %v16908_v57 = vld [vmem:[#allocation13 + $0xfc4] sm:$0xf] }
 0x2cd   :  { %v2745_v48 = vunpack.c.l.b16 %v2730_v10  ;;  %v2746_v32 = vunpack.c.h.b16 %v2730_v10  ;;  %v2721_v10 = vmax.f32 %v2631_v16, 0.0  ;;  %v16417_v25 = vld [vmem:[#allocation13 + $0x64] sm:$0xf0] }
 0x2ce   :  { %6040 = vmatpush.bf16.msra.mxu0 %v13049_v45  ;;  %6054 = vmatpush.bf16.msra.mxu1 %v13305_v11  ;;  %v2706_v35 = vpop.f32.mrf.mxu3  ;;  %v2689_v45 = vpop.f32.mrf.mxu2  ;;  %v12729_v11 = vor.u32 %v16580_v43, %v12726_v23  ;;  %v12630_v43 = vld [vmem:[#allocation13 + $0x4e0] sm:$0xf0]  ;;  %v12316_v29 = vld [vmem:[#allocation13 + $0x248] sm:$0xf] }
 0x2cf   :  { %v18191_v2 = vpack.c.b16 %v2745_v48, %v2741_v27  ;;  %v18193_v1 = vpack.c.b16 %v2746_v32, %v2742_v41  ;;  %v2707_v42 = vadd.f32 %v2706_v35, %v2688_v12  ;;  %v12125_v27 = vor.u32 %v16433_v44, %v12124_v49  ;;  %v16425_v48 = vld [vmem:[#allocation13 + $0xa4] sm:$0xf0]  ;;  %v12886_v12 = vld [vmem:[#allocation13 + $0x6e0] sm:$0xf0] }
 0x2d0   :  { %v12381_v41 = vor.u32 %v16497_v26, %v12380_v58  ;;  %v2725_v32 = vmax.f32 %v2633_v15, 0.0  ;;  %v12093_v23 = vor.u32 %v16425_v48, %v12092_v52  ;;  %v12889_v40 = vor.u32 %v16620_v46, %v12886_v12  ;;  %v12028_v20 = vld [vmem:[#allocation13 + $0x8] sm:$0xf]  ;;  %v12566_v58 = vld [vmem:[#allocation13 + $0x460] sm:$0xf0] }
 0x2d1   :  { %6041 = vmatmul.bf16.vlgmr.msra.gmra.mxu0 %v18143_v7  ;;  %6055 = vmatmul.bf16.vlgmr.msra.gmra.mxu1 %v18145_v28  ;;  %v2722_v5 = vmax.f32 %v2707_v42, 0.0  ;;  %v12284_v4 = vld [vmem:[#allocation13 + $0x208] sm:$0xf]  ;;  %v16604_v26 = vld [vmem:[#allocation13 + $0x644] sm:$0xf] }
 0x2d2   :  { %6089 = vmatpush.bf16.msrb.mxu0 %v12253_v55  ;;  %6103 = vmatpush.bf16.msrb.mxu1 %v12509_v59  ;;  %v16572_v55 = vld [vmem:[#allocation13 + $0x544] sm:$0xf]  ;;  %v2671_v59 = vadd.f32 %v2670_v22, %v2652_v37  ;;  %v16481_v37 = vld [vmem:[#allocation13 + $0x264] sm:$0xf0] }
 0x2d3   :  { %5901 = vmatmul.bf16.vlgmr.msrb.gmra.mxu2 %v18191_v2  ;;  %5915 = vmatmul.bf16.vlgmr.msrb.gmra.mxu3 %v18193_v1  ;;  %v12697_v56 = vor.u32 %v16572_v55, %v12694_v62  ;;  %v2732_v51 = vpack.c.bf16 %v2722_v5, %v2721_v10  ;;  %v12061_v55 = vor.u32 %v16417_v25, %v12060_v50  ;;  %v16409_v62 = vld [vmem:[#allocation13 + $0x24] sm:$0xf0]  ;;  %v16540_v5 = vld [vmem:[#allocation13 + $0x444] sm:$0xf] }
 0x2d4   :  { %6005 = vmatpush.bf16.msrb.mxu2 %v12761_v21  ;;  %6019 = vmatpush.bf16.msrb.mxu3 %v13017_v39  ;;  %v2690_v9 = vadd.f32 %v2689_v45, %v2671_v59  ;;  %v16556_v21 = vld [vmem:[#allocation13 + $0x4c4] sm:$0xf]  ;;  %v12317_v59 = vor.u32 %v16481_v37, %v12316_v29  ;;  %v16473_v33 = vld [vmem:[#allocation13 + $0x224] sm:$0xf0] }
 0x2d5   :  { %v2761_v36 = vunpack.c.l.b16 %v2732_v51  ;;  %v2762_v22 = vunpack.c.h.b16 %v2732_v51  ;;  %v12633_v42 = vor.u32 %v16556_v21, %v12630_v43  ;;  %v12598_v45 = vld [vmem:[#allocation13 + $0x4a0] sm:$0xf0]  ;;  %v13532_v15 = vld [vmem:[#allocation13 + $0xbc8] sm:$0xf] }
 0x2d6   :  { %6090 = vmatpush.bf16.msrb.mxu0 %v12221_v17  ;;  %6104 = vmatpush.bf16.msrb.mxu1 %v12477_v24  ;;  %v2708_v47 = vpop.f32.mrf.mxu3  ;;  %v12662_v17 = vld [vmem:[#allocation13 + $0x520] sm:$0xf0]  ;;  %v12601_v49 = vor.u32 %v16548_v60, %v12598_v45  ;;  %v16705_v12 = vld [vmem:[#allocation13 + $0x964] sm:$0xf0] }
 0x2d7   :  { %v2709_v0 = vadd.f32 %v2708_v47, %v2690_v9  ;;  %v16628_v24 = vld [vmem:[#allocation13 + $0x704] sm:$0xf]  ;;  %v12665_v18 = vor.u32 %v16564_v19, %v12662_v17  ;;  %v16785_v9 = vld [vmem:[#allocation13 + $0xbe4] sm:$0xf0]  ;;  %v12029_v47 = vor.u32 %v16409_v62, %v12028_v20 }
 0x2d8   :  { %6006 = vmatpush.bf16.msrb.mxu2 %v12729_v11  ;;  %6020 = vmatpush.bf16.msrb.mxu3 %v12985_v38  ;;  %v12921_v35 = vor.u32 %v16628_v24, %v12918_v3  ;;  %v16612_v11 = vld [vmem:[#allocation13 + $0x684] sm:$0xf]  ;;  %v13533_v19 = vor.u32 %v16785_v9, %v13532_v15  ;;  %v16713_v17 = vld [vmem:[#allocation13 + $0x9a4] sm:$0xf0]  ;;  %v12569_v3 = vor.u32 %v16540_v5, %v12566_v58 }
 0x2d9   :  { %v2726_v31 = vmax.f32 %v2709_v0, 0.0  ;;  %v12854_v38 = vld [vmem:[#allocation13 + $0x6a0] sm:$0xf0]  ;;  %v13244_v0 = vld [vmem:[#allocation13 + $0x988] sm:$0xf] }
 0x2da   :  { %6091 = vmatpush.bf16.msrb.mxu0 %v12189_v14  ;;  %6105 = vmatpush.bf16.msrb.mxu1 %v12445_v61  ;;  %v12857_v44 = vor.u32 %v16612_v11, %v12854_v38  ;;  %v12822_v10 = vld [vmem:[#allocation13 + $0x660] sm:$0xf0]  ;;  %v13500_v24 = vld [vmem:[#allocation13 + $0xb88] sm:$0xf] }
 0x2db   :  { %v2734_v39 = vpack.c.bf16 %v2726_v31, %v2725_v32  ;;  %v16532_v52 = vld [vmem:[#allocation13 + $0x404] sm:$0xf]  ;;  %v13436_v60 = vld [vmem:[#allocation13 + $0xb08] sm:$0xf] }
 0x2dc   :  { %6007 = vmatpush.bf16.msrb.mxu2 %v12697_v56  ;;  %6021 = vmatpush.bf16.msrb.mxu3 %v12953_v13  ;;  %v12285_v56 = vor.u32 %v16473_v33, %v12284_v4  ;;  %v12534_v48 = vld [vmem:[#allocation13 + $0x420] sm:$0xf0]  ;;  %v16761_v45 = vld [vmem:[#allocation13 + $0xb24] sm:$0xf0] }
 0x2dd   :  { %v2765_v14 = vunpack.c.l.b16 %v2734_v39  ;;  %v2766_v61 = vunpack.c.h.b16 %v2734_v39  ;;  %v16596_v32 = vld [vmem:[#allocation13 + $0x604] sm:$0xf]  ;;  %v13212_v39 = vld [vmem:[#allocation13 + $0x948] sm:$0xf]  ;;  %v12537_v43 = vor.u32 %v16532_v52, %v12534_v48  ;;  %v13437_v33 = vor.u32 %v16761_v45, %v13436_v60 }
 0x2de   :  { %6092 = vmatpush.bf16.msrb.mxu0 %v12157_v30  ;;  %6106 = vmatpush.bf16.msrb.mxu1 %v12413_v63  ;;  %v13276_v30 = vld [vmem:[#allocation13 + $0x9c8] sm:$0xf]  ;;  %v12790_v51 = vld [vmem:[#allocation13 + $0x620] sm:$0xf0]  ;;  %v13213_v29 = vor.u32 %v16705_v12, %v13212_v39 }
 0x2df   :  { %v18203_v8 = vpack.c.b16 %v2765_v14, %v2761_v36  ;;  %v18205_v16 = vpack.c.b16 %v2766_v61, %v2762_v22  ;;  %v16721_v63 = vld [vmem:[#allocation13 + $0x9e4] sm:$0xf0]  ;;  %v16844_v31 = vld [vmem:[#allocation13 + $0xdc4] sm:$0xf]  ;;  %v12793_v46 = vor.u32 %v16596_v32, %v12790_v51 }
 0x2e0   :  { %6008 = vmatpush.bf16.msrb.mxu2 %v12665_v18  ;;  %6022 = vmatpush.bf16.msrb.mxu3 %v12921_v35  ;;  %v13277_v13 = vor.u32 %v16721_v63, %v13276_v30  ;;  %v14038_v18 = vld [vmem:[#allocation13 + $0xfe0] sm:$0xf0]  ;;  %v13245_v35 = vor.u32 %v16713_v17, %v13244_v0  ;;  %v13785_v50 = vor.u32 %v16844_v31, %v13782_v34  ;;  %v13148_v30 = vld [vmem:[#allocation13 + $0x8c8] sm:$0xf] }
 0x2e1   :  { %v14041_v36 = vor.u32 %v16908_v57, %v14038_v18  ;;  %v16836_v22 = vld [vmem:[#allocation13 + $0xd84] sm:$0xf]  ;;  %v16689_v63 = vld [vmem:[#allocation13 + $0x8e4] sm:$0xf0] }
 0x2e2   :  { %6093 = vmatpush.bf16.msrb.mxu0 %v12125_v27  ;;  %6107 = vmatpush.bf16.msrb.mxu1 %v12381_v41  ;;  %v12825_v27 = vor.u32 %v16604_v26, %v12822_v10  ;;  %v16777_v41 = vld [vmem:[#allocation13 + $0xba4] sm:$0xf0]  ;;  %v13750_v14 = vld [vmem:[#allocation13 + $0xda0] sm:$0xf0] }
 0x2e3   :  { %5957 = vmatmul.bf16.vlgmr.msra.gmra.mxu2 %v18203_v8  ;;  %5971 = vmatmul.bf16.vlgmr.msra.gmra.mxu3 %v18205_v16  ;;  %v13501_v21 = vor.u32 %v16777_v41, %v13500_v24  ;;  %v16900_v61 = vld [vmem:[#allocation13 + $0xf84] sm:$0xf]  ;;  %v13753_v11 = vor.u32 %v16836_v22, %v13750_v14  ;;  %v13372_v0 = vld [vmem:[#allocation13 + $0xa88] sm:$0xf] }
 0x2e4   :  { %6009 = vmatpush.bf16.msrb.mxu2 %v12633_v42  ;;  %6023 = vmatpush.bf16.msrb.mxu3 %v12889_v40  ;;  %v14006_v25 = vld [vmem:[#allocation13 + $0xfa0] sm:$0xf0]  ;;  %v13180_v42 = vld [vmem:[#allocation13 + $0x908] sm:$0xf] }
 0x2e5   :  { %v16697_v40 = vld [vmem:[#allocation13 + $0x924] sm:$0xf0]  ;;  %v14009_v38 = vor.u32 %v16900_v61, %v14006_v25  ;;  %v16892_v20 = vld [vmem:[#allocation13 + $0xf44] sm:$0xf]  ;;  %v16461_v61 = vld [vmem:[#allocation13 + $0x1cc] sm:$0xf] }
 0x2e6   :  { %6094 = vmatpush.bf16.msrb.mxu0 %v12093_v23  ;;  %6108 = vmatpush.bf16.msrb.mxu1 %v12349_v6  ;;  %v13468_v23 = vld [vmem:[#allocation13 + $0xb48] sm:$0xf]  ;;  %v13974_v62 = vld [vmem:[#allocation13 + $0xf60] sm:$0xf0]  ;;  %v13181_v4 = vor.u32 %v16697_v40, %v13180_v42  ;;  %v12254_v25 = vld [vmem:[#allocation13 + $0x1e8] sm:$0xf0] }
 0x2e7   :  { %v16769_v6 = vld [vmem:[#allocation13 + $0xb64] sm:$0xf0]  ;;  %v13977_v9 = vor.u32 %v16892_v20, %v13974_v62  ;;  %v16820_v5 = vld [vmem:[#allocation13 + $0xd04] sm:$0xf]  ;;  %v16525_v42 = vld [vmem:[#allocation13 + $0x3cc] sm:$0xf]  ;;  %v12257_v20 = vor.u32 %v16461_v61, %v12254_v25 }
 0x2e8   :  { %6010 = vmatpush.bf16.msrb.mxu2 %v12601_v49  ;;  %6024 = vmatpush.bf16.msrb.mxu3 %v12857_v44  ;;  %v13469_v37 = vor.u32 %v16769_v6, %v13468_v23  ;;  %v13404_v49 = vld [vmem:[#allocation13 + $0xac8] sm:$0xf]  ;;  %v13686_v58 = vld [vmem:[#allocation13 + $0xd20] sm:$0xf0]  ;;  %v12510_v40 = vld [vmem:[#allocation13 + $0x3e8] sm:$0xf0] }
 0x2e9   :  { %v16753_v44 = vld [vmem:[#allocation13 + $0xae4] sm:$0xf0]  ;;  %v16884_v26 = vld [vmem:[#allocation13 + $0xf04] sm:$0xf]  ;;  %v13689_v24 = vor.u32 %v16820_v5, %v13686_v58  ;;  %v12513_v62 = vor.u32 %v16525_v42, %v12510_v40  ;;  %v16429_v40 = vld [vmem:[#allocation13 + $0xcc] sm:$0xf] }
 0x2ea   :  { %6095 = vmatpush.bf16.msrb.mxu0 %v12061_v55  ;;  %6109 = vmatpush.bf16.msrb.mxu1 %v12317_v59  ;;  %v16828_v55 = vld [vmem:[#allocation13 + $0xd44] sm:$0xf]  ;;  %v16745_v17 = vld [vmem:[#allocation13 + $0xaa4] sm:$0xf0] }
 0x2eb   :  { %v13718_v59 = vld [vmem:[#allocation13 + $0xd60] sm:$0xf0]  ;;  %v13373_v51 = vor.u32 %v16745_v17, %v13372_v0  ;;  %v13084_v31 = vld [vmem:[#allocation13 + $0x848] sm:$0xf] }
 0x2ec   :  { %6011 = vmatpush.bf16.msrb.mxu2 %v12569_v3  ;;  %6025 = vmatpush.bf16.msrb.mxu3 %v12825_v27  ;;  %v13721_v15 = vor.u32 %v16828_v55, %v13718_v59  ;;  %v13942_v10 = vld [vmem:[#allocation13 + $0xf20] sm:$0xf0]  ;;  %v16673_v34 = vld [vmem:[#allocation13 + $0x864] sm:$0xf0] }
 0x2ed   :  { %v13945_v3 = vor.u32 %v16884_v26, %v13942_v10  ;;  %v16812_v27 = vld [vmem:[#allocation13 + $0xcc4] sm:$0xf]  ;;  %v13340_v57 = vld [vmem:[#allocation13 + $0xa48] sm:$0xf]  ;;  %v13085_v23 = vor.u32 %v16673_v34, %v13084_v31 }
 0x2ee   :  { %6096 = vmatpush.bf16.msrb.mxu0 %v12029_v47  ;;  %6110 = vmatpush.bf16.msrb.mxu1 %v12285_v56  ;;  %v13149_v47 = vor.u32 %v16689_v63, %v13148_v30  ;;  %v13405_v56 = vor.u32 %v16753_v44, %v13404_v49  ;;  %v13654_v41 = vld [vmem:[#allocation13 + $0xce0] sm:$0xf0]  ;;  %v16737_v18 = vld [vmem:[#allocation13 + $0xa64] sm:$0xf0]  ;;  %v16517_v30 = vld [vmem:[#allocation13 + $0x38c] sm:$0xf] }
 0x2ef   :  { %v16876_v52 = vld [vmem:[#allocation13 + $0xec4] sm:$0xf]  ;;  %v13341_v6 = vor.u32 %v16737_v18, %v13340_v57  ;;  %v13308_v22 = vld [vmem:[#allocation13 + $0xa08] sm:$0xf]  ;;  %v12478_v44 = vld [vmem:[#allocation13 + $0x3a8] sm:$0xf0] }
 0x2f0   :  { %6012 = vmatpush.bf16.msrb.mxu2 %v12537_v43  ;;  %6026 = vmatpush.bf16.msrb.mxu3 %v12793_v46  ;;  %v13910_v48 = vld [vmem:[#allocation13 + $0xee0] sm:$0xf0]  ;;  %v16729_v14 = vld [vmem:[#allocation13 + $0xa24] sm:$0xf0] }
 0x2f1   :  { %6097 = vmatmul.bf16.vlgmr.msrb.gmra.mxu0 %v18117_v53  ;;  %6111 = vmatmul.bf16.vlgmr.msrb.gmra.mxu1 %v18119_v54  ;;  %v16804_v39 = vld [vmem:[#allocation13 + $0xc84] sm:$0xf]  ;;  %v13309_v59 = vor.u32 %v16729_v14, %v13308_v22  ;;  %v12764_v26 = vld [vmem:[#allocation13 + $0x5c8] sm:$0xf] }
 0x2f2   :  { %6145 = vmatpush.bf16.msra.mxu0 %v13277_v13  ;;  %6159 = vmatpush.bf16.msra.mxu1 %v13533_v19  ;;  %v13116_v13 = vld [vmem:[#allocation13 + $0x888] sm:$0xf]  ;;  %v13622_v43 = vld [vmem:[#allocation13 + $0xca0] sm:$0xf0] }
 0x2f3   :  { %6013 = vmatmul.bf16.vlgmr.msrb.gmra.mxu2 %v18191_v2  ;;  %6027 = vmatmul.bf16.vlgmr.msrb.gmra.mxu3 %v18193_v1  ;;  %v16681_v19 = vld [vmem:[#allocation13 + $0x8a4] sm:$0xf0]  ;;  %v16868_v46 = vld [vmem:[#allocation13 + $0xe84] sm:$0xf] }
 0x2f4   :  { %6061 = vmatpush.bf16.msra.mxu2 %v13785_v50  ;;  %6075 = vmatpush.bf16.msra.mxu3 %v14041_v36  ;;  %v13117_v32 = vor.u32 %v16681_v19, %v13116_v13  ;;  %v13878_v12 = vld [vmem:[#allocation13 + $0xea0] sm:$0xf0]  ;;  %v13052_v50 = vld [vmem:[#allocation13 + $0x808] sm:$0xf]  ;;  %v12481_v19 = vor.u32 %v16517_v30, %v12478_v44  ;;  %v12094_v44 = vld [vmem:[#allocation13 + $0xa8] sm:$0xf0] }
 0x2f5   :  { %v16665_v36 = vld [vmem:[#allocation13 + $0x824] sm:$0xf0]  ;;  %v16796_v60 = vld [vmem:[#allocation13 + $0xc44] sm:$0xf] }
 0x2f6   :  { %6146 = vmatpush.bf16.msra.mxu0 %v13245_v35  ;;  %6160 = vmatpush.bf16.msra.mxu1 %v13501_v21  ;;  %v13657_v35 = vor.u32 %v16812_v27, %v13654_v41  ;;  %v13913_v21 = vor.u32 %v16876_v52, %v13910_v48  ;;  %v13590_v45 = vld [vmem:[#allocation13 + $0xc60] sm:$0xf0]  ;;  %v13053_v55 = vor.u32 %v16665_v36, %v13052_v50  ;;  %v16593_v10 = vld [vmem:[#allocation13 + $0x5e4] sm:$0xf0]  ;;  %v16509_v27 = vld [vmem:[#allocation13 + $0x34c] sm:$0xf] }
 0x2f7   :  { %v13593_v63 = vor.u32 %v16796_v60, %v13590_v45  ;;  %v16852_v5 = vld [vmem:[#allocation13 + $0xe04] sm:$0xf]  ;;  %v12765_v41 = vor.u32 %v16593_v10, %v12764_v26  ;;  %v12446_v48 = vld [vmem:[#allocation13 + $0x368] sm:$0xf0]  ;;  %v16585_v31 = vld [vmem:[#allocation13 + $0x5a4] sm:$0xf0] }
 0x2f8   :  { %6062 = vmatpush.bf16.msra.mxu2 %v13753_v11  ;;  %6076 = vmatpush.bf16.msra.mxu3 %v14009_v38  ;;  %v16860_v11 = vld [vmem:[#allocation13 + $0xe44] sm:$0xf]  ;;  %v12988_v34 = vld [vmem:[#allocation13 + $0x788] sm:$0xf]  ;;  %v12126_v60 = vld [vmem:[#allocation13 + $0xe8] sm:$0xf0] }
 0x2f9   :  { %v13846_v38 = vld [vmem:[#allocation13 + $0xe60] sm:$0xf0]  ;;  %v16649_v57 = vld [vmem:[#allocation13 + $0x7a4] sm:$0xf0]  ;;  %v12129_v30 = vor.u32 %v16429_v40, %v12126_v60 }
 0x2fa   :  { %6147 = vmatpush.bf16.msra.mxu0 %v13213_v29  ;;  %6161 = vmatpush.bf16.msra.mxu1 %v13469_v37  ;;  %v13625_v29 = vor.u32 %v16804_v39, %v13622_v43  ;;  %v13881_v37 = vor.u32 %v16868_v46, %v13878_v12  ;;  %v13849_v49 = vor.u32 %v16860_v11, %v13846_v38  ;;  %v13814_v58 = vld [vmem:[#allocation13 + $0xe20] sm:$0xf0]  ;;  %v16437_v39 = vld [vmem:[#allocation13 + $0x10c] sm:$0xf]  ;;  %v12700_v50 = vld [vmem:[#allocation13 + $0x548] sm:$0xf] }
 0x2fb   :  { %v13817_v17 = vor.u32 %v16852_v5, %v13814_v58  ;;  %v12158_v43 = vld [vmem:[#allocation13 + $0x128] sm:$0xf0]  ;;  %v12989_v12 = vor.u32 %v16649_v57, %v12988_v34  ;;  %v16577_v36 = vld [vmem:[#allocation13 + $0x564] sm:$0xf0] }
 0x2fc   :  { %6063 = vmatpush.bf16.msra.mxu2 %v13721_v15  ;;  %6077 = vmatpush.bf16.msra.mxu3 %v13977_v9  ;;  %v16788_v15 = vld [vmem:[#allocation13 + $0xc04] sm:$0xf]  ;;  %v12956_v22 = vld [vmem:[#allocation13 + $0x748] sm:$0xf]  ;;  %v12701_v45 = vor.u32 %v16577_v36, %v12700_v50  ;;  %v16493_v38 = vld [vmem:[#allocation13 + $0x2cc] sm:$0xf] }
 0x2fd   :  { %v13558_v9 = vld [vmem:[#allocation13 + $0xc20] sm:$0xf0]  ;;  %v16641_v14 = vld [vmem:[#allocation13 + $0x764] sm:$0xf0]  ;;  %v16485_v5 = vld [vmem:[#allocation13 + $0x28c] sm:$0xf] }
 0x2fe   :  { %6148 = vmatpush.bf16.msra.mxu0 %v13181_v4  ;;  %6162 = vmatpush.bf16.msra.mxu1 %v13437_v33  ;;  %v16453_v4 = vld [vmem:[#allocation13 + $0x18c] sm:$0xf]  ;;  %v13561_v0 = vor.u32 %v16788_v15, %v13558_v9  ;;  %v12957_v11 = vor.u32 %v16641_v14, %v12956_v22  ;;  %v12636_v26 = vld [vmem:[#allocation13 + $0x4c8] sm:$0xf] }
 0x2ff   :  { %v12222_v33 = vld [vmem:[#allocation13 + $0x1a8] sm:$0xf0]  ;;  %v16561_v10 = vld [vmem:[#allocation13 + $0x4e4] sm:$0xf0] }
 0x300   :  { %6064 = vmatpush.bf16.msra.mxu2 %v13689_v24  ;;  %6078 = vmatpush.bf16.msra.mxu3 %v13945_v3  ;;  %v12225_v13 = vor.u32 %v16453_v4, %v12222_v33  ;;  %v16445_v24 = vld [vmem:[#allocation13 + $0x14c] sm:$0xf]  ;;  %v12924_v4 = vld [vmem:[#allocation13 + $0x708] sm:$0xf] }
 0x301   :  { %v12190_v3 = vld [vmem:[#allocation13 + $0x168] sm:$0xf0]  ;;  %v16633_v33 = vld [vmem:[#allocation13 + $0x724] sm:$0xf0] }
 0x302   :  { %6149 = vmatpush.bf16.msra.mxu0 %v13149_v47  ;;  %6163 = vmatpush.bf16.msra.mxu1 %v13405_v56  ;;  %v13020_v47 = vld [vmem:[#allocation13 + $0x7c8] sm:$0xf]  ;;  %v12193_v18 = vor.u32 %v16445_v24, %v12190_v3  ;;  %v12925_v9 = vor.u32 %v16633_v33, %v12924_v4  ;;  %v12350_v58 = vld [vmem:[#allocation13 + $0x2a8] sm:$0xf0] }
 0x303   :  { %v16657_v56 = vld [vmem:[#allocation13 + $0x7e4] sm:$0xf0]  ;;  %v16413_v24 = vld [vmem:[#allocation13 + $0x4c] sm:$0xf] }
 0x304   :  { %6065 = vmatpush.bf16.msra.mxu2 %v13657_v35  ;;  %6079 = vmatpush.bf16.msra.mxu3 %v13913_v21  ;;  %v13021_v52 = vor.u32 %v16657_v56, %v13020_v47  ;;  %v12449_v35 = vor.u32 %v16509_v27, %v12446_v48  ;;  %v12892_v47 = vld [vmem:[#allocation13 + $0x6c8] sm:$0xf]  ;;  %v12062_v3 = vld [vmem:[#allocation13 + $0x68] sm:$0xf0]  ;;  %v12637_v27 = vor.u32 %v16561_v10, %v12636_v26 }
 0x305   :  { %v16625_v56 = vld [vmem:[#allocation13 + $0x6e4] sm:$0xf0]  ;;  %v12318_v48 = vld [vmem:[#allocation13 + $0x268] sm:$0xf0] }
 0x306   :  { %6150 = vmatpush.bf16.msra.mxu0 %v13117_v32  ;;  %6164 = vmatpush.bf16.msra.mxu1 %v13373_v51  ;;  %v18215_v32 = vld [vmem:[#allocation14] sm:$0xff]  ;;  %v12732_v51 = vld [vmem:[#allocation13 + $0x588] sm:$0xf]  ;;  %v16717_v50 = vld [vmem:[#allocation13 + $0x9cc] sm:$0xf] }
 0x307   :  { %v18881_v21 = vperm.slane %v18215_v32, 0  ;;  %v12733_v46 = vor.u32 %v16585_v31, %v12732_v51  ;;  %v12604_v51 = vld [vmem:[#allocation13 + $0x488] sm:$0xf]  ;;  %v13278_v36 = vld [vmem:[#allocation13 + $0x9e8] sm:$0xf0] }
 0x308   :  { %6066 = vmatpush.bf16.msra.mxu2 %v13625_v29  ;;  %6080 = vmatpush.bf16.msra.mxu3 %v13881_v37  ;;  %v12161_v37 = vor.u32 %v16437_v39, %v12158_v43  ;;  %v16553_v31 = vld [vmem:[#allocation13 + $0x4a4] sm:$0xf0]  ;;  %v16405_v39 = vld [vmem:[#allocation13 + $0xc] sm:$0xf] }
 0x309   :  { %v12860_v34 = vld [vmem:[#allocation13 + $0x688] sm:$0xf]  ;;  %v12030_v43 = vld [vmem:[#allocation13 + $0x28] sm:$0xf0] }
 0x30a   :  { %6151 = vmatpush.bf16.msra.mxu0 %v13085_v23  ;;  %6165 = vmatpush.bf16.msra.mxu1 %v13341_v6  ;;  %v16501_v23 = vld [vmem:[#allocation13 + $0x30c] sm:$0xf]  ;;  %v16617_v57 = vld [vmem:[#allocation13 + $0x6a4] sm:$0xf0]  ;;  %v12033_v60 = vor.u32 %v16405_v39, %v12030_v43  ;;  %v3290_v43 = vperm.slane %v18215_v32, 1 }
 0x30b   :  { %v12414_v6 = vld [vmem:[#allocation13 + $0x328] sm:$0xf0]  ;;  %v16609_v40 = vld [vmem:[#allocation13 + $0x664] sm:$0xf0] }
 0x30c   :  { %6067 = vmatpush.bf16.msra.mxu2 %v13593_v63  ;;  %6081 = vmatpush.bf16.msra.mxu3 %v13849_v49  ;;  %v12417_v42 = vor.u32 %v16501_v23, %v12414_v6  ;;  %v16421_v49 = vld [vmem:[#allocation13 + $0x8c] sm:$0xf]  ;;  %v12861_v23 = vor.u32 %v16617_v57, %v12860_v34  ;;  %v16913_v26 = vld [vmem:[#allocation13 + $0xfe4] sm:$0xf0] }
 0x30d   :  { %v12286_v6 = vld [vmem:[#allocation13 + $0x228] sm:$0xf0]  ;;  %v16841_v34 = vld [vmem:[#allocation13 + $0xda4] sm:$0xf0] }
 0x30e   :  { %6152 = vmatpush.bf16.msra.mxu0 %v13053_v55  ;;  %6166 = vmatpush.bf16.msra.mxu1 %v13309_v59  ;;  %v5874_v61 = vpop.f32.mrf.mxu0  ;;  %v5888_v25 = vpop.f32.mrf.mxu1  ;;  %v12382_v55 = vld [vmem:[#allocation13 + $0x2e8] sm:$0xf0]  ;;  %v12668_v59 = vld [vmem:[#allocation13 + $0x508] sm:$0xf] }
 0x30f   :  { %v5875_v29 = vadd.f32 %v5874_v61, %v18881_v21  ;;  %v12385_v63 = vor.u32 %v16493_v38, %v12382_v55  ;;  %v16781_v22 = vld [vmem:[#allocation13 + $0xbcc] sm:$0xf]  ;;  %v12572_v61 = vld [vmem:[#allocation13 + $0x448] sm:$0xf]  ;;  %v13830_v21 = vld [vmem:[#allocation13 + $0xe30] sm:$0xf0] }
 0x310   :  { %6068 = vmatpush.bf16.msra.mxu2 %v13561_v0  ;;  %6082 = vmatpush.bf16.msra.mxu3 %v13817_v17  ;;  %v12097_v0 = vor.u32 %v16421_v49, %v12094_v44  ;;  %v12353_v17 = vor.u32 %v16485_v5, %v12350_v58  ;;  %v13534_v14 = vld [vmem:[#allocation13 + $0xbe8] sm:$0xf0]  ;;  %v16537_v49 = vld [vmem:[#allocation13 + $0x424] sm:$0xf0] }
 0x311   :  { %6153 = vmatmul.bf16.vlgmr.msra.gmra.mxu0 %v18143_v7  ;;  %6167 = vmatmul.bf16.vlgmr.msra.gmra.mxu1 %v18145_v28  ;;  %v13537_v38 = vor.u32 %v16781_v22, %v13534_v14  ;;  %v16709_v55 = vld [vmem:[#allocation13 + $0x98c] sm:$0xf]  ;;  %v12796_v44 = vld [vmem:[#allocation13 + $0x608] sm:$0xf] }
 0x312   :  { %6201 = vmatpush.bf16.msrb.mxu0 %v12257_v20  ;;  %6215 = vmatpush.bf16.msrb.mxu1 %v12513_v62  ;;  %v18222_v20 = vadd.f32 %v5888_v25, %v5875_v29  ;;  %v16569_v62 = vld [vmem:[#allocation13 + $0x524] sm:$0xf0] }
 0x313   :  { %6069 = vmatmul.bf16.vlgmr.msra.gmra.mxu2 %v18203_v8  ;;  %6083 = vmatmul.bf16.vlgmr.msra.gmra.mxu3 %v18205_v16  ;;  %v12669_v15 = vor.u32 %v16569_v62, %v12668_v59  ;;  %v13246_v59 = vld [vmem:[#allocation13 + $0x9a8] sm:$0xf0]  ;;  %v16849_v5 = vld [vmem:[#allocation13 + $0xde4] sm:$0xf0] }
 0x314   :  { %6117 = vmatpush.bf16.msrb.mxu2 %v12765_v41  ;;  %6131 = vmatpush.bf16.msrb.mxu3 %v13021_v52  ;;  %v12893_v41 = vor.u32 %v16625_v56, %v12892_v47  ;;  %v16477_v52 = vld [vmem:[#allocation13 + $0x24c] sm:$0xf]  ;;  %v14044_v58 = vld [vmem:[#allocation13 + $0xfc8] sm:$0xf]  ;;  %v13249_v10 = vor.u32 %v16709_v55, %v13246_v59 }
 0x315   :  { %v16773_v62 = vld [vmem:[#allocation13 + $0xb8c] sm:$0xf]  ;;  %v14012_v57 = vld [vmem:[#allocation13 + $0xf88] sm:$0xf] }
 0x316   :  { %6202 = vmatpush.bf16.msrb.mxu0 %v12225_v13  ;;  %6216 = vmatpush.bf16.msrb.mxu1 %v12481_v19  ;;  %v18224_v13 = vpop.f32.mrf.mxu0  ;;  %v18226_v19 = vpop.f32.mrf.mxu1  ;;  %v13724_v22 = vld [vmem:[#allocation13 + $0xd48] sm:$0xf]  ;;  %v16749_v59 = vld [vmem:[#allocation13 + $0xacc] sm:$0xf] }
 0x317   :  { %v16833_v14 = vld [vmem:[#allocation13 + $0xd64] sm:$0xf0] }
 0x318   :  { %6118 = vmatpush.bf16.msrb.mxu2 %v12733_v46  ;;  %6132 = vmatpush.bf16.msrb.mxu3 %v12989_v12  ;;  %v16469_v46 = vld [vmem:[#allocation13 + $0x20c] sm:$0xf]  ;;  %v12605_v12 = vor.u32 %v16553_v31, %v12604_v51  ;;  %v13756_v31 = vld [vmem:[#allocation13 + $0xd88] sm:$0xf] }
 0x319   :  { %v13470_v51 = vld [vmem:[#allocation13 + $0xb68] sm:$0xf0] }
 0x31a   :  { %6203 = vmatpush.bf16.msrb.mxu0 %v12193_v18  ;;  %6217 = vmatpush.bf16.msrb.mxu1 %v12449_v35  ;;  %v12065_v18 = vor.u32 %v16413_v24, %v12062_v3  ;;  %v12321_v35 = vor.u32 %v16477_v52, %v12318_v48  ;;  %v13214_v24 = vld [vmem:[#allocation13 + $0x968] sm:$0xf0]  ;;  %v14045_v52 = vor.u32 %v16913_v26, %v14044_v58 }
 0x31b   :  { %v16765_v48 = vld [vmem:[#allocation13 + $0xb4c] sm:$0xf] }
 0x31c   :  { %6119 = vmatpush.bf16.msrb.mxu2 %v12701_v45  ;;  %6133 = vmatpush.bf16.msrb.mxu3 %v12957_v11  ;;  %v12289_v45 = vor.u32 %v16469_v46, %v12286_v6  ;;  %v13281_v11 = vor.u32 %v16717_v50, %v13278_v36  ;;  %v13473_v39 = vor.u32 %v16765_v48, %v13470_v51  ;;  %v16693_v46 = vld [vmem:[#allocation13 + $0x90c] sm:$0xf] }
 0x31d   :  { %v16757_v50 = vld [vmem:[#allocation13 + $0xb0c] sm:$0xf] }
 0x31e   :  { %6204 = vmatpush.bf16.msrb.mxu0 %v12161_v37  ;;  %6218 = vmatpush.bf16.msrb.mxu1 %v12417_v42  ;;  %v18228_v25 = vpop.f32.mrf.mxu0  ;;  %v18230_v29 = vpop.f32.mrf.mxu1  ;;  %v16545_v37 = vld [vmem:[#allocation13 + $0x464] sm:$0xf0]  ;;  %v13438_v36 = vld [vmem:[#allocation13 + $0xb28] sm:$0xf0] }
 0x31f   :  { %v12828_v42 = vld [vmem:[#allocation13 + $0x648] sm:$0xf]  ;;  %v12573_v4 = vor.u32 %v16545_v37, %v12572_v61  ;;  %v16677_v58 = vld [vmem:[#allocation13 + $0x88c] sm:$0xf] }
 0x320   :  { %6120 = vmatpush.bf16.msrb.mxu2 %v12669_v15  ;;  %6134 = vmatpush.bf16.msrb.mxu3 %v12925_v9  ;;  %v12829_v33 = vor.u32 %v16609_v40, %v12828_v42  ;;  %v16601_v15 = vld [vmem:[#allocation13 + $0x624] sm:$0xf0]  ;;  %v13441_v40 = vor.u32 %v16757_v50, %v13438_v36  ;;  %v13118_v26 = vld [vmem:[#allocation13 + $0x8a8] sm:$0xf0] }
 0x321   :  { %v13788_v9 = vld [vmem:[#allocation13 + $0xdc8] sm:$0xf]  ;;  %v13121_v48 = vor.u32 %v16677_v58, %v13118_v26 }
 0x322   :  { %6205 = vmatpush.bf16.msrb.mxu0 %v12129_v30  ;;  %6219 = vmatpush.bf16.msrb.mxu1 %v12385_v63  ;;  %v13502_v30 = vld [vmem:[#allocation13 + $0xba8] sm:$0xf0]  ;;  %v12540_v63 = vld [vmem:[#allocation13 + $0x408] sm:$0xf] }
 0x323   :  { %v13505_v47 = vor.u32 %v16773_v62, %v13502_v30  ;;  %v12541_v56 = vor.u32 %v16537_v49, %v12540_v63  ;;  %v13980_v61 = vld [vmem:[#allocation13 + $0xf48] sm:$0xf]  ;;  %v13406_v62 = vld [vmem:[#allocation13 + $0xae8] sm:$0xf0] }
 0x324   :  { %6121 = vmatpush.bf16.msrb.mxu2 %v12637_v27  ;;  %6135 = vmatpush.bf16.msrb.mxu3 %v12893_v41  ;;  %v13789_v41 = vor.u32 %v16849_v5, %v13788_v9  ;;  %v16897_v37 = vld [vmem:[#allocation13 + $0xf64] sm:$0xf0]  ;;  %v13409_v5 = vor.u32 %v16749_v59, %v13406_v62 }
 0x325   :  { %v13981_v55 = vor.u32 %v16897_v37, %v13980_v61  ;;  %v16825_v30 = vld [vmem:[#allocation13 + $0xd24] sm:$0xf0]  ;;  %v16725_v61 = vld [vmem:[#allocation13 + $0xa0c] sm:$0xf] }
 0x326   :  { %6206 = vmatpush.bf16.msrb.mxu0 %v12097_v0  ;;  %6220 = vmatpush.bf16.msrb.mxu1 %v12353_v17  ;;  %v12797_v0 = vor.u32 %v16601_v15, %v12796_v44  ;;  %v16701_v17 = vld [vmem:[#allocation13 + $0x94c] sm:$0xf]  ;;  %v18234_v3 = vpop.f32.mrf.mxu0  ;;  %v18236_v27 = vpop.f32.mrf.mxu1  ;;  %v13948_v63 = vld [vmem:[#allocation13 + $0xf08] sm:$0xf] }
 0x327   :  { %v16889_v49 = vld [vmem:[#allocation13 + $0xf24] sm:$0xf0] }
 0x328   :  { %6122 = vmatpush.bf16.msrb.mxu2 %v12605_v12  ;;  %6136 = vmatpush.bf16.msrb.mxu3 %v12861_v23  ;;  %v13182_v12 = vld [vmem:[#allocation13 + $0x928] sm:$0xf0]  ;;  %v13757_v23 = vor.u32 %v16841_v34, %v13756_v31  ;;  %v16801_v59 = vld [vmem:[#allocation13 + $0xc64] sm:$0xf0] }
 0x329   :  { %v13185_v42 = vor.u32 %v16693_v46, %v13182_v12  ;;  %v16669_v31 = vld [vmem:[#allocation13 + $0x84c] sm:$0xf]  ;;  %v13628_v46 = vld [vmem:[#allocation13 + $0xc88] sm:$0xf] }
 0x32a   :  { %6207 = vmatpush.bf16.msrb.mxu0 %v12065_v18  ;;  %6221 = vmatpush.bf16.msrb.mxu1 %v12321_v35  ;;  %v16905_v18 = vld [vmem:[#allocation13 + $0xfa4] sm:$0xf0]  ;;  %v13217_v35 = vor.u32 %v16701_v17, %v13214_v24  ;;  %v13086_v34 = vld [vmem:[#allocation13 + $0x868] sm:$0xf0] }
 0x32b   :  { %v14013_v6 = vor.u32 %v16905_v18, %v14012_v57  ;;  %v13660_v17 = vld [vmem:[#allocation13 + $0xcc8] sm:$0xf]  ;;  %v13089_v50 = vor.u32 %v16669_v31, %v13086_v34 }
 0x32c   :  { %6123 = vmatpush.bf16.msrb.mxu2 %v12573_v4  ;;  %6137 = vmatpush.bf16.msrb.mxu3 %v12829_v33  ;;  %v13692_v4 = vld [vmem:[#allocation13 + $0xd08] sm:$0xf] }
 0x32d   :  { %v16817_v24 = vld [vmem:[#allocation13 + $0xce4] sm:$0xf0] }
 0x32e   :  { %6208 = vmatpush.bf16.msrb.mxu0 %v12033_v60  ;;  %6222 = vmatpush.bf16.msrb.mxu1 %v12289_v45  ;;  %v16685_v60 = vld [vmem:[#allocation13 + $0x8cc] sm:$0xf]  ;;  %v6000_v44 = vpop.f32.mrf.mxu1  ;;  %v13661_v57 = vor.u32 %v16817_v24, %v13660_v17  ;;  %v16809_v12 = vld [vmem:[#allocation13 + $0xca4] sm:$0xf0] }
 0x32f   :  { %v13150_v45 = vld [vmem:[#allocation13 + $0x8e8] sm:$0xf0]  ;;  %v13629_v37 = vor.u32 %v16809_v12, %v13628_v46  ;;  %v13852_v62 = vld [vmem:[#allocation13 + $0xe48] sm:$0xf]  ;;  %v12452_v12 = vld [vmem:[#allocation13 + $0x350] sm:$0xf] }
 0x330   :  { %6124 = vmatpush.bf16.msrb.mxu2 %v12541_v56  ;;  %6138 = vmatpush.bf16.msrb.mxu3 %v12797_v0  ;;  %v13153_v9 = vor.u32 %v16685_v60, %v13150_v45  ;;  %v16741_v56 = vld [vmem:[#allocation13 + $0xa8c] sm:$0xf]  ;;  %v12260_v60 = vld [vmem:[#allocation13 + $0x1d0] sm:$0xf]  ;;  %v16857_v17 = vld [vmem:[#allocation13 + $0xe24] sm:$0xf0] }
 0x331   :  { %6209 = vmatmul.bf16.vlgmr.msrb.gmra.mxu0 %v18117_v53  ;;  %6223 = vmatmul.bf16.vlgmr.msrb.gmra.mxu1 %v18119_v54  ;;  %v13374_v0 = vld [vmem:[#allocation13 + $0xaa8] sm:$0xf0]  ;;  %v16466_v45 = vld [vmem:[#allocation13 + $0x1ec] sm:$0xf0] }
 0x332   :  { %6257 = vmatpush.bf16.msra.mxu0 %v13281_v11  ;;  %6271 = vmatpush.bf16.msra.mxu1 %v13537_v38  ;;  %v5986_v11 = vpop.f32.mrf.mxu0  ;;  %v13725_v38 = vor.u32 %v16833_v14, %v13724_v22  ;;  %v13377_v51 = vor.u32 %v16741_v56, %v13374_v0  ;;  %v16661_v22 = vld [vmem:[#allocation13 + $0x80c] sm:$0xf]  ;;  %v16793_v56 = vld [vmem:[#allocation13 + $0xc24] sm:$0xf0] }
 0x333   :  { %6125 = vmatmul.bf16.vlgmr.msrb.gmra.mxu2 %v18191_v2  ;;  %6139 = vmatmul.bf16.vlgmr.msrb.gmra.mxu3 %v18193_v1  ;;  %v5987_v33 = vadd.f32 %v5986_v11, %v3290_v43  ;;  %v13054_v14 = vld [vmem:[#allocation13 + $0x828] sm:$0xf0]  ;;  %v12516_v11 = vld [vmem:[#allocation13 + $0x3d0] sm:$0xf]  ;;  %v13820_v0 = vld [vmem:[#allocation13 + $0xe08] sm:$0xf] }
 0x334   :  { %6173 = vmatpush.bf16.msra.mxu2 %v13789_v41  ;;  %6187 = vmatpush.bf16.msra.mxu3 %v14045_v52  ;;  %v13916_v41 = vld [vmem:[#allocation13 + $0xec8] sm:$0xf]  ;;  %v16589_v24 = vld [vmem:[#allocation13 + $0x5cc] sm:$0xf] }
 0x335   :  { %v18243_v15 = vadd.f32 %v6000_v44, %v5987_v33  ;;  %v16881_v52 = vld [vmem:[#allocation13 + $0xee4] sm:$0xf0]  ;;  %v13057_v33 = vor.u32 %v16661_v22, %v13054_v14  ;;  %v12228_v44 = vld [vmem:[#allocation13 + $0x190] sm:$0xf]  ;;  %v12990_v22 = vld [vmem:[#allocation13 + $0x7a8] sm:$0xf0] }
 0x336   :  { %6258 = vmatpush.bf16.msra.mxu0 %v13249_v10  ;;  %6272 = vmatpush.bf16.msra.mxu1 %v13505_v47  ;;  %v13693_v10 = vor.u32 %v16825_v30, %v13692_v4  ;;  %v13949_v47 = vor.u32 %v16889_v49, %v13948_v63  ;;  %v13917_v18 = vor.u32 %v16881_v52, %v13916_v41  ;;  %v16865_v4 = vld [vmem:[#allocation13 + $0xe64] sm:$0xf0]  ;;  %v12766_v41 = vld [vmem:[#allocation13 + $0x5e8] sm:$0xf0] }
 0x337   :  { %v12261_v63 = vor.u32 %v16466_v45, %v12260_v60  ;;  %v13853_v26 = vor.u32 %v16865_v4, %v13852_v62  ;;  %v16653_v52 = vld [vmem:[#allocation13 + $0x7cc] sm:$0xf]  ;;  %v12420_v45 = vld [vmem:[#allocation13 + $0x310] sm:$0xf] }
 0x338   :  { %6174 = vmatpush.bf16.msra.mxu2 %v13757_v23  ;;  %6188 = vmatpush.bf16.msra.mxu3 %v14013_v6  ;;  %v13884_v23 = vld [vmem:[#allocation13 + $0xe88] sm:$0xf]  ;;  %v12958_v62 = vld [vmem:[#allocation13 + $0x768] sm:$0xf0] }
 0x339   :  { %v16873_v6 = vld [vmem:[#allocation13 + $0xea4] sm:$0xf0] }
 0x33a   :  { %6259 = vmatpush.bf16.msra.mxu0 %v13217_v35  ;;  %6273 = vmatpush.bf16.msra.mxu1 %v13473_v39  ;;  %v16733_v35 = vld [vmem:[#allocation13 + $0xa4c] sm:$0xf] }
 0x33b   :  { %v13342_v39 = vld [vmem:[#allocation13 + $0xa68] sm:$0xf0] }
 0x33c   :  { %6175 = vmatpush.bf16.msra.mxu2 %v13725_v38  ;;  %6189 = vmatpush.bf16.msra.mxu3 %v13981_v55  ;;  %v13345_v36 = vor.u32 %v16733_v35, %v13342_v39  ;;  %v16530_v38 = vld [vmem:[#allocation13 + $0x3ec] sm:$0xf0]  ;;  %v13596_v55 = vld [vmem:[#allocation13 + $0xc48] sm:$0xf]  ;;  %v12769_v39 = vor.u32 %v16589_v24, %v12766_v41 }
 0x33d   :  { %v12517_v49 = vor.u32 %v16530_v38, %v12516_v11  ;;  %v13597_v58 = vor.u32 %v16801_v59, %v13596_v55  ;;  %v16450_v35 = vld [vmem:[#allocation13 + $0x16c] sm:$0xf0]  ;;  %v16573_v38 = vld [vmem:[#allocation13 + $0x54c] sm:$0xf] }
 0x33e   :  { %6260 = vmatpush.bf16.msra.mxu0 %v13185_v42  ;;  %6274 = vmatpush.bf16.msra.mxu1 %v13441_v40  ;;  %v13885_v42 = vor.u32 %v16873_v6, %v13884_v23  ;;  %v13310_v40 = vld [vmem:[#allocation13 + $0xa28] sm:$0xf0]  ;;  %v16514_v23 = vld [vmem:[#allocation13 + $0x36c] sm:$0xf0] }
 0x33f   :  { %v13313_v30 = vor.u32 %v16725_v61, %v13310_v40  ;;  %v16581_v6 = vld [vmem:[#allocation13 + $0x58c] sm:$0xf]  ;;  %v12453_v61 = vor.u32 %v16514_v23, %v12452_v12  ;;  %v16506_v11 = vld [vmem:[#allocation13 + $0x32c] sm:$0xf0] }
 0x340   :  { %6176 = vmatpush.bf16.msra.mxu2 %v13693_v10  ;;  %6190 = vmatpush.bf16.msra.mxu3 %v13949_v47  ;;  %v16522_v10 = vld [vmem:[#allocation13 + $0x3ac] sm:$0xf0]  ;;  %v13564_v47 = vld [vmem:[#allocation13 + $0xc08] sm:$0xf]  ;;  %v12702_v55 = vld [vmem:[#allocation13 + $0x568] sm:$0xf0] }
 0x341   :  { %v13565_v34 = vor.u32 %v16793_v56, %v13564_v47  ;;  %v16637_v59 = vld [vmem:[#allocation13 + $0x74c] sm:$0xf]  ;;  %v18249_v56 = vpop.f32.mrf.mxu0  ;;  %v12100_v24 = vld [vmem:[#allocation13 + $0x90] sm:$0xf] }
 0x342   :  { %6261 = vmatpush.bf16.msra.mxu0 %v13153_v9  ;;  %6275 = vmatpush.bf16.msra.mxu1 %v13409_v5  ;;  %v16458_v9 = vld [vmem:[#allocation13 + $0x1ac] sm:$0xf0]  ;;  %v12926_v47 = vld [vmem:[#allocation13 + $0x728] sm:$0xf0] }
 0x343   :  { %v12484_v5 = vld [vmem:[#allocation13 + $0x390] sm:$0xf] }
 0x344   :  { %6177 = vmatpush.bf16.msra.mxu2 %v13661_v57  ;;  %6191 = vmatpush.bf16.msra.mxu3 %v13917_v18  ;;  %v12485_v31 = vor.u32 %v16522_v10, %v12484_v5  ;;  %v13821_v57 = vor.u32 %v16857_v17, %v13820_v0  ;;  %v12196_v18 = vld [vmem:[#allocation13 + $0x150] sm:$0xf]  ;;  %v16629_v10 = vld [vmem:[#allocation13 + $0x70c] sm:$0xf] }
 0x345   :  { %v12197_v14 = vor.u32 %v16450_v35, %v12196_v18  ;;  %v16498_v5 = vld [vmem:[#allocation13 + $0x2ec] sm:$0xf0]  ;;  %v12638_v18 = vld [vmem:[#allocation13 + $0x4e8] sm:$0xf0] }
 0x346   :  { %6262 = vmatpush.bf16.msra.mxu0 %v13121_v48  ;;  %6276 = vmatpush.bf16.msra.mxu1 %v13377_v51  ;;  %v13022_v48 = vld [vmem:[#allocation13 + $0x7e8] sm:$0xf0]  ;;  %v12229_v51 = vor.u32 %v16458_v9, %v12228_v44  ;;  %v12961_v44 = vor.u32 %v16637_v59, %v12958_v62  ;;  %v12388_v9 = vld [vmem:[#allocation13 + $0x2d0] sm:$0xf] }
 0x347   :  { %v13025_v46 = vor.u32 %v16653_v52, %v13022_v48  ;;  %v12389_v17 = vor.u32 %v16498_v5, %v12388_v9  ;;  %v16426_v41 = vld [vmem:[#allocation13 + $0xac] sm:$0xf0]  ;;  %v18251_v52 = vpop.f32.mrf.mxu1  ;;  %v16621_v35 = vld [vmem:[#allocation13 + $0x6cc] sm:$0xf] }
 0x348   :  { %6178 = vmatpush.bf16.msra.mxu2 %v13629_v37  ;;  %6192 = vmatpush.bf16.msra.mxu3 %v13885_v42  ;;  %v12164_v37 = vld [vmem:[#allocation13 + $0x110] sm:$0xf] }
 0x349   :  { %v16442_v42 = vld [vmem:[#allocation13 + $0x12c] sm:$0xf0] }
 0x34a   :  { %6263 = vmatpush.bf16.msra.mxu0 %v13089_v50  ;;  %6277 = vmatpush.bf16.msra.mxu1 %v13345_v36  ;;  %v12734_v50 = vld [vmem:[#allocation13 + $0x5a8] sm:$0xf0]  ;;  %v12165_v4 = vor.u32 %v16442_v42, %v12164_v37  ;;  %v12068_v23 = vld [vmem:[#allocation13 + $0x50] sm:$0xf] }
 0x34b   :  { %v16645_v36 = vld [vmem:[#allocation13 + $0x78c] sm:$0xf]  ;;  %v12737_v40 = vor.u32 %v16581_v6, %v12734_v50  ;;  %v16418_v6 = vld [vmem:[#allocation13 + $0x6c] sm:$0xf0] }
 0x34c   :  { %6179 = vmatpush.bf16.msra.mxu2 %v13597_v58  ;;  %6193 = vmatpush.bf16.msra.mxu3 %v13853_v26  ;;  %v12993_v60 = vor.u32 %v16645_v36, %v12990_v22  ;;  %v16565_v58 = vld [vmem:[#allocation13 + $0x50c] sm:$0xf]  ;;  %v16482_v37 = vld [vmem:[#allocation13 + $0x26c] sm:$0xf0]  ;;  %v12069_v59 = vor.u32 %v16418_v6, %v12068_v23 }
 0x34d   :  { %v12670_v26 = vld [vmem:[#allocation13 + $0x528] sm:$0xf0]  ;;  %v13284_v9 = vld [vmem:[#allocation13 + $0x9d0] sm:$0xf] }
 0x34e   :  { %6264 = vmatpush.bf16.msra.mxu0 %v13057_v33  ;;  %6278 = vmatpush.bf16.msra.mxu1 %v13313_v30  ;;  %v12421_v33 = vor.u32 %v16506_v11, %v12420_v45  ;;  %v12132_v30 = vld [vmem:[#allocation13 + $0xd0] sm:$0xf]  ;;  %v12673_v48 = vor.u32 %v16565_v58, %v12670_v26  ;;  %v16549_v42 = vld [vmem:[#allocation13 + $0x48c] sm:$0xf] }
 0x34f   :  { %v16613_v45 = vld [vmem:[#allocation13 + $0x68c] sm:$0xf]  ;;  %v16722_v5 = vld [vmem:[#allocation13 + $0x9ec] sm:$0xf0] }
 0x350   :  { %6180 = vmatpush.bf16.msra.mxu2 %v13565_v34  ;;  %6194 = vmatpush.bf16.msra.mxu3 %v13821_v57  ;;  %v16490_v34 = vld [vmem:[#allocation13 + $0x2ac] sm:$0xf0]  ;;  %v16557_v57 = vld [vmem:[#allocation13 + $0x4cc] sm:$0xf] }
 0x351   :  { %6265 = vmatmul.bf16.vlgmr.msra.gmra.mxu0 %v18143_v7  ;;  %6279 = vmatmul.bf16.vlgmr.msra.gmra.mxu1 %v18145_v28  ;;  %v12641_v22 = vor.u32 %v16557_v57, %v12638_v18  ;;  %v12862_v11 = vld [vmem:[#allocation13 + $0x6a8] sm:$0xf0]  ;;  %v13540_v26 = vld [vmem:[#allocation13 + $0xbd0] sm:$0xf]  ;;  %v13285_v57 = vor.u32 %v16722_v5, %v13284_v9 }
 0x352   :  { %6313 = vmatpush.bf16.msrb.mxu0 %v12261_v63  ;;  %6327 = vmatpush.bf16.msrb.mxu1 %v12517_v49  ;;  %v16434_v63 = vld [vmem:[#allocation13 + $0xec] sm:$0xf0]  ;;  %v12705_v49 = vor.u32 %v16573_v38, %v12702_v55  ;;  %v18254_v38 = vpop.f32.mrf.mxu0  ;;  %v16533_v6 = vld [vmem:[#allocation13 + $0x40c] sm:$0xf] }
 0x353   :  { %6181 = vmatmul.bf16.vlgmr.msra.gmra.mxu2 %v18203_v8  ;;  %6195 = vmatmul.bf16.vlgmr.msra.gmra.mxu3 %v18205_v16  ;;  %v12133_v0 = vor.u32 %v16434_v63, %v12132_v30  ;;  %v12292_v30 = vld [vmem:[#allocation13 + $0x210] sm:$0xf]  ;;  %v18256_v63 = vpop.f32.mrf.mxu1  ;;  %v16901_v9 = vld [vmem:[#allocation13 + $0xf8c] sm:$0xf] }
 0x354   :  { %6229 = vmatpush.bf16.msrb.mxu2 %v12769_v39  ;;  %6243 = vmatpush.bf16.msrb.mxu3 %v13025_v46  ;;  %v12894_v39 = vld [vmem:[#allocation13 + $0x6e8] sm:$0xf0]  ;;  %v12101_v46 = vor.u32 %v16426_v41, %v12100_v24  ;;  %v13252_v18 = vld [vmem:[#allocation13 + $0x990] sm:$0xf] }
 0x355   :  { %v12830_v24 = vld [vmem:[#allocation13 + $0x668] sm:$0xf0]  ;;  %v16778_v23 = vld [vmem:[#allocation13 + $0xbac] sm:$0xf0] }
 0x356   :  { %6314 = vmatpush.bf16.msrb.mxu0 %v12229_v51  ;;  %6328 = vmatpush.bf16.msrb.mxu1 %v12485_v31  ;;  %v12929_v51 = vor.u32 %v16629_v10, %v12926_v47  ;;  %v12356_v31 = vld [vmem:[#allocation13 + $0x290] sm:$0xf]  ;;  %v5902_v50 = vpop.f32.mrf.mxu2  ;;  %v5916_v36 = vpop.f32.mrf.mxu3  ;;  %v16541_v47 = vld [vmem:[#allocation13 + $0x44c] sm:$0xf] }
 0x357   :  { %v12357_v12 = vor.u32 %v16490_v34, %v12356_v31  ;;  %v16786_v10 = vld [vmem:[#allocation13 + $0xbec] sm:$0xf0]  ;;  %v14014_v5 = vld [vmem:[#allocation13 + $0xfa8] sm:$0xf0] }
 0x358   :  { %6230 = vmatpush.bf16.msrb.mxu2 %v12737_v40  ;;  %6244 = vmatpush.bf16.msrb.mxu3 %v12993_v60  ;;  %v5903_v40 = vadd.f32 %v5902_v50, %v18222_v20  ;;  %v12606_v60 = vld [vmem:[#allocation13 + $0x4a8] sm:$0xf0]  ;;  %v16474_v20 = vld [vmem:[#allocation13 + $0x22c] sm:$0xf0] }
 0x359   :  { %v12542_v50 = vld [vmem:[#allocation13 + $0x428] sm:$0xf0] }
 0x35a   :  { %6315 = vmatpush.bf16.msrb.mxu0 %v12197_v14  ;;  %6329 = vmatpush.bf16.msrb.mxu1 %v12453_v61  ;;  %v12897_v14 = vor.u32 %v16621_v35, %v12894_v39  ;;  %v12324_v61 = vld [vmem:[#allocation13 + $0x250] sm:$0xf]  ;;  %v5917_v55 = vadd.f32 %v5916_v36, %v5903_v40  ;;  %v16597_v36 = vld [vmem:[#allocation13 + $0x60c] sm:$0xf] }
 0x35b   :  { %v12325_v62 = vor.u32 %v16482_v37, %v12324_v61  ;;  %v16714_v35 = vld [vmem:[#allocation13 + $0x9ac] sm:$0xf0]  ;;  %v16909_v61 = vld [vmem:[#allocation13 + $0xfcc] sm:$0xf] }
 0x35c   :  { %6231 = vmatpush.bf16.msrb.mxu2 %v12705_v49  ;;  %6245 = vmatpush.bf16.msrb.mxu3 %v12961_v44  ;;  %v12609_v49 = vor.u32 %v16549_v42, %v12606_v60  ;;  %v12865_v44 = vor.u32 %v16613_v45, %v12862_v11  ;;  %v5931_v58 = vadd.f32 %v18228_v25, %v5917_v55  ;;  %v13508_v39 = vld [vmem:[#allocation13 + $0xb90] sm:$0xf]  ;;  %v14046_v37 = vld [vmem:[#allocation13 + $0xfe8] sm:$0xf0]  ;;  %v18264_v42 = vpop.f32.mrf.mxu0 }
 0x35d   :  { %v13541_v25 = vor.u32 %v16786_v10, %v13540_v26  ;;  %v13253_v40 = vor.u32 %v16714_v35, %v13252_v18  ;;  %v13509_v60 = vor.u32 %v16778_v23, %v13508_v39  ;;  %v12545_v45 = vor.u32 %v16533_v6, %v12542_v50  ;;  %v13220_v55 = vld [vmem:[#allocation13 + $0x950] sm:$0xf]  ;;  %v16829_v35 = vld [vmem:[#allocation13 + $0xd4c] sm:$0xf] }
 0x35e   :  { %6316 = vmatpush.bf16.msrb.mxu0 %v12165_v4  ;;  %6330 = vmatpush.bf16.msrb.mxu1 %v12421_v33  ;;  %v12036_v4 = vld [vmem:[#allocation13 + $0x10] sm:$0xf]  ;;  %v18260_v31 = vpop.f32.mrf.mxu2  ;;  %v18262_v34 = vpop.f32.mrf.mxu3  ;;  %v13982_v23 = vld [vmem:[#allocation13 + $0xf68] sm:$0xf0] }
 0x35f   :  { %v16410_v33 = vld [vmem:[#allocation13 + $0x2c] sm:$0xf0] }
 0x360   :  { %6232 = vmatpush.bf16.msrb.mxu2 %v12673_v48  ;;  %6246 = vmatpush.bf16.msrb.mxu3 %v12929_v51  ;;  %v12037_v41 = vor.u32 %v16410_v33, %v12036_v4  ;;  %v12293_v48 = vor.u32 %v16474_v20, %v12292_v30  ;;  %v5945_v51 = vadd.f32 %v18230_v29, %v5931_v58  ;;  %v13790_v29 = vld [vmem:[#allocation13 + $0xde8] sm:$0xf0]  ;;  %v13476_v30 = vld [vmem:[#allocation13 + $0xb50] sm:$0xf] }
 0x361   :  { %v14049_v33 = vor.u32 %v16909_v61, %v14046_v37  ;;  %v13758_v20 = vld [vmem:[#allocation13 + $0xda8] sm:$0xf0]  ;;  %v16762_v18 = vld [vmem:[#allocation13 + $0xb2c] sm:$0xf0] }
 0x362   :  { %6317 = vmatpush.bf16.msrb.mxu0 %v12133_v0  ;;  %6331 = vmatpush.bf16.msrb.mxu1 %v12389_v17  ;;  %v12574_v0 = vld [vmem:[#allocation13 + $0x468] sm:$0xf0] }
 0x363   :  { %v16605_v17 = vld [vmem:[#allocation13 + $0x64c] sm:$0xf] }
 0x364   :  { %6233 = vmatpush.bf16.msrb.mxu2 %v12641_v22  ;;  %6247 = vmatpush.bf16.msrb.mxu3 %v12897_v14  ;;  %v12798_v22 = vld [vmem:[#allocation13 + $0x628] sm:$0xf0] }
 0x365   :  { %v16845_v14 = vld [vmem:[#allocation13 + $0xdcc] sm:$0xf]  ;;  %v12801_v11 = vor.u32 %v16597_v36, %v12798_v22  ;;  %v13156_v22 = vld [vmem:[#allocation13 + $0x8d0] sm:$0xf] }
 0x366   :  { %6318 = vmatpush.bf16.msrb.mxu0 %v12101_v46  ;;  %6332 = vmatpush.bf16.msrb.mxu1 %v12357_v12  ;;  %v12577_v46 = vor.u32 %v16541_v47, %v12574_v0  ;;  %v12833_v12 = vor.u32 %v16605_v17, %v12830_v24  ;;  %v13793_v4 = vor.u32 %v16845_v14, %v13790_v29  ;;  %v5958_v58 = vpop.f32.mrf.mxu2  ;;  %v5972_v26 = vpop.f32.mrf.mxu3  ;;  %v18880_v17 = vperm.slane %v18215_v32, 2  ;;  %v13188_v24 = vld [vmem:[#allocation13 + $0x910] sm:$0xf] }
 0x367   :  { %v5959_v10 = vadd.f32 %v5958_v58, %v5945_v51  ;;  %v16690_v14 = vld [vmem:[#allocation13 + $0x8ec] sm:$0xf0] }
 0x368   :  { %6234 = vmatpush.bf16.msrb.mxu2 %v12609_v49  ;;  %6248 = vmatpush.bf16.msrb.mxu3 %v12865_v44  ;;  %v16770_v49 = vld [vmem:[#allocation13 + $0xb6c] sm:$0xf0]  ;;  %v16837_v44 = vld [vmem:[#allocation13 + $0xd8c] sm:$0xf] }
 0x369   :  { %v13477_v0 = vor.u32 %v16770_v49, %v13476_v30  ;;  %v18271_v39 = vadd.f32 %v5972_v26, %v5959_v10  ;;  %v13157_v49 = vor.u32 %v16690_v14, %v13156_v22  ;;  %v13380_v26 = vld [vmem:[#allocation13 + $0xa90] sm:$0xf] }
 0x36a   :  { %6319 = vmatpush.bf16.msrb.mxu0 %v12069_v59  ;;  %6333 = vmatpush.bf16.msrb.mxu1 %v12325_v62  ;;  %v16706_v59 = vld [vmem:[#allocation13 + $0x96c] sm:$0xf0]  ;;  %v18266_v62 = vpop.f32.mrf.mxu1 }
 0x36b   :  { %v13221_v47 = vor.u32 %v16706_v59, %v13220_v55  ;;  %v13694_v55 = vld [vmem:[#allocation13 + $0xd28] sm:$0xf0]  ;;  %v16746_v10 = vld [vmem:[#allocation13 + $0xaac] sm:$0xf0] }
 0x36c   :  { %6235 = vmatpush.bf16.msrb.mxu2 %v12577_v46  ;;  %6249 = vmatpush.bf16.msrb.mxu3 %v12833_v12  ;;  %v13726_v46 = vld [vmem:[#allocation13 + $0xd68] sm:$0xf0] }
 0x36d   :  { %v16893_v12 = vld [vmem:[#allocation13 + $0xf4c] sm:$0xf]  ;;  %v13729_v61 = vor.u32 %v16829_v35, %v13726_v46 }
 0x36e   :  { %6320 = vmatpush.bf16.msrb.mxu0 %v12037_v41  ;;  %6334 = vmatpush.bf16.msrb.mxu1 %v12293_v48  ;;  %v16698_v41 = vld [vmem:[#allocation13 + $0x92c] sm:$0xf0]  ;;  %v13761_v48 = vor.u32 %v16837_v44, %v13758_v20  ;;  %v6098_v51 = vpop.f32.mrf.mxu0  ;;  %v13985_v37 = vor.u32 %v16893_v12, %v13982_v23  ;;  %v16885_v59 = vld [vmem:[#allocation13 + $0xf0c] sm:$0xf]  ;;  %v18281_v30 = vpop.f32.mrf.mxu3 }
 0x36f   :  { %v6099_v6 = vadd.f32 %v6098_v51, %v18880_v17  ;;  %v13189_v50 = vor.u32 %v16698_v41, %v13188_v24  ;;  %v13124_v20 = vld [vmem:[#allocation13 + $0x890] sm:$0xf]  ;;  %v16877_v24 = vld [vmem:[#allocation13 + $0xecc] sm:$0xf]  ;;  %v16854_v17 = vld [vmem:[#allocation13 + $0xe14] sm:$0xf] }
 0x370   :  { %6236 = vmatpush.bf16.msrb.mxu2 %v12545_v45  ;;  %6250 = vmatpush.bf16.msrb.mxu3 %v12801_v11  ;;  %v16821_v45 = vld [vmem:[#allocation13 + $0xd0c] sm:$0xf]  ;;  %v13348_v12 = vld [vmem:[#allocation13 + $0xa50] sm:$0xf] }
 0x371   :  { %6321 = vmatmul.bf16.vlgmr.msrb.gmra.mxu0 %v18117_v53  ;;  %6335 = vmatmul.bf16.vlgmr.msrb.gmra.mxu1 %v18119_v54  ;;  %v13918_v41 = vld [vmem:[#allocation13 + $0xee8] sm:$0xf0]  ;;  %v16738_v23 = vld [vmem:[#allocation13 + $0xa6c] sm:$0xf0] }
 0x372   :  { %6369 = vmatpush.bf16.msra.mxu0 %v13285_v57  ;;  %6383 = vmatpush.bf16.msra.mxu1 %v13541_v25  ;;  %v14017_v57 = vor.u32 %v16901_v9, %v14014_v5  ;;  %v13444_v25 = vld [vmem:[#allocation13 + $0xb10] sm:$0xf]  ;;  %v6112_v29 = vpop.f32.mrf.mxu1  ;;  %v13697_v5 = vor.u32 %v16821_v45, %v13694_v55  ;;  %v13921_v46 = vor.u32 %v16877_v24, %v13918_v41  ;;  %v16805_v51 = vld [vmem:[#allocation13 + $0xc8c] sm:$0xf] }
 0x373   :  { %6237 = vmatmul.bf16.vlgmr.msrb.gmra.mxu2 %v18191_v2  ;;  %6251 = vmatmul.bf16.vlgmr.msrb.gmra.mxu3 %v18193_v1  ;;  %v13445_v36 = vor.u32 %v16762_v18, %v13444_v25  ;;  %v18277_v11 = vadd.f32 %v6112_v29, %v6099_v6  ;;  %v16682_v9 = vld [vmem:[#allocation13 + $0x8ac] sm:$0xf0]  ;;  %v13630_v6 = vld [vmem:[#allocation13 + $0xca8] sm:$0xf0] }
 0x374   :  { %6285 = vmatpush.bf16.msra.mxu2 %v13793_v4  ;;  %6299 = vmatpush.bf16.msra.mxu3 %v14049_v33  ;;  %v13950_v4 = vld [vmem:[#allocation13 + $0xf28] sm:$0xf0]  ;;  %v18279_v33 = vpop.f32.mrf.mxu2  ;;  %v13092_v25 = vld [vmem:[#allocation13 + $0x850] sm:$0xf]  ;;  %v13633_v55 = vor.u32 %v16805_v51, %v13630_v6 }
 0x375   :  { %v13953_v58 = vor.u32 %v16885_v59, %v13950_v4  ;;  %v16674_v18 = vld [vmem:[#allocation13 + $0x86c] sm:$0xf0]  ;;  %v16853_v6 = vld [vmem:[#allocation13 + $0xe0c] sm:$0xf] }
 0x376   :  { %6370 = vmatpush.bf16.msra.mxu0 %v13253_v40  ;;  %6384 = vmatpush.bf16.msra.mxu1 %v13509_v60  ;;  %v13412_v40 = vld [vmem:[#allocation13 + $0xad0] sm:$0xf]  ;;  %v6028_v14 = vpop.f32.mrf.mxu3  ;;  %v13093_v29 = vor.u32 %v16674_v18, %v13092_v25  ;;  %v16454_v25 = vld [vmem:[#allocation13 + $0x194] sm:$0xf] }
 0x377   :  { %v16754_v60 = vld [vmem:[#allocation13 + $0xaec] sm:$0xf0]  ;;  %v12230_v18 = vld [vmem:[#allocation13 + $0x1b0] sm:$0xf0] }
 0x378   :  { %6286 = vmatpush.bf16.msra.mxu2 %v13761_v48  ;;  %6300 = vmatpush.bf16.msra.mxu3 %v14017_v57  ;;  %v13413_v44 = vor.u32 %v16754_v60, %v13412_v40  ;;  %v13125_v48 = vor.u32 %v16682_v9, %v13124_v20  ;;  %v13381_v57 = vor.u32 %v16746_v10, %v13380_v26  ;;  %v16666_v40 = vld [vmem:[#allocation13 + $0x82c] sm:$0xf0]  ;;  %v16526_v20 = vld [vmem:[#allocation13 + $0x3d4] sm:$0xf]  ;;  %v13598_v10 = vld [vmem:[#allocation13 + $0xc68] sm:$0xf0] }
 0x379   :  { %v13316_v60 = vld [vmem:[#allocation13 + $0xa10] sm:$0xf]  ;;  %v12518_v9 = vld [vmem:[#allocation13 + $0x3f0] sm:$0xf0] }
 0x37a   :  { %6371 = vmatpush.bf16.msra.mxu0 %v13221_v47  ;;  %6385 = vmatpush.bf16.msra.mxu1 %v13477_v0  ;;  %v16813_v47 = vld [vmem:[#allocation13 + $0xccc] sm:$0xf]  ;;  %v16730_v4 = vld [vmem:[#allocation13 + $0xa2c] sm:$0xf0] }
 0x37b   :  { %v13662_v0 = vld [vmem:[#allocation13 + $0xce8] sm:$0xf0] }
 0x37c   :  { %6287 = vmatpush.bf16.msra.mxu2 %v13729_v61  ;;  %6301 = vmatpush.bf16.msra.mxu3 %v13985_v37  ;;  %v13665_v35 = vor.u32 %v16813_v47, %v13662_v0  ;;  %v6014_v22 = vpop.f32.mrf.mxu2  ;;  %v13349_v61 = vor.u32 %v16738_v23, %v13348_v12  ;;  %v13060_v37 = vld [vmem:[#allocation13 + $0x810] sm:$0xf]  ;;  %v16861_v47 = vld [vmem:[#allocation13 + $0xe4c] sm:$0xf] }
 0x37d   :  { %v6015_v45 = vadd.f32 %v6014_v22, %v18243_v15  ;;  %v13854_v0 = vld [vmem:[#allocation13 + $0xe68] sm:$0xf0]  ;;  %v13061_v24 = vor.u32 %v16666_v40, %v13060_v37  ;;  %v13317_v15 = vor.u32 %v16730_v4, %v13316_v60  ;;  %v12233_v40 = vor.u32 %v16454_v25, %v12230_v18  ;;  %v12198_v4 = vld [vmem:[#allocation13 + $0x170] sm:$0xf0] }
 0x37e   :  { %6372 = vmatpush.bf16.msra.mxu0 %v13189_v50  ;;  %6386 = vmatpush.bf16.msra.mxu1 %v13445_v36  ;;  %v16869_v50 = vld [vmem:[#allocation13 + $0xe8c] sm:$0xf]  ;;  %v13857_v12 = vor.u32 %v16861_v47, %v13854_v0  ;;  %v16502_v25 = vld [vmem:[#allocation13 + $0x314] sm:$0xf] }
 0x37f   :  { %v13886_v36 = vld [vmem:[#allocation13 + $0xea8] sm:$0xf0]  ;;  %v6029_v26 = vadd.f32 %v6028_v14, %v6015_v45  ;;  %v16594_v14 = vld [vmem:[#allocation13 + $0x5ec] sm:$0xf0]  ;;  %v12422_v18 = vld [vmem:[#allocation13 + $0x330] sm:$0xf0] }
 0x380   :  { %6288 = vmatpush.bf16.msra.mxu2 %v13697_v5  ;;  %6302 = vmatpush.bf16.msra.mxu3 %v13953_v58  ;;  %v13889_v59 = vor.u32 %v16869_v50, %v13886_v36  ;;  %v16797_v5 = vld [vmem:[#allocation13 + $0xc4c] sm:$0xf]  ;;  %v5989_v58 = vadd.f32 %v18249_v56, %v3290_v43  ;;  %v12486_v43 = vld [vmem:[#allocation13 + $0x3b0] sm:$0xf0]  ;;  %v12772_v36 = vld [vmem:[#allocation13 + $0x5d0] sm:$0xf] }
 0x381   :  { %v6043_v41 = vadd.f32 %v18254_v38, %v6029_v26  ;;  %v16789_v56 = vld [vmem:[#allocation13 + $0xc0c] sm:$0xf]  ;;  %v12996_v26 = vld [vmem:[#allocation13 + $0x790] sm:$0xf] }
 0x382   :  { %6373 = vmatpush.bf16.msra.mxu0 %v13157_v49  ;;  %6387 = vmatpush.bf16.msra.mxu1 %v13413_v44  ;;  %v16462_v49 = vld [vmem:[#allocation13 + $0x1d4] sm:$0xf]  ;;  %v13566_v23 = vld [vmem:[#allocation13 + $0xc28] sm:$0xf0]  ;;  %v6003_v51 = vadd.f32 %v18251_v52, %v5989_v58  ;;  %v6030_v52 = vpop.f32.mrf.mxu3  ;;  %v16586_v58 = vld [vmem:[#allocation13 + $0x5ac] sm:$0xf0] }
 0x383   :  { %v12262_v44 = vld [vmem:[#allocation13 + $0x1f0] sm:$0xf0]  ;;  %v13822_v50 = vld [vmem:[#allocation13 + $0xe28] sm:$0xf0]  ;;  %v18290_v22 = vadd.f32 %v18256_v63, %v6043_v41  ;;  %v13569_v45 = vor.u32 %v16789_v56, %v13566_v23  ;;  %v12425_v23 = vor.u32 %v16502_v25, %v12422_v18  ;;  %v12612_v25 = vld [vmem:[#allocation13 + $0x490] sm:$0xf] }
 0x384   :  { %6289 = vmatpush.bf16.msra.mxu2 %v13665_v35  ;;  %6303 = vmatpush.bf16.msra.mxu3 %v13921_v46  ;;  %v16518_v35 = vld [vmem:[#allocation13 + $0x394] sm:$0xf]  ;;  %v13601_v46 = vor.u32 %v16797_v5, %v13598_v10  ;;  %v6016_v38 = vpop.f32.mrf.mxu2  ;;  %v12740_v5 = vld [vmem:[#allocation13 + $0x590] sm:$0xf] }
 0x385   :  { %v6017_v37 = vadd.f32 %v6016_v38, %v6003_v51  ;;  %v12489_v60 = vor.u32 %v16518_v35, %v12486_v43  ;;  %v16650_v10 = vld [vmem:[#allocation13 + $0x7ac] sm:$0xf0]  ;;  %v12166_v41 = vld [vmem:[#allocation13 + $0x130] sm:$0xf0] }
 0x386   :  { %6374 = vmatpush.bf16.msra.mxu0 %v13125_v48  ;;  %6388 = vmatpush.bf16.msra.mxu1 %v13381_v57  ;;  %v12265_v48 = vor.u32 %v16462_v49, %v12262_v44  ;;  %v12521_v57 = vor.u32 %v16526_v20, %v12518_v9  ;;  %v12773_v49 = vor.u32 %v16594_v14, %v12772_v36  ;;  %v16510_v20 = vld [vmem:[#allocation13 + $0x354] sm:$0xf]  ;;  %v12708_v35 = vld [vmem:[#allocation13 + $0x550] sm:$0xf] }
 0x387   :  { %v6031_v63 = vadd.f32 %v6030_v52, %v6017_v37  ;;  %v12454_v9 = vld [vmem:[#allocation13 + $0x370] sm:$0xf0]  ;;  %v16642_v43 = vld [vmem:[#allocation13 + $0x76c] sm:$0xf0] }
 0x388   :  { %6290 = vmatpush.bf16.msra.mxu2 %v13633_v55  ;;  %6304 = vmatpush.bf16.msra.mxu3 %v13889_v59  ;;  %v13825_v55 = vor.u32 %v16853_v6, %v13822_v50  ;;  %v16446_v59 = vld [vmem:[#allocation13 + $0x154] sm:$0xf]  ;;  %v18300_v50 = vpop.f32.mrf.mxu0  ;;  %v12932_v37 = vld [vmem:[#allocation13 + $0x710] sm:$0xf] }
 0x389   :  { %v6045_v47 = vadd.f32 %v18264_v42, %v6031_v63  ;;  %v12201_v0 = vor.u32 %v16446_v59, %v12198_v4  ;;  %v12964_v42 = vld [vmem:[#allocation13 + $0x750] sm:$0xf]  ;;  %v16430_v51 = vld [vmem:[#allocation13 + $0xd4] sm:$0xf] }
 0x38a   :  { %6375 = vmatpush.bf16.msra.mxu0 %v13093_v29  ;;  %6389 = vmatpush.bf16.msra.mxu1 %v13349_v61  ;;  %v13028_v29 = vld [vmem:[#allocation13 + $0x7d0] sm:$0xf]  ;;  %v12134_v6 = vld [vmem:[#allocation13 + $0xf0] sm:$0xf0] }
 0x38b   :  { %v16658_v61 = vld [vmem:[#allocation13 + $0x7ec] sm:$0xf0]  ;;  %v16494_v38 = vld [vmem:[#allocation13 + $0x2d4] sm:$0xf]  ;;  %v12137_v52 = vor.u32 %v16430_v51, %v12134_v6 }
 0x38c   :  { %6291 = vmatpush.bf16.msra.mxu2 %v13601_v46  ;;  %6305 = vmatpush.bf16.msra.mxu3 %v13857_v12  ;;  %v13029_v44 = vor.u32 %v16658_v61, %v13028_v29  ;;  %v18296_v46 = vadd.f32 %v18266_v62, %v6045_v47  ;;  %v16578_v12 = vld [vmem:[#allocation13 + $0x56c] sm:$0xf0]  ;;  %v12965_v62 = vor.u32 %v16642_v43, %v12964_v42  ;;  %v12390_v14 = vld [vmem:[#allocation13 + $0x2f0] sm:$0xf0] }
 0x38d   :  { %v12709_v36 = vor.u32 %v16578_v12, %v12708_v35  ;;  %v12676_v29 = vld [vmem:[#allocation13 + $0x510] sm:$0xf]  ;;  %v12102_v59 = vld [vmem:[#allocation13 + $0xb0] sm:$0xf0] }
 0x38e   :  { %6376 = vmatpush.bf16.msra.mxu0 %v13061_v24  ;;  %6390 = vmatpush.bf16.msra.mxu1 %v13317_v15  ;;  %v12457_v24 = vor.u32 %v16510_v20, %v12454_v9  ;;  %v16438_v15 = vld [vmem:[#allocation13 + $0x114] sm:$0xf]  ;;  %v16570_v61 = vld [vmem:[#allocation13 + $0x52c] sm:$0xf0] }
 0x38f   :  { %v12169_v56 = vor.u32 %v16438_v15, %v12166_v41  ;;  %v12677_v4 = vor.u32 %v16570_v61, %v12676_v29  ;;  %v12644_v20 = vld [vmem:[#allocation13 + $0x4d0] sm:$0xf]  ;;  %v16414_v47 = vld [vmem:[#allocation13 + $0x54] sm:$0xf] }
 0x390   :  { %6292 = vmatpush.bf16.msra.mxu2 %v13569_v45  ;;  %6306 = vmatpush.bf16.msra.mxu3 %v13825_v55  ;;  %v12393_v45 = vor.u32 %v16494_v38, %v12390_v14  ;;  %v16422_v55 = vld [vmem:[#allocation13 + $0x94] sm:$0xf]  ;;  %v16562_v9 = vld [vmem:[#allocation13 + $0x4ec] sm:$0xf0] }
 0x391   :  { %6377 = vmatmul.bf16.vlgmr.msra.gmra.mxu0 %v18143_v7  ;;  %6391 = vmatmul.bf16.vlgmr.msra.gmra.mxu1 %v18145_v28  ;;  %v12645_v15 = vor.u32 %v16562_v9, %v12644_v20  ;;  %v16554_v12 = vld [vmem:[#allocation13 + $0x4ac] sm:$0xf0]  ;;  %v16470_v38 = vld [vmem:[#allocation13 + $0x214] sm:$0xf] }
 0x392   :  { %6425 = vmatpush.bf16.msrb.mxu0 %v12265_v48  ;;  %6439 = vmatpush.bf16.msrb.mxu1 %v12521_v57  ;;  %v12741_v48 = vor.u32 %v16586_v58, %v12740_v5  ;;  %v12997_v57 = vor.u32 %v16650_v10, %v12996_v26  ;;  %v12900_v5 = vld [vmem:[#allocation13 + $0x6d0] sm:$0xf]  ;;  %v12105_v26 = vor.u32 %v16422_v55, %v12102_v59 }
 0x393   :  { %6293 = vmatmul.bf16.vlgmr.msra.gmra.mxu2 %v18203_v8  ;;  %6307 = vmatmul.bf16.vlgmr.msra.gmra.mxu3 %v18205_v16  ;;  %v16626_v58 = vld [vmem:[#allocation13 + $0x6ec] sm:$0xf0]  ;;  %v12613_v29 = vor.u32 %v16554_v12, %v12612_v25 }
 0x394   :  { %6341 = vmatpush.bf16.msrb.mxu2 %v12773_v49  ;;  %6355 = vmatpush.bf16.msrb.mxu3 %v13029_v44  ;;  %v16486_v49 = vld [vmem:[#allocation13 + $0x294] sm:$0xf]  ;;  %v12901_v41 = vor.u32 %v16626_v58, %v12900_v5  ;;  %v12868_v42 = vld [vmem:[#allocation13 + $0x690] sm:$0xf] }
 0x395   :  { %v12358_v44 = vld [vmem:[#allocation13 + $0x2b0] sm:$0xf0]  ;;  %v16618_v43 = vld [vmem:[#allocation13 + $0x6ac] sm:$0xf0] }
 0x396   :  { %6426 = vmatpush.bf16.msrb.mxu0 %v12233_v40  ;;  %6440 = vmatpush.bf16.msrb.mxu1 %v12489_v60  ;;  %v16634_v40 = vld [vmem:[#allocation13 + $0x72c] sm:$0xf0]  ;;  %v18302_v60 = vpop.f32.mrf.mxu1  ;;  %v12361_v10 = vor.u32 %v16486_v49, %v12358_v44  ;;  %v6070_v18 = vpop.f32.mrf.mxu2  ;;  %v12869_v61 = vor.u32 %v16618_v43, %v12868_v42  ;;  %v16710_v5 = vld [vmem:[#allocation13 + $0x994] sm:$0xf] }
 0x397   :  { %v12933_v63 = vor.u32 %v16634_v40, %v12932_v37  ;;  %v6084_v35 = vpop.f32.mrf.mxu3  ;;  %v12294_v37 = vld [vmem:[#allocation13 + $0x230] sm:$0xf0]  ;;  %v12580_v55 = vld [vmem:[#allocation13 + $0x450] sm:$0xf] }
 0x398   :  { %6342 = vmatpush.bf16.msrb.mxu2 %v12741_v48  ;;  %6356 = vmatpush.bf16.msrb.mxu3 %v12997_v57  ;;  %v16478_v48 = vld [vmem:[#allocation13 + $0x254] sm:$0xf]  ;;  %v16546_v59 = vld [vmem:[#allocation13 + $0x46c] sm:$0xf0]  ;;  %v12297_v44 = vor.u32 %v16470_v38, %v12294_v37 }
 0x399   :  { %v12326_v57 = vld [vmem:[#allocation13 + $0x270] sm:$0xf0]  ;;  %v12804_v25 = vld [vmem:[#allocation13 + $0x610] sm:$0xf] }
 0x39a   :  { %6427 = vmatpush.bf16.msrb.mxu0 %v12201_v0  ;;  %6441 = vmatpush.bf16.msrb.mxu1 %v12457_v24  ;;  %v12070_v0 = vld [vmem:[#allocation13 + $0x70] sm:$0xf0]  ;;  %v18304_v24 = vpop.f32.mrf.mxu0  ;;  %v12329_v6 = vor.u32 %v16478_v48, %v12326_v57  ;;  %v16538_v48 = vld [vmem:[#allocation13 + $0x42c] sm:$0xf0] }
 0x39b   :  { %v12073_v51 = vor.u32 %v16414_v47, %v12070_v0  ;;  %v16718_v40 = vld [vmem:[#allocation13 + $0x9d4] sm:$0xf]  ;;  %v16850_v43 = vld [vmem:[#allocation13 + $0xdec] sm:$0xf0] }
 0x39c   :  { %6343 = vmatpush.bf16.msrb.mxu2 %v12709_v36  ;;  %6357 = vmatpush.bf16.msrb.mxu3 %v12965_v62  ;;  %v16406_v36 = vld [vmem:[#allocation13 + $0x14] sm:$0xf] }
 0x39d   :  { %v12038_v62 = vld [vmem:[#allocation13 + $0x30] sm:$0xf0] }
 0x39e   :  { %6428 = vmatpush.bf16.msrb.mxu0 %v12169_v56  ;;  %6442 = vmatpush.bf16.msrb.mxu1 %v12425_v23  ;;  %v6071_v56 = vadd.f32 %v6070_v18, %v18290_v22  ;;  %v18307_v23 = vpop.f32.mrf.mxu1  ;;  %v13542_v22 = vld [vmem:[#allocation13 + $0xbf0] sm:$0xf0]  ;;  %v12041_v49 = vor.u32 %v16406_v36, %v12038_v62  ;;  %v6072_v0 = vpop.f32.mrf.mxu2  ;;  %v16602_v18 = vld [vmem:[#allocation13 + $0x62c] sm:$0xf0] }
 0x39f   :  { %v13254_v58 = vld [vmem:[#allocation13 + $0x9b0] sm:$0xf0]  ;;  %v6073_v57 = vadd.f32 %v6072_v0, %v18296_v46  ;;  %v6086_v42 = vpop.f32.mrf.mxu3 }
 0x3a0   :  { %6344 = vmatpush.bf16.msrb.mxu2 %v12677_v4  ;;  %6358 = vmatpush.bf16.msrb.mxu3 %v12933_v63  ;;  %v18309_v14 = vadd.f32 %v6084_v35, %v6071_v56  ;;  %v12836_v4 = vld [vmem:[#allocation13 + $0x650] sm:$0xf]  ;;  %v13257_v36 = vor.u32 %v16710_v5, %v13254_v58  ;;  %v13222_v37 = vld [vmem:[#allocation13 + $0x970] sm:$0xf0] }
 0x3a1   :  { %v16610_v63 = vld [vmem:[#allocation13 + $0x66c] sm:$0xf0] }
 0x3a2   :  { %6429 = vmatpush.bf16.msrb.mxu0 %v12137_v52  ;;  %6443 = vmatpush.bf16.msrb.mxu1 %v12393_v45  ;;  %v13286_v52 = vld [vmem:[#allocation13 + $0x9f0] sm:$0xf0]  ;;  %v12837_v47 = vor.u32 %v16610_v63, %v12836_v4  ;;  %v13796_v35 = vld [vmem:[#allocation13 + $0xdd0] sm:$0xf]  ;;  %v18312_v12 = vpop.f32.mrf.mxu0 }
 0x3a3   :  { %v16782_v45 = vld [vmem:[#allocation13 + $0xbd4] sm:$0xf]  ;;  %v13289_v20 = vor.u32 %v16718_v40, %v13286_v52  ;;  %v14052_v56 = vld [vmem:[#allocation13 + $0xfd0] sm:$0xf]  ;;  %v6762_v52 = vmax.f32 %v18309_v14, 0.0 }
 0x3a4   :  { %6345 = vmatpush.bf16.msrb.mxu2 %v12645_v15  ;;  %6359 = vmatpush.bf16.msrb.mxu3 %v12901_v41  ;;  %v13545_v9 = vor.u32 %v16782_v45, %v13542_v22  ;;  %v13510_v15 = vld [vmem:[#allocation13 + $0xbb0] sm:$0xf0]  ;;  %v12548_v41 = vld [vmem:[#allocation13 + $0x410] sm:$0xf]  ;;  %v13797_v22 = vor.u32 %v16850_v43, %v13796_v35 }
 0x3a5   :  { %v12549_v46 = vor.u32 %v16538_v48, %v12548_v41  ;;  %v16766_v40 = vld [vmem:[#allocation13 + $0xb54] sm:$0xf]  ;;  %v13764_v4 = vld [vmem:[#allocation13 + $0xd90] sm:$0xf] }
 0x3a6   :  { %6430 = vmatpush.bf16.msrb.mxu0 %v12105_v26  ;;  %6444 = vmatpush.bf16.msrb.mxu1 %v12361_v10  ;;  %v16774_v26 = vld [vmem:[#allocation13 + $0xb94] sm:$0xf]  ;;  %v12581_v10 = vor.u32 %v16546_v59, %v12580_v55  ;;  %v18314_v38 = vpop.f32.mrf.mxu1  ;;  %v16842_v63 = vld [vmem:[#allocation13 + $0xdac] sm:$0xf0] }
 0x3a7   :  { %v13513_v62 = vor.u32 %v16774_v26, %v13510_v15  ;;  %v13478_v59 = vld [vmem:[#allocation13 + $0xb70] sm:$0xf0]  ;;  %v13732_v48 = vld [vmem:[#allocation13 + $0xd50] sm:$0xf] }
 0x3a8   :  { %6346 = vmatpush.bf16.msrb.mxu2 %v12613_v29  ;;  %6360 = vmatpush.bf16.msrb.mxu3 %v12869_v61  ;;  %v12805_v29 = vor.u32 %v16602_v18, %v12804_v25  ;;  %v16702_v61 = vld [vmem:[#allocation13 + $0x954] sm:$0xf]  ;;  %v13481_v58 = vor.u32 %v16766_v40, %v13478_v59  ;;  %v16834_v25 = vld [vmem:[#allocation13 + $0xd6c] sm:$0xf0] }
 0x3a9   :  { %v13225_v5 = vor.u32 %v16702_v61, %v13222_v37  ;;  %v16694_v26 = vld [vmem:[#allocation13 + $0x914] sm:$0xf]  ;;  %v13988_v18 = vld [vmem:[#allocation13 + $0xf50] sm:$0xf] }
 0x3aa   :  { %6431 = vmatpush.bf16.msrb.mxu0 %v12073_v51  ;;  %6445 = vmatpush.bf16.msrb.mxu1 %v12329_v6  ;;  %v16914_v51 = vld [vmem:[#allocation13 + $0xfec] sm:$0xf0]  ;;  %v6087_v6 = vadd.f32 %v6086_v42, %v6073_v57  ;;  %v16758_v15 = vld [vmem:[#allocation13 + $0xb14] sm:$0xf] }
 0x3ab   :  { %v14053_v55 = vor.u32 %v16914_v51, %v14052_v56  ;;  %v13446_v41 = vld [vmem:[#allocation13 + $0xb30] sm:$0xf0]  ;;  %v16898_v35 = vld [vmem:[#allocation13 + $0xf6c] sm:$0xf0] }
 0x3ac   :  { %6347 = vmatpush.bf16.msrb.mxu2 %v12581_v10  ;;  %6361 = vmatpush.bf16.msrb.mxu3 %v12837_v47  ;;  %v6770_v45 = vmax.f32 %v6087_v6, 0.0  ;;  %v13190_v10 = vld [vmem:[#allocation13 + $0x930] sm:$0xf0]  ;;  %v13765_v47 = vor.u32 %v16842_v63, %v13764_v4  ;;  %v13449_v51 = vor.u32 %v16758_v15, %v13446_v41  ;;  %v13700_v40 = vld [vmem:[#allocation13 + $0xd10] sm:$0xf] }
 0x3ad   :  { %v13193_v56 = vor.u32 %v16694_v26, %v13190_v10  ;;  %v16686_v6 = vld [vmem:[#allocation13 + $0x8d4] sm:$0xf]  ;;  %v13668_v26 = vld [vmem:[#allocation13 + $0xcd0] sm:$0xf] }
 0x3ae   :  { %6432 = vmatpush.bf16.msrb.mxu0 %v12041_v49  ;;  %6446 = vmatpush.bf16.msrb.mxu1 %v12297_v44  ;;  %v14020_v49 = vld [vmem:[#allocation13 + $0xf90] sm:$0xf]  ;;  %v6210_v57 = vpop.f32.mrf.mxu0  ;;  %v6224_v43 = vpop.f32.mrf.mxu1  ;;  %v16750_v61 = vld [vmem:[#allocation13 + $0xad4] sm:$0xf] }
 0x3af   :  { %v16906_v44 = vld [vmem:[#allocation13 + $0xfac] sm:$0xf0]  ;;  %v13414_v37 = vld [vmem:[#allocation13 + $0xaf0] sm:$0xf0] }
 0x3b0   :  { %6348 = vmatpush.bf16.msrb.mxu2 %v12549_v46  ;;  %6362 = vmatpush.bf16.msrb.mxu3 %v12805_v29  ;;  %v14021_v0 = vor.u32 %v16906_v44, %v14020_v49  ;;  %v13733_v46 = vor.u32 %v16834_v25, %v13732_v48  ;;  %v13989_v29 = vor.u32 %v16898_v35, %v13988_v18  ;;  %v16678_v4 = vld [vmem:[#allocation13 + $0x894] sm:$0xf]  ;;  %v16818_v10 = vld [vmem:[#allocation13 + $0xcec] sm:$0xf0] }
 0x3b1   :  { %6433 = vmatmul.bf16.vlgmr.msrb.gmra.mxu0 %v18117_v53  ;;  %6447 = vmatmul.bf16.vlgmr.msrb.gmra.mxu1 %v18119_v54  ;;  %v13417_v59 = vor.u32 %v16750_v61, %v13414_v37  ;;  %v13126_v63 = vld [vmem:[#allocation13 + $0x8b0] sm:$0xf0]  ;;  %v13669_v25 = vor.u32 %v16818_v10, %v13668_v26  ;;  %v16802_v26 = vld [vmem:[#allocation13 + $0xc6c] sm:$0xf0] }
 0x3b2   :  { %6481 = vmatpush.bf16.msra.mxu0 %v13289_v20  ;;  %6495 = vmatpush.bf16.msra.mxu1 %v13545_v9  ;;  %v18319_v20 = vpack.c.bf16 %v6770_v45, %v6762_v52  ;;  %v18321_v9 = vld [vmem:[#allocation14] sm:$0xff]  ;;  %v16826_v52 = vld [vmem:[#allocation13 + $0xd2c] sm:$0xf0]  ;;  %v13129_v15 = vor.u32 %v16678_v4, %v13126_v63  ;;  %v16670_v48 = vld [vmem:[#allocation13 + $0x854] sm:$0xf] }
 0x3b3   :  { %v18879_v14 = vperm.slane %v18321_v9, 3  ;;  %6349 = vmatmul.bf16.vlgmr.msrb.gmra.mxu2 %v18191_v2  ;;  %6363 = vmatmul.bf16.vlgmr.msrb.gmra.mxu3 %v18193_v1  ;;  %v13956_v45 = vld [vmem:[#allocation13 + $0xf10] sm:$0xf]  ;;  %v13701_v49 = vor.u32 %v16826_v52, %v13700_v40  ;;  %v16734_v35 = vld [vmem:[#allocation13 + $0xa54] sm:$0xf] }
 0x3b4   :  { %6397 = vmatpush.bf16.msra.mxu2 %v13797_v22  ;;  %6411 = vmatpush.bf16.msra.mxu3 %v14053_v55  ;;  %v16890_v22 = vld [vmem:[#allocation13 + $0xf2c] sm:$0xf0]  ;;  %v16662_v40 = vld [vmem:[#allocation13 + $0x814] sm:$0xf]  ;;  %v12268_v63 = vld [vmem:[#allocation13 + $0x1d8] sm:$0xf] }
 0x3b5   :  { %v6211_v42 = vadd.f32 %v6210_v57, %v18879_v14  ;;  %v13957_v44 = vor.u32 %v16890_v22, %v13956_v45  ;;  %v13094_v57 = vld [vmem:[#allocation13 + $0x870] sm:$0xf0]  ;;  %v13860_v10 = vld [vmem:[#allocation13 + $0xe50] sm:$0xf] }
 0x3b6   :  { %6482 = vmatpush.bf16.msra.mxu0 %v13257_v36  ;;  %6496 = vmatpush.bf16.msra.mxu1 %v13513_v62  ;;  %v13158_v36 = vld [vmem:[#allocation13 + $0x8f0] sm:$0xf0]  ;;  %v13097_v61 = vor.u32 %v16670_v48, %v13094_v57  ;;  %v12236_v57 = vld [vmem:[#allocation13 + $0x198] sm:$0xf] }
 0x3b7   :  { %v18328_v62 = vadd.f32 %v6224_v43, %v6211_v42  ;;  %v13161_v55 = vor.u32 %v16686_v6, %v13158_v36  ;;  %v13350_v42 = vld [vmem:[#allocation13 + $0xa70] sm:$0xf0]  ;;  %v13636_v43 = vld [vmem:[#allocation13 + $0xc90] sm:$0xf] }
 0x3b8   :  { %6398 = vmatpush.bf16.msra.mxu2 %v13765_v47  ;;  %6412 = vmatpush.bf16.msra.mxu3 %v14021_v0  ;;  %v13924_v47 = vld [vmem:[#allocation13 + $0xed0] sm:$0xf]  ;;  %v13353_v37 = vor.u32 %v16734_v35, %v13350_v42  ;;  %v13062_v52 = vld [vmem:[#allocation13 + $0x830] sm:$0xf0] }
 0x3b9   :  { %v16882_v0 = vld [vmem:[#allocation13 + $0xeec] sm:$0xf0]  ;;  %v16726_v45 = vld [vmem:[#allocation13 + $0xa14] sm:$0xf] }
 0x3ba   :  { %6483 = vmatpush.bf16.msra.mxu0 %v13225_v5  ;;  %6497 = vmatpush.bf16.msra.mxu1 %v13481_v58  ;;  %v16742_v5 = vld [vmem:[#allocation13 + $0xa94] sm:$0xf]  ;;  %v13925_v18 = vor.u32 %v16882_v0, %v13924_v47  ;;  %v13892_v6 = vld [vmem:[#allocation13 + $0xe90] sm:$0xf]  ;;  %v13065_v0 = vor.u32 %v16662_v40, %v13062_v52 }
 0x3bb   :  { %v13382_v58 = vld [vmem:[#allocation13 + $0xab0] sm:$0xf0]  ;;  %v16874_v36 = vld [vmem:[#allocation13 + $0xeac] sm:$0xf0] }
 0x3bc   :  { %6399 = vmatpush.bf16.msra.mxu2 %v13733_v46  ;;  %6413 = vmatpush.bf16.msra.mxu3 %v13989_v29  ;;  %v13385_v41 = vor.u32 %v16742_v5, %v13382_v58  ;;  %v6140_v29 = vpop.f32.mrf.mxu3  ;;  %v13318_v4 = vld [vmem:[#allocation13 + $0xa30] sm:$0xf0]  ;;  %v16531_v5 = vld [vmem:[#allocation13 + $0x3f4] sm:$0xf0]  ;;  %v13604_v58 = vld [vmem:[#allocation13 + $0xc50] sm:$0xf] }
 0x3bd   :  { %v16866_v47 = vld [vmem:[#allocation13 + $0xe6c] sm:$0xf0]  ;;  %v13605_v42 = vor.u32 %v16802_v26, %v13604_v58  ;;  %v16646_v58 = vld [vmem:[#allocation13 + $0x794] sm:$0xf] }
 0x3be   :  { %6484 = vmatpush.bf16.msra.mxu0 %v13193_v56  ;;  %6498 = vmatpush.bf16.msra.mxu1 %v13449_v51  ;;  %v6126_v56 = vpop.f32.mrf.mxu2  ;;  %v16810_v51 = vld [vmem:[#allocation13 + $0xcac] sm:$0xf0]  ;;  %v13574_v14 = vld [vmem:[#allocation13 + $0xc30] sm:$0xf0] }
 0x3bf   :  { %v6127_v46 = vadd.f32 %v6126_v56, %v18277_v11  ;;  %v13572_v56 = vld [vmem:[#allocation13 + $0xc10] sm:$0xf] }
 0x3c0   :  { %6400 = vmatpush.bf16.msra.mxu2 %v13701_v49  ;;  %6414 = vmatpush.bf16.msra.mxu3 %v13957_v44  ;;  %v16467_v49 = vld [vmem:[#allocation13 + $0x1f4] sm:$0xf0] }
 0x3c1   :  { %v6141_v22 = vadd.f32 %v6140_v29, %v6127_v46  ;;  %v12524_v44 = vld [vmem:[#allocation13 + $0x3d8] sm:$0xf]  ;;  %v16590_v46 = vld [vmem:[#allocation13 + $0x5d4] sm:$0xf] }
 0x3c2   :  { %6485 = vmatpush.bf16.msra.mxu0 %v13161_v55  ;;  %6499 = vmatpush.bf16.msra.mxu1 %v13417_v59  ;;  %v13637_v55 = vor.u32 %v16810_v51, %v13636_v43  ;;  %v13893_v59 = vor.u32 %v16874_v36, %v13892_v6  ;;  %v12525_v48 = vor.u32 %v16531_v5, %v12524_v44  ;;  %v16794_v51 = vld [vmem:[#allocation13 + $0xc2c] sm:$0xf0]  ;;  %v12774_v29 = vld [vmem:[#allocation13 + $0x5f0] sm:$0xf0] }
 0x3c3   :  { %v6155_v11 = vadd.f32 %v18304_v24, %v6141_v22  ;;  %v13861_v43 = vor.u32 %v16866_v47, %v13860_v10  ;;  %v16523_v24 = vld [vmem:[#allocation13 + $0x3b4] sm:$0xf0]  ;;  %v13828_v6 = vld [vmem:[#allocation13 + $0xe10] sm:$0xf]  ;;  %v16582_v44 = vld [vmem:[#allocation13 + $0x594] sm:$0xf] }
 0x3c4   :  { %6401 = vmatpush.bf16.msra.mxu2 %v13669_v25  ;;  %6415 = vmatpush.bf16.msra.mxu3 %v13925_v18  ;;  %v16459_v25 = vld [vmem:[#allocation13 + $0x1b4] sm:$0xf0]  ;;  %v16858_v36 = vld [vmem:[#allocation13 + $0xe2c] sm:$0xf0]  ;;  %v12742_v5 = vld [vmem:[#allocation13 + $0x5b0] sm:$0xf0] }
 0x3c5   :  { %v12492_v18 = vld [vmem:[#allocation13 + $0x398] sm:$0xf]  ;;  %v18333_v35 = vadd.f32 %v18307_v23, %v6155_v11  ;;  %v12237_v40 = vor.u32 %v16459_v25, %v12236_v57  ;;  %v13573_v23 = vor.u32 %v16794_v51, %v13572_v56  ;;  %v12998_v11 = vld [vmem:[#allocation13 + $0x7b0] sm:$0xf0] }
 0x3c6   :  { %6486 = vmatpush.bf16.msra.mxu0 %v13129_v15  ;;  %6500 = vmatpush.bf16.msra.mxu1 %v13385_v41  ;;  %v13321_v15 = vor.u32 %v16726_v45, %v13318_v4  ;;  %v12269_v41 = vor.u32 %v16467_v49, %v12268_v63  ;;  %v12493_v52 = vor.u32 %v16523_v24, %v12492_v18  ;;  %v12204_v22 = vld [vmem:[#allocation13 + $0x158] sm:$0xf]  ;;  %v16574_v25 = vld [vmem:[#allocation13 + $0x554] sm:$0xf] }
 0x3c7   :  { %v13829_v45 = vor.u32 %v16858_v36, %v13828_v6  ;;  %v12460_v63 = vld [vmem:[#allocation13 + $0x358] sm:$0xf]  ;;  %v12710_v18 = vld [vmem:[#allocation13 + $0x570] sm:$0xf0] }
 0x3c8   :  { %6402 = vmatpush.bf16.msra.mxu2 %v13637_v55  ;;  %6416 = vmatpush.bf16.msra.mxu3 %v13893_v59  ;;  %v16451_v55 = vld [vmem:[#allocation13 + $0x174] sm:$0xf0]  ;;  %v12777_v59 = vor.u32 %v16590_v46, %v12774_v29  ;;  %v12713_v36 = vor.u32 %v16574_v25, %v12710_v18 }
 0x3c9   :  { %v16515_v49 = vld [vmem:[#allocation13 + $0x374] sm:$0xf0]  ;;  %v12205_v26 = vor.u32 %v16451_v55, %v12204_v22  ;;  %v18341_v22 = vpop.f32.mrf.mxu3 }
 0x3ca   :  { %6487 = vmatpush.bf16.msra.mxu0 %v13097_v61  ;;  %6501 = vmatpush.bf16.msra.mxu1 %v13353_v37  ;;  %v16654_v61 = vld [vmem:[#allocation13 + $0x7d4] sm:$0xf]  ;;  %v12461_v10 = vor.u32 %v16515_v49, %v12460_v63  ;;  %v12172_v47 = vld [vmem:[#allocation13 + $0x118] sm:$0xf] }
 0x3cb   :  { %v13030_v37 = vld [vmem:[#allocation13 + $0x7f0] sm:$0xf0]  ;;  %v16507_v57 = vld [vmem:[#allocation13 + $0x334] sm:$0xf0] }
 0x3cc   :  { %6403 = vmatpush.bf16.msra.mxu2 %v13605_v42  ;;  %6417 = vmatpush.bf16.msra.mxu3 %v13861_v43  ;;  %v13033_v4 = vor.u32 %v16654_v61, %v13030_v37  ;;  %v16638_v42 = vld [vmem:[#allocation13 + $0x754] sm:$0xf]  ;;  %v12140_v51 = vld [vmem:[#allocation13 + $0xd8] sm:$0xf] }
 0x3cd   :  { %v12966_v43 = vld [vmem:[#allocation13 + $0x770] sm:$0xf0]  ;;  %v16435_v6 = vld [vmem:[#allocation13 + $0xf4] sm:$0xf0] }
 0x3ce   :  { %6488 = vmatpush.bf16.msra.mxu0 %v13065_v0  ;;  %6502 = vmatpush.bf16.msra.mxu1 %v13321_v15  ;;  %v16443_v0 = vld [vmem:[#allocation13 + $0x134] sm:$0xf0]  ;;  %v12745_v15 = vor.u32 %v16582_v44, %v12742_v5  ;;  %v12969_v46 = vor.u32 %v16638_v42, %v12966_v43  ;;  %v16566_v37 = vld [vmem:[#allocation13 + $0x514] sm:$0xf]  ;;  %v12141_v55 = vor.u32 %v16435_v6, %v12140_v51 }
 0x3cf   :  { %v12173_v24 = vor.u32 %v16443_v0, %v12172_v47  ;;  %v12396_v29 = vld [vmem:[#allocation13 + $0x2d8] sm:$0xf]  ;;  %v12902_v47 = vld [vmem:[#allocation13 + $0x6f0] sm:$0xf0] }
 0x3d0   :  { %6404 = vmatpush.bf16.msra.mxu2 %v13573_v23  ;;  %6418 = vmatpush.bf16.msra.mxu3 %v13829_v45  ;;  %v16499_v61 = vld [vmem:[#allocation13 + $0x2f4] sm:$0xf0]  ;;  %v16630_v23 = vld [vmem:[#allocation13 + $0x714] sm:$0xf] }
 0x3d1   :  { %6489 = vmatmul.bf16.vlgmr.msra.gmra.mxu0 %v18143_v7  ;;  %6503 = vmatmul.bf16.vlgmr.msra.gmra.mxu1 %v18145_v28  ;;  %v12934_v45 = vld [vmem:[#allocation13 + $0x730] sm:$0xf0]  ;;  %v16427_v63 = vld [vmem:[#allocation13 + $0xb4] sm:$0xf0] }
 0x3d2   :  { %6537 = vmatpush.bf16.msrb.mxu0 %v12269_v41  ;;  %6551 = vmatpush.bf16.msrb.mxu1 %v12525_v48  ;;  %v13001_v41 = vor.u32 %v16646_v58, %v12998_v11  ;;  %v12428_v48 = vld [vmem:[#allocation13 + $0x318] sm:$0xf]  ;;  %v12937_v44 = vor.u32 %v16630_v23, %v12934_v45  ;;  %v16558_v11 = vld [vmem:[#allocation13 + $0x4d4] sm:$0xf] }
 0x3d3   :  { %6405 = vmatmul.bf16.vlgmr.msra.gmra.mxu2 %v18203_v8  ;;  %6419 = vmatmul.bf16.vlgmr.msra.gmra.mxu3 %v18205_v16  ;;  %v12429_v56 = vor.u32 %v16507_v57, %v12428_v48  ;;  %v12364_v5 = vld [vmem:[#allocation13 + $0x298] sm:$0xf]  ;;  %v16550_v43 = vld [vmem:[#allocation13 + $0x494] sm:$0xf] }
 0x3d4   :  { %6453 = vmatpush.bf16.msrb.mxu2 %v12777_v59  ;;  %6467 = vmatpush.bf16.msrb.mxu3 %v13033_v4  ;;  %v12397_v59 = vor.u32 %v16499_v61, %v12396_v29  ;;  %v12108_v4 = vld [vmem:[#allocation13 + $0x98] sm:$0xf]  ;;  %v16614_v51 = vld [vmem:[#allocation13 + $0x694] sm:$0xf] }
 0x3d5   :  { %v16491_v58 = vld [vmem:[#allocation13 + $0x2b4] sm:$0xf0]  ;;  %v12109_v0 = vor.u32 %v16427_v63, %v12108_v4  ;;  %v12870_v6 = vld [vmem:[#allocation13 + $0x6b0] sm:$0xf0] }
 0x3d6   :  { %6538 = vmatpush.bf16.msrb.mxu0 %v12237_v40  ;;  %6552 = vmatpush.bf16.msrb.mxu1 %v12493_v52  ;;  %v18339_v40 = vpop.f32.mrf.mxu2  ;;  %v12678_v52 = vld [vmem:[#allocation13 + $0x530] sm:$0xf0]  ;;  %v16419_v48 = vld [vmem:[#allocation13 + $0x74] sm:$0xf0] }
 0x3d7   :  { %v12681_v49 = vor.u32 %v16566_v37, %v12678_v52  ;;  %v12332_v18 = vld [vmem:[#allocation13 + $0x258] sm:$0xf] }
 0x3d8   :  { %6454 = vmatpush.bf16.msrb.mxu2 %v12745_v15  ;;  %6468 = vmatpush.bf16.msrb.mxu3 %v13001_v41  ;;  %v12365_v15 = vor.u32 %v16491_v58, %v12364_v5  ;;  %v12076_v41 = vld [vmem:[#allocation13 + $0x58] sm:$0xf]  ;;  %v12582_v58 = vld [vmem:[#allocation13 + $0x470] sm:$0xf0] }
 0x3d9   :  { %v16483_v42 = vld [vmem:[#allocation13 + $0x274] sm:$0xf0]  ;;  %v12077_v29 = vor.u32 %v16419_v48, %v12076_v41 }
 0x3da   :  { %6539 = vmatpush.bf16.msrb.mxu0 %v12205_v26  ;;  %6553 = vmatpush.bf16.msrb.mxu1 %v12461_v10  ;;  %v12646_v26 = vld [vmem:[#allocation13 + $0x4f0] sm:$0xf0]  ;;  %v12333_v61 = vor.u32 %v16483_v42, %v12332_v18  ;;  %v12044_v37 = vld [vmem:[#allocation13 + $0x18] sm:$0xf] }
 0x3db   :  { %v16622_v10 = vld [vmem:[#allocation13 + $0x6d4] sm:$0xf]  ;;  %v12649_v57 = vor.u32 %v16558_v11, %v12646_v26  ;;  %v16411_v52 = vld [vmem:[#allocation13 + $0x34] sm:$0xf0] }
 0x3dc   :  { %6455 = vmatpush.bf16.msrb.mxu2 %v12713_v36  ;;  %6469 = vmatpush.bf16.msrb.mxu3 %v12969_v46  ;;  %v12905_v25 = vor.u32 %v16622_v10, %v12902_v47  ;;  %v6196_v46 = vpop.f32.mrf.mxu3  ;;  %v12300_v23 = vld [vmem:[#allocation13 + $0x218] sm:$0xf]  ;;  %v16606_v11 = vld [vmem:[#allocation13 + $0x654] sm:$0xf]  ;;  %v12045_v10 = vor.u32 %v16411_v52, %v12044_v37 }
 0x3dd   :  { %v16475_v4 = vld [vmem:[#allocation13 + $0x234] sm:$0xf0]  ;;  %v12838_v26 = vld [vmem:[#allocation13 + $0x670] sm:$0xf0] }
 0x3de   :  { %6540 = vmatpush.bf16.msrb.mxu0 %v12173_v24  ;;  %6554 = vmatpush.bf16.msrb.mxu1 %v12429_v56  ;;  %v6182_v24 = vpop.f32.mrf.mxu2  ;;  %v12614_v56 = vld [vmem:[#allocation13 + $0x4b0] sm:$0xf0]  ;;  %v13292_v63 = vld [vmem:[#allocation13 + $0x9d8] sm:$0xf]  ;;  %v12301_v47 = vor.u32 %v16475_v4, %v12300_v23  ;;  %v12841_v18 = vor.u32 %v16606_v11, %v12838_v26 }
 0x3df   :  { %v6183_v36 = vadd.f32 %v6182_v24, %v18333_v35  ;;  %v16787_v5 = vld [vmem:[#allocation13 + $0xbf4] sm:$0xf0]  ;;  %v16542_v35 = vld [vmem:[#allocation13 + $0x454] sm:$0xf] }
 0x3e0   :  { %6456 = vmatpush.bf16.msrb.mxu2 %v12681_v49  ;;  %6470 = vmatpush.bf16.msrb.mxu3 %v12937_v44  ;;  %v16723_v49 = vld [vmem:[#allocation13 + $0x9f4] sm:$0xf0]  ;;  %v12550_v24 = vld [vmem:[#allocation13 + $0x430] sm:$0xf0] }
 0x3e1   :  { %v18344_v45 = vadd.f32 %v6196_v46, %v6183_v36  ;;  %v13548_v44 = vld [vmem:[#allocation13 + $0xbd8] sm:$0xf]  ;;  %v13798_v36 = vld [vmem:[#allocation13 + $0xdf0] sm:$0xf0] }
 0x3e2   :  { %6541 = vmatpush.bf16.msrb.mxu0 %v12141_v55  ;;  %6555 = vmatpush.bf16.msrb.mxu1 %v12397_v59  ;;  %v12617_v55 = vor.u32 %v16550_v43, %v12614_v56  ;;  %v12873_v59 = vor.u32 %v16614_v51, %v12870_v6  ;;  %v13260_v41 = vld [vmem:[#allocation13 + $0x998] sm:$0xf]  ;;  %v16534_v43 = vld [vmem:[#allocation13 + $0x414] sm:$0xf] }
 0x3e3   :  { %18886 = vst [vmem:[#allocation26_spill] sm:$0xff] %v18344_v45  ;;  %v16715_v48 = vld [vmem:[#allocation13 + $0x9b4] sm:$0xf0]  ;;  %v16598_v56 = vld [vmem:[#allocation13 + $0x614] sm:$0xf]  ;;  %v12553_v52 = vor.u32 %v16534_v43, %v12550_v24 }
 0x3e4   :  { %6457 = vmatpush.bf16.msrb.mxu2 %v12649_v57  ;;  %6471 = vmatpush.bf16.msrb.mxu3 %v12905_v25  ;;  %v13516_v57 = vld [vmem:[#allocation13 + $0xb98] sm:$0xf]  ;;  %v12585_v25 = vor.u32 %v16542_v35, %v12582_v58  ;;  %v12806_v51 = vld [vmem:[#allocation13 + $0x630] sm:$0xf0]  ;;  %v16599_v45 = vld [vmem:[#allocation13 + $0x61c] sm:$0xf] }
 0x3e5   :  { %v16779_v42 = vld [vmem:[#allocation13 + $0xbb4] sm:$0xf0]  ;;  %v16846_v6 = vld [vmem:[#allocation13 + $0xdd4] sm:$0xf]  ;;  %v12809_v23 = vor.u32 %v16598_v56, %v12806_v51 }
 0x3e6   :  { %6542 = vmatpush.bf16.msrb.mxu0 %v12109_v0  ;;  %6556 = vmatpush.bf16.msrb.mxu1 %v12365_v15  ;;  %v13293_v0 = vor.u32 %v16723_v49, %v13292_v63  ;;  %v13549_v15 = vor.u32 %v16787_v5, %v13548_v44  ;;  %v16910_v46 = vld [vmem:[#allocation13 + $0xfd4] sm:$0xf]  ;;  %v13517_v37 = vor.u32 %v16779_v42, %v13516_v57  ;;  %v13484_v49 = vld [vmem:[#allocation13 + $0xb58] sm:$0xf] }
 0x3e7   :  { %v13801_v4 = vor.u32 %v16846_v6, %v13798_v36  ;;  %v16771_v44 = vld [vmem:[#allocation13 + $0xb74] sm:$0xf0]  ;;  %v16838_v5 = vld [vmem:[#allocation13 + $0xd94] sm:$0xf] }
 0x3e8   :  { %6458 = vmatpush.bf16.msrb.mxu2 %v12617_v55  ;;  %6472 = vmatpush.bf16.msrb.mxu3 %v12873_v59  ;;  %v13228_v55 = vld [vmem:[#allocation13 + $0x958] sm:$0xf]  ;;  %v13766_v35 = vld [vmem:[#allocation13 + $0xdb0] sm:$0xf0] }
 0x3e9   :  { %v16707_v59 = vld [vmem:[#allocation13 + $0x974] sm:$0xf0]  ;;  %v16902_v58 = vld [vmem:[#allocation13 + $0xf94] sm:$0xf] }
 0x3ea   :  { %6543 = vmatpush.bf16.msrb.mxu0 %v12077_v29  ;;  %6557 = vmatpush.bf16.msrb.mxu1 %v12333_v61  ;;  %v14054_v29 = vld [vmem:[#allocation13 + $0xff0] sm:$0xf0]  ;;  %v13261_v61 = vor.u32 %v16715_v48, %v13260_v41  ;;  %v13229_v26 = vor.u32 %v16707_v59, %v13228_v55  ;;  %v13452_v48 = vld [vmem:[#allocation13 + $0xb18] sm:$0xf] }
 0x3eb   :  { %v14057_v63 = vor.u32 %v16910_v46, %v14054_v29  ;;  %v14022_v11 = vld [vmem:[#allocation13 + $0xfb0] sm:$0xf0]  ;;  %v16763_v57 = vld [vmem:[#allocation13 + $0xb34] sm:$0xf0] }
 0x3ec   :  { %6459 = vmatpush.bf16.msrb.mxu2 %v12585_v25  ;;  %6473 = vmatpush.bf16.msrb.mxu3 %v12841_v18  ;;  %v14025_v41 = vor.u32 %v16902_v58, %v14022_v11  ;;  %v16830_v25 = vld [vmem:[#allocation13 + $0xd54] sm:$0xf]  ;;  %v13453_v56 = vor.u32 %v16763_v57, %v13452_v48  ;;  %v13164_v51 = vld [vmem:[#allocation13 + $0x8d8] sm:$0xf]  ;;  %v18356_v48 = vpop.f32.mrf.mxu1 }
 0x3ed   :  { %v13734_v18 = vld [vmem:[#allocation13 + $0xd70] sm:$0xf0]  ;;  %v16691_v6 = vld [vmem:[#allocation13 + $0x8f4] sm:$0xf0] }
 0x3ee   :  { %6544 = vmatpush.bf16.msrb.mxu0 %v12045_v10  ;;  %6558 = vmatpush.bf16.msrb.mxu1 %v12301_v47  ;;  %v13485_v10 = vor.u32 %v16771_v44, %v13484_v49  ;;  %v13196_v47 = vld [vmem:[#allocation13 + $0x918] sm:$0xf]  ;;  %v16894_v42 = vld [vmem:[#allocation13 + $0xf54] sm:$0xf]  ;;  %v13737_v36 = vor.u32 %v16830_v25, %v13734_v18 }
 0x3ef   :  { %v13990_v43 = vld [vmem:[#allocation13 + $0xf70] sm:$0xf0]  ;;  %v13420_v29 = vld [vmem:[#allocation13 + $0xad8] sm:$0xf] }
 0x3f0   :  { %6460 = vmatpush.bf16.msrb.mxu2 %v12553_v52  ;;  %6474 = vmatpush.bf16.msrb.mxu3 %v12809_v23  ;;  %v13993_v46 = vor.u32 %v16894_v42, %v13990_v43  ;;  %v18350_v52 = vpop.f32.mrf.mxu2  ;;  %v13702_v23 = vld [vmem:[#allocation13 + $0xd30] sm:$0xf0]  ;;  %v13132_v44 = vld [vmem:[#allocation13 + $0x898] sm:$0xf] }
 0x3f1   :  { %6545 = vmatmul.bf16.vlgmr.msrb.gmra.mxu0 %v18117_v53  ;;  %6559 = vmatmul.bf16.vlgmr.msrb.gmra.mxu1 %v18119_v54  ;;  %v16886_v55 = vld [vmem:[#allocation13 + $0xf14] sm:$0xf]  ;;  %v13388_v11 = vld [vmem:[#allocation13 + $0xa98] sm:$0xf] }
 0x3f2   :  { %6593 = vmatpush.bf16.msra.mxu0 %v13293_v0  ;;  %6607 = vmatpush.bf16.msra.mxu1 %v13549_v15  ;;  %v16699_v0 = vld [vmem:[#allocation13 + $0x934] sm:$0xf0]  ;;  %v13769_v15 = vor.u32 %v16838_v5, %v13766_v35  ;;  %v13958_v59 = vld [vmem:[#allocation13 + $0xf30] sm:$0xf0] }
 0x3f3   :  { %6461 = vmatmul.bf16.vlgmr.msrb.gmra.mxu2 %v18191_v2  ;;  %6475 = vmatmul.bf16.vlgmr.msrb.gmra.mxu3 %v18193_v1  ;;  %v13197_v24 = vor.u32 %v16699_v0, %v13196_v47  ;;  %v16683_v5 = vld [vmem:[#allocation13 + $0x8b4] sm:$0xf0]  ;;  %v13961_v58 = vor.u32 %v16886_v55, %v13958_v59  ;;  %v18354_v47 = vpop.f32.mrf.mxu0  ;;  %v13670_v0 = vld [vmem:[#allocation13 + $0xcf0] sm:$0xf0] }
 0x3f4   :  { %6509 = vmatpush.bf16.msra.mxu2 %v13801_v4  ;;  %6523 = vmatpush.bf16.msra.mxu3 %v14057_v63  ;;  %v18352_v4 = vpop.f32.mrf.mxu3  ;;  %v13165_v63 = vor.u32 %v16691_v6, %v13164_v51  ;;  %v13133_v57 = vor.u32 %v16683_v5, %v13132_v44  ;;  %v13100_v18 = vld [vmem:[#allocation13 + $0x858] sm:$0xf]  ;;  %v16806_v6 = vld [vmem:[#allocation13 + $0xc94] sm:$0xf] }
 0x3f5   :  { %v16675_v42 = vld [vmem:[#allocation13 + $0x874] sm:$0xf0] }
 0x3f6   :  { %6594 = vmatpush.bf16.msra.mxu0 %v13261_v61  ;;  %6608 = vmatpush.bf16.msra.mxu1 %v13517_v37  ;;  %v16755_v61 = vld [vmem:[#allocation13 + $0xaf4] sm:$0xf0]  ;;  %v16822_v37 = vld [vmem:[#allocation13 + $0xd14] sm:$0xf]  ;;  %v13101_v55 = vor.u32 %v16675_v42, %v13100_v18  ;;  %v6280_v42 = vpop.f32.mrf.mxu1 }
 0x3f7   :  { %v13421_v49 = vor.u32 %v16755_v61, %v13420_v29  ;;  %v13705_v35 = vor.u32 %v16822_v37, %v13702_v23  ;;  %v16739_v51 = vld [vmem:[#allocation13 + $0xa74] sm:$0xf0]  ;;  %v16870_v29 = vld [vmem:[#allocation13 + $0xe94] sm:$0xf] }
 0x3f8   :  { %6510 = vmatpush.bf16.msra.mxu2 %v13769_v15  ;;  %6524 = vmatpush.bf16.msra.mxu3 %v14025_v41  ;;  %v16878_v15 = vld [vmem:[#allocation13 + $0xed4] sm:$0xf]  ;;  %v13324_v44 = vld [vmem:[#allocation13 + $0xa18] sm:$0xf] }
 0x3f9   :  { %v13926_v41 = vld [vmem:[#allocation13 + $0xef0] sm:$0xf0] }
 0x3fa   :  { %6595 = vmatpush.bf16.msra.mxu0 %v13229_v26  ;;  %6609 = vmatpush.bf16.msra.mxu1 %v13485_v10  ;;  %v16747_v26 = vld [vmem:[#allocation13 + $0xab4] sm:$0xf0]  ;;  %v16814_v10 = vld [vmem:[#allocation13 + $0xcd4] sm:$0xf] }
 0x3fb   :  { %v13389_v25 = vor.u32 %v16747_v26, %v13388_v11  ;;  %v13673_v43 = vor.u32 %v16814_v10, %v13670_v0  ;;  %v13894_v61 = vld [vmem:[#allocation13 + $0xeb0] sm:$0xf0]  ;;  %v16731_v11 = vld [vmem:[#allocation13 + $0xa34] sm:$0xf0]  ;;  %v16463_v26 = vld [vmem:[#allocation13 + $0x1dc] sm:$0xf]  ;;  %v6266_v0 = vpop.f32.mrf.mxu0 }
 0x3fc   :  { %6511 = vmatpush.bf16.msra.mxu2 %v13737_v36  ;;  %6525 = vmatpush.bf16.msra.mxu3 %v13993_v46  ;;  %v6238_v36 = vpop.f32.mrf.mxu2  ;;  %v13638_v46 = vld [vmem:[#allocation13 + $0xcb0] sm:$0xf0]  ;;  %v6252_v23 = vpop.f32.mrf.mxu3  ;;  %v12270_v10 = vld [vmem:[#allocation13 + $0x1f8] sm:$0xf0] }
 0x3fd   :  { %v6239_v37 = vadd.f32 %v6238_v36, %v18328_v62  ;;  %v16798_v62 = vld [vmem:[#allocation13 + $0xc54] sm:$0xf] }
 0x3fe   :  { %6596 = vmatpush.bf16.msra.mxu0 %v13197_v24  ;;  %6610 = vmatpush.bf16.msra.mxu1 %v13453_v56  ;;  %v13929_v24 = vor.u32 %v16878_v15, %v13926_v41  ;;  %v13356_v56 = vld [vmem:[#allocation13 + $0xa58] sm:$0xf]  ;;  %v16527_v15 = vld [vmem:[#allocation13 + $0x3dc] sm:$0xf]  ;;  %v16862_v36 = vld [vmem:[#allocation13 + $0xe54] sm:$0xf] }
 0x3ff   :  { %v13357_v59 = vor.u32 %v16739_v51, %v13356_v56  ;;  %v6253_v5 = vadd.f32 %v6252_v23, %v6239_v37  ;;  %v12526_v41 = vld [vmem:[#allocation13 + $0x3f8] sm:$0xf0]  ;;  %v13862_v18 = vld [vmem:[#allocation13 + $0xe70] sm:$0xf0] }
 0x400   :  { %6512 = vmatpush.bf16.msra.mxu2 %v13705_v35  ;;  %6526 = vmatpush.bf16.msra.mxu3 %v13961_v58  ;;  %v13641_v35 = vor.u32 %v16806_v6, %v13638_v46  ;;  %v13897_v58 = vor.u32 %v16870_v29, %v13894_v61  ;;  %v12529_v51 = vor.u32 %v16527_v15, %v12526_v41  ;;  %v16455_v6 = vld [vmem:[#allocation13 + $0x19c] sm:$0xf] }
 0x401   :  { %v12238_v46 = vld [vmem:[#allocation13 + $0x1b8] sm:$0xf0]  ;;  %v13865_v23 = vor.u32 %v16862_v36, %v13862_v18  ;;  %v16587_v36 = vld [vmem:[#allocation13 + $0x5b4] sm:$0xf0] }
 0x402   :  { %6597 = vmatpush.bf16.msra.mxu0 %v13165_v63  ;;  %6611 = vmatpush.bf16.msra.mxu1 %v13421_v49  ;;  %v13068_v63 = vld [vmem:[#allocation13 + $0x818] sm:$0xf]  ;;  %v16519_v29 = vld [vmem:[#allocation13 + $0x39c] sm:$0xf] }
 0x403   :  { %v16667_v49 = vld [vmem:[#allocation13 + $0x834] sm:$0xf0] }
 0x404   :  { %6513 = vmatpush.bf16.msra.mxu2 %v13673_v43  ;;  %6527 = vmatpush.bf16.msra.mxu3 %v13929_v24  ;;  %v13069_v56 = vor.u32 %v16667_v49, %v13068_v63  ;;  %v13325_v43 = vor.u32 %v16731_v11, %v13324_v44  ;;  %v12273_v24 = vor.u32 %v16463_v26, %v12270_v10  ;;  %v13036_v63 = vld [vmem:[#allocation13 + $0x7d8] sm:$0xf]  ;;  %v16447_v26 = vld [vmem:[#allocation13 + $0x15c] sm:$0xf] }
 0x405   :  { %v16659_v49 = vld [vmem:[#allocation13 + $0x7f4] sm:$0xf0]  ;;  %v12241_v44 = vor.u32 %v16455_v6, %v12238_v46  ;;  %v13833_v11 = vor.u32 %v16854_v17, %v13830_v21  ;;  %v12206_v10 = vld [vmem:[#allocation13 + $0x178] sm:$0xf0] }
 0x406   :  { %6598 = vmatpush.bf16.msra.mxu0 %v13133_v57  ;;  %6612 = vmatpush.bf16.msra.mxu1 %v13389_v25  ;;  %v6267_v57 = vadd.f32 %v6266_v0, %v6253_v5  ;;  %v13606_v25 = vld [vmem:[#allocation13 + $0xc70] sm:$0xf0]  ;;  %v12494_v5 = vld [vmem:[#allocation13 + $0x3b8] sm:$0xf0]  ;;  %v13037_v41 = vor.u32 %v16659_v49, %v13036_v63  ;;  %v13004_v18 = vld [vmem:[#allocation13 + $0x798] sm:$0xf] }
 0x407   :  { %v13609_v37 = vor.u32 %v16798_v62, %v13606_v25  ;;  %v16790_v0 = vld [vmem:[#allocation13 + $0xc14] sm:$0xf]  ;;  %v16511_v62 = vld [vmem:[#allocation13 + $0x35c] sm:$0xf]  ;;  %v12748_v25 = vld [vmem:[#allocation13 + $0x598] sm:$0xf] }
 0x408   :  { %6514 = vmatpush.bf16.msra.mxu2 %v13641_v35  ;;  %6528 = vmatpush.bf16.msra.mxu3 %v13897_v58  ;;  %v18359_v61 = vadd.f32 %v6280_v42, %v6267_v57  ;;  %v12497_v35 = vor.u32 %v16519_v29, %v12494_v5  ;;  %v13577_v58 = vor.u32 %v16790_v0, %v13574_v14  ;;  %v12462_v57 = vld [vmem:[#allocation13 + $0x378] sm:$0xf0]  ;;  %v16651_v42 = vld [vmem:[#allocation13 + $0x7b4] sm:$0xf0] }
 0x409   :  { %v12209_v14 = vor.u32 %v16447_v26, %v12206_v10  ;;  %v12465_v21 = vor.u32 %v16511_v62, %v12462_v57  ;;  %v16439_v17 = vld [vmem:[#allocation13 + $0x11c] sm:$0xf]  ;;  %v12716_v46 = vld [vmem:[#allocation13 + $0x558] sm:$0xf] }
 0x40a   :  { %6599 = vmatpush.bf16.msra.mxu0 %v13101_v55  ;;  %6613 = vmatpush.bf16.msra.mxu1 %v13357_v59  ;;  %v12780_v55 = vld [vmem:[#allocation13 + $0x5d8] sm:$0xf]  ;;  %v12430_v6 = vld [vmem:[#allocation13 + $0x338] sm:$0xf0] }
 0x40b   :  { %v16595_v59 = vld [vmem:[#allocation13 + $0x5f4] sm:$0xf0] }
 0x40c   :  { %6515 = vmatpush.bf16.msra.mxu2 %v13609_v37  ;;  %6529 = vmatpush.bf16.msra.mxu3 %v13865_v23  ;;  %v12781_v15 = vor.u32 %v16595_v59, %v12780_v55  ;;  %v16579_v29 = vld [vmem:[#allocation13 + $0x574] sm:$0xf0]  ;;  %v16431_v55 = vld [vmem:[#allocation13 + $0xdc] sm:$0xf] }
 0x40d   :  { %v12972_v37 = vld [vmem:[#allocation13 + $0x758] sm:$0xf]  ;;  %v12142_v59 = vld [vmem:[#allocation13 + $0xf8] sm:$0xf0]  ;;  %v12717_v63 = vor.u32 %v16579_v29, %v12716_v46 }
 0x40e   :  { %6600 = vmatpush.bf16.msra.mxu0 %v13069_v56  ;;  %6614 = vmatpush.bf16.msra.mxu1 %v13325_v43  ;;  %v12174_v56 = vld [vmem:[#allocation13 + $0x138] sm:$0xf0]  ;;  %v12749_v43 = vor.u32 %v16587_v36, %v12748_v25  ;;  %v16643_v23 = vld [vmem:[#allocation13 + $0x774] sm:$0xf0]  ;;  %v12145_v62 = vor.u32 %v16431_v55, %v12142_v59 }
 0x40f   :  { %v12177_v5 = vor.u32 %v16439_v17, %v12174_v56  ;;  %v12973_v49 = vor.u32 %v16643_v23, %v12972_v37  ;;  %v16571_v26 = vld [vmem:[#allocation13 + $0x534] sm:$0xf0]  ;;  %v16423_v25 = vld [vmem:[#allocation13 + $0x9c] sm:$0xf] }
 0x410   :  { %6516 = vmatpush.bf16.msra.mxu2 %v13577_v58  ;;  %6530 = vmatpush.bf16.msra.mxu3 %v13833_v11  ;;  %v12684_v58 = vld [vmem:[#allocation13 + $0x518] sm:$0xf]  ;;  %v18365_v11 = vpop.f32.mrf.mxu2  ;;  %v12110_v36 = vld [vmem:[#allocation13 + $0xb8] sm:$0xf0] }
 0x411   :  { %6601 = vmatmul.bf16.vlgmr.msra.gmra.mxu0 %v18143_v7  ;;  %6615 = vmatmul.bf16.vlgmr.msra.gmra.mxu1 %v18145_v28  ;;  %v12940_v10 = vld [vmem:[#allocation13 + $0x718] sm:$0xf]  ;;  %v16415_v46 = vld [vmem:[#allocation13 + $0x5c] sm:$0xf] }
 0x412   :  { %6649 = vmatpush.bf16.msrb.mxu0 %v12273_v24  ;;  %6663 = vmatpush.bf16.msrb.mxu1 %v12529_v51  ;;  %v13005_v24 = vor.u32 %v16651_v42, %v13004_v18  ;;  %v16503_v51 = vld [vmem:[#allocation13 + $0x31c] sm:$0xf]  ;;  %v12685_v18 = vor.u32 %v16571_v26, %v12684_v58  ;;  %v12652_v17 = vld [vmem:[#allocation13 + $0x4d8] sm:$0xf] }
 0x413   :  { %6517 = vmatmul.bf16.vlgmr.msra.gmra.mxu2 %v18203_v8  ;;  %6531 = vmatmul.bf16.vlgmr.msra.gmra.mxu3 %v18205_v16  ;;  %v12433_v0 = vor.u32 %v16503_v51, %v12430_v6  ;;  %v16563_v56 = vld [vmem:[#allocation13 + $0x4f4] sm:$0xf0]  ;;  %v12113_v51 = vor.u32 %v16423_v25, %v12110_v36  ;;  %v12078_v29 = vld [vmem:[#allocation13 + $0x78] sm:$0xf0] }
 0x414   :  { %6565 = vmatpush.bf16.msrb.mxu2 %v12781_v15  ;;  %6579 = vmatpush.bf16.msrb.mxu3 %v13037_v41  ;;  %v16635_v15 = vld [vmem:[#allocation13 + $0x734] sm:$0xf0]  ;;  %v18367_v41 = vpop.f32.mrf.mxu3  ;;  %v12653_v37 = vor.u32 %v16563_v56, %v12652_v17  ;;  %v12081_v26 = vor.u32 %v16415_v46, %v12078_v29  ;;  %v16783_v17 = vld [vmem:[#allocation13 + $0xbdc] sm:$0xf] }
 0x415   :  { %v12941_v42 = vor.u32 %v16635_v15, %v12940_v10  ;;  %v12620_v55 = vld [vmem:[#allocation13 + $0x498] sm:$0xf]  ;;  %v16407_v15 = vld [vmem:[#allocation13 + $0x1c] sm:$0xf] }
 0x416   :  { %6650 = vmatpush.bf16.msrb.mxu0 %v12241_v44  ;;  %6664 = vmatpush.bf16.msrb.mxu1 %v12497_v35  ;;  %v16495_v44 = vld [vmem:[#allocation13 + $0x2dc] sm:$0xf] }
 0x417   :  { %v12398_v35 = vld [vmem:[#allocation13 + $0x2f8] sm:$0xf0] }
 0x418   :  { %6566 = vmatpush.bf16.msrb.mxu2 %v12749_v43  ;;  %6580 = vmatpush.bf16.msrb.mxu3 %v13005_v24  ;;  %v12401_v57 = vor.u32 %v16495_v44, %v12398_v35  ;;  %v12908_v43 = vld [vmem:[#allocation13 + $0x6d8] sm:$0xf]  ;;  %v6294_v59 = vpop.f32.mrf.mxu2  ;;  %v13550_v56 = vld [vmem:[#allocation13 + $0xbf8] sm:$0xf0] }
 0x419   :  { %v16627_v24 = vld [vmem:[#allocation13 + $0x6f4] sm:$0xf0]  ;;  %v6295_v35 = vadd.f32 %v6294_v59, %v18359_v61 }
 0x41a   :  { %6651 = vmatpush.bf16.msrb.mxu0 %v12209_v14  ;;  %6665 = vmatpush.bf16.msrb.mxu1 %v12465_v21  ;;  %v16487_v14 = vld [vmem:[#allocation13 + $0x29c] sm:$0xf]  ;;  %v12909_v23 = vor.u32 %v16627_v24, %v12908_v43  ;;  %v16619_v44 = vld [vmem:[#allocation13 + $0x6b4] sm:$0xf0] }
 0x41b   :  { %v12366_v21 = vld [vmem:[#allocation13 + $0x2b8] sm:$0xf0]  ;;  %v12588_v61 = vld [vmem:[#allocation13 + $0x458] sm:$0xf] }
 0x41c   :  { %6567 = vmatpush.bf16.msrb.mxu2 %v12717_v63  ;;  %6581 = vmatpush.bf16.msrb.mxu3 %v12973_v49  ;;  %v12369_v6 = vor.u32 %v16487_v14, %v12366_v21  ;;  %v16555_v63 = vld [vmem:[#allocation13 + $0x4b4] sm:$0xf0]  ;;  %v6308_v58 = vpop.f32.mrf.mxu3  ;;  %v16719_v14 = vld [vmem:[#allocation13 + $0x9dc] sm:$0xf] }
 0x41d   :  { %v12876_v49 = vld [vmem:[#allocation13 + $0x698] sm:$0xf]  ;;  %v18370_v25 = vadd.f32 %v6308_v58, %v6295_v35  ;;  %v12621_v36 = vor.u32 %v16555_v63, %v12620_v55  ;;  %v13294_v21 = vld [vmem:[#allocation13 + $0x9f8] sm:$0xf0] }
 0x41e   :  { %6652 = vmatpush.bf16.msrb.mxu0 %v12177_v5  ;;  %6666 = vmatpush.bf16.msrb.mxu1 %v12433_v0  ;;  %v16479_v5 = vld [vmem:[#allocation13 + $0x25c] sm:$0xf]  ;;  %v16547_v43 = vld [vmem:[#allocation13 + $0x474] sm:$0xf0]  ;;  %v13297_v29 = vor.u32 %v16719_v14, %v13294_v21 }
 0x41f   :  { %v12334_v0 = vld [vmem:[#allocation13 + $0x278] sm:$0xf0]  ;;  %18887 = vst [vmem:[#allocation27_spill] sm:$0xff] %v18370_v25  ;;  %v12844_v24 = vld [vmem:[#allocation13 + $0x658] sm:$0xf]  ;;  %v12589_v55 = vor.u32 %v16547_v43, %v12588_v61 }
 0x420   :  { %6568 = vmatpush.bf16.msrb.mxu2 %v12685_v18  ;;  %6582 = vmatpush.bf16.msrb.mxu3 %v12941_v42  ;;  %v12337_v10 = vor.u32 %v16479_v5, %v12334_v0  ;;  %v12877_v18 = vor.u32 %v16619_v44, %v12876_v49  ;;  %v12302_v42 = vld [vmem:[#allocation13 + $0x238] sm:$0xf0]  ;;  %v12556_v49 = vld [vmem:[#allocation13 + $0x418] sm:$0xf] }
 0x421   :  { %v13262_v5 = vld [vmem:[#allocation13 + $0x9b8] sm:$0xf0]  ;;  %v16539_v44 = vld [vmem:[#allocation13 + $0x434] sm:$0xf0] }
 0x422   :  { %6653 = vmatpush.bf16.msrb.mxu0 %v12145_v62  ;;  %6667 = vmatpush.bf16.msrb.mxu1 %v12401_v57  ;;  %v12046_v62 = vld [vmem:[#allocation13 + $0x38] sm:$0xf0]  ;;  %v12812_v35 = vld [vmem:[#allocation13 + $0x618] sm:$0xf] }
 0x423   :  { %v16471_v57 = vld [vmem:[#allocation13 + $0x21c] sm:$0xf]  ;;  %v16603_v58 = vld [vmem:[#allocation13 + $0x634] sm:$0xf0] }
 0x424   :  { %6569 = vmatpush.bf16.msrb.mxu2 %v12653_v37  ;;  %6583 = vmatpush.bf16.msrb.mxu3 %v12909_v23  ;;  %v12305_v46 = vor.u32 %v16471_v57, %v12302_v42  ;;  %v13553_v37 = vor.u32 %v16783_v17, %v13550_v56  ;;  %v16711_v23 = vld [vmem:[#allocation13 + $0x99c] sm:$0xf]  ;;  %v13804_v25 = vld [vmem:[#allocation13 + $0xdd8] sm:$0xf] }
 0x425   :  { %v16775_v0 = vld [vmem:[#allocation13 + $0xb9c] sm:$0xf]  ;;  %v13772_v43 = vld [vmem:[#allocation13 + $0xd98] sm:$0xf] }
 0x426   :  { %6654 = vmatpush.bf16.msrb.mxu0 %v12113_v51  ;;  %6668 = vmatpush.bf16.msrb.mxu1 %v12369_v6  ;;  %v16611_v51 = vld [vmem:[#allocation13 + $0x674] sm:$0xf0]  ;;  %v12049_v6 = vor.u32 %v16407_v15, %v12046_v62  ;;  %v13518_v63 = vld [vmem:[#allocation13 + $0xbb8] sm:$0xf0]  ;;  %v13265_v62 = vor.u32 %v16711_v23, %v13262_v5 }
 0x427   :  { %v12845_v59 = vor.u32 %v16611_v51, %v12844_v24  ;;  %v16915_v15 = vld [vmem:[#allocation13 + $0xff4] sm:$0xf0]  ;;  %v13521_v57 = vor.u32 %v16775_v0, %v13518_v63  ;;  %v16703_v42 = vld [vmem:[#allocation13 + $0x95c] sm:$0xf] }
 0x428   :  { %6570 = vmatpush.bf16.msrb.mxu2 %v12621_v36  ;;  %6584 = vmatpush.bf16.msrb.mxu3 %v12877_v18  ;;  %v12557_v36 = vor.u32 %v16539_v44, %v12556_v49  ;;  %v12813_v18 = vor.u32 %v16603_v58, %v12812_v35  ;;  %v13230_v14 = vld [vmem:[#allocation13 + $0x978] sm:$0xf0]  ;;  %v16843_v24 = vld [vmem:[#allocation13 + $0xdb4] sm:$0xf0] }
 0x429   :  { %v16767_v56 = vld [vmem:[#allocation13 + $0xb5c] sm:$0xf]  ;;  %v14028_v51 = vld [vmem:[#allocation13 + $0xf98] sm:$0xf] }
 0x42a   :  { %6655 = vmatpush.bf16.msrb.mxu0 %v12081_v26  ;;  %6669 = vmatpush.bf16.msrb.mxu1 %v12337_v10  ;;  %v16851_v26 = vld [vmem:[#allocation13 + $0xdf4] sm:$0xf0]  ;;  %v13486_v61 = vld [vmem:[#allocation13 + $0xb78] sm:$0xf0] }
 0x42b   :  { %v14060_v10 = vld [vmem:[#allocation13 + $0xfd8] sm:$0xf]  ;;  %v13805_v21 = vor.u32 %v16851_v26, %v13804_v25  ;;  %v13198_v23 = vld [vmem:[#allocation13 + $0x938] sm:$0xf0] }
 0x42c   :  { %6571 = vmatpush.bf16.msrb.mxu2 %v12589_v55  ;;  %6585 = vmatpush.bf16.msrb.mxu3 %v12845_v59  ;;  %v14061_v17 = vor.u32 %v16915_v15, %v14060_v10  ;;  %v16759_v25 = vld [vmem:[#allocation13 + $0xb1c] sm:$0xf]  ;;  %v13740_v0 = vld [vmem:[#allocation13 + $0xd58] sm:$0xf] }
 0x42d   :  { %v13454_v5 = vld [vmem:[#allocation13 + $0xb38] sm:$0xf0]  ;;  %v16835_v55 = vld [vmem:[#allocation13 + $0xd74] sm:$0xf0] }
 0x42e   :  { %6656 = vmatpush.bf16.msrb.mxu0 %v12049_v6  ;;  %6670 = vmatpush.bf16.msrb.mxu1 %v12305_v46  ;;  %v16907_v6 = vld [vmem:[#allocation13 + $0xfb4] sm:$0xf0]  ;;  %v13233_v46 = vor.u32 %v16703_v42, %v13230_v14  ;;  %v13457_v44 = vor.u32 %v16759_v25, %v13454_v5  ;;  %v16687_v35 = vld [vmem:[#allocation13 + $0x8dc] sm:$0xf]  ;;  %v13741_v26 = vor.u32 %v16835_v55, %v13740_v0 }
 0x42f   :  { %v13996_v59 = vld [vmem:[#allocation13 + $0xf58] sm:$0xf]  ;;  %v13166_v58 = vld [vmem:[#allocation13 + $0x8f8] sm:$0xf0] }
 0x430   :  { %6572 = vmatpush.bf16.msrb.mxu2 %v12557_v36  ;;  %6586 = vmatpush.bf16.msrb.mxu3 %v12813_v18  ;;  %v16899_v63 = vld [vmem:[#allocation13 + $0xf74] sm:$0xf0]  ;;  %v16751_v15 = vld [vmem:[#allocation13 + $0xadc] sm:$0xf]  ;;  %v13169_v14 = vor.u32 %v16687_v35, %v13166_v58 }
 0x431   :  { %6657 = vmatmul.bf16.vlgmr.msrb.gmra.mxu0 %v18117_v53  ;;  %6671 = vmatmul.bf16.vlgmr.msrb.gmra.mxu1 %v18119_v54  ;;  %v13773_v53 = vor.u32 %v16843_v24, %v13772_v43  ;;  %v14029_v54 = vor.u32 %v16907_v6, %v14028_v51  ;;  %v13997_v10 = vor.u32 %v16899_v63, %v13996_v59  ;;  %v16827_v36 = vld [vmem:[#allocation13 + $0xd34] sm:$0xf0]  ;;  %v16743_v24 = vld [vmem:[#allocation13 + $0xa9c] sm:$0xf] }
 0x432   :  { %6705 = vmatpush.bf16.msra.mxu0 %v13297_v29  ;;  %6719 = vmatpush.bf16.msra.mxu1 %v13553_v37  ;;  %v13489_v29 = vor.u32 %v16767_v56, %v13486_v61  ;;  %v16695_v37 = vld [vmem:[#allocation13 + $0x91c] sm:$0xf]  ;;  %v13964_v18 = vld [vmem:[#allocation13 + $0xf18] sm:$0xf] }
 0x433   :  { %6573 = vmatmul.bf16.vlgmr.msrb.gmra.mxu2 %v18191_v2  ;;  %6587 = vmatmul.bf16.vlgmr.msrb.gmra.mxu3 %v18193_v1  ;;  %v13201_v49 = vor.u32 %v16695_v37, %v13198_v23  ;;  %v16891_v42 = vld [vmem:[#allocation13 + $0xf34] sm:$0xf0]  ;;  %v13134_v56 = vld [vmem:[#allocation13 + $0x8b8] sm:$0xf0] }
 0x434   :  { %6621 = vmatpush.bf16.msra.mxu2 %v13805_v21  ;;  %6635 = vmatpush.bf16.msra.mxu3 %v14061_v17  ;;  %v16679_v17 = vld [vmem:[#allocation13 + $0x89c] sm:$0xf]  ;;  %v13965_v43 = vor.u32 %v16891_v42, %v13964_v18  ;;  %v13676_v6 = vld [vmem:[#allocation13 + $0xcd8] sm:$0xf]  ;;  %v14292_v42 = vld [vmem:[#allocation16 + $0x1c0] sm:$0xf] }
 0x435   :  { %v13390_v51 = vld [vmem:[#allocation13 + $0xab8] sm:$0xf0]  ;;  %v16883_v37 = vld [vmem:[#allocation13 + $0xef4] sm:$0xf0]  ;;  %v13137_v23 = vor.u32 %v16679_v17, %v13134_v56  ;;  %v17040_v17 = vld [vmem:[#allocation16 + $0x3dc] sm:$0xf0] }
 0x436   :  { %6706 = vmatpush.bf16.msra.mxu0 %v13265_v62  ;;  %6720 = vmatpush.bf16.msra.mxu1 %v13521_v57  ;;  %v13422_v62 = vld [vmem:[#allocation13 + $0xaf8] sm:$0xf0]  ;;  %v13708_v57 = vld [vmem:[#allocation13 + $0xd18] sm:$0xf] }
 0x437   :  { %v13425_v21 = vor.u32 %v16751_v15, %v13422_v62  ;;  %v13709_v61 = vor.u32 %v16827_v36, %v13708_v57  ;;  %v13102_v25 = vld [vmem:[#allocation13 + $0x878] sm:$0xf0]  ;;  %v13644_v63 = vld [vmem:[#allocation13 + $0xc98] sm:$0xf] }
 0x438   :  { %6622 = vmatpush.bf16.msra.mxu2 %v13773_v53  ;;  %6636 = vmatpush.bf16.msra.mxu3 %v14029_v54  ;;  %v13393_v53 = vor.u32 %v16743_v24, %v13390_v51  ;;  %v16671_v54 = vld [vmem:[#allocation13 + $0x85c] sm:$0xf]  ;;  %v16875_v35 = vld [vmem:[#allocation13 + $0xeb4] sm:$0xf0] }
 0x439   :  { %v16735_v55 = vld [vmem:[#allocation13 + $0xa5c] sm:$0xf]  ;;  %v13105_v58 = vor.u32 %v16671_v54, %v13102_v25  ;;  %v13612_v56 = vld [vmem:[#allocation13 + $0xc58] sm:$0xf]  ;;  %v18888_v54 = vperm.slane %v18215_v32, 0 }
 0x43a   :  { %6707 = vmatpush.bf16.msra.mxu0 %v13233_v46  ;;  %6721 = vmatpush.bf16.msra.mxu1 %v13489_v29  ;;  %v16819_v46 = vld [vmem:[#allocation13 + $0xcf4] sm:$0xf0]  ;;  %v13358_v59 = vld [vmem:[#allocation13 + $0xa78] sm:$0xf0] }
 0x43b   :  { %v13932_v29 = vld [vmem:[#allocation13 + $0xed8] sm:$0xf]  ;;  %v13677_v5 = vor.u32 %v16819_v46, %v13676_v6  ;;  %v13070_v15 = vld [vmem:[#allocation13 + $0x838] sm:$0xf0]  ;;  %v5877_v25 = vadd.f32 %v18224_v13, %v18888_v54  ;;  %v17016_v54 = vld [vmem:[#allocation16 + $0x31c] sm:$0xf0] }
 0x43c   :  { %6623 = vmatpush.bf16.msra.mxu2 %v13741_v26  ;;  %6637 = vmatpush.bf16.msra.mxu3 %v13997_v10  ;;  %v13933_v0 = vor.u32 %v16883_v37, %v13932_v29  ;;  %v13361_v26 = vor.u32 %v16735_v55, %v13358_v59  ;;  %v16663_v10 = vld [vmem:[#allocation13 + $0x81c] sm:$0xf]  ;;  %v16867_v24 = vld [vmem:[#allocation13 + $0xe74] sm:$0xf0]  ;;  %v14260_v37 = vld [vmem:[#allocation16 + $0x180] sm:$0xf] }
 0x43d   :  { %v16727_v62 = vld [vmem:[#allocation13 + $0xa1c] sm:$0xf]  ;;  %v13073_v51 = vor.u32 %v16663_v10, %v13070_v15  ;;  %v17032_v55 = vld [vmem:[#allocation16 + $0x39c] sm:$0xf0]  ;;  %v13580_v59 = vld [vmem:[#allocation13 + $0xc18] sm:$0xf] }
 0x43e   :  { %6708 = vmatpush.bf16.msra.mxu0 %v13201_v49  ;;  %6722 = vmatpush.bf16.msra.mxu1 %v13457_v44  ;;  %v16811_v49 = vld [vmem:[#allocation13 + $0xcb4] sm:$0xf0]  ;;  %v13326_v18 = vld [vmem:[#allocation13 + $0xa38] sm:$0xf0] }
 0x43f   :  { %v13900_v44 = vld [vmem:[#allocation13 + $0xe98] sm:$0xf]  ;;  %v13645_v57 = vor.u32 %v16811_v49, %v13644_v63  ;;  %v13329_v6 = vor.u32 %v16727_v62, %v13326_v18  ;;  %v13038_v10 = vld [vmem:[#allocation13 + $0x7f8] sm:$0xf0]  ;;  %v14228_v18 = vld [vmem:[#allocation16 + $0x140] sm:$0xf] }
 0x440   :  { %6624 = vmatpush.bf16.msra.mxu2 %v13709_v61  ;;  %6638 = vmatpush.bf16.msra.mxu3 %v13965_v43  ;;  %v13901_v36 = vor.u32 %v16875_v35, %v13900_v44  ;;  %v16803_v61 = vld [vmem:[#allocation13 + $0xc74] sm:$0xf0]  ;;  %v16591_v35 = vld [vmem:[#allocation13 + $0x5dc] sm:$0xf] }
 0x441   :  { %v13868_v43 = vld [vmem:[#allocation13 + $0xe58] sm:$0xf] }
 0x442   :  { %6709 = vmatpush.bf16.msra.mxu0 %v13169_v14  ;;  %6723 = vmatpush.bf16.msra.mxu1 %v13425_v21  ;;  %v16976_v14 = vld [vmem:[#allocation16 + $0x1dc] sm:$0xf0]  ;;  %v16795_v63 = vld [vmem:[#allocation13 + $0xc34] sm:$0xf0] }
 0x443   :  { %v14548_v21 = vld [vmem:[#allocation16 + $0x3c0] sm:$0xf]  ;;  %v14293_v46 = vor.u32 %v16976_v14, %v14292_v42  ;;  %v13836_v49 = vld [vmem:[#allocation13 + $0xe18] sm:$0xf]  ;;  %v13581_v13 = vor.u32 %v16795_v63, %v13580_v59  ;;  %v12974_v59 = vld [vmem:[#allocation13 + $0x778] sm:$0xf0]  ;;  %v18388_v63 = vpop.f32.mrf.mxu2 }
 0x444   :  { %6625 = vmatpush.bf16.msra.mxu2 %v13677_v5  ;;  %6639 = vmatpush.bf16.msra.mxu3 %v13933_v0  ;;  %v14549_v29 = vor.u32 %v17040_v17, %v14548_v21  ;;  %v13613_v5 = vor.u32 %v16803_v61, %v13612_v56  ;;  %v13869_v0 = vor.u32 %v16867_v24, %v13868_v43  ;;  %v16859_v44 = vld [vmem:[#allocation13 + $0xe34] sm:$0xf0]  ;;  %v16960_v42 = vld [vmem:[#allocation16 + $0x15c] sm:$0xf0]  ;;  %v16583_v61 = vld [vmem:[#allocation13 + $0x59c] sm:$0xf] }
 0x445   :  { %v14484_v17 = vld [vmem:[#allocation16 + $0x340] sm:$0xf]  ;;  %v12750_v24 = vld [vmem:[#allocation13 + $0x5b8] sm:$0xf0] }
 0x446   :  { %6710 = vmatpush.bf16.msra.mxu0 %v13137_v23  ;;  %6724 = vmatpush.bf16.msra.mxu1 %v13393_v53  ;;  %v16968_v23 = vld [vmem:[#allocation16 + $0x19c] sm:$0xf0] }
 0x447   :  { %v14516_v53 = vld [vmem:[#allocation16 + $0x380] sm:$0xf]  ;;  %v14261_v15 = vor.u32 %v16968_v23, %v14260_v37  ;;  %v18385_v37 = vpop.f32.mrf.mxu1  ;;  %v12753_v23 = vor.u32 %v16583_v61, %v12750_v24 }
 0x448   :  { %6626 = vmatpush.bf16.msra.mxu2 %v13645_v57  ;;  %6640 = vmatpush.bf16.msra.mxu3 %v13901_v36  ;;  %v14517_v62 = vor.u32 %v17032_v55, %v14516_v53  ;;  %v5891_v57 = vadd.f32 %v18226_v19, %v5877_v25  ;;  %v13837_v36 = vor.u32 %v16859_v44, %v13836_v49  ;;  %v17024_v56 = vld [vmem:[#allocation16 + $0x35c] sm:$0xf0]  ;;  %v13006_v19 = vld [vmem:[#allocation13 + $0x7b8] sm:$0xf0] }
 0x449   :  { %v16575_v25 = vld [vmem:[#allocation13 + $0x55c] sm:$0xf] }
 0x44a   :  { %6711 = vmatpush.bf16.msra.mxu0 %v13105_v58  ;;  %6725 = vmatpush.bf16.msra.mxu1 %v13361_v26  ;;  %v12782_v58 = vld [vmem:[#allocation13 + $0x5f8] sm:$0xf0]  ;;  %v5905_v43 = vadd.f32 %v18260_v31, %v5891_v57  ;;  %v14452_v31 = vld [vmem:[#allocation16 + $0x300] sm:$0xf] }
 0x44b   :  { %v16655_v26 = vld [vmem:[#allocation13 + $0x7dc] sm:$0xf]  ;;  %v12785_v14 = vor.u32 %v16591_v35, %v12782_v58  ;;  %v14453_v44 = vor.u32 %v17016_v54, %v14452_v31  ;;  %v14164_v35 = vld [vmem:[#allocation16 + $0xc0] sm:$0xf] }
 0x44c   :  { %6627 = vmatpush.bf16.msra.mxu2 %v13613_v5  ;;  %6641 = vmatpush.bf16.msra.mxu3 %v13869_v0  ;;  %v13041_v21 = vor.u32 %v16655_v26, %v13038_v10  ;;  %v5919_v5 = vadd.f32 %v18262_v34, %v5905_v43  ;;  %v12718_v0 = vld [vmem:[#allocation13 + $0x578] sm:$0xf0]  ;;  %v16944_v58 = vld [vmem:[#allocation16 + $0xdc] sm:$0xf0]  ;;  %v18397_v43 = vpop.f32.mrf.mxu3 }
 0x44d   :  { %v16639_v55 = vld [vmem:[#allocation13 + $0x75c] sm:$0xf]  ;;  %v12721_v26 = vor.u32 %v16575_v25, %v12718_v0  ;;  %v14420_v34 = vld [vmem:[#allocation16 + $0x2c0] sm:$0xf] }
 0x44e   :  { %6712 = vmatpush.bf16.msra.mxu0 %v13073_v51  ;;  %6726 = vmatpush.bf16.msra.mxu1 %v13329_v6  ;;  %v16647_v51 = vld [vmem:[#allocation13 + $0x79c] sm:$0xf]  ;;  %v18383_v6 = vpop.f32.mrf.mxu0  ;;  %v12977_v10 = vor.u32 %v16639_v55, %v12974_v59  ;;  %v5933_v57 = vadd.f32 %v18234_v3, %v5919_v5  ;;  %v14388_v3 = vld [vmem:[#allocation16 + $0x280] sm:$0xf] }
 0x44f   :  { %v13009_v53 = vor.u32 %v16647_v51, %v13006_v19  ;;  %v18395_v61 = vpop.f32.mrf.mxu1  ;;  %v17000_v19 = vld [vmem:[#allocation16 + $0x29c] sm:$0xf0] }
 0x450   :  { %6628 = vmatpush.bf16.msra.mxu2 %v13581_v13  ;;  %6642 = vmatpush.bf16.msra.mxu3 %v13837_v36  ;;  %v12686_v13 = vld [vmem:[#allocation13 + $0x538] sm:$0xf0]  ;;  %v14389_v25 = vor.u32 %v17000_v19, %v14388_v3  ;;  %v14100_v5 = vld [vmem:[#allocation16 + $0x40] sm:$0xf] }
 0x451   :  { %6713 = vmatmul.bf16.vlgmr.msra.gmra.mxu0 %v18143_v7  ;;  %6727 = vmatmul.bf16.vlgmr.msra.gmra.mxu1 %v18145_v28  ;;  %v14485_v7 = vor.u32 %v17024_v56, %v14484_v17  ;;  %v16952_v28 = vld [vmem:[#allocation16 + $0x11c] sm:$0xf0]  ;;  %v16631_v36 = vld [vmem:[#allocation13 + $0x71c] sm:$0xf] }
 0x452   :  { %9875 = vmatpush.bf16.msrb.mxu0 %v14293_v46  ;;  %9889 = vmatpush.bf16.msrb.mxu1 %v14549_v29  ;;  %v14229_v46 = vor.u32 %v16960_v42, %v14228_v18  ;;  %v14196_v29 = vld [vmem:[#allocation16 + $0x100] sm:$0xf]  ;;  %v12942_v18 = vld [vmem:[#allocation13 + $0x738] sm:$0xf0] }
 0x453   :  { %6629 = vmatmul.bf16.vlgmr.msra.gmra.mxu2 %v18203_v8  ;;  %6643 = vmatmul.bf16.vlgmr.msra.gmra.mxu3 %v18205_v16  ;;  %v14197_v49 = vor.u32 %v16952_v28, %v14196_v29  ;;  %v14132_v17 = vld [vmem:[#allocation16 + $0x80] sm:$0xf]  ;;  %v12945_v51 = vor.u32 %v16631_v36, %v12942_v18  ;;  %v12654_v29 = vld [vmem:[#allocation13 + $0x4f8] sm:$0xf0] }
 0x454   :  { %6677 = vmatpush.bf16.msrb.mxu2 %v12785_v14  ;;  %6691 = vmatpush.bf16.msrb.mxu3 %v13041_v21  ;;  %v14165_v14 = vor.u32 %v16944_v58, %v14164_v35  ;;  %v16936_v56 = vld [vmem:[#allocation16 + $0x9c] sm:$0xf0]  ;;  %v16623_v28 = vld [vmem:[#allocation13 + $0x6dc] sm:$0xf] }
 0x455   :  { %v14133_v54 = vor.u32 %v16936_v56, %v14132_v17  ;;  %v16928_v0 = vld [vmem:[#allocation16 + $0x5c] sm:$0xf0]  ;;  %v12622_v35 = vld [vmem:[#allocation13 + $0x4b8] sm:$0xf0] }
 0x456   :  { %9876 = vmatpush.bf16.msrb.mxu0 %v14261_v15  ;;  %9890 = vmatpush.bf16.msrb.mxu1 %v14517_v62  ;;  %v17008_v15 = vld [vmem:[#allocation16 + $0x2dc] sm:$0xf0]  ;;  %v16567_v62 = vld [vmem:[#allocation13 + $0x51c] sm:$0xf]  ;;  %v18393_v42 = vpop.f32.mrf.mxu0 }
 0x457   :  { %v14421_v21 = vor.u32 %v17008_v15, %v14420_v34  ;;  %v12689_v24 = vor.u32 %v16567_v62, %v12686_v13  ;;  %v16615_v58 = vld [vmem:[#allocation13 + $0x69c] sm:$0xf]  ;;  %v14101_v15 = vor.u32 %v16928_v0, %v14100_v5  ;;  %v16920_v13 = vld [vmem:[#allocation16 + $0x1c] sm:$0xf0] }
 0x458   :  { %6678 = vmatpush.bf16.msrb.mxu2 %v12753_v23  ;;  %6692 = vmatpush.bf16.msrb.mxu3 %v13009_v53  ;;  %v12910_v23 = vld [vmem:[#allocation13 + $0x6f8] sm:$0xf0]  ;;  %v18400_v53 = vpop.f32.mrf.mxu2  ;;  %v14324_v36 = vld [vmem:[#allocation16 + $0x200] sm:$0xf] }
 0x459   :  { %v12913_v59 = vor.u32 %v16623_v28, %v12910_v23  ;;  %v16984_v56 = vld [vmem:[#allocation16 + $0x21c] sm:$0xf0]  ;;  %v16543_v3 = vld [vmem:[#allocation13 + $0x45c] sm:$0xf]  ;;  %v6761_v23 = vmax.f32 %v18271_v39, 0.0 }
 0x45a   :  { %9877 = vmatpush.bf16.msrb.mxu0 %v14229_v46  ;;  %9891 = vmatpush.bf16.msrb.mxu1 %v14485_v7  ;;  %v16559_v46 = vld [vmem:[#allocation13 + $0x4dc] sm:$0xf]  ;;  %v5947_v7 = vadd.f32 %v18236_v27, %v5933_v57  ;;  %v14068_v57 = vld [vmem:[#allocation16] sm:$0xf] }
 0x45b   :  { %v12657_v55 = vor.u32 %v16559_v46, %v12654_v29  ;;  %v16551_v27 = vld [vmem:[#allocation13 + $0x49c] sm:$0xf]  ;;  %v6338_v46 = vpop.f32.mrf.mxu1  ;;  %v15572_v29 = vld [vmem:[#allocation16 + $0xbc0] sm:$0xf] }
 0x45c   :  { %6679 = vmatpush.bf16.msrb.mxu2 %v12721_v26  ;;  %6693 = vmatpush.bf16.msrb.mxu3 %v12977_v10  ;;  %v5961_v31 = vadd.f32 %v18279_v33, %v5947_v7  ;;  %v12878_v26 = vld [vmem:[#allocation13 + $0x6b8] sm:$0xf0]  ;;  %v18403_v10 = vld [vmem:[#allocation14] sm:$0xff]  ;;  %v17296_v28 = vld [vmem:[#allocation16 + $0xbdc] sm:$0xf0] }
 0x45d   :  { %v3293_v33 = vperm.slane %v18403_v10, 4  ;;  %v12881_v17 = vor.u32 %v16615_v58, %v12878_v26  ;;  %v12590_v19 = vld [vmem:[#allocation13 + $0x478] sm:$0xf0] }
 0x45e   :  { %9878 = vmatpush.bf16.msrb.mxu0 %v14197_v49  ;;  %9892 = vmatpush.bf16.msrb.mxu1 %v14453_v44  ;;  %v14356_v49 = vld [vmem:[#allocation16 + $0x240] sm:$0xf]  ;;  %v5975_v34 = vadd.f32 %v18281_v30, %v5961_v31  ;;  %v6324_v18 = vpop.f32.mrf.mxu0  ;;  %v16607_v30 = vld [vmem:[#allocation13 + $0x65c] sm:$0xf] }
 0x45f   :  { %v16992_v44 = vld [vmem:[#allocation16 + $0x25c] sm:$0xf0]  ;;  %v12846_v7 = vld [vmem:[#allocation13 + $0x678] sm:$0xf0]  ;;  %v6323_v5 = vadd.f32 %v18393_v42, %v3293_v33 }
 0x460   :  { %6680 = vmatpush.bf16.msrb.mxu2 %v12689_v24  ;;  %6694 = vmatpush.bf16.msrb.mxu3 %v12945_v51  ;;  %v14357_v62 = vor.u32 %v16992_v44, %v14356_v49  ;;  %v15316_v24 = vld [vmem:[#allocation16 + $0x9c0] sm:$0xf]  ;;  %v6769_v31 = vmax.f32 %v5975_v34, 0.0  ;;  %v6352_v0 = vpop.f32.mrf.mxu2  ;;  %v12849_v58 = vor.u32 %v16607_v30, %v12846_v7  ;;  %v12558_v26 = vld [vmem:[#allocation13 + $0x438] sm:$0xf0]  ;;  %v15573_v34 = vor.u32 %v17296_v28, %v15572_v29 }
 0x461   :  { %v17232_v51 = vld [vmem:[#allocation16 + $0x9dc] sm:$0xf0]  ;;  %v12814_v39 = vld [vmem:[#allocation13 + $0x638] sm:$0xf0] }
 0x462   :  { %9879 = vmatpush.bf16.msrb.mxu0 %v14165_v14  ;;  %9893 = vmatpush.bf16.msrb.mxu1 %v14421_v21  ;;  %v18407_v14 = vpop.f32.mrf.mxu3  ;;  %v12625_v21 = vor.u32 %v16551_v27, %v12622_v35  ;;  %v15284_v49 = vld [vmem:[#allocation16 + $0x980] sm:$0xf]  ;;  %v16535_v27 = vld [vmem:[#allocation13 + $0x41c] sm:$0xf]  ;;  %v6325_v35 = vadd.f32 %v6324_v18, %v3293_v33 }
 0x463   :  { %v17224_v44 = vld [vmem:[#allocation16 + $0x99c] sm:$0xf0]  ;;  %v14062_v42 = vld [vmem:[#allocation13 + $0xff8] sm:$0xf0]  ;;  %v12561_v18 = vor.u32 %v16535_v27, %v12558_v26  ;;  %v18416_v7 = vpop.f32.mrf.mxu1 }
 0x464   :  { %6681 = vmatpush.bf16.msrb.mxu2 %v12657_v55  ;;  %6695 = vmatpush.bf16.msrb.mxu3 %v12913_v59  ;;  %v15317_v55 = vor.u32 %v17232_v51, %v15316_v24  ;;  %v12593_v59 = vor.u32 %v16543_v3, %v12590_v19  ;;  %v15285_v33 = vor.u32 %v17224_v44, %v15284_v49  ;;  %v15252_v19 = vld [vmem:[#allocation16 + $0x940] sm:$0xf]  ;;  %v16839_v28 = vld [vmem:[#allocation13 + $0xd9c] sm:$0xf] }
 0x465   :  { %v6339_v24 = vadd.f32 %v6338_v46, %v6325_v35  ;;  %v12817_v51 = vor.u32 %v16599_v45, %v12814_v39  ;;  %v17216_v30 = vld [vmem:[#allocation16 + $0x95c] sm:$0xf0]  ;;  %v14030_v45 = vld [vmem:[#allocation13 + $0xfb8] sm:$0xf0] }
 0x466   :  { %9880 = vmatpush.bf16.msrb.mxu0 %v14133_v54  ;;  %9894 = vmatpush.bf16.msrb.mxu1 %v14389_v25  ;;  %v14069_v54 = vor.u32 %v16920_v13, %v14068_v57  ;;  %v14325_v25 = vor.u32 %v16984_v56, %v14324_v36  ;;  %v16911_v57 = vld [vmem:[#allocation13 + $0xfdc] sm:$0xf]  ;;  %v18411_v13 = vpack.c.bf16 %v6769_v31, %v6761_v23  ;;  %v15540_v36 = vld [vmem:[#allocation16 + $0xb80] sm:$0xf]  ;;  %v18414_v56 = vpop.f32.mrf.mxu0 }
 0x467   :  { %v13774_v23 = vld [vmem:[#allocation13 + $0xdb8] sm:$0xf0]  ;;  %v15253_v49 = vor.u32 %v17216_v30, %v15252_v19  ;;  %v15220_v27 = vld [vmem:[#allocation16 + $0x900] sm:$0xf] }
 0x468   :  { %6682 = vmatpush.bf16.msrb.mxu2 %v12625_v21  ;;  %6696 = vmatpush.bf16.msrb.mxu3 %v12881_v17  ;;  %v17288_v21 = vld [vmem:[#allocation16 + $0xb9c] sm:$0xf0]  ;;  %v6337_v17 = vadd.f32 %v18395_v61, %v6323_v5  ;;  %v14065_v61 = vor.u32 %v16911_v57, %v14062_v42  ;;  %v16903_v31 = vld [vmem:[#allocation13 + $0xf9c] sm:$0xf]  ;;  %v13777_v44 = vor.u32 %v16839_v28, %v13774_v23 }
 0x469   :  { %v15508_v5 = vld [vmem:[#allocation16 + $0xb40] sm:$0xf]  ;;  %v16831_v26 = vld [vmem:[#allocation13 + $0xd5c] sm:$0xf] }
 0x46a   :  { %9881 = vmatpush.bf16.msrb.mxu0 %v14101_v15  ;;  %9895 = vmatpush.bf16.msrb.mxu1 %v14357_v62  ;;  %v16847_v15 = vld [vmem:[#allocation13 + $0xddc] sm:$0xf]  ;;  %v6366_v29 = vpop.f32.mrf.mxu3  ;;  %v6351_v46 = vadd.f32 %v18400_v53, %v6337_v17  ;;  %v17208_v35 = vld [vmem:[#allocation16 + $0x91c] sm:$0xf0] }
 0x46b   :  { %v13806_v62 = vld [vmem:[#allocation13 + $0xdf8] sm:$0xf0]  ;;  %v15476_v57 = vld [vmem:[#allocation16 + $0xb00] sm:$0xf]  ;;  %v6394_v23 = vpop.f32.mrf.mxu1 }
 0x46c   :  { %6683 = vmatpush.bf16.msrb.mxu2 %v12593_v59  ;;  %6697 = vmatpush.bf16.msrb.mxu3 %v12849_v58  ;;  %v13809_v3 = vor.u32 %v16847_v15, %v13806_v62  ;;  %v18421_v59 = vpop.f32.mrf.mxu2  ;;  %v14033_v58 = vor.u32 %v16903_v31, %v14030_v45  ;;  %v13742_v39 = vld [vmem:[#allocation13 + $0xd78] sm:$0xf0]  ;;  %v17272_v42 = vld [vmem:[#allocation16 + $0xb1c] sm:$0xf0] }
 0x46d   :  { %v13998_v62 = vld [vmem:[#allocation13 + $0xf78] sm:$0xf0]  ;;  %v15188_v17 = vld [vmem:[#allocation16 + $0x8c0] sm:$0xf] }
 0x46e   :  { %9882 = vmatpush.bf16.msrb.mxu0 %v14069_v54  ;;  %9896 = vmatpush.bf16.msrb.mxu1 %v14325_v25  ;;  %v15541_v54 = vor.u32 %v17288_v21, %v15540_v36  ;;  %v6353_v25 = vadd.f32 %v6352_v0, %v6339_v24  ;;  %v6365_v0 = vadd.f32 %v18407_v14, %v6351_v46  ;;  %v13710_v14 = vld [vmem:[#allocation13 + $0xd38] sm:$0xf0]  ;;  %v17264_v28 = vld [vmem:[#allocation16 + $0xadc] sm:$0xf0] }
 0x46f   :  { %v15221_v36 = vor.u32 %v17208_v35, %v15220_v27  ;;  %v13745_v21 = vor.u32 %v16831_v26, %v13742_v39  ;;  %v16887_v19 = vld [vmem:[#allocation13 + $0xf1c] sm:$0xf]  ;;  %v15156_v46 = vld [vmem:[#allocation16 + $0x880] sm:$0xf] }
 0x470   :  { %6684 = vmatpush.bf16.msrb.mxu2 %v12561_v18  ;;  %6698 = vmatpush.bf16.msrb.mxu3 %v12817_v51  ;;  %v6367_v15 = vadd.f32 %v6366_v29, %v6353_v25  ;;  %v6380_v18 = vpop.f32.mrf.mxu0  ;;  %v6379_v30 = vadd.f32 %v18414_v56, %v6365_v0  ;;  %v17192_v25 = vld [vmem:[#allocation16 + $0x89c] sm:$0xf0] }
 0x471   :  { %9883 = vmatmul.bf16.vlgmr.msrb.gmra.mxu0 %v18411_v13  ;;  %9897 = vmatmul.bf16.vlgmr.msrb.gmra.mxu1 %v18319_v20  ;;  %v15412_v26 = vld [vmem:[#allocation16 + $0xa80] sm:$0xf] }
 0x472   :  { %9931 = vmatpush.bf16.msra.mxu0 %v15317_v55  ;;  %9945 = vmatpush.bf16.msra.mxu1 %v15573_v34  ;;  %v17280_v55 = vld [vmem:[#allocation16 + $0xb5c] sm:$0xf0]  ;;  %v16895_v34 = vld [vmem:[#allocation13 + $0xf5c] sm:$0xf]  ;;  %v6420_v24 = vpop.f32.mrf.mxu3  ;;  %v6381_v29 = vadd.f32 %v6380_v18, %v6367_v15  ;;  %v6393_v56 = vadd.f32 %v18416_v7, %v6379_v30 }
 0x473   :  { %v15509_v53 = vor.u32 %v17280_v55, %v15508_v5  ;;  %6685 = vmatmul.bf16.vlgmr.msrb.gmra.mxu2 %v18191_v2  ;;  %6699 = vmatmul.bf16.vlgmr.msrb.gmra.mxu3 %v18193_v1  ;;  %v14001_v51 = vor.u32 %v16895_v34, %v13998_v62  ;;  %v15477_v2 = vor.u32 %v17272_v42, %v15476_v57  ;;  %v15444_v1 = vld [vmem:[#allocation16 + $0xac0] sm:$0xf]  ;;  %v16815_v55 = vld [vmem:[#allocation13 + $0xcdc] sm:$0xf] }
 0x474   :  { %6733 = vmatpush.bf16.msra.mxu2 %v13809_v3  ;;  %6747 = vmatpush.bf16.msra.mxu3 %v14065_v61  ;;  %v16823_v3 = vld [vmem:[#allocation13 + $0xd1c] sm:$0xf]  ;;  %v6408_v45 = vpop.f32.mrf.mxu2  ;;  %v15445_v27 = vor.u32 %v17264_v28, %v15444_v1  ;;  %v6395_v35 = vadd.f32 %v6394_v23, %v6381_v29  ;;  %v17256_v39 = vld [vmem:[#allocation16 + $0xa9c] sm:$0xf0]  ;;  %v15157_v34 = vor.u32 %v17192_v25, %v15156_v46  ;;  %v16972_v28 = vld [vmem:[#allocation16 + $0x1c4] sm:$0xf] }
 0x475   :  { %v13966_v61 = vld [vmem:[#allocation13 + $0xf38] sm:$0xf0]  ;;  %v15124_v62 = vld [vmem:[#allocation16 + $0x840] sm:$0xf]  ;;  %v14294_v23 = vld [vmem:[#allocation16 + $0x1e0] sm:$0xf0] }
 0x476   :  { %9932 = vmatpush.bf16.msra.mxu0 %v15285_v33  ;;  %9946 = vmatpush.bf16.msra.mxu1 %v15541_v54  ;;  %v17200_v33 = vld [vmem:[#allocation16 + $0x8dc] sm:$0xf0]  ;;  %v13713_v54 = vor.u32 %v16823_v3, %v13710_v14  ;;  %v13969_v5 = vor.u32 %v16887_v19, %v13966_v61  ;;  %v6409_v0 = vadd.f32 %v6408_v45, %v6395_v35  ;;  %v16871_v7 = vld [vmem:[#allocation13 + $0xe9c] sm:$0xf]  ;;  %v18431_v14 = vpop.f32.mrf.mxu1 }
 0x477   :  { %v15189_v31 = vor.u32 %v17200_v33, %v15188_v17  ;;  %v17184_v57 = vld [vmem:[#allocation16 + $0x85c] sm:$0xf0]  ;;  %v13646_v17 = vld [vmem:[#allocation13 + $0xcb8] sm:$0xf0]  ;;  %v15413_v33 = vor.u32 %v17256_v39, %v15412_v26  ;;  %v14297_v26 = vor.u32 %v16972_v28, %v14294_v23  ;;  %v16956_v23 = vld [vmem:[#allocation16 + $0x144] sm:$0xf] }
 0x478   :  { %6734 = vmatpush.bf16.msra.mxu2 %v13777_v44  ;;  %6748 = vmatpush.bf16.msra.mxu3 %v14033_v58  ;;  %v16879_v44 = vld [vmem:[#allocation13 + $0xedc] sm:$0xf]  ;;  %v18429_v42 = vpop.f32.mrf.mxu0  ;;  %v17248_v3 = vld [vmem:[#allocation16 + $0xa5c] sm:$0xf0]  ;;  %v15125_v19 = vor.u32 %v17184_v57, %v15124_v62 }
 0x479   :  { %v13934_v58 = vld [vmem:[#allocation13 + $0xef8] sm:$0xf0]  ;;  %v17176_v1 = vld [vmem:[#allocation16 + $0x81c] sm:$0xf0] }
 0x47a   :  { %9933 = vmatpush.bf16.msra.mxu0 %v15253_v49  ;;  %9947 = vmatpush.bf16.msra.mxu1 %v15509_v53  ;;  %v13678_v49 = vld [vmem:[#allocation13 + $0xcf8] sm:$0xf0]  ;;  %v6407_v53 = vadd.f32 %v18421_v59, %v6393_v56  ;;  %v6422_v59 = vpop.f32.mrf.mxu3  ;;  %v14550_v56 = vld [vmem:[#allocation16 + $0x3e0] sm:$0xf0] }
 0x47b   :  { %v13681_v15 = vor.u32 %v16815_v55, %v13678_v49  ;;  %v13902_v18 = vld [vmem:[#allocation13 + $0xeb8] sm:$0xf0]  ;;  %v6423_v29 = vadd.f32 %v6422_v59, %v6409_v0  ;;  %v15348_v55 = vld [vmem:[#allocation16 + $0xa00] sm:$0xf]  ;;  %v14518_v59 = vld [vmem:[#allocation16 + $0x3a0] sm:$0xf0] }
 0x47c   :  { %6735 = vmatpush.bf16.msra.mxu2 %v13745_v21  ;;  %6749 = vmatpush.bf16.msra.mxu3 %v14001_v51  ;;  %v16807_v21 = vld [vmem:[#allocation13 + $0xc9c] sm:$0xf]  ;;  %v15380_v51 = vld [vmem:[#allocation16 + $0xa40] sm:$0xf]  ;;  %v6421_v30 = vadd.f32 %v6420_v24, %v6407_v53  ;;  %v17036_v24 = vld [vmem:[#allocation16 + $0x3c4] sm:$0xf] }
 0x47d   :  { %v13649_v61 = vor.u32 %v16807_v21, %v13646_v17  ;;  %v13614_v46 = vld [vmem:[#allocation13 + $0xc78] sm:$0xf0]  ;;  %v15381_v45 = vor.u32 %v17248_v3, %v15380_v51  ;;  %v17240_v49 = vld [vmem:[#allocation16 + $0xa1c] sm:$0xf0]  ;;  %v17028_v3 = vld [vmem:[#allocation16 + $0x384] sm:$0xf] }
 0x47e   :  { %9934 = vmatpush.bf16.msra.mxu0 %v15221_v36  ;;  %9948 = vmatpush.bf16.msra.mxu1 %v15477_v2  ;;  %v13937_v36 = vor.u32 %v16879_v44, %v13934_v58  ;;  %v15092_v2 = vld [vmem:[#allocation16 + $0x800] sm:$0xf]  ;;  %v16863_v25 = vld [vmem:[#allocation13 + $0xe5c] sm:$0xf]  ;;  %v6765_v35 = vmax.f32 %v6421_v30, 0.0  ;;  %v6773_v58 = vmax.f32 %v6423_v29, 0.0 }
 0x47f   :  { %v15093_v44 = vor.u32 %v17176_v1, %v15092_v2  ;;  %v16791_v53 = vld [vmem:[#allocation13 + $0xc1c] sm:$0xf]  ;;  %v14804_v21 = vld [vmem:[#allocation16 + $0x5c0] sm:$0xf]  ;;  %v3294_v29 = vperm.slane %v18403_v10, 5 }
 0x480   :  { %6736 = vmatpush.bf16.msra.mxu2 %v13713_v54  ;;  %6750 = vmatpush.bf16.msra.mxu3 %v13969_v5  ;;  %v16799_v54 = vld [vmem:[#allocation13 + $0xc5c] sm:$0xf]  ;;  %v17104_v17 = vld [vmem:[#allocation16 + $0x5dc] sm:$0xf0] }
 0x481   :  { %v13870_v5 = vld [vmem:[#allocation13 + $0xe78] sm:$0xf0]  ;;  %v13617_v39 = vor.u32 %v16799_v54, %v13614_v46  ;;  %v17168_v51 = vld [vmem:[#allocation16 + $0x7dc] sm:$0xf0]  ;;  %v14805_v28 = vor.u32 %v17104_v17, %v14804_v21  ;;  %v18889_v54 = vperm.slane %v18215_v32, 2 }
 0x482   :  { %9935 = vmatpush.bf16.msra.mxu0 %v15189_v31  ;;  %9949 = vmatpush.bf16.msra.mxu1 %v15445_v27  ;;  %v13905_v31 = vor.u32 %v16871_v7, %v13902_v18  ;;  %v16964_v27 = vld [vmem:[#allocation16 + $0x184] sm:$0xf]  ;;  %v13873_v0 = vor.u32 %v16863_v25, %v13870_v5  ;;  %v16855_v62 = vld [vmem:[#allocation13 + $0xe1c] sm:$0xf]  ;;  %v15060_v7 = vld [vmem:[#allocation16 + $0x7c0] sm:$0xf]  ;;  %v6436_v18 = vpop.f32.mrf.mxu0  ;;  %v6462_v25 = vpop.f32.mrf.mxu2 }
 0x483   :  { %v13838_v57 = vld [vmem:[#allocation13 + $0xe38] sm:$0xf0]  ;;  %v6101_v46 = vadd.f32 %v18300_v50, %v18889_v54  ;;  %v15061_v5 = vor.u32 %v17168_v51, %v15060_v7  ;;  %v17096_v10 = vld [vmem:[#allocation16 + $0x59c] sm:$0xf0]  ;;  %v14486_v32 = vld [vmem:[#allocation16 + $0x360] sm:$0xf0] }
 0x484   :  { %6737 = vmatpush.bf16.msra.mxu2 %v13681_v15  ;;  %6751 = vmatpush.bf16.msra.mxu3 %v13937_v36  ;;  %v13582_v15 = vld [vmem:[#allocation13 + $0xc38] sm:$0xf0]  ;;  %v15349_v36 = vor.u32 %v17240_v49, %v15348_v55  ;;  %v13841_v1 = vor.u32 %v16855_v62, %v13838_v57  ;;  %v14772_v55 = vld [vmem:[#allocation16 + $0x580] sm:$0xf]  ;;  %v17012_v21 = vld [vmem:[#allocation16 + $0x304] sm:$0xf] }
 0x485   :  { %v13585_v30 = vor.u32 %v16791_v53, %v13582_v15  ;;  %v15028_v49 = vld [vmem:[#allocation16 + $0x780] sm:$0xf]  ;;  %v6115_v53 = vadd.f32 %v18302_v60, %v6101_v46  ;;  %v14454_v17 = vld [vmem:[#allocation16 + $0x320] sm:$0xf0] }
 0x486   :  { %9936 = vmatpush.bf16.msra.mxu0 %v15157_v34  ;;  %9950 = vmatpush.bf16.msra.mxu1 %v15413_v33  ;;  %v14262_v34 = vld [vmem:[#allocation16 + $0x1a0] sm:$0xf0]  ;;  %v14553_v33 = vor.u32 %v17036_v24, %v14550_v56  ;;  %v17160_v56 = vld [vmem:[#allocation16 + $0x79c] sm:$0xf0] }
 0x487   :  { %v14265_v2 = vor.u32 %v16964_v27, %v14262_v34  ;;  %v18890_v27 = vperm.slane %v18321_v9, 3  ;;  %v14198_v34 = vld [vmem:[#allocation16 + $0x120] sm:$0xf0]  ;;  %v14740_v9 = vld [vmem:[#allocation16 + $0x540] sm:$0xf]  ;;  %v6129_v7 = vadd.f32 %v18339_v40, %v6115_v53 }
 0x488   :  { %6738 = vmatpush.bf16.msra.mxu2 %v13649_v61  ;;  %6752 = vmatpush.bf16.msra.mxu3 %v13905_v31  ;;  %v18436_v61 = vpop.f32.mrf.mxu1  ;;  %v14230_v31 = vld [vmem:[#allocation16 + $0x160] sm:$0xf0]  ;;  %v17088_v15 = vld [vmem:[#allocation16 + $0x55c] sm:$0xf0] }
 0x489   :  { %v6213_v24 = vadd.f32 %v18354_v47, %v18890_v27  ;;  %v14233_v50 = vor.u32 %v16956_v23, %v14230_v31  ;;  %v14996_v47 = vld [vmem:[#allocation16 + $0x740] sm:$0xf]  ;;  %v17004_v54 = vld [vmem:[#allocation16 + $0x2c4] sm:$0xf] }
 0x48a   :  { %9937 = vmatpush.bf16.msra.mxu0 %v15125_v19  ;;  %9951 = vmatpush.bf16.msra.mxu1 %v15381_v45  ;;  %v18433_v19 = vpack.c.bf16 %v6773_v58, %v6765_v35  ;;  %v18441_v45 = vpop.f32.mrf.mxu3  ;;  %v17020_v35 = vld [vmem:[#allocation16 + $0x344] sm:$0xf]  ;;  %v6435_v58 = vadd.f32 %v18429_v42, %v3294_v29  ;;  %v17152_v42 = vld [vmem:[#allocation16 + $0x75c] sm:$0xf0] }
 0x48b   :  { %v14489_v62 = vor.u32 %v17020_v35, %v14486_v32  ;;  %v6227_v57 = vadd.f32 %v18356_v48, %v6213_v24  ;;  %v14741_v48 = vor.u32 %v17088_v15, %v14740_v9  ;;  %v14964_v40 = vld [vmem:[#allocation16 + $0x700] sm:$0xf]  ;;  %v14102_v9 = vld [vmem:[#allocation16 + $0x60] sm:$0xf0] }
 0x48c   :  { %6739 = vmatpush.bf16.msra.mxu2 %v13617_v39  ;;  %6753 = vmatpush.bf16.msra.mxu3 %v13873_v0  ;;  %v16948_v39 = vld [vmem:[#allocation16 + $0x104] sm:$0xf]  ;;  %v15029_v0 = vor.u32 %v17160_v56, %v15028_v49  ;;  %v6449_v51 = vadd.f32 %v18431_v14, %v6435_v58  ;;  %v17144_v31 = vld [vmem:[#allocation16 + $0x71c] sm:$0xf0]  ;;  %v6143_v14 = vadd.f32 %v18341_v22, %v6129_v7 }
 0x48d   :  { %v14201_v60 = vor.u32 %v16948_v39, %v14198_v34  ;;  %v16932_v49 = vld [vmem:[#allocation16 + $0x84] sm:$0xf]  ;;  %v14965_v27 = vor.u32 %v17144_v31, %v14964_v40  ;;  %v17072_v24 = vld [vmem:[#allocation16 + $0x4dc] sm:$0xf0] }
 0x48e   :  { %9938 = vmatpush.bf16.msra.mxu0 %v15093_v44  ;;  %9952 = vmatpush.bf16.msra.mxu1 %v15349_v36  ;;  %v14521_v44 = vor.u32 %v17028_v3, %v14518_v59  ;;  %v18450_v36 = vpop.f32.mrf.mxu0  ;;  %v6437_v3 = vadd.f32 %v6436_v18, %v3294_v29  ;;  %v6463_v23 = vadd.f32 %v6462_v25, %v6449_v51  ;;  %v6464_v18 = vpop.f32.mrf.mxu2  ;;  %v14676_v25 = vld [vmem:[#allocation16 + $0x4c0] sm:$0xf]  ;;  %v16996_v58 = vld [vmem:[#allocation16 + $0x284] sm:$0xf] }
 0x48f   :  { %v14932_v56 = vld [vmem:[#allocation16 + $0x6c0] sm:$0xf]  ;;  %v14677_v53 = vor.u32 %v17072_v24, %v14676_v25  ;;  %v16988_v7 = vld [vmem:[#allocation16 + $0x244] sm:$0xf] }
 0x490   :  { %6740 = vmatpush.bf16.msra.mxu2 %v13585_v30  ;;  %6754 = vmatpush.bf16.msra.mxu3 %v13841_v1  ;;  %v18457_v59 = vpop.f32.mrf.mxu1  ;;  %v14997_v30 = vor.u32 %v17152_v42, %v14996_v47  ;;  %v14708_v1 = vld [vmem:[#allocation16 + $0x500] sm:$0xf]  ;;  %v6477_v22 = vadd.f32 %v18441_v45, %v6463_v23 }
 0x491   :  { %9939 = vmatmul.bf16.vlgmr.msra.gmra.mxu0 %v18433_v19  ;;  %v14644_v47 = vld [vmem:[#allocation16 + $0x480] sm:$0xf] }
 0x492   :  { %9987 = vmatpush.bf16.msrb.mxu0 %v14297_v26  ;;  %10001 = vmatpush.bf16.msrb.mxu1 %v14553_v33  ;;  %v14773_v26 = vor.u32 %v17096_v10, %v14772_v55  ;;  %v6241_v33 = vadd.f32 %v18365_v11, %v6227_v57  ;;  %v14422_v11 = vld [vmem:[#allocation16 + $0x2e0] sm:$0xf0]  ;;  %v6478_v29 = vpop.f32.mrf.mxu3  ;;  %v6451_v55 = vadd.f32 %v18436_v61, %v6437_v3  ;;  %v14900_v45 = vld [vmem:[#allocation16 + $0x680] sm:$0xf] }
 0x493   :  { %6741 = vmatmul.bf16.vlgmr.msra.gmra.mxu2 %v18203_v8  ;;  %6755 = vmatmul.bf16.vlgmr.msra.gmra.mxu3 %v18205_v16  ;;  %v14166_v8 = vld [vmem:[#allocation16 + $0xe0] sm:$0xf0]  ;;  %v14457_v16 = vor.u32 %v17012_v21, %v14454_v17  ;;  %v14425_v35 = vor.u32 %v17004_v54, %v14422_v11  ;;  %v6491_v21 = vadd.f32 %v18450_v36, %v6477_v22  ;;  %v17128_v17 = vld [vmem:[#allocation16 + $0x69c] sm:$0xf0] }
 0x494   :  { %9903 = vmatpush.bf16.msrb.mxu2 %v14805_v28  ;;  %9917 = vmatpush.bf16.msrb.mxu3 %v15061_v5  ;;  %v17080_v28 = vld [vmem:[#allocation16 + $0x51c] sm:$0xf0]  ;;  %v6255_v5 = vadd.f32 %v18367_v41, %v6241_v33  ;;  %v6465_v32 = vadd.f32 %v6464_v18, %v6451_v55  ;;  %v6157_v41 = vadd.f32 %v18312_v12, %v6143_v14  ;;  %v16980_v18 = vld [vmem:[#allocation16 + $0x204] sm:$0xf] }
 0x495   :  { %v14709_v10 = vor.u32 %v17080_v28, %v14708_v1  ;;  %v17228_v1 = vld [vmem:[#allocation16 + $0x9c4] sm:$0xf]  ;;  %v14901_v40 = vor.u32 %v17128_v17, %v14900_v45  ;;  %v17056_v23 = vld [vmem:[#allocation16 + $0x45c] sm:$0xf0]  ;;  %v6505_v14 = vadd.f32 %v18457_v59, %v6491_v21  ;;  %v18891_v21 = vld [vmem:[#allocation26_spill] sm:$0xff] }
 0x496   :  { %9988 = vmatpush.bf16.msrb.mxu0 %v14265_v2  ;;  %10002 = vmatpush.bf16.msrb.mxu1 %v14521_v44  ;;  %v16940_v2 = vld [vmem:[#allocation16 + $0xc4] sm:$0xf]  ;;  %v6269_v39 = vadd.f32 %v18383_v6, %v6255_v5  ;;  %v6492_v34 = vpop.f32.mrf.mxu0  ;;  %v6479_v12 = vadd.f32 %v6478_v29, %v6465_v32  ;;  %v6171_v6 = vadd.f32 %v18314_v38, %v6157_v41  ;;  %v6518_v33 = vpop.f32.mrf.mxu2  ;;  %v14868_v31 = vld [vmem:[#allocation16 + $0x640] sm:$0xf] }
 0x497   :  { %v14169_v46 = vor.u32 %v16940_v2, %v14166_v8  ;;  %v14134_v44 = vld [vmem:[#allocation16 + $0xa0] sm:$0xf0]  ;;  %v14580_v25 = vld [vmem:[#allocation16 + $0x400] sm:$0xf] }
 0x498   :  { %9904 = vmatpush.bf16.msrb.mxu2 %v14773_v26  ;;  %9918 = vmatpush.bf16.msrb.mxu3 %v15029_v0  ;;  %v14390_v26 = vld [vmem:[#allocation16 + $0x2a0] sm:$0xf0]  ;;  %v14137_v61 = vor.u32 %v16932_v49, %v14134_v44  ;;  %v6506_v42 = vpop.f32.mrf.mxu1  ;;  %v6283_v2 = vadd.f32 %v18385_v37, %v6269_v39  ;;  %v6185_v36 = vadd.f32 %v18350_v52, %v6171_v6  ;;  %v17120_v37 = vld [vmem:[#allocation16 + $0x65c] sm:$0xf0] }
 0x499   :  { %v16924_v0 = vld [vmem:[#allocation16 + $0x44] sm:$0xf]  ;;  %v14393_v57 = vor.u32 %v16996_v58, %v14390_v26  ;;  %v6493_v11 = vadd.f32 %v6492_v34, %v6479_v12  ;;  %v6519_v52 = vadd.f32 %v6518_v33, %v6505_v14  ;;  %v17048_v24 = vld [vmem:[#allocation16 + $0x41c] sm:$0xf0]  ;;  %v6763_v12 = vmax.f32 %v18891_v21, 0.0 }
 0x49a   :  { %9989 = vmatpush.bf16.msrb.mxu0 %v14233_v50  ;;  %10003 = vmatpush.bf16.msrb.mxu1 %v14489_v62  ;;  %v17136_v50 = vld [vmem:[#allocation16 + $0x6dc] sm:$0xf0]  ;;  %v6532_v51 = vpop.f32.mrf.mxu3  ;;  %v14105_v3 = vor.u32 %v16924_v0, %v14102_v9  ;;  %v15318_v28 = vld [vmem:[#allocation16 + $0x9e0] sm:$0xf0]  ;;  %v6297_v54 = vadd.f32 %v18388_v63, %v6283_v2  ;;  %v14869_v63 = vor.u32 %v17120_v37, %v14868_v31 }
 0x49b   :  { %v14933_v15 = vor.u32 %v17136_v50, %v14932_v56  ;;  %v17064_v62 = vld [vmem:[#allocation16 + $0x49c] sm:$0xf0]  ;;  %v14326_v29 = vld [vmem:[#allocation16 + $0x220] sm:$0xf0]  ;;  %v15321_v55 = vor.u32 %v17228_v1, %v15318_v28  ;;  %v6507_v22 = vadd.f32 %v6506_v42, %v6493_v11  ;;  %v6533_v39 = vadd.f32 %v6532_v51, %v6519_v52 }
 0x49c   :  { %9905 = vmatpush.bf16.msrb.mxu2 %v14741_v48  ;;  %9919 = vmatpush.bf16.msrb.mxu3 %v14997_v30  ;;  %v16916_v48 = vld [vmem:[#allocation16 + $0x4] sm:$0xf]  ;;  %v14645_v8 = vor.u32 %v17064_v62, %v14644_v47  ;;  %v14836_v59 = vld [vmem:[#allocation16 + $0x600] sm:$0xf]  ;;  %v14329_v56 = vor.u32 %v16980_v18, %v14326_v29  ;;  %v14581_v34 = vor.u32 %v17048_v24, %v14580_v25 }
 0x49d   :  { %v14070_v30 = vld [vmem:[#allocation16 + $0x20] sm:$0xf0]  ;;  %v17112_v32 = vld [vmem:[#allocation16 + $0x61c] sm:$0xf0]  ;;  %v6766_v33 = vmax.f32 %v6533_v39, 0.0 }
 0x49e   :  { %9990 = vmatpush.bf16.msrb.mxu0 %v14201_v60  ;;  %10004 = vmatpush.bf16.msrb.mxu1 %v14457_v16  ;;  %v14358_v60 = vld [vmem:[#allocation16 + $0x260] sm:$0xf0]  ;;  %v14612_v16 = vld [vmem:[#allocation16 + $0x440] sm:$0xf]  ;;  %v18471_v5 = vpop.f32.mrf.mxu0  ;;  %v6520_v41 = vpop.f32.mrf.mxu2  ;;  %v14837_v9 = vor.u32 %v17112_v32, %v14836_v59 }
 0x49f   :  { %v14361_v38 = vor.u32 %v16988_v7, %v14358_v60  ;;  %v17220_v49 = vld [vmem:[#allocation16 + $0x984] sm:$0xf]  ;;  %v15828_v50 = vld [vmem:[#allocation16 + $0xdc0] sm:$0xf]  ;;  %v18892_v60 = vld [vmem:[#allocation27_spill] sm:$0xff] }
 0x4a0   :  { %9906 = vmatpush.bf16.msrb.mxu2 %v14709_v10  ;;  %9920 = vmatpush.bf16.msrb.mxu3 %v14965_v27  ;;  %v14613_v10 = vor.u32 %v17056_v23, %v14612_v16  ;;  %v15286_v44 = vld [vmem:[#allocation16 + $0x9a0] sm:$0xf0]  ;;  %v6199_v27 = vadd.f32 %v18352_v4, %v6185_v36  ;;  %v17360_v58 = vld [vmem:[#allocation16 + $0xddc] sm:$0xf0]  ;;  %v18475_v26 = vpop.f32.mrf.mxu1  ;;  %v6521_v4 = vadd.f32 %v6520_v41, %v6507_v22  ;;  %v6764_v6 = vmax.f32 %v18892_v60, 0.0 }
 0x4a1   :  { %v15829_v47 = vor.u32 %v17360_v58, %v15828_v50  ;;  %v17352_v42 = vld [vmem:[#allocation16 + $0xd9c] sm:$0xf0]  ;;  %v17292_v17 = vld [vmem:[#allocation16 + $0xbc4] sm:$0xf] }
 0x4a2   :  { %9991 = vmatpush.bf16.msrb.mxu0 %v14169_v46  ;;  %10005 = vmatpush.bf16.msrb.mxu1 %v14425_v35  ;;  %v14073_v46 = vor.u32 %v16916_v48, %v14070_v30  ;;  %v6311_v35 = vadd.f32 %v18397_v43, %v6297_v54  ;;  %v6534_v0 = vpop.f32.mrf.mxu3  ;;  %v15254_v43 = vld [vmem:[#allocation16 + $0x960] sm:$0xf0]  ;;  %v15764_v16 = vld [vmem:[#allocation16 + $0xd40] sm:$0xf] }
 0x4a3   :  { %v6535_v45 = vadd.f32 %v6534_v0, %v6521_v4  ;;  %v15574_v7 = vld [vmem:[#allocation16 + $0xbe0] sm:$0xf0]  ;;  %v17344_v23 = vld [vmem:[#allocation16 + $0xd5c] sm:$0xf0] }
 0x4a4   :  { %9907 = vmatpush.bf16.msrb.mxu2 %v14677_v53  ;;  %9921 = vmatpush.bf16.msrb.mxu3 %v14933_v15  ;;  %v6771_v53 = vmax.f32 %v6199_v27, 0.0  ;;  %v17212_v15 = vld [vmem:[#allocation16 + $0x944] sm:$0xf]  ;;  %v6772_v62 = vmax.f32 %v6311_v35, 0.0  ;;  %v15765_v18 = vor.u32 %v17344_v23, %v15764_v16  ;;  %v17336_v52 = vld [vmem:[#allocation16 + $0xd1c] sm:$0xf0] }
 0x4a5   :  { %v6774_v51 = vmax.f32 %v6535_v45, 0.0  ;;  %v17204_v2 = vld [vmem:[#allocation16 + $0x904] sm:$0xf]  ;;  %v15700_v59 = vld [vmem:[#allocation16 + $0xcc0] sm:$0xf] }
 0x4a6   :  { %9992 = vmatpush.bf16.msrb.mxu0 %v14137_v61  ;;  %10006 = vmatpush.bf16.msrb.mxu1 %v14393_v57  ;;  %v15289_v61 = vor.u32 %v17220_v49, %v15286_v44  ;;  %v15796_v57 = vld [vmem:[#allocation16 + $0xd80] sm:$0xf]  ;;  %v18480_v48 = vpack.c.bf16 %v6771_v53, %v6763_v12  ;;  %v18482_v1 = vpack.c.bf16 %v6772_v62, %v6764_v6  ;;  %v18484_v28 = vpop.f32.mrf.mxu0  ;;  %v17284_v31 = vld [vmem:[#allocation16 + $0xb84] sm:$0xf] }
 0x4a7   :  { %v15797_v30 = vor.u32 %v17352_v42, %v15796_v57  ;;  %v18486_v36 = vpack.c.bf16 %v6774_v51, %v6766_v33  ;;  %v17196_v14 = vld [vmem:[#allocation16 + $0x8c4] sm:$0xf]  ;;  %v15668_v4 = vld [vmem:[#allocation16 + $0xc80] sm:$0xf]  ;;  %v16977_v57 = vld [vmem:[#allocation16 + $0x1e4] sm:$0xf0] }
 0x4a8   :  { %9908 = vmatpush.bf16.msrb.mxu2 %v14645_v8  ;;  %9922 = vmatpush.bf16.msrb.mxu3 %v14901_v40  ;;  %v15222_v8 = vld [vmem:[#allocation16 + $0x920] sm:$0xf0]  ;;  %v15577_v40 = vor.u32 %v17292_v17, %v15574_v7  ;;  %v18490_v11 = vpop.f32.mrf.mxu1  ;;  %v15636_v42 = vld [vmem:[#allocation16 + $0xc40] sm:$0xf]  ;;  %v14268_v33 = vld [vmem:[#allocation16 + $0x188] sm:$0xf] }
 0x4a9   :  { %v15225_v54 = vor.u32 %v17204_v2, %v15222_v8  ;;  %9953 = vmatmul.bf16.vlgmr.msra.gmra.mxu1 %v18486_v36  ;;  %v15190_v37 = vld [vmem:[#allocation16 + $0x8e0] sm:$0xf0]  ;;  %v17312_v21 = vld [vmem:[#allocation16 + $0xc5c] sm:$0xf0]  ;;  %v16969_v51 = vld [vmem:[#allocation16 + $0x1a4] sm:$0xf0] }
 0x4aa   :  { %9993 = vmatpush.bf16.msrb.mxu0 %v14105_v3  ;;  %10007 = vmatpush.bf16.msrb.mxu1 %v14361_v38  ;;  %v15257_v3 = vor.u32 %v17212_v15, %v15254_v43  ;;  %v15542_v38 = vld [vmem:[#allocation16 + $0xba0] sm:$0xf0]  ;;  %v15193_v49 = vor.u32 %v17196_v14, %v15190_v37 }
 0x4ab   :  { %v15545_v29 = vor.u32 %v17284_v31, %v15542_v38  ;;  %v17188_v44 = vld [vmem:[#allocation16 + $0x884] sm:$0xf] }
 0x4ac   :  { %9909 = vmatpush.bf16.msrb.mxu2 %v14613_v10  ;;  %9923 = vmatpush.bf16.msrb.mxu3 %v14869_v63  ;;  %v15510_v10 = vld [vmem:[#allocation16 + $0xb60] sm:$0xf0] }
 0x4ad   :  { %v15158_v27 = vld [vmem:[#allocation16 + $0x8a0] sm:$0xf0] }
 0x4ae   :  { %9994 = vmatpush.bf16.msrb.mxu0 %v14073_v46  ;;  %10008 = vmatpush.bf16.msrb.mxu1 %v14329_v56  ;;  %v15732_v46 = vld [vmem:[#allocation16 + $0xd00] sm:$0xf]  ;;  %v18493_v25 = vpop.f32.mrf.mxu0  ;;  %v17268_v35 = vld [vmem:[#allocation16 + $0xb04] sm:$0xf]  ;;  %v15161_v32 = vor.u32 %v17188_v44, %v15158_v27  ;;  %v18503_v44 = vld [vmem:[#allocation14] sm:$0xff] }
 0x4af   :  { %v15733_v63 = vor.u32 %v17336_v52, %v15732_v46  ;;  %v17328_v56 = vld [vmem:[#allocation16 + $0xcdc] sm:$0xf0]  ;;  %v15478_v22 = vld [vmem:[#allocation16 + $0xb20] sm:$0xf0]  ;;  %v3295_v27 = vperm.slane %v18503_v44, 6 }
 0x4b0   :  { %9910 = vmatpush.bf16.msrb.mxu2 %v14581_v34  ;;  %9924 = vmatpush.bf16.msrb.mxu3 %v14837_v9  ;;  %v18495_v50 = vpop.f32.mrf.mxu1  ;;  %v17180_v58 = vld [vmem:[#allocation16 + $0x844] sm:$0xf]  ;;  %v15481_v39 = vor.u32 %v17268_v35, %v15478_v22  ;;  %v17320_v34 = vld [vmem:[#allocation16 + $0xc9c] sm:$0xf0] }
 0x4b1   :  { %9995 = vmatmul.bf16.vlgmr.msrb.gmra.mxu0 %v18411_v13  ;;  %v15126_v41 = vld [vmem:[#allocation16 + $0x860] sm:$0xf0]  ;;  %v15669_v62 = vor.u32 %v17320_v34, %v15668_v4  ;;  %v17424_v4 = vld [vmem:[#allocation16 + $0xfdc] sm:$0xf0] }
 0x4b2   :  { %10043 = vmatpush.bf16.msra.mxu0 %v15321_v55  ;;  %10057 = vmatpush.bf16.msra.mxu1 %v15577_v40  ;;  %v17276_v55 = vld [vmem:[#allocation16 + $0xb44] sm:$0xf]  ;;  %v15129_v9 = vor.u32 %v17180_v58, %v15126_v41  ;;  %v17304_v40 = vld [vmem:[#allocation16 + $0xc1c] sm:$0xf0]  ;;  %v16953_v41 = vld [vmem:[#allocation16 + $0x124] sm:$0xf0] }
 0x4b3   :  { %9911 = vmatmul.bf16.vlgmr.msrb.gmra.mxu2 %v18480_v48  ;;  %9925 = vmatmul.bf16.vlgmr.msrb.gmra.mxu3 %v18482_v1  ;;  %v15513_v24 = vor.u32 %v17276_v55, %v15510_v10  ;;  %v17260_v53 = vld [vmem:[#allocation16 + $0xac4] sm:$0xf] }
 0x4b4   :  { %9959 = vmatpush.bf16.msra.mxu2 %v15829_v47  ;;  %v15446_v0 = vld [vmem:[#allocation16 + $0xae0] sm:$0xf0]  ;;  %v14300_v47 = vld [vmem:[#allocation16 + $0x1c8] sm:$0xf] }
 0x4b5   :  { %v17172_v15 = vld [vmem:[#allocation16 + $0x804] sm:$0xf]  ;;  %v15449_v45 = vor.u32 %v17260_v53, %v15446_v0  ;;  %v14301_v6 = vor.u32 %v16977_v57, %v14300_v47  ;;  %v14524_v47 = vld [vmem:[#allocation16 + $0x388] sm:$0xf] }
 0x4b6   :  { %10044 = vmatpush.bf16.msra.mxu0 %v15289_v61  ;;  %10058 = vmatpush.bf16.msra.mxu1 %v15545_v29  ;;  %v15701_v61 = vor.u32 %v17328_v56, %v15700_v59  ;;  %v15094_v43 = vld [vmem:[#allocation16 + $0x820] sm:$0xf0]  ;;  %v18497_v7 = vpop.f32.mrf.mxu0  ;;  %v16961_v29 = vld [vmem:[#allocation16 + $0x164] sm:$0xf0]  ;;  %v6574_v56 = vpop.f32.mrf.mxu2 }
 0x4b7   :  { %v17252_v12 = vld [vmem:[#allocation16 + $0xa84] sm:$0xf]  ;;  %v15097_v60 = vor.u32 %v17172_v15, %v15094_v43  ;;  %v17041_v59 = vld [vmem:[#allocation16 + $0x3e4] sm:$0xf0]  ;;  %v18508_v35 = vpop.f32.mrf.mxu3  ;;  %v6547_v43 = vadd.f32 %v18471_v5, %v3295_v27  ;;  %v6549_v5 = vadd.f32 %v18484_v28, %v3295_v27 }
 0x4b8   :  { %9960 = vmatpush.bf16.msra.mxu2 %v15797_v30  ;;  %v15414_v17 = vld [vmem:[#allocation16 + $0xaa0] sm:$0xf0]  ;;  %v15604_v30 = vld [vmem:[#allocation16 + $0xc00] sm:$0xf]  ;;  %v18500_v16 = vpop.f32.mrf.mxu1  ;;  %v14172_v57 = vld [vmem:[#allocation16 + $0xc8] sm:$0xf] }
 0x4b9   :  { %10009 = vmatmul.bf16.vlgmr.msrb.gmra.mxu1 %v18319_v20  ;;  %v15417_v2 = vor.u32 %v17252_v12, %v15414_v17  ;;  %v17244_v8 = vld [vmem:[#allocation16 + $0xa44] sm:$0xf]  ;;  %v15605_v14 = vor.u32 %v17304_v40, %v15604_v30  ;;  %v16052_v12 = vld [vmem:[#allocation16 + $0xf80] sm:$0xf]  ;;  %v14140_v40 = vld [vmem:[#allocation16 + $0x88] sm:$0xf] }
 0x4ba   :  { %10045 = vmatpush.bf16.msra.mxu0 %v15257_v3  ;;  %10059 = vmatpush.bf16.msra.mxu1 %v15513_v24  ;;  %v15637_v3 = vor.u32 %v17312_v21, %v15636_v42  ;;  %v15382_v23 = vld [vmem:[#allocation16 + $0xa60] sm:$0xf0]  ;;  %v14556_v24 = vld [vmem:[#allocation16 + $0x3c8] sm:$0xf]  ;;  %v17416_v17 = vld [vmem:[#allocation16 + $0xf9c] sm:$0xf0] }
 0x4bb   :  { %v17100_v31 = vld [vmem:[#allocation16 + $0x5c4] sm:$0xf]  ;;  %v15385_v37 = vor.u32 %v17244_v8, %v15382_v23  ;;  %v14557_v53 = vor.u32 %v17041_v59, %v14556_v24  ;;  %v16945_v42 = vld [vmem:[#allocation16 + $0xe4] sm:$0xf0] }
 0x4bc   :  { %9961 = vmatpush.bf16.msra.mxu2 %v15765_v18  ;;  %v14806_v38 = vld [vmem:[#allocation16 + $0x5e0] sm:$0xf0]  ;;  %v14236_v18 = vld [vmem:[#allocation16 + $0x148] sm:$0xf]  ;;  %v14173_v30 = vor.u32 %v16945_v42, %v14172_v57 }
 0x4bd   :  { %v17236_v46 = vld [vmem:[#allocation16 + $0xa04] sm:$0xf]  ;;  %v14809_v52 = vor.u32 %v17100_v31, %v14806_v38  ;;  %v14237_v22 = vor.u32 %v16961_v29, %v14236_v18  ;;  %v17025_v8 = vld [vmem:[#allocation16 + $0x364] sm:$0xf0] }
 0x4be   :  { %10046 = vmatpush.bf16.msra.mxu0 %v15225_v54  ;;  %10060 = vmatpush.bf16.msra.mxu1 %v15481_v39  ;;  %v14269_v54 = vor.u32 %v16969_v51, %v14268_v33  ;;  %v15350_v55 = vld [vmem:[#allocation16 + $0xa20] sm:$0xf0]  ;;  %v16084_v39 = vld [vmem:[#allocation16 + $0xfc0] sm:$0xf]  ;;  %v16053_v51 = vor.u32 %v17416_v17, %v16052_v12  ;;  %v16937_v38 = vld [vmem:[#allocation16 + $0xa4] sm:$0xf0]  ;;  %v6576_v18 = vpop.f32.mrf.mxu2 }
 0x4bf   :  { %v17092_v10 = vld [vmem:[#allocation16 + $0x584] sm:$0xf]  ;;  %v15353_v58 = vor.u32 %v17236_v46, %v15350_v55  ;;  %v16085_v15 = vor.u32 %v17424_v4, %v16084_v39  ;;  %v6563_v55 = vadd.f32 %v18490_v11, %v6549_v5  ;;  %v14141_v24 = vor.u32 %v16937_v38, %v14140_v40  ;;  %v14108_v59 = vld [vmem:[#allocation16 + $0x48] sm:$0xf]  ;;  %v15956_v12 = vld [vmem:[#allocation16 + $0xec0] sm:$0xf] }
 0x4c0   :  { %9962 = vmatpush.bf16.msra.mxu2 %v15733_v63  ;;  %v18506_v63 = vpop.f32.mrf.mxu0  ;;  %v18510_v34 = vpop.f32.mrf.mxu1  ;;  %v17084_v0 = vld [vmem:[#allocation16 + $0x544] sm:$0xf]  ;;  %v17233_v42 = vld [vmem:[#allocation16 + $0x9e4] sm:$0xf0]  ;;  %v17392_v17 = vld [vmem:[#allocation16 + $0xedc] sm:$0xf0] }
 0x4c1   :  { %9973 = vmatpush.bf16.msra.mxu3 %v16085_v15  ;;  %v14710_v33 = vld [vmem:[#allocation16 + $0x520] sm:$0xf0]  ;;  %v15957_v5 = vor.u32 %v17392_v17, %v15956_v12 }
 0x4c2   :  { %10047 = vmatpush.bf16.msra.mxu0 %v15193_v49  ;;  %10061 = vmatpush.bf16.msra.mxu1 %v15449_v45  ;;  %v14774_v49 = vld [vmem:[#allocation16 + $0x5a0] sm:$0xf0] }
 0x4c3   :  { %v17068_v29 = vld [vmem:[#allocation16 + $0x4c4] sm:$0xf] }
 0x4c4   :  { %9963 = vmatpush.bf16.msra.mxu2 %v15701_v61  ;;  %v14777_v61 = vor.u32 %v17092_v10, %v14774_v49  ;;  %v14678_v46 = vld [vmem:[#allocation16 + $0x4e0] sm:$0xf0]  ;;  %v14460_v10 = vld [vmem:[#allocation16 + $0x308] sm:$0xf] }
 0x4c5   :  { %9974 = vmatpush.bf16.msra.mxu3 %v16053_v51  ;;  %v17017_v49 = vld [vmem:[#allocation16 + $0x324] sm:$0xf0]  ;;  %v17060_v4 = vld [vmem:[#allocation16 + $0x484] sm:$0xf] }
 0x4c6   :  { %10048 = vmatpush.bf16.msra.mxu0 %v15161_v32  ;;  %10062 = vmatpush.bf16.msra.mxu1 %v15417_v2  ;;  %v14204_v32 = vld [vmem:[#allocation16 + $0x108] sm:$0xf]  ;;  %v14461_v39 = vor.u32 %v17017_v49, %v14460_v10  ;;  %v14646_v11 = vld [vmem:[#allocation16 + $0x4a0] sm:$0xf0] }
 0x4c7   :  { %v14205_v45 = vor.u32 %v16953_v41, %v14204_v32  ;;  %v14492_v2 = vld [vmem:[#allocation16 + $0x348] sm:$0xf]  ;;  %v15988_v41 = vld [vmem:[#allocation16 + $0xf00] sm:$0xf]  ;;  %v17052_v51 = vld [vmem:[#allocation16 + $0x444] sm:$0xf] }
 0x4c8   :  { %9964 = vmatpush.bf16.msra.mxu2 %v15669_v62  ;;  %v17033_v62 = vld [vmem:[#allocation16 + $0x3a4] sm:$0xf0]  ;;  %v18516_v23 = vpop.f32.mrf.mxu0  ;;  %v14493_v28 = vor.u32 %v17025_v8, %v14492_v2  ;;  %v18519_v27 = vpop.f32.mrf.mxu1 }
 0x4c9   :  { %v16929_v32 = vld [vmem:[#allocation16 + $0x64] sm:$0xf0] }
 0x4ca   :  { %10049 = vmatpush.bf16.msra.mxu0 %v15129_v9  ;;  %10063 = vmatpush.bf16.msra.mxu1 %v15385_v37  ;;  %v14742_v9 = vld [vmem:[#allocation16 + $0x560] sm:$0xf0]  ;;  %v17408_v37 = vld [vmem:[#allocation16 + $0xf5c] sm:$0xf0]  ;;  %v14109_v15 = vor.u32 %v16929_v32, %v14108_v59  ;;  %v14396_v2 = vld [vmem:[#allocation16 + $0x288] sm:$0xf] }
 0x4cb   :  { %v14745_v21 = vor.u32 %v17084_v0, %v14742_v9  ;;  %v14428_v0 = vld [vmem:[#allocation16 + $0x2c8] sm:$0xf]  ;;  %v15892_v59 = vld [vmem:[#allocation16 + $0xe40] sm:$0xf] }
 0x4cc   :  { %9965 = vmatpush.bf16.msra.mxu2 %v15637_v3  ;;  %v6561_v3 = vadd.f32 %v18475_v26, %v6547_v43  ;;  %v6590_v26 = vpop.f32.mrf.mxu3  ;;  %v17009_v9 = vld [vmem:[#allocation16 + $0x2e4] sm:$0xf0] }
 0x4cd   :  { %v14076_v43 = vld [vmem:[#allocation16 + $0x8] sm:$0xf] }
 0x4ce   :  { %10050 = vmatpush.bf16.msra.mxu0 %v15097_v60  ;;  %10064 = vmatpush.bf16.msra.mxu1 %v15353_v58  ;;  %v14525_v60 = vor.u32 %v17033_v62, %v14524_v47  ;;  %v6575_v31 = vadd.f32 %v6574_v56, %v6561_v3  ;;  %v14681_v58 = vor.u32 %v17068_v29, %v14678_v46  ;;  %v16921_v47 = vld [vmem:[#allocation16 + $0x24] sm:$0xf0]  ;;  %v14614_v3 = vld [vmem:[#allocation16 + $0x460] sm:$0xf0] }
 0x4cf   :  { %v15324_v62 = vld [vmem:[#allocation16 + $0x9c8] sm:$0xf]  ;;  %v17044_v29 = vld [vmem:[#allocation16 + $0x404] sm:$0xf] }
 0x4d0   :  { %9966 = vmatpush.bf16.msra.mxu2 %v15605_v14  ;;  %v16020_v14 = vld [vmem:[#allocation16 + $0xf40] sm:$0xf]  ;;  %v6589_v56 = vadd.f32 %v18508_v35, %v6575_v31  ;;  %v18523_v57 = vpop.f32.mrf.mxu0  ;;  %v17001_v8 = vld [vmem:[#allocation16 + $0x2a4] sm:$0xf0]  ;;  %v15325_v40 = vor.u32 %v17233_v42, %v15324_v62  ;;  %v14582_v46 = vld [vmem:[#allocation16 + $0x420] sm:$0xf0] }
 0x4d1   :  { %10051 = vmatmul.bf16.vlgmr.msra.gmra.mxu0 %v18433_v19  ;;  %10065 = vmatmul.bf16.vlgmr.msra.gmra.mxu1 %v18486_v36  ;;  %v14364_v10 = vld [vmem:[#allocation16 + $0x248] sm:$0xf]  ;;  %v15860_v42 = vld [vmem:[#allocation16 + $0xe00] sm:$0xf] }
 0x4d2   :  { %10099 = vmatpush.bf16.msrb.mxu0 %v14301_v6  ;;  %10113 = vmatpush.bf16.msrb.mxu1 %v14557_v53  ;;  %v17076_v6 = vld [vmem:[#allocation16 + $0x504] sm:$0xf]  ;;  %v6603_v35 = vadd.f32 %v18493_v25, %v6589_v56  ;;  %v14077_v25 = vor.u32 %v16921_v47, %v14076_v43  ;;  %v16993_v49 = vld [vmem:[#allocation16 + $0x264] sm:$0xf0]  ;;  %v17376_v56 = vld [vmem:[#allocation16 + $0xe5c] sm:$0xf0] }
 0x4d3   :  { %v14365_v32 = vor.u32 %v16993_v49, %v14364_v10  ;;  %v15580_v43 = vld [vmem:[#allocation16 + $0xbc8] sm:$0xf] }
 0x4d4   :  { %10015 = vmatpush.bf16.msrb.mxu2 %v14809_v52  ;;  %v16021_v52 = vor.u32 %v17408_v37, %v16020_v14  ;;  %v6617_v38 = vadd.f32 %v18495_v50, %v6603_v35  ;;  %v14617_v14 = vor.u32 %v17052_v51, %v14614_v3  ;;  %v15924_v37 = vld [vmem:[#allocation16 + $0xe80] sm:$0xf]  ;;  %v17297_v47 = vld [vmem:[#allocation16 + $0xbe4] sm:$0xf0] }
 0x4d6   :  { %10100 = vmatpush.bf16.msrb.mxu0 %v14269_v54  ;;  %v14713_v54 = vor.u32 %v17076_v6, %v14710_v33  ;;  %10114 = vmatpush.bf16.msrb.mxu1 %v14525_v60  ;;  %v6630_v60 = vpop.f32.mrf.mxu2  ;;  %v6644_v6 = vpop.f32.mrf.mxu3  ;;  %v14429_v33 = vor.u32 %v17009_v9, %v14428_v0  ;;  %v18531_v0 = vld [vmem:[#allocation17] sm:$0xff] }
 0x4d7   :  { %9975 = vmatpush.bf16.msra.mxu3 %v16021_v52 }
 0x4d8   :  { %10016 = vmatpush.bf16.msrb.mxu2 %v14777_v61  ;;  %v17400_v61 = vld [vmem:[#allocation16 + $0xf1c] sm:$0xf0] }
 0x4d9   :  { %v15989_v53 = vor.u32 %v17400_v61, %v15988_v41  ;;  %v17217_v41 = vld [vmem:[#allocation16 + $0x964] sm:$0xf0]  ;;  %v15893_v61 = vor.u32 %v17376_v56, %v15892_v59 }
 0x4da   :  { %10101 = vmatpush.bf16.msrb.mxu0 %v14237_v22  ;;  %v6577_v22 = vadd.f32 %v6576_v18, %v6563_v55  ;;  %10115 = vmatpush.bf16.msrb.mxu1 %v14493_v28  ;;  %v17384_v18 = vld [vmem:[#allocation16 + $0xe9c] sm:$0xf0]  ;;  %v17225_v28 = vld [vmem:[#allocation16 + $0x9a4] sm:$0xf0]  ;;  %v6631_v55 = vadd.f32 %v6630_v60, %v6617_v38 }
 0x4db   :  { %9976 = vmatpush.bf16.msra.mxu3 %v15989_v53  ;;  %v15925_v52 = vor.u32 %v17384_v18, %v15924_v37  ;;  %v16985_v53 = vld [vmem:[#allocation16 + $0x224] sm:$0xf0]  ;;  %v17348_v18 = vld [vmem:[#allocation16 + $0xd84] sm:$0xf] }
 0x4dc   :  { %10017 = vmatpush.bf16.msrb.mxu2 %v14745_v21  ;;  %v14649_v21 = vor.u32 %v17060_v4, %v14646_v11  ;;  %v14332_v11 = vld [vmem:[#allocation16 + $0x208] sm:$0xf] }
 0x4dd   :  { %v14333_v17 = vor.u32 %v16985_v53, %v14332_v11  ;;  %v15228_v60 = vld [vmem:[#allocation16 + $0x908] sm:$0xf] }
 0x4de   :  { %10102 = vmatpush.bf16.msrb.mxu0 %v14205_v45  ;;  %v6591_v45 = vadd.f32 %v6590_v26, %v6577_v22  ;;  %10116 = vmatpush.bf16.msrb.mxu1 %v14461_v39  ;;  %v14397_v26 = vor.u32 %v17001_v8, %v14396_v2  ;;  %v6632_v22 = vpop.f32.mrf.mxu2  ;;  %v6645_v39 = vadd.f32 %v6644_v6, %v6631_v55  ;;  %v6646_v9 = vpop.f32.mrf.mxu3  ;;  %v17209_v6 = vld [vmem:[#allocation16 + $0x924] sm:$0xf0]  ;;  %v17164_v2 = vld [vmem:[#allocation16 + $0x7c4] sm:$0xf] }
 0x4df   :  { %9977 = vmatpush.bf16.msra.mxu3 %v15957_v5  ;;  %v15581_v5 = vor.u32 %v17297_v47, %v15580_v43  ;;  %v15062_v8 = vld [vmem:[#allocation16 + $0x7e0] sm:$0xf0]  ;;  %v17289_v38 = vld [vmem:[#allocation16 + $0xba4] sm:$0xf0]  ;;  %v15229_v37 = vor.u32 %v17209_v6, %v15228_v60 }
 0x4e0   :  { %10018 = vmatpush.bf16.msrb.mxu2 %v14713_v54  ;;  %v6605_v31 = vadd.f32 %v18497_v7, %v6591_v45  ;;  %v15292_v54 = vld [vmem:[#allocation16 + $0x988] sm:$0xf]  ;;  %v15830_v45 = vld [vmem:[#allocation16 + $0xde0] sm:$0xf0]  ;;  %v6767_v51 = vmax.f32 %v6645_v39, 0.0 }
 0x4e1   :  { %v15293_v50 = vor.u32 %v17225_v28, %v15292_v54  ;;  %v15065_v54 = vor.u32 %v17164_v2, %v15062_v8  ;;  %v15196_v28 = vld [vmem:[#allocation16 + $0x8c8] sm:$0xf]  ;;  %v17148_v39 = vld [vmem:[#allocation16 + $0x744] sm:$0xf] }
 0x4e2   :  { %10103 = vmatpush.bf16.msrb.mxu0 %v14173_v30  ;;  %v18525_v30 = vpop.f32.mrf.mxu1  ;;  %10117 = vmatpush.bf16.msrb.mxu1 %v14429_v33  ;;  %v6619_v7 = vadd.f32 %v18500_v16, %v6605_v31  ;;  %v18533_v16 = vpop.f32.mrf.mxu0  ;;  %v15548_v31 = vld [vmem:[#allocation16 + $0xb88] sm:$0xf]  ;;  %v14966_v60 = vld [vmem:[#allocation16 + $0x720] sm:$0xf0] }
 0x4e3   :  { %9978 = vmatpush.bf16.msra.mxu3 %v15925_v52  ;;  %v15030_v52 = vld [vmem:[#allocation16 + $0x7a0] sm:$0xf0]  ;;  %v15549_v55 = vor.u32 %v17289_v38, %v15548_v31  ;;  %v17273_v43 = vld [vmem:[#allocation16 + $0xb24] sm:$0xf0] }
 0x4e4   :  { %10019 = vmatpush.bf16.msrb.mxu2 %v14681_v58  ;;  %v15260_v58 = vld [vmem:[#allocation16 + $0x948] sm:$0xf]  ;;  %v6633_v4 = vadd.f32 %v6632_v22, %v6619_v7  ;;  %v17340_v22 = vld [vmem:[#allocation16 + $0xd44] sm:$0xf] }
 0x4e5   :  { %v15261_v35 = vor.u32 %v17217_v41, %v15260_v58  ;;  %v15516_v7 = vld [vmem:[#allocation16 + $0xb48] sm:$0xf]  ;;  %v17324_v8 = vld [vmem:[#allocation16 + $0xcc4] sm:$0xf] }
 0x4e6   :  { %10104 = vmatpush.bf16.msrb.mxu0 %v14141_v24  ;;  %v14585_v24 = vor.u32 %v17044_v29, %v14582_v46  ;;  %10118 = vmatpush.bf16.msrb.mxu1 %v14397_v26  ;;  %v6647_v62 = vadd.f32 %v6646_v9, %v6633_v4  ;;  %v15798_v26 = vld [vmem:[#allocation16 + $0xda0] sm:$0xf0]  ;;  %v17201_v29 = vld [vmem:[#allocation16 + $0x8e4] sm:$0xf0] }
 0x4e7   :  { %9979 = vmatpush.bf16.msra.mxu3 %v15893_v61  ;;  %v17156_v46 = vld [vmem:[#allocation16 + $0x784] sm:$0xf]  ;;  %v15801_v49 = vor.u32 %v17348_v18, %v15798_v26  ;;  %v15197_v56 = vor.u32 %v17201_v29, %v15196_v28  ;;  %v15164_v58 = vld [vmem:[#allocation16 + $0x888] sm:$0xf]  ;;  %v16973_v26 = vld [vmem:[#allocation16 + $0x1cc] sm:$0xf] }
 0x4e8   :  { %10020 = vmatpush.bf16.msrb.mxu2 %v14649_v21  ;;  %v17368_v21 = vld [vmem:[#allocation16 + $0xe1c] sm:$0xf0]  ;;  %v6775_v3 = vmax.f32 %v6647_v62, 0.0  ;;  %v17193_v61 = vld [vmem:[#allocation16 + $0x8a4] sm:$0xf0] }
 0x4e9   :  { %v15861_v33 = vor.u32 %v17368_v21, %v15860_v42  ;;  %v14998_v4 = vld [vmem:[#allocation16 + $0x760] sm:$0xf0]  ;;  %v15165_v62 = vor.u32 %v17193_v61, %v15164_v58  ;;  %v15132_v42 = vld [vmem:[#allocation16 + $0x848] sm:$0xf]  ;;  %v14302_v28 = vld [vmem:[#allocation16 + $0x1e8] sm:$0xf0] }
 0x4ea   :  { %10105 = vmatpush.bf16.msrb.mxu0 %v14109_v15  ;;  %v17356_v15 = vld [vmem:[#allocation16 + $0xdc4] sm:$0xf]  ;;  %v18535_v12 = vpop.f32.mrf.mxu1  ;;  %10119 = vmatpush.bf16.msrb.mxu1 %v14365_v32  ;;  %v15001_v47 = vor.u32 %v17148_v39, %v14998_v4  ;;  %v17185_v21 = vld [vmem:[#allocation16 + $0x864] sm:$0xf0] }
 0x4eb   :  { %9980 = vmatpush.bf16.msra.mxu3 %v15861_v33  ;;  %v15766_v32 = vld [vmem:[#allocation16 + $0xd60] sm:$0xf0]  ;;  %v15133_v2 = vor.u32 %v17185_v21, %v15132_v42  ;;  %v15100_v31 = vld [vmem:[#allocation16 + $0x808] sm:$0xf] }
 0x4ec   :  { %10021 = vmatpush.bf16.msrb.mxu2 %v14617_v14  ;;  %v18538_v14 = vpack.c.bf16 %v6775_v3, %v6767_v51  ;;  %v15769_v9 = vor.u32 %v17340_v22, %v15766_v32  ;;  %v15452_v51 = vld [vmem:[#allocation16 + $0xac8] sm:$0xf]  ;;  %v16965_v22 = vld [vmem:[#allocation16 + $0x18c] sm:$0xf]  ;;  %v17308_v39 = vld [vmem:[#allocation16 + $0xc44] sm:$0xf] }
 0x4ed   :  { %v17265_v3 = vld [vmem:[#allocation16 + $0xae4] sm:$0xf0]  ;;  %v14270_v32 = vld [vmem:[#allocation16 + $0x1a8] sm:$0xf0]  ;;  %v15638_v4 = vld [vmem:[#allocation16 + $0xc60] sm:$0xf0] }
 0x4ee   :  { %10106 = vmatpush.bf16.msrb.mxu0 %v14077_v25  ;;  %v18883_v25 = vperm.slane %v18531_v0, 0  ;;  %10120 = vmatpush.bf16.msrb.mxu1 %v14333_v17  ;;  %v9884_v10 = vpop.f32.mrf.mxu0  ;;  %v17140_v17 = vld [vmem:[#allocation16 + $0x704] sm:$0xf]  ;;  %v17177_v38 = vld [vmem:[#allocation16 + $0x824] sm:$0xf0]  ;;  %v15453_v18 = vor.u32 %v17265_v3, %v15452_v51  ;;  %v15641_v21 = vor.u32 %v17308_v39, %v15638_v4 }
 0x4ef   :  { %9967 = vmatmul.bf16.vlgmr.msra.gmra.mxu2 %v18538_v14  ;;  %10029 = vmatpush.bf16.msrb.mxu3 %v15065_v54  ;;  %v17132_v54 = vld [vmem:[#allocation16 + $0x6c4] sm:$0xf]  ;;  %v17249_v61 = vld [vmem:[#allocation16 + $0xa64] sm:$0xf0]  ;;  %v17037_v51 = vld [vmem:[#allocation16 + $0x3cc] sm:$0xf] }
 0x4f0   :  { %10022 = vmatpush.bf16.msrb.mxu2 %v14585_v24  ;;  %v15033_v24 = vor.u32 %v17156_v46, %v15030_v52  ;;  %v9885_v59 = vadd.f32 %v9884_v10, %v18883_v25  ;;  %v15420_v46 = vld [vmem:[#allocation16 + $0xa88] sm:$0xf]  ;;  %v15101_v10 = vor.u32 %v17177_v38, %v15100_v31  ;;  %v17300_v42 = vld [vmem:[#allocation16 + $0xc04] sm:$0xf]  ;;  %v14558_v3 = vld [vmem:[#allocation16 + $0x3e8] sm:$0xf0] }
 0x4f1   :  { %10107 = vmatmul.bf16.vlgmr.msrb.gmra.mxu0 %v18411_v13  ;;  %10121 = vmatmul.bf16.vlgmr.msrb.gmra.mxu1 %v18319_v20  ;;  %v17257_v52 = vld [vmem:[#allocation16 + $0xaa4] sm:$0xf0]  ;;  %v14838_v31 = vld [vmem:[#allocation16 + $0x620] sm:$0xf0] }
 0x4f2   :  { %10155 = vmatpush.bf16.msra.mxu0 %v15325_v40  ;;  %v15833_v40 = vor.u32 %v17356_v15, %v15830_v45  ;;  %10169 = vmatpush.bf16.msra.mxu1 %v15581_v5  ;;  %v9898_v41 = vpop.f32.mrf.mxu1  ;;  %v15484_v15 = vld [vmem:[#allocation16 + $0xb08] sm:$0xf]  ;;  %v15734_v45 = vld [vmem:[#allocation16 + $0xd20] sm:$0xf0]  ;;  %v14969_v5 = vor.u32 %v17140_v17, %v14966_v60 }
 0x4f3   :  { %v18544_v11 = vadd.f32 %v9898_v41, %v9885_v59  ;;  %10030 = vmatpush.bf16.msrb.mxu3 %v15033_v24  ;;  %v15485_v6 = vor.u32 %v17273_v43, %v15484_v15  ;;  %v17124_v24 = vld [vmem:[#allocation16 + $0x684] sm:$0xf]  ;;  %v15388_v41 = vld [vmem:[#allocation16 + $0xa48] sm:$0xf]  ;;  %v14273_v15 = vor.u32 %v16965_v22, %v14270_v32 }
 0x4f4   :  { %10071 = vmatpush.bf16.msra.mxu2 %v15833_v40  ;;  %v15702_v40 = vld [vmem:[#allocation16 + $0xce0] sm:$0xf0]  ;;  %v15356_v60 = vld [vmem:[#allocation16 + $0xa08] sm:$0xf] }
 0x4f5   :  { %v15705_v29 = vor.u32 %v17324_v8, %v15702_v40  ;;  %v14902_v59 = vld [vmem:[#allocation16 + $0x6a0] sm:$0xf0]  ;;  %v17105_v8 = vld [vmem:[#allocation16 + $0x5e4] sm:$0xf0] }
 0x4f6   :  { %10156 = vmatpush.bf16.msra.mxu0 %v15293_v50  ;;  %v17281_v50 = vld [vmem:[#allocation16 + $0xb64] sm:$0xf0]  ;;  %10170 = vmatpush.bf16.msra.mxu1 %v15549_v55  ;;  %v17116_v43 = vld [vmem:[#allocation16 + $0x644] sm:$0xf]  ;;  %v6700_v38 = vpop.f32.mrf.mxu3 }
 0x4f7   :  { %v15517_v53 = vor.u32 %v17281_v50, %v15516_v7  ;;  %10031 = vmatpush.bf16.msrb.mxu3 %v15001_v47  ;;  %v15670_v7 = vld [vmem:[#allocation16 + $0xca0] sm:$0xf0]  ;;  %v14305_v50 = vor.u32 %v16973_v26, %v14302_v28  ;;  %v14561_v28 = vor.u32 %v17037_v51, %v14558_v3  ;;  %v14748_v39 = vld [vmem:[#allocation16 + $0x548] sm:$0xf]  ;;  %v14110_v51 = vld [vmem:[#allocation16 + $0x68] sm:$0xf0] }
 0x4f8   :  { %10072 = vmatpush.bf16.msra.mxu2 %v15801_v49  ;;  %v17316_v49 = vld [vmem:[#allocation16 + $0xc84] sm:$0xf]  ;;  %v17089_v4 = vld [vmem:[#allocation16 + $0x564] sm:$0xf0] }
 0x4f9   :  { %v15673_v58 = vor.u32 %v17316_v49, %v15670_v7  ;;  %v14870_v47 = vld [vmem:[#allocation16 + $0x660] sm:$0xf0]  ;;  %v14780_v7 = vld [vmem:[#allocation16 + $0x588] sm:$0xf] }
 0x4fa   :  { %10157 = vmatpush.bf16.msra.mxu0 %v15261_v35  ;;  %v17332_v35 = vld [vmem:[#allocation16 + $0xd04] sm:$0xf]  ;;  %10171 = vmatpush.bf16.msra.mxu1 %v15517_v53  ;;  %v14905_v53 = vor.u32 %v17124_v24, %v14902_v59  ;;  %v16941_v24 = vld [vmem:[#allocation16 + $0xcc] sm:$0xf] }
 0x4fb   :  { %v15737_v33 = vor.u32 %v17332_v35, %v15734_v45  ;;  %10032 = vmatpush.bf16.msrb.mxu3 %v14969_v5  ;;  %v16957_v35 = vld [vmem:[#allocation16 + $0x14c] sm:$0xf]  ;;  %v15606_v17 = vld [vmem:[#allocation16 + $0xc20] sm:$0xf0]  ;;  %v6686_v5 = vpop.f32.mrf.mxu2 }
 0x4fc   :  { %10073 = vmatpush.bf16.msra.mxu2 %v15769_v9  ;;  %v3296_v9 = vperm.slane %v18503_v44, 7  ;;  %v14238_v45 = vld [vmem:[#allocation16 + $0x168] sm:$0xf0]  ;;  %v14873_v44 = vor.u32 %v17116_v43, %v14870_v47  ;;  %v17108_v40 = vld [vmem:[#allocation16 + $0x604] sm:$0xf]  ;;  %v15609_v26 = vor.u32 %v17300_v42, %v15606_v17 }
 0x4fd   :  { %v14174_v59 = vld [vmem:[#allocation16 + $0xe8] sm:$0xf0]  ;;  %v17081_v17 = vld [vmem:[#allocation16 + $0x524] sm:$0xf0] }
 0x4fe   :  { %10158 = vmatpush.bf16.msra.mxu0 %v15229_v37  ;;  %v14934_v37 = vld [vmem:[#allocation16 + $0x6e0] sm:$0xf0]  ;;  %10172 = vmatpush.bf16.msra.mxu1 %v15485_v6  ;;  %v17241_v6 = vld [vmem:[#allocation16 + $0xa24] sm:$0xf0]  ;;  %v6661_v32 = vadd.f32 %v18516_v23, %v3296_v9  ;;  %v14142_v43 = vld [vmem:[#allocation16 + $0xa8] sm:$0xf0] }
 0x4ff   :  { %v14937_v55 = vor.u32 %v17132_v54, %v14934_v37  ;;  %10023 = vmatmul.bf16.vlgmr.msrb.gmra.mxu2 %v18480_v48  ;;  %v15357_v54 = vor.u32 %v17241_v6, %v15356_v60  ;;  %v16949_v37 = vld [vmem:[#allocation16 + $0x10c] sm:$0xf] }
 0x500   :  { %10074 = vmatpush.bf16.msra.mxu2 %v15737_v33  ;;  %v14812_v33 = vld [vmem:[#allocation16 + $0x5c8] sm:$0xf]  ;;  %v6675_v23 = vadd.f32 %v18519_v27, %v6661_v32  ;;  %v15294_v32 = vld [vmem:[#allocation16 + $0x9a8] sm:$0xf0] }
 0x501   :  { %10033 = vmatpush.bf16.msrb.mxu3 %v14937_v55  ;;  %v14526_v55 = vld [vmem:[#allocation16 + $0x3a8] sm:$0xf0] }
 0x502   :  { %10159 = vmatpush.bf16.msra.mxu0 %v15197_v56  ;;  %10173 = vmatpush.bf16.msra.mxu1 %v15453_v18  ;;  %v15421_v56 = vor.u32 %v17257_v52, %v15420_v46  ;;  %v14206_v18 = vld [vmem:[#allocation16 + $0x128] sm:$0xf0]  ;;  %v14813_v46 = vor.u32 %v17105_v8, %v14812_v33  ;;  %v14684_v8 = vld [vmem:[#allocation16 + $0x4c8] sm:$0xf] }
 0x503   :  { %v17029_v52 = vld [vmem:[#allocation16 + $0x38c] sm:$0xf]  ;;  %v14209_v49 = vor.u32 %v16949_v37, %v14206_v18  ;;  %v6688_v47 = vpop.f32.mrf.mxu2 }
 0x504   :  { %10075 = vmatpush.bf16.msra.mxu2 %v15705_v29  ;;  %v6659_v29 = vadd.f32 %v18506_v63, %v3296_v9  ;;  %v6702_v9 = vpop.f32.mrf.mxu3  ;;  %v6689_v6 = vadd.f32 %v6688_v47, %v6675_v23  ;;  %v16925_v33 = vld [vmem:[#allocation16 + $0x4c] sm:$0xf] }
 0x505   :  { %10034 = vmatpush.bf16.msrb.mxu3 %v14905_v53  ;;  %v14113_v27 = vor.u32 %v16925_v33, %v14110_v51  ;;  %v16917_v37 = vld [vmem:[#allocation16 + $0xc] sm:$0xf]  ;;  %v15836_v51 = vld [vmem:[#allocation16 + $0xdc8] sm:$0xf] }
 0x506   :  { %10160 = vmatpush.bf16.msra.mxu0 %v15165_v62  ;;  %10174 = vmatpush.bf16.msra.mxu1 %v15421_v56  ;;  %v15389_v62 = vor.u32 %v17249_v61, %v15388_v41  ;;  %v14529_v56 = vor.u32 %v17029_v52, %v14526_v55  ;;  %v6673_v22 = vadd.f32 %v18510_v34, %v6659_v29  ;;  %v14494_v41 = vld [vmem:[#allocation16 + $0x368] sm:$0xf0] }
 0x507   :  { %v14177_v61 = vor.u32 %v16941_v24, %v14174_v59  ;;  %v14078_v18 = vld [vmem:[#allocation16 + $0x28] sm:$0xf0] }
 0x508   :  { %10076 = vmatpush.bf16.msra.mxu2 %v15673_v58  ;;  %v17021_v58 = vld [vmem:[#allocation16 + $0x34c] sm:$0xf]  ;;  %v6687_v53 = vadd.f32 %v6686_v5, %v6673_v22 }
 0x509   :  { %10035 = vmatpush.bf16.msrb.mxu3 %v14873_v44  ;;  %v14497_v34 = vor.u32 %v17021_v58, %v14494_v41  ;;  %v17005_v5 = vld [vmem:[#allocation16 + $0x2cc] sm:$0xf] }
 0x50a   :  { %10161 = vmatpush.bf16.msra.mxu0 %v15133_v2  ;;  %v14241_v2 = vor.u32 %v16957_v35, %v14238_v45  ;;  %10175 = vmatpush.bf16.msra.mxu1 %v15389_v62  ;;  %v14749_v62 = vor.u32 %v17089_v4, %v14748_v39  ;;  %v17013_v35 = vld [vmem:[#allocation16 + $0x30c] sm:$0xf]  ;;  %v6701_v60 = vadd.f32 %v6700_v38, %v6687_v53  ;;  %v14620_v39 = vld [vmem:[#allocation16 + $0x448] sm:$0xf] }
 0x50b   :  { %v14462_v45 = vld [vmem:[#allocation16 + $0x328] sm:$0xf0]  ;;  %v17057_v4 = vld [vmem:[#allocation16 + $0x464] sm:$0xf0] }
 0x50c   :  { %10077 = vmatpush.bf16.msra.mxu2 %v15641_v21  ;;  %v14716_v21 = vld [vmem:[#allocation16 + $0x508] sm:$0xf]  ;;  %v14465_v3 = vor.u32 %v17013_v35, %v14462_v45  ;;  %v15326_v29 = vld [vmem:[#allocation16 + $0x9e8] sm:$0xf0] }
 0x50d   :  { %v14717_v44 = vor.u32 %v17081_v17, %v14716_v21  ;;  %v16997_v55 = vld [vmem:[#allocation16 + $0x28c] sm:$0xf]  ;;  %v17049_v21 = vld [vmem:[#allocation16 + $0x424] sm:$0xf0]  ;;  %v17420_v17 = vld [vmem:[#allocation16 + $0xfc4] sm:$0xf] }
 0x50e   :  { %10162 = vmatpush.bf16.msra.mxu0 %v15101_v10  ;;  %v14841_v10 = vor.u32 %v17108_v40, %v14838_v31  ;;  %10176 = vmatpush.bf16.msra.mxu1 %v15357_v54  ;;  %v17073_v40 = vld [vmem:[#allocation16 + $0x4e4] sm:$0xf0]  ;;  %v6715_v31 = vadd.f32 %v18523_v57, %v6701_v60  ;;  %v6703_v54 = vadd.f32 %v6702_v9, %v6689_v6  ;;  %v17221_v22 = vld [vmem:[#allocation16 + $0x98c] sm:$0xf]  ;;  %v16086_v60 = vld [vmem:[#allocation16 + $0xfe0] sm:$0xf0] }
 0x50f   :  { %v14685_v52 = vor.u32 %v17073_v40, %v14684_v8  ;;  %v16989_v41 = vld [vmem:[#allocation16 + $0x24c] sm:$0xf]  ;;  %v14621_v9 = vor.u32 %v17057_v4, %v14620_v39 }
 0x510   :  { %10078 = vmatpush.bf16.msra.mxu2 %v15609_v26  ;;  %10036 = vmatpush.bf16.msrb.mxu3 %v14841_v10  ;;  %v14398_v10 = vld [vmem:[#allocation16 + $0x2a8] sm:$0xf0]  ;;  %v6717_v24 = vadd.f32 %v18533_v16, %v6703_v54  ;;  %v6729_v57 = vadd.f32 %v18525_v30, %v6715_v31 }
 0x511   :  { %10163 = vmatmul.bf16.vlgmr.msra.gmra.mxu0 %v18433_v19  ;;  %10177 = vmatmul.bf16.vlgmr.msra.gmra.mxu1 %v18486_v36  ;;  %v15262_v47 = vld [vmem:[#allocation16 + $0x968] sm:$0xf0] }
 0x512   :  { %10211 = vmatpush.bf16.msrb.mxu0 %v14305_v50  ;;  %v17097_v50 = vld [vmem:[#allocation16 + $0x5a4] sm:$0xf0]  ;;  %10225 = vmatpush.bf16.msrb.mxu1 %v14561_v28  ;;  %v17229_v28 = vld [vmem:[#allocation16 + $0x9cc] sm:$0xf]  ;;  %v6731_v53 = vadd.f32 %v18535_v12, %v6717_v24  ;;  %v18560_v12 = vpop.f32.mrf.mxu0  ;;  %v18564_v24 = vpop.f32.mrf.mxu1 }
 0x513   :  { %v14781_v63 = vor.u32 %v17097_v50, %v14780_v7  ;;  %10079 = vmatmul.bf16.vlgmr.msra.gmra.mxu2 %v18538_v14  ;;  %v14652_v7 = vld [vmem:[#allocation16 + $0x488] sm:$0xf]  ;;  %v15329_v59 = vor.u32 %v17229_v28, %v15326_v29  ;;  %v16981_v35 = vld [vmem:[#allocation16 + $0x20c] sm:$0xf] }
 0x514   :  { %10127 = vmatpush.bf16.msrb.mxu2 %v14813_v46  ;;  %v17065_v50 = vld [vmem:[#allocation16 + $0x4a4] sm:$0xf0]  ;;  %v14334_v45 = vld [vmem:[#allocation16 + $0x228] sm:$0xf0] }
 0x515   :  { %v14653_v58 = vor.u32 %v17065_v50, %v14652_v7  ;;  %v15230_v8 = vld [vmem:[#allocation16 + $0x928] sm:$0xf0] }
 0x516   :  { %10212 = vmatpush.bf16.msrb.mxu0 %v14273_v15  ;;  %v16933_v15 = vld [vmem:[#allocation16 + $0x8c] sm:$0xf]  ;;  %10226 = vmatpush.bf16.msrb.mxu1 %v14529_v56  ;;  %v6742_v26 = vpop.f32.mrf.mxu2  ;;  %v6756_v46 = vpop.f32.mrf.mxu3  ;;  %v14401_v56 = vor.u32 %v16997_v55, %v14398_v10  ;;  %v17353_v55 = vld [vmem:[#allocation16 + $0xda4] sm:$0xf0] }
 0x517   :  { %v14145_v42 = vor.u32 %v16933_v15, %v14142_v43  ;;  %v15297_v15 = vor.u32 %v17221_v22, %v15294_v32  ;;  %v17213_v43 = vld [vmem:[#allocation16 + $0x94c] sm:$0xf]  ;;  %v16022_v22 = vld [vmem:[#allocation16 + $0xf60] sm:$0xf0] }
 0x518   :  { %10128 = vmatpush.bf16.msrb.mxu2 %v14781_v63  ;;  %v6743_v63 = vadd.f32 %v6742_v26, %v6729_v57  ;;  %v15265_v33 = vor.u32 %v17213_v43, %v15262_v47  ;;  %v17412_v26 = vld [vmem:[#allocation16 + $0xf84] sm:$0xf]  ;;  %v17285_v10 = vld [vmem:[#allocation16 + $0xb8c] sm:$0xf] }
 0x519   :  { %v17197_v7 = vld [vmem:[#allocation16 + $0x8cc] sm:$0xf]  ;;  %v17396_v43 = vld [vmem:[#allocation16 + $0xf04] sm:$0xf] }
 0x51a   :  { %10213 = vmatpush.bf16.msrb.mxu0 %v14241_v2  ;;  %10227 = vmatpush.bf16.msrb.mxu1 %v14497_v34  ;;  %v14430_v2 = vld [vmem:[#allocation16 + $0x2e8] sm:$0xf0]  ;;  %v6757_v34 = vadd.f32 %v6756_v46, %v6743_v63  ;;  %v18567_v32 = vpop.f32.mrf.mxu0  ;;  %v15990_v47 = vld [vmem:[#allocation16 + $0xf20] sm:$0xf0] }
 0x51b   :  { %v14433_v38 = vor.u32 %v17005_v5, %v14430_v2  ;;  %v14337_v5 = vor.u32 %v16981_v35, %v14334_v45  ;;  %v15582_v2 = vld [vmem:[#allocation16 + $0xbe8] sm:$0xf0] }
 0x51c   :  { %10129 = vmatpush.bf16.msrb.mxu2 %v14749_v62  ;;  %v14588_v62 = vld [vmem:[#allocation16 + $0x408] sm:$0xf]  ;;  %v6768_v40 = vmax.f32 %v6757_v34, 0.0  ;;  %v15198_v50 = vld [vmem:[#allocation16 + $0x8e8] sm:$0xf0] }
 0x51d   :  { %v14589_v54 = vor.u32 %v17049_v21, %v14588_v62  ;;  %v17277_v39 = vld [vmem:[#allocation16 + $0xb4c] sm:$0xf]  ;;  %v17337_v62 = vld [vmem:[#allocation16 + $0xd24] sm:$0xf0] }
 0x51e   :  { %10214 = vmatpush.bf16.msrb.mxu0 %v14209_v49  ;;  %10228 = vmatpush.bf16.msrb.mxu1 %v14465_v3  ;;  %v14081_v49 = vor.u32 %v16917_v37, %v14078_v18  ;;  %v6744_v16 = vpop.f32.mrf.mxu2  ;;  %v17361_v3 = vld [vmem:[#allocation16 + $0xde4] sm:$0xf0]  ;;  %v16089_v37 = vor.u32 %v17420_v17, %v16086_v60  ;;  %v15518_v4 = vld [vmem:[#allocation16 + $0xb68] sm:$0xf0]  ;;  %v15993_v60 = vor.u32 %v17396_v43, %v15990_v47  ;;  %v18882_v47 = vperm.slane %v18531_v0, 1 }
 0x51f   :  { %v6745_v23 = vadd.f32 %v6744_v16, %v6731_v53  ;;  %v15837_v18 = vor.u32 %v17361_v3, %v15836_v51  ;;  %v17189_v53 = vld [vmem:[#allocation16 + $0x88c] sm:$0xf]  ;;  %v15521_v34 = vor.u32 %v17277_v39, %v15518_v4  ;;  %v15958_v51 = vld [vmem:[#allocation16 + $0xee0] sm:$0xf0]  ;;  %v17313_v43 = vld [vmem:[#allocation16 + $0xc64] sm:$0xf0] }
 0x520   :  { %10130 = vmatpush.bf16.msrb.mxu2 %v14717_v44  ;;  %v17293_v44 = vld [vmem:[#allocation16 + $0xbcc] sm:$0xf] }
 0x521   :  { %v15585_v29 = vor.u32 %v17293_v44, %v15582_v2  ;;  %v17269_v35 = vld [vmem:[#allocation16 + $0xb0c] sm:$0xf]  ;;  %v17329_v2 = vld [vmem:[#allocation16 + $0xce4] sm:$0xf0] }
 0x522   :  { %10215 = vmatpush.bf16.msrb.mxu0 %v14177_v61  ;;  %10229 = vmatpush.bf16.msrb.mxu1 %v14433_v38  ;;  %v14366_v61 = vld [vmem:[#allocation16 + $0x268] sm:$0xf0]  ;;  %v16054_v38 = vld [vmem:[#allocation16 + $0xfa0] sm:$0xf0] }
 0x523   :  { %v14369_v30 = vor.u32 %v16989_v41, %v14366_v61  ;;  %v16057_v57 = vor.u32 %v17412_v26, %v16054_v38  ;;  %v15772_v41 = vld [vmem:[#allocation16 + $0xd48] sm:$0xf]  ;;  %v15486_v45 = vld [vmem:[#allocation16 + $0xb28] sm:$0xf0]  ;;  %v16978_v26 = vld [vmem:[#allocation16 + $0x1ec] sm:$0xf0] }
 0x524   :  { %10131 = vmatpush.bf16.msrb.mxu2 %v14685_v52  ;;  %v15804_v52 = vld [vmem:[#allocation16 + $0xd88] sm:$0xf]  ;;  %v15134_v21 = vld [vmem:[#allocation16 + $0x868] sm:$0xf0]  ;;  %v15489_v3 = vor.u32 %v17269_v35, %v15486_v45  ;;  %v14244_v35 = vld [vmem:[#allocation16 + $0x150] sm:$0xf] }
 0x525   :  { %v17345_v61 = vld [vmem:[#allocation16 + $0xd64] sm:$0xf0]  ;;  %v16962_v45 = vld [vmem:[#allocation16 + $0x16c] sm:$0xf0] }
 0x526   :  { %10216 = vmatpush.bf16.msrb.mxu0 %v14145_v42  ;;  %10230 = vmatpush.bf16.msrb.mxu1 %v14401_v56  ;;  %v6758_v42 = vpop.f32.mrf.mxu3  ;;  %v17404_v56 = vld [vmem:[#allocation16 + $0xf44] sm:$0xf]  ;;  %v9954_v17 = vpop.f32.mrf.mxu1 }
 0x527   :  { %v6759_v6 = vadd.f32 %v6758_v42, %v6745_v23  ;;  %v16025_v16 = vor.u32 %v17404_v56, %v16022_v22  ;;  %v17181_v42 = vld [vmem:[#allocation16 + $0x84c] sm:$0xf] }
 0x528   :  { %10132 = vmatpush.bf16.msrb.mxu2 %v14653_v58  ;;  %v15201_v58 = vor.u32 %v17197_v7, %v15198_v50  ;;  %v15137_v44 = vor.u32 %v17181_v42, %v15134_v21  ;;  %v15926_v7 = vld [vmem:[#allocation16 + $0xea0] sm:$0xf0]  ;;  %v15676_v50 = vld [vmem:[#allocation16 + $0xc88] sm:$0xf]  ;;  %v17253_v22 = vld [vmem:[#allocation16 + $0xa8c] sm:$0xf] }
 0x529   :  { %v6776_v31 = vmax.f32 %v6759_v6, 0.0 }
 0x52a   :  { %10217 = vmatpush.bf16.msrb.mxu0 %v14113_v27  ;;  %10231 = vmatpush.bf16.msrb.mxu1 %v14369_v30  ;;  %v17205_v27 = vld [vmem:[#allocation16 + $0x90c] sm:$0xf]  ;;  %v15773_v30 = vor.u32 %v17345_v61, %v15772_v41  ;;  %v16970_v41 = vld [vmem:[#allocation16 + $0x1ac] sm:$0xf0] }
 0x52b   :  { %v18562_v28 = vpack.c.bf16 %v6776_v31, %v6768_v40  ;;  %v15233_v46 = vor.u32 %v17205_v27, %v15230_v8  ;;  %v17261_v27 = vld [vmem:[#allocation16 + $0xacc] sm:$0xf] }
 0x52c   :  { %10133 = vmatpush.bf16.msrb.mxu2 %v14621_v9  ;;  %v15740_v9 = vld [vmem:[#allocation16 + $0xd08] sm:$0xf]  ;;  %v15454_v8 = vld [vmem:[#allocation16 + $0xae8] sm:$0xf0] }
 0x52d   :  { %9981 = vmatmul.bf16.vlgmr.msra.gmra.mxu3 %v18562_v28  ;;  %v15741_v6 = vor.u32 %v17337_v62, %v15740_v9  ;;  %v17173_v40 = vld [vmem:[#allocation16 + $0x80c] sm:$0xf] }
 0x52e   :  { %10218 = vmatpush.bf16.msrb.mxu0 %v14081_v49  ;;  %10232 = vmatpush.bf16.msrb.mxu1 %v14337_v5  ;;  %v15550_v49 = vld [vmem:[#allocation16 + $0xba8] sm:$0xf0]  ;;  %v15708_v5 = vld [vmem:[#allocation16 + $0xcc8] sm:$0xf] }
 0x52f   :  { %10085 = vmatpush.bf16.msra.mxu3 %v16089_v37  ;;  %v15553_v63 = vor.u32 %v17285_v10, %v15550_v49  ;;  %v15102_v31 = vld [vmem:[#allocation16 + $0x828] sm:$0xf0]  ;;  %v15457_v10 = vor.u32 %v17261_v27, %v15454_v8  ;;  %v15068_v27 = vld [vmem:[#allocation16 + $0x7c8] sm:$0xf] }
 0x530   :  { %10134 = vmatpush.bf16.msrb.mxu2 %v14589_v54  ;;  %v18571_v54 = vpop.f32.mrf.mxu0  ;;  %v15105_v49 = vor.u32 %v17173_v40, %v15102_v31  ;;  %v15390_v9 = vld [vmem:[#allocation16 + $0xa68] sm:$0xf0]  ;;  %v17169_v8 = vld [vmem:[#allocation16 + $0x7e4] sm:$0xf0] }
 0x531   :  { %10219 = vmatmul.bf16.vlgmr.msrb.gmra.mxu0 %v18411_v13  ;;  %10233 = vmatmul.bf16.vlgmr.msrb.gmra.mxu1 %v18319_v20  ;;  %18893 = vst [vmem:[#allocation26_spill] sm:$0xff] %v18571_v54  ;;  %v17101_v40 = vld [vmem:[#allocation16 + $0x5cc] sm:$0xf]  ;;  %v15436_v54 = vld [vmem:[#allocation16 + $0xa98] sm:$0xf] }
 0x532   :  { %10267 = vmatpush.bf16.msra.mxu0 %v15329_v59  ;;  %v15805_v59 = vor.u32 %v17353_v55, %v15804_v52  ;;  %10281 = vmatpush.bf16.msra.mxu1 %v15585_v29  ;;  %v17380_v52 = vld [vmem:[#allocation16 + $0xe84] sm:$0xf] }
 0x533   :  { %10135 = vmatmul.bf16.vlgmr.msrb.gmra.mxu2 %v18480_v48  ;;  %10086 = vmatpush.bf16.msra.mxu3 %v16057_v57  ;;  %v17321_v57 = vld [vmem:[#allocation16 + $0xca4] sm:$0xf0]  ;;  %v15929_v39 = vor.u32 %v17380_v52, %v15926_v7  ;;  %v14212_v52 = vld [vmem:[#allocation16 + $0x110] sm:$0xf] }
 0x534   :  { %10183 = vmatpush.bf16.msra.mxu2 %v15837_v18  ;;  %v14308_v18 = vld [vmem:[#allocation16 + $0x1d0] sm:$0xf]  ;;  %v15677_v4 = vor.u32 %v17321_v57, %v15676_v50  ;;  %v15036_v57 = vld [vmem:[#allocation16 + $0x788] sm:$0xf] }
 0x535   :  { %v14309_v56 = vor.u32 %v16978_v26, %v14308_v18  ;;  %v14564_v18 = vld [vmem:[#allocation16 + $0x3d0] sm:$0xf] }
 0x536   :  { %10268 = vmatpush.bf16.msra.mxu0 %v15297_v15  ;;  %v15166_v15 = vld [vmem:[#allocation16 + $0x8a8] sm:$0xf0]  ;;  %10282 = vmatpush.bf16.msra.mxu1 %v15553_v63  ;;  %v9912_v37 = vpop.f32.mrf.mxu2  ;;  %v9926_v55 = vpop.f32.mrf.mxu3  ;;  %v17042_v26 = vld [vmem:[#allocation16 + $0x3ec] sm:$0xf0] }
 0x537   :  { %v15169_v23 = vor.u32 %v17189_v53, %v15166_v15  ;;  %10087 = vmatpush.bf16.msra.mxu3 %v16025_v16  ;;  %v9913_v38 = vadd.f32 %v9912_v37, %v18544_v11  ;;  %v15422_v63 = vld [vmem:[#allocation16 + $0xaa8] sm:$0xf0]  ;;  %v18575_v11 = vpop.f32.mrf.mxu1  ;;  %v17372_v53 = vld [vmem:[#allocation16 + $0xe44] sm:$0xf]  ;;  %v14565_v50 = vor.u32 %v17042_v26, %v14564_v18  ;;  %v14940_v18 = vld [vmem:[#allocation16 + $0x6c8] sm:$0xf] }
 0x538   :  { %10184 = vmatpush.bf16.msra.mxu2 %v15805_v59  ;;  %18894 = vst [vmem:[#allocation27_spill] sm:$0xff] %v18575_v11  ;;  %v15425_v15 = vor.u32 %v17253_v22, %v15422_v63  ;;  %v15894_v16 = vld [vmem:[#allocation16 + $0xe60] sm:$0xf0]  ;;  %v14814_v37 = vld [vmem:[#allocation16 + $0x5e8] sm:$0xf0] }
 0x539   :  { %v9927_v59 = vadd.f32 %v9926_v55, %v9913_v38  ;;  %v15897_v42 = vor.u32 %v17372_v53, %v15894_v16  ;;  %v16954_v55 = vld [vmem:[#allocation16 + $0x12c] sm:$0xf0]  ;;  %v14817_v7 = vor.u32 %v17101_v40, %v14814_v37  ;;  %v14782_v63 = vld [vmem:[#allocation16 + $0x5a8] sm:$0xf0]  ;;  %v15004_v16 = vld [vmem:[#allocation16 + $0x748] sm:$0xf] }
 0x53a   :  { %10269 = vmatpush.bf16.msra.mxu0 %v15265_v33  ;;  %v17388_v33 = vld [vmem:[#allocation16 + $0xec4] sm:$0xf]  ;;  %10283 = vmatpush.bf16.msra.mxu1 %v15521_v34  ;;  %v14213_v22 = vor.u32 %v16954_v55, %v14212_v52  ;;  %v17137_v26 = vld [vmem:[#allocation16 + $0x6e4] sm:$0xf0]  ;;  %v14686_v52 = vld [vmem:[#allocation16 + $0x4e8] sm:$0xf0] }
 0x53b   :  { %10088 = vmatpush.bf16.msra.mxu3 %v15993_v60  ;;  %v15961_v29 = vor.u32 %v17388_v33, %v15958_v51  ;;  %v9941_v61 = vadd.f32 %v18567_v32, %v9927_v59  ;;  %v9996_v32 = vpop.f32.mrf.mxu0  ;;  %v17364_v60 = vld [vmem:[#allocation16 + $0xe04] sm:$0xf]  ;;  %v15612_v33 = vld [vmem:[#allocation16 + $0xc08] sm:$0xf]  ;;  %v14436_v55 = vld [vmem:[#allocation16 + $0x2d0] sm:$0xf] }
 0x53c   :  { %10185 = vmatpush.bf16.msra.mxu2 %v15773_v30  ;;  %v15644_v30 = vld [vmem:[#allocation16 + $0xc48] sm:$0xf]  ;;  %v17179_v11 = vld [vmem:[#allocation16 + $0x834] sm:$0xf0] }
 0x53d   :  { %10037 = vmatmul.bf16.vlgmr.msrb.gmra.mxu3 %v18482_v1  ;;  %v18579_v62 = vadd.f32 %v9954_v17, %v9941_v61  ;;  %v15645_v21 = vor.u32 %v17313_v43, %v15644_v30  ;;  %v9997_v17 = vadd.f32 %v9996_v32, %v18882_v47  ;;  %v17161_v59 = vld [vmem:[#allocation16 + $0x7a4] sm:$0xf0]  ;;  %v14180_v61 = vld [vmem:[#allocation16 + $0xd0] sm:$0xf]  ;;  %v17085_v43 = vld [vmem:[#allocation16 + $0x54c] sm:$0xf] }
 0x53e   :  { %10270 = vmatpush.bf16.msra.mxu0 %v15233_v46  ;;  %v15709_v46 = vor.u32 %v17329_v2, %v15708_v5  ;;  %10284 = vmatpush.bf16.msra.mxu1 %v15489_v3  ;;  %v17305_v3 = vld [vmem:[#allocation16 + $0xc24] sm:$0xf0]  ;;  %v15358_v5 = vld [vmem:[#allocation16 + $0xa28] sm:$0xf0]  ;;  %v14245_v2 = vor.u32 %v16962_v45, %v14244_v35  ;;  %v17026_v32 = vld [vmem:[#allocation16 + $0x36c] sm:$0xf0] }
 0x53f   :  { %10089 = vmatpush.bf16.msra.mxu3 %v15961_v29  ;;  %v10010_v31 = vpop.f32.mrf.mxu1  ;;  %v17153_v30 = vld [vmem:[#allocation16 + $0x764] sm:$0xf0]  ;;  %v14148_v35 = vld [vmem:[#allocation16 + $0x90] sm:$0xf] }
 0x540   :  { %10186 = vmatpush.bf16.msra.mxu2 %v15741_v6  ;;  %v15862_v6 = vld [vmem:[#allocation16 + $0xe20] sm:$0xf0]  ;;  %v18584_v38 = vadd.f32 %v10010_v31, %v9997_v17  ;;  %v16938_v45 = vld [vmem:[#allocation16 + $0xac] sm:$0xf0] }
 0x541   :  { %v15865_v29 = vor.u32 %v17364_v60, %v15862_v6  ;;  %v14972_v6 = vld [vmem:[#allocation16 + $0x708] sm:$0xf]  ;;  %v17018_v17 = vld [vmem:[#allocation16 + $0x32c] sm:$0xf0] }
 0x542   :  { %10271 = vmatpush.bf16.msra.mxu0 %v15201_v58  ;;  %v14276_v58 = vld [vmem:[#allocation16 + $0x190] sm:$0xf]  ;;  %10285 = vmatpush.bf16.msra.mxu1 %v15457_v10 }
 0x543   :  { %v14277_v34 = vor.u32 %v16970_v41, %v14276_v58  ;;  %10090 = vmatpush.bf16.msra.mxu3 %v15929_v39  ;;  %v14532_v58 = vld [vmem:[#allocation16 + $0x390] sm:$0xf] }
 0x544   :  { %10187 = vmatpush.bf16.msra.mxu2 %v15709_v46  ;;  %v15613_v46 = vor.u32 %v17305_v3, %v15612_v33  ;;  %v17034_v41 = vld [vmem:[#allocation16 + $0x3ac] sm:$0xf0]  ;;  %v17145_v33 = vld [vmem:[#allocation16 + $0x724] sm:$0xf0]  ;;  %v14149_v3 = vor.u32 %v16938_v45, %v14148_v35 }
 0x545   :  { %v16946_v39 = vld [vmem:[#allocation16 + $0xec] sm:$0xf0]  ;;  %v14973_v40 = vor.u32 %v17145_v33, %v14972_v6  ;;  %v17121_v35 = vld [vmem:[#allocation16 + $0x664] sm:$0xf0] }
 0x546   :  { %10272 = vmatpush.bf16.msra.mxu0 %v15169_v23  ;;  %v17245_v23 = vld [vmem:[#allocation16 + $0xa4c] sm:$0xf]  ;;  %10286 = vmatpush.bf16.msra.mxu1 %v15425_v15  ;;  %v14533_v15 = vor.u32 %v17034_v41, %v14532_v58  ;;  %v14908_v58 = vld [vmem:[#allocation16 + $0x688] sm:$0xf]  ;;  %v14372_v6 = vld [vmem:[#allocation16 + $0x250] sm:$0xf] }
 0x547   :  { %v15393_v51 = vor.u32 %v17245_v23, %v15390_v9  ;;  %10091 = vmatpush.bf16.msra.mxu3 %v15897_v42  ;;  %v14750_v23 = vld [vmem:[#allocation16 + $0x568] sm:$0xf0]  ;;  %v14500_v9 = vld [vmem:[#allocation16 + $0x350] sm:$0xf]  ;;  %v15005_v42 = vor.u32 %v17153_v30, %v15004_v16  ;;  %v17129_v41 = vld [vmem:[#allocation16 + $0x6a4] sm:$0xf0] }
 0x548   :  { %10188 = vmatpush.bf16.msra.mxu2 %v15677_v4  ;;  %v15037_v4 = vor.u32 %v17161_v59, %v15036_v57  ;;  %v14501_v60 = vor.u32 %v17026_v32, %v14500_v9  ;;  %v14941_v57 = vor.u32 %v17137_v26, %v14940_v18  ;;  %v15332_v59 = vld [vmem:[#allocation16 + $0x9d0] sm:$0xf]  ;;  %v14876_v32 = vld [vmem:[#allocation16 + $0x648] sm:$0xf] }
 0x549   :  { %v14404_v16 = vld [vmem:[#allocation16 + $0x290] sm:$0xf] }
 0x54a   :  { %10273 = vmatpush.bf16.msra.mxu0 %v15137_v44  ;;  %v17237_v44 = vld [vmem:[#allocation16 + $0xa0c] sm:$0xf]  ;;  %10287 = vmatpush.bf16.msra.mxu1 %v15393_v51  ;;  %v17002_v30 = vld [vmem:[#allocation16 + $0x2ac] sm:$0xf0] }
 0x54b   :  { %v15361_v10 = vor.u32 %v17237_v44, %v15358_v5  ;;  %10092 = vmatpush.bf16.msra.mxu3 %v15865_v29  ;;  %v17077_v51 = vld [vmem:[#allocation16 + $0x50c] sm:$0xf]  ;;  %v14468_v5 = vld [vmem:[#allocation16 + $0x310] sm:$0xf]  ;;  %v14405_v45 = vor.u32 %v17002_v30, %v14404_v16 }
 0x54c   :  { %10189 = vmatpush.bf16.msra.mxu2 %v15645_v21  ;;  %v14753_v21 = vor.u32 %v17085_v43, %v14750_v23  ;;  %v14718_v44 = vld [vmem:[#allocation16 + $0x528] sm:$0xf0]  ;;  %v14469_v37 = vor.u32 %v17018_v17, %v14468_v5  ;;  %v14909_v43 = vor.u32 %v17129_v41, %v14908_v58  ;;  %v17226_v23 = vld [vmem:[#allocation16 + $0x9ac] sm:$0xf0]  ;;  %v14844_v5 = vld [vmem:[#allocation16 + $0x608] sm:$0xf] }
 0x54d   :  { %v14721_v31 = vor.u32 %v17077_v51, %v14718_v44  ;;  %v17069_v29 = vld [vmem:[#allocation16 + $0x4cc] sm:$0xf]  ;;  %v16994_v33 = vld [vmem:[#allocation16 + $0x26c] sm:$0xf0]  ;;  %v17113_v17 = vld [vmem:[#allocation16 + $0x624] sm:$0xf0] }
 0x54e   :  { %10274 = vmatpush.bf16.msra.mxu0 %v15105_v49  ;;  %v15069_v49 = vor.u32 %v17169_v8, %v15068_v27  ;;  %10288 = vmatpush.bf16.msra.mxu1 %v15361_v10  ;;  %v14116_v27 = vld [vmem:[#allocation16 + $0x50] sm:$0xf]  ;;  %v14373_v18 = vor.u32 %v16994_v33, %v14372_v6  ;;  %v17349_v30 = vld [vmem:[#allocation16 + $0xd8c] sm:$0xf] }
 0x54f   :  { %10093 = vmatmul.bf16.vlgmr.msra.gmra.mxu3 %v18562_v28  ;;  %v16930_v8 = vld [vmem:[#allocation16 + $0x6c] sm:$0xf0] }
 0x550   :  { %10190 = vmatpush.bf16.msra.mxu2 %v15613_v46  ;;  %10141 = vmatpush.bf16.msrb.mxu3 %v15069_v49  ;;  %v14117_v46 = vor.u32 %v16930_v8, %v14116_v27  ;;  %v17010_v10 = vld [vmem:[#allocation16 + $0x2ec] sm:$0xf0]  ;;  %v18591_v49 = vpop.f32.mrf.mxu1 }
 0x551   :  { %10275 = vmatmul.bf16.vlgmr.msra.gmra.mxu0 %v18433_v19  ;;  %10289 = vmatmul.bf16.vlgmr.msra.gmra.mxu1 %v18486_v36  ;;  %v15268_v51 = vld [vmem:[#allocation16 + $0x950] sm:$0xf] }
 0x552   :  { %10323 = vmatpush.bf16.msrb.mxu0 %v14309_v56  ;;  %v17093_v56 = vld [vmem:[#allocation16 + $0x58c] sm:$0xf]  ;;  %10337 = vmatpush.bf16.msrb.mxu1 %v14565_v50  ;;  %v16922_v50 = vld [vmem:[#allocation16 + $0x2c] sm:$0xf0] }
 0x553   :  { %v14785_v53 = vor.u32 %v17093_v56, %v14782_v63  ;;  %10191 = vmatmul.bf16.vlgmr.msra.gmra.mxu2 %v18538_v14  ;;  %v17234_v56 = vld [vmem:[#allocation16 + $0x9ec] sm:$0xf0]  ;;  %v14437_v63 = vor.u32 %v17010_v10, %v14436_v55  ;;  %v17357_v55 = vld [vmem:[#allocation16 + $0xdcc] sm:$0xf] }
 0x554   :  { %10239 = vmatpush.bf16.msrb.mxu2 %v14817_v7  ;;  %10142 = vmatpush.bf16.msrb.mxu3 %v15037_v4  ;;  %v14084_v7 = vld [vmem:[#allocation16 + $0x10] sm:$0xf]  ;;  %v14654_v4 = vld [vmem:[#allocation16 + $0x4a8] sm:$0xf0] }
 0x555   :  { %v17218_v44 = vld [vmem:[#allocation16 + $0x96c] sm:$0xf0]  ;;  %v15838_v10 = vld [vmem:[#allocation16 + $0xde8] sm:$0xf0] }
 0x556   :  { %10324 = vmatpush.bf16.msrb.mxu0 %v14277_v34  ;;  %v14181_v34 = vor.u32 %v16946_v39, %v14180_v61  ;;  %10338 = vmatpush.bf16.msrb.mxu1 %v14533_v15  ;;  %v14085_v61 = vor.u32 %v16922_v50, %v14084_v7  ;;  %v17061_v39 = vld [vmem:[#allocation16 + $0x48c] sm:$0xf]  ;;  %v15333_v15 = vor.u32 %v17234_v56, %v15332_v59  ;;  %v16986_v26 = vld [vmem:[#allocation16 + $0x22c] sm:$0xf0] }
 0x557   :  { %v14657_v9 = vor.u32 %v17061_v39, %v14654_v4  ;;  %v15588_v7 = vld [vmem:[#allocation16 + $0xbd0] sm:$0xf]  ;;  %v14845_v50 = vor.u32 %v17113_v17, %v14844_v5  ;;  %v16060_v39 = vld [vmem:[#allocation16 + $0xf88] sm:$0xf] }
 0x558   :  { %10240 = vmatpush.bf16.msrb.mxu2 %v14785_v53  ;;  %10143 = vmatpush.bf16.msrb.mxu3 %v15005_v42  ;;  %v17053_v42 = vld [vmem:[#allocation16 + $0x44c] sm:$0xf]  ;;  %v18595_v27 = vpop.f32.mrf.mxu1  ;;  %v15236_v59 = vld [vmem:[#allocation16 + $0x910] sm:$0xf]  ;;  %v17417_v4 = vld [vmem:[#allocation16 + $0xfa4] sm:$0xf0] }
 0x559   :  { %v17210_v56 = vld [vmem:[#allocation16 + $0x92c] sm:$0xf0] }
 0x55a   :  { %10325 = vmatpush.bf16.msrb.mxu0 %v14245_v2  ;;  %v18589_v2 = vpop.f32.mrf.mxu0  ;;  %10339 = vmatpush.bf16.msrb.mxu1 %v14501_v60  ;;  %v15237_v16 = vor.u32 %v17210_v56, %v15236_v59  ;;  %v17282_v5 = vld [vmem:[#allocation16 + $0xb6c] sm:$0xf0] }
 0x55b   :  { %v15172_v17 = vld [vmem:[#allocation16 + $0x890] sm:$0xf] }
 0x55c   :  { %10241 = vmatpush.bf16.msrb.mxu2 %v14753_v21  ;;  %10144 = vmatpush.bf16.msrb.mxu3 %v14973_v40  ;;  %v14622_v21 = vld [vmem:[#allocation16 + $0x468] sm:$0xf0]  ;;  %v17274_v59 = vld [vmem:[#allocation16 + $0xb2c] sm:$0xf0] }
 0x55d   :  { %v14625_v8 = vor.u32 %v17053_v42, %v14622_v21  ;;  %v17045_v40 = vld [vmem:[#allocation16 + $0x40c] sm:$0xf]  ;;  %v16028_v42 = vld [vmem:[#allocation16 + $0xf48] sm:$0xf]  ;;  %v15140_v56 = vld [vmem:[#allocation16 + $0x850] sm:$0xf] }
 0x55e   :  { %10326 = vmatpush.bf16.msrb.mxu0 %v14213_v22  ;;  %10340 = vmatpush.bf16.msrb.mxu1 %v14469_v37  ;;  %v14689_v22 = vor.u32 %v17069_v29, %v14686_v52  ;;  %v14340_v37 = vld [vmem:[#allocation16 + $0x210] sm:$0xf]  ;;  %v16092_v29 = vld [vmem:[#allocation16 + $0xfc8] sm:$0xf]  ;;  %v15269_v52 = vor.u32 %v17218_v44, %v15268_v51  ;;  %v17341_v51 = vld [vmem:[#allocation16 + $0xd4c] sm:$0xf] }
 0x55f   :  { %v14341_v41 = vor.u32 %v16986_v26, %v14340_v37  ;;  %v17409_v21 = vld [vmem:[#allocation16 + $0xf64] sm:$0xf0]  ;;  %v15524_v44 = vld [vmem:[#allocation16 + $0xb50] sm:$0xf]  ;;  %v18605_v37 = vld [vmem:[#allocation17] sm:$0xff] }
 0x560   :  { %10242 = vmatpush.bf16.msrb.mxu2 %v14721_v31  ;;  %10145 = vmatpush.bf16.msrb.mxu3 %v14941_v57  ;;  %v14590_v31 = vld [vmem:[#allocation16 + $0x428] sm:$0xf0]  ;;  %v17298_v57 = vld [vmem:[#allocation16 + $0xbec] sm:$0xf0] }
 0x562   :  { %10327 = vmatpush.bf16.msrb.mxu0 %v14181_v34  ;;  %v18593_v53 = vpop.f32.mrf.mxu0  ;;  %v15300_v34 = vld [vmem:[#allocation16 + $0x990] sm:$0xf]  ;;  %10341 = vmatpush.bf16.msrb.mxu1 %v14437_v63  ;;  %v14593_v63 = vor.u32 %v17045_v40, %v14590_v31  ;;  %v16029_v31 = vor.u32 %v17409_v21, %v16028_v42  ;;  %v16974_v21 = vld [vmem:[#allocation16 + $0x1d4] sm:$0xf] }
 0x563   :  { %v15301_v60 = vor.u32 %v17226_v23, %v15300_v34  ;;  %v15556_v34 = vld [vmem:[#allocation16 + $0xb90] sm:$0xf] }
 0x564   :  { %10243 = vmatpush.bf16.msrb.mxu2 %v14689_v22  ;;  %10146 = vmatpush.bf16.msrb.mxu3 %v14909_v43  ;;  %v15806_v43 = vld [vmem:[#allocation16 + $0xda8] sm:$0xf0]  ;;  %v17290_v23 = vld [vmem:[#allocation16 + $0xbac] sm:$0xf0] }
 0x565   :  { %v15557_v6 = vor.u32 %v17290_v23, %v15556_v34  ;;  %v15710_v34 = vld [vmem:[#allocation16 + $0xce8] sm:$0xf0]  ;;  %v15460_v23 = vld [vmem:[#allocation16 + $0xad0] sm:$0xf] }
 0x566   :  { %10328 = vmatpush.bf16.msrb.mxu0 %v14149_v3  ;;  %v14877_v3 = vor.u32 %v17121_v35, %v14876_v32  ;;  %10342 = vmatpush.bf16.msrb.mxu1 %v14405_v45  ;;  %v17202_v32 = vld [vmem:[#allocation16 + $0x8ec] sm:$0xf0]  ;;  %v16061_v35 = vor.u32 %v17417_v4, %v16060_v39  ;;  %v15809_v45 = vor.u32 %v17349_v30, %v15806_v43  ;;  %v15964_v39 = vld [vmem:[#allocation16 + $0xec8] sm:$0xf]  ;;  %v17325_v43 = vld [vmem:[#allocation16 + $0xccc] sm:$0xf] }
 0x567   :  { %v17393_v4 = vld [vmem:[#allocation16 + $0xee4] sm:$0xf0] }
 0x568   :  { %10244 = vmatpush.bf16.msrb.mxu2 %v14657_v9  ;;  %10147 = vmatpush.bf16.msrb.mxu3 %v14877_v3  ;;  %v15204_v9 = vld [vmem:[#allocation16 + $0x8d0] sm:$0xf]  ;;  %v15774_v3 = vld [vmem:[#allocation16 + $0xd68] sm:$0xf0]  ;;  %v15965_v42 = vor.u32 %v17393_v4, %v15964_v39 }
 0x569   :  { %v15205_v33 = vor.u32 %v17202_v32, %v15204_v9  ;;  %v15777_v26 = vor.u32 %v17341_v51, %v15774_v3  ;;  %v17266_v32 = vld [vmem:[#allocation16 + $0xaec] sm:$0xf0]  ;;  %v15932_v51 = vld [vmem:[#allocation16 + $0xe88] sm:$0xf]  ;;  %v15646_v39 = vld [vmem:[#allocation16 + $0xc68] sm:$0xf0] }
 0x56a   :  { %10329 = vmatpush.bf16.msrb.mxu0 %v14117_v46  ;;  %v17425_v46 = vld [vmem:[#allocation16 + $0xfe4] sm:$0xf0]  ;;  %v18598_v22 = vpop.f32.mrf.mxu0  ;;  %10343 = vmatpush.bf16.msrb.mxu1 %v14373_v18  ;;  %v7301_v18 = vperm.slane %v18605_v37, 2 }
 0x56b   :  { %18895 = vst [vmem:[#allocation28_spill] sm:$0xff] %v18598_v22  ;;  %v16093_v58 = vor.u32 %v17425_v46, %v16092_v29  ;;  %v15996_v29 = vld [vmem:[#allocation16 + $0xf08] sm:$0xf] }
 0x56c   :  { %10245 = vmatpush.bf16.msrb.mxu2 %v14625_v8  ;;  %10148 = vmatpush.bf16.msrb.mxu3 %v14845_v50  ;;  %v17194_v8 = vld [vmem:[#allocation16 + $0x8ac] sm:$0xf0]  ;;  %v17401_v46 = vld [vmem:[#allocation16 + $0xf24] sm:$0xf0]  ;;  %v15742_v50 = vld [vmem:[#allocation16 + $0xd28] sm:$0xf0] }
 0x56d   :  { %v17385_v3 = vld [vmem:[#allocation16 + $0xea4] sm:$0xf0] }
 0x56e   :  { %10330 = vmatpush.bf16.msrb.mxu0 %v14085_v61  ;;  %v15841_v61 = vor.u32 %v17357_v55, %v15838_v10  ;;  %10344 = vmatpush.bf16.msrb.mxu1 %v14341_v41  ;;  %v15525_v55 = vor.u32 %v17282_v5, %v15524_v44  ;;  %v15173_v10 = vor.u32 %v17194_v8, %v15172_v17 }
 0x56f   :  { %10149 = vmatmul.bf16.vlgmr.msrb.gmra.mxu3 %v18482_v1  ;;  %v15461_v17 = vor.u32 %v17266_v32, %v15460_v23  ;;  %v17369_v23 = vld [vmem:[#allocation16 + $0xe24] sm:$0xf0] }
 0x570   :  { %10246 = vmatpush.bf16.msrb.mxu2 %v14593_v63  ;;  %10197 = vmatpush.bf16.msra.mxu3 %v16093_v58  ;;  %v17186_v63 = vld [vmem:[#allocation16 + $0x86c] sm:$0xf0]  ;;  %v15997_v58 = vor.u32 %v17401_v46, %v15996_v29 }
 0x571   :  { %10331 = vmatmul.bf16.vlgmr.msrb.gmra.mxu0 %v18411_v13  ;;  %10345 = vmatmul.bf16.vlgmr.msrb.gmra.mxu1 %v18319_v20  ;;  %v15141_v30 = vor.u32 %v17186_v63, %v15140_v56  ;;  %v15428_v46 = vld [vmem:[#allocation16 + $0xa90] sm:$0xf]  ;;  %v15900_v56 = vld [vmem:[#allocation16 + $0xe48] sm:$0xf] }
 0x572   :  { %10379 = vmatpush.bf16.msra.mxu0 %v15333_v15  ;;  %v15589_v15 = vor.u32 %v17298_v57, %v15588_v7  ;;  %v10108_v40 = vpop.f32.mrf.mxu0  ;;  %v17333_v7 = vld [vmem:[#allocation16 + $0xd0c] sm:$0xf]  ;;  %v15492_v57 = vld [vmem:[#allocation16 + $0xb10] sm:$0xf]  ;;  %v17377_v63 = vld [vmem:[#allocation16 + $0xe64] sm:$0xf0] }
 0x573   :  { %10247 = vmatmul.bf16.vlgmr.msrb.gmra.mxu2 %v18480_v48  ;;  %v10109_v41 = vadd.f32 %v10108_v40, %v7301_v18  ;;  %v17317_v40 = vld [vmem:[#allocation16 + $0xc8c] sm:$0xf] }
 0x574   :  { %10295 = vmatpush.bf16.msra.mxu2 %v15841_v61  ;;  %10393 = vmatpush.bf16.msra.mxu1 %v15589_v15  ;;  %v15745_v61 = vor.u32 %v17333_v7, %v15742_v50  ;;  %v16966_v7 = vld [vmem:[#allocation16 + $0x194] sm:$0xf] }
 0x575   :  { %10198 = vmatpush.bf16.msra.mxu3 %v16061_v35  ;;  %v15108_v35 = vld [vmem:[#allocation16 + $0x810] sm:$0xf]  ;;  %v14278_v50 = vld [vmem:[#allocation16 + $0x1b0] sm:$0xf0] }
 0x576   :  { %10380 = vmatpush.bf16.msra.mxu0 %v15301_v60  ;;  %v18600_v60 = vpop.f32.mrf.mxu1  ;;  %v14281_v4 = vor.u32 %v16966_v7, %v14278_v50 }
 0x577   :  { %18896 = vst [vmem:[#allocation29_spill] sm:$0xff] %v18600_v60  ;;  %v15940_v60 = vld [vmem:[#allocation16 + $0xe90] sm:$0xf] }
 0x578   :  { %10296 = vmatpush.bf16.msra.mxu2 %v15809_v45  ;;  %10394 = vmatpush.bf16.msra.mxu1 %v15557_v6  ;;  %v17178_v45 = vld [vmem:[#allocation16 + $0x82c] sm:$0xf0]  ;;  %v14310_v6 = vld [vmem:[#allocation16 + $0x1f0] sm:$0xf0] }
 0x579   :  { %10199 = vmatpush.bf16.msra.mxu3 %v16029_v31  ;;  %v15109_v8 = vor.u32 %v17178_v45, %v15108_v35  ;;  %v15678_v31 = vld [vmem:[#allocation16 + $0xca8] sm:$0xf0]  ;;  %v14313_v29 = vor.u32 %v16974_v21, %v14310_v6 }
 0x57a   :  { %10381 = vmatpush.bf16.msra.mxu0 %v15269_v52  ;;  %v18608_v52 = vpop.f32.mrf.mxu2  ;;  %v10110_v44 = vpop.f32.mrf.mxu0  ;;  %v17301_v35 = vld [vmem:[#allocation16 + $0xc0c] sm:$0xf] }
 0x57b   :  { %v15614_v45 = vld [vmem:[#allocation16 + $0xc28] sm:$0xf0] }
 0x57c   :  { %10297 = vmatpush.bf16.msra.mxu2 %v15777_v26  ;;  %10395 = vmatpush.bf16.msra.mxu1 %v15525_v55  ;;  %v17258_v55 = vld [vmem:[#allocation16 + $0xaac] sm:$0xf0] }
 0x57d   :  { %10200 = vmatpush.bf16.msra.mxu3 %v15997_v58 }
 0x57e   :  { %10382 = vmatpush.bf16.msra.mxu0 %v15237_v16  ;;  %v10122_v15 = vpop.f32.mrf.mxu1  ;;  %v15493_v16 = vor.u32 %v17274_v59, %v15492_v57  ;;  %v10111_v57 = vadd.f32 %v10110_v44, %v7301_v18  ;;  %v15681_v59 = vor.u32 %v17317_v40, %v15678_v31  ;;  %v14246_v18 = vld [vmem:[#allocation16 + $0x170] sm:$0xf0] }
 0x57f   :  { %v18610_v9 = vadd.f32 %v10122_v15, %v10109_v41  ;;  %v15429_v41 = vor.u32 %v17258_v55, %v15428_v46  ;;  %v15396_v15 = vld [vmem:[#allocation16 + $0xa50] sm:$0xf]  ;;  %v14566_v31 = vld [vmem:[#allocation16 + $0x3f0] sm:$0xf0]  ;;  %v15617_v55 = vor.u32 %v17301_v35, %v15614_v45 }
 0x580   :  { %10298 = vmatpush.bf16.msra.mxu2 %v15745_v61  ;;  %10396 = vmatpush.bf16.msra.mxu1 %v15493_v16  ;;  %v17309_v61 = vld [vmem:[#allocation16 + $0xc4c] sm:$0xf]  ;;  %v17250_v16 = vld [vmem:[#allocation16 + $0xa6c] sm:$0xf0]  ;;  %v14214_v46 = vld [vmem:[#allocation16 + $0x130] sm:$0xf0] }
 0x581   :  { %10201 = vmatpush.bf16.msra.mxu3 %v15965_v42  ;;  %v15649_v32 = vor.u32 %v17309_v61, %v15646_v39  ;;  %v15364_v42 = vld [vmem:[#allocation16 + $0xa10] sm:$0xf]  ;;  %v15397_v6 = vor.u32 %v17250_v16, %v15396_v15  ;;  %v17030_v61 = vld [vmem:[#allocation16 + $0x394] sm:$0xf] }
 0x582   :  { %10383 = vmatpush.bf16.msra.mxu0 %v15205_v33  ;;  %v15713_v33 = vor.u32 %v17325_v43, %v15710_v34  ;;  %v9968_v5 = vpop.f32.mrf.mxu2  ;;  %v15901_v43 = vor.u32 %v17377_v63, %v15900_v56  ;;  %v15868_v34 = vld [vmem:[#allocation16 + $0xe08] sm:$0xf]  ;;  %v14534_v39 = vld [vmem:[#allocation16 + $0x3b0] sm:$0xf0]  ;;  %v14756_v45 = vld [vmem:[#allocation16 + $0x550] sm:$0xf] }
 0x583   :  { %v18613_v26 = vadd.f32 %v9968_v5, %v18579_v62  ;;  %v14820_v5 = vld [vmem:[#allocation16 + $0x5d0] sm:$0xf]  ;;  %v15869_v40 = vor.u32 %v17369_v23, %v15868_v34  ;;  %v14182_v15 = vld [vmem:[#allocation16 + $0xf0] sm:$0xf0]  ;;  %v15006_v34 = vld [vmem:[#allocation16 + $0x768] sm:$0xf0] }
 0x584   :  { %10299 = vmatpush.bf16.msra.mxu2 %v15713_v33  ;;  %10397 = vmatpush.bf16.msra.mxu1 %v15461_v17  ;;  %v17242_v33 = vld [vmem:[#allocation16 + $0xa2c] sm:$0xf0] }
 0x585   :  { %v17106_v17 = vld [vmem:[#allocation16 + $0x5ec] sm:$0xf0]  ;;  %v15365_v7 = vor.u32 %v17242_v33, %v15364_v42  ;;  %v14502_v33 = vld [vmem:[#allocation16 + $0x370] sm:$0xf0] }
 0x586   :  { %10384 = vmatpush.bf16.msra.mxu0 %v15173_v10  ;;  %v15933_v10 = vor.u32 %v17385_v3, %v15932_v51  ;;  %v10124_v58 = vpop.f32.mrf.mxu1  ;;  %v17165_v51 = vld [vmem:[#allocation16 + $0x7cc] sm:$0xf]  ;;  %v14821_v50 = vor.u32 %v17106_v17, %v14820_v5  ;;  %v17090_v42 = vld [vmem:[#allocation16 + $0x56c] sm:$0xf0] }
 0x587   :  { %v18615_v62 = vadd.f32 %v10124_v58, %v10111_v57  ;;  %v15070_v3 = vld [vmem:[#allocation16 + $0x7e8] sm:$0xf0]  ;;  %v14788_v58 = vld [vmem:[#allocation16 + $0x590] sm:$0xf]  ;;  %v14757_v5 = vor.u32 %v17090_v42, %v14756_v45 }
 0x588   :  { %10202 = vmatpush.bf16.msra.mxu3 %v15933_v10  ;;  %10300 = vmatpush.bf16.msra.mxu2 %v15681_v59  ;;  %v15073_v10 = vor.u32 %v17165_v51, %v15070_v3  ;;  %v17157_v57 = vld [vmem:[#allocation16 + $0x78c] sm:$0xf]  ;;  %v16934_v51 = vld [vmem:[#allocation16 + $0x94] sm:$0xf] }
 0x589   :  { %10398 = vmatpush.bf16.msra.mxu1 %v15429_v41  ;;  %v15038_v59 = vld [vmem:[#allocation16 + $0x7a8] sm:$0xf0]  ;;  %v17098_v41 = vld [vmem:[#allocation16 + $0x5ac] sm:$0xf0]  ;;  %v14150_v3 = vld [vmem:[#allocation16 + $0xb0] sm:$0xf0] }
 0x58a   :  { %10385 = vmatpush.bf16.msra.mxu0 %v15141_v30  ;;  %v16958_v30 = vld [vmem:[#allocation16 + $0x154] sm:$0xf]  ;;  %v18618_v21 = vpop.f32.mrf.mxu2  ;;  %v15041_v16 = vor.u32 %v17157_v57, %v15038_v59  ;;  %v14974_v17 = vld [vmem:[#allocation16 + $0x728] sm:$0xf0] }
 0x58b   :  { %18897 = vst [vmem:[#allocation30_spill] sm:$0xff] %v18618_v21  ;;  %v14249_v44 = vor.u32 %v16958_v30, %v14246_v18  ;;  %v17149_v18 = vld [vmem:[#allocation16 + $0x74c] sm:$0xf]  ;;  %v17035_v21 = vld [vmem:[#allocation16 + $0x3b4] sm:$0xf0] }
 0x58c   :  { %10203 = vmatpush.bf16.msra.mxu3 %v15901_v43  ;;  %10301 = vmatpush.bf16.msra.mxu2 %v15649_v32  ;;  %v14789_v43 = vor.u32 %v17098_v41, %v14788_v58  ;;  %v14537_v32 = vor.u32 %v17030_v61, %v14534_v39  ;;  %v17133_v59 = vld [vmem:[#allocation16 + $0x6cc] sm:$0xf]  ;;  %v14692_v41 = vld [vmem:[#allocation16 + $0x4d0] sm:$0xf]  ;;  %v17006_v39 = vld [vmem:[#allocation16 + $0x2d4] sm:$0xf] }
 0x58d   :  { %10399 = vmatpush.bf16.msra.mxu1 %v15397_v6  ;;  %v17022_v6 = vld [vmem:[#allocation16 + $0x354] sm:$0xf]  ;;  %v17074_v61 = vld [vmem:[#allocation16 + $0x4ec] sm:$0xf0] }
 0x58e   :  { %10386 = vmatpush.bf16.msra.mxu0 %v15109_v8  ;;  %v17038_v8 = vld [vmem:[#allocation16 + $0x3d4] sm:$0xf] }
 0x58f   :  { %v14569_v56 = vor.u32 %v17038_v8, %v14566_v31  ;;  %v14505_v8 = vor.u32 %v17022_v6, %v14502_v33  ;;  %v14724_v31 = vld [vmem:[#allocation16 + $0x510] sm:$0xf] }
 0x590   :  { %10204 = vmatpush.bf16.msra.mxu3 %v15869_v40  ;;  %10302 = vmatpush.bf16.msra.mxu2 %v15617_v55  ;;  %v14153_v40 = vor.u32 %v16934_v51, %v14150_v3  ;;  %v14470_v55 = vld [vmem:[#allocation16 + $0x330] sm:$0xf0]  ;;  %v14660_v6 = vld [vmem:[#allocation16 + $0x490] sm:$0xf] }
 0x591   :  { %10387 = vmatmul.bf16.vlgmr.msra.gmra.mxu0 %v18433_v19  ;;  %10400 = vmatpush.bf16.msra.mxu1 %v15365_v7  ;;  %v14118_v7 = vld [vmem:[#allocation16 + $0x70] sm:$0xf0]  ;;  %v17066_v33 = vld [vmem:[#allocation16 + $0x4ac] sm:$0xf0] }
 0x592   :  { %10435 = vmatpush.bf16.msrb.mxu0 %v14313_v29  ;;  %v16950_v29 = vld [vmem:[#allocation16 + $0x114] sm:$0xf]  ;;  %v10024_v30 = vpop.f32.mrf.mxu2 }
 0x593   :  { %v14217_v63 = vor.u32 %v16950_v29, %v14214_v46  ;;  %v18621_v23 = vadd.f32 %v10024_v30, %v18584_v38  ;;  %10205 = vmatmul.bf16.vlgmr.msra.gmra.mxu3 %v18562_v28  ;;  %10303 = vmatmul.bf16.vlgmr.msra.gmra.mxu2 %v18538_v14  ;;  %v17141_v38 = vld [vmem:[#allocation16 + $0x70c] sm:$0xf]  ;;  %v17082_v29 = vld [vmem:[#allocation16 + $0x52c] sm:$0xf0]  ;;  %v17014_v46 = vld [vmem:[#allocation16 + $0x314] sm:$0xf] }
 0x594   :  { %10253 = vmatpush.bf16.msrb.mxu3 %v15073_v10  ;;  %10351 = vmatpush.bf16.msrb.mxu2 %v14821_v50  ;;  %v16926_v10 = vld [vmem:[#allocation16 + $0x54] sm:$0xf]  ;;  %v14977_v50 = vor.u32 %v17141_v38, %v14974_v17  ;;  %v14725_v57 = vor.u32 %v17082_v29, %v14724_v31  ;;  %v17117_v31 = vld [vmem:[#allocation16 + $0x64c] sm:$0xf] }
 0x595   :  { %10449 = vmatpush.bf16.msrb.mxu1 %v14569_v56  ;;  %v14942_v56 = vld [vmem:[#allocation16 + $0x6e8] sm:$0xf0]  ;;  %v14121_v58 = vor.u32 %v16926_v10, %v14118_v7  ;;  %v16998_v3 = vld [vmem:[#allocation16 + $0x294] sm:$0xf]  ;;  %v14628_v10 = vld [vmem:[#allocation16 + $0x450] sm:$0xf] }
 0x596   :  { %10436 = vmatpush.bf16.msrb.mxu0 %v14281_v4  ;;  %v16942_v4 = vld [vmem:[#allocation16 + $0xd4] sm:$0xf]  ;;  %10401 = vmatmul.bf16.vlgmr.msra.gmra.mxu1 %v18486_v36  ;;  %v14945_v30 = vor.u32 %v17133_v59, %v14942_v56  ;;  %v14878_v29 = vld [vmem:[#allocation16 + $0x668] sm:$0xf0]  ;;  %v17058_v7 = vld [vmem:[#allocation16 + $0x46c] sm:$0xf0] }
 0x597   :  { %v14185_v35 = vor.u32 %v16942_v4, %v14182_v15  ;;  %v14438_v4 = vld [vmem:[#allocation16 + $0x2f0] sm:$0xf0] }
 0x598   :  { %10254 = vmatpush.bf16.msrb.mxu3 %v15041_v16  ;;  %10352 = vmatpush.bf16.msrb.mxu2 %v14789_v43  ;;  %v16918_v15 = vld [vmem:[#allocation16 + $0x14] sm:$0xf]  ;;  %v14441_v45 = vor.u32 %v17006_v39, %v14438_v4  ;;  %v14629_v39 = vor.u32 %v17058_v7, %v14628_v10  ;;  %v14596_v4 = vld [vmem:[#allocation16 + $0x410] sm:$0xf] }
 0x599   :  { %10450 = vmatpush.bf16.msrb.mxu1 %v14537_v32  ;;  %v14086_v16 = vld [vmem:[#allocation16 + $0x30] sm:$0xf0]  ;;  %v17125_v32 = vld [vmem:[#allocation16 + $0x68c] sm:$0xf] }
 0x59a   :  { %10437 = vmatpush.bf16.msrb.mxu0 %v14249_v44  ;;  %v15009_v44 = vor.u32 %v17149_v18, %v15006_v34  ;;  %v17230_v43 = vld [vmem:[#allocation16 + $0x9d4] sm:$0xf]  ;;  %v14693_v34 = vor.u32 %v17074_v61, %v14692_v41  ;;  %v14089_v42 = vor.u32 %v16918_v15, %v14086_v16  ;;  %v17109_v41 = vld [vmem:[#allocation16 + $0x60c] sm:$0xf]  ;;  %v17050_v15 = vld [vmem:[#allocation16 + $0x42c] sm:$0xf0] }
 0x59b   :  { %v15334_v18 = vld [vmem:[#allocation16 + $0x9f0] sm:$0xf0]  ;;  %v14846_v61 = vld [vmem:[#allocation16 + $0x628] sm:$0xf0] }
 0x59c   :  { %10255 = vmatpush.bf16.msrb.mxu3 %v15009_v44  ;;  %10353 = vmatpush.bf16.msrb.mxu2 %v14757_v5  ;;  %v15337_v51 = vor.u32 %v17230_v43, %v15334_v18  ;;  %v14406_v44 = vld [vmem:[#allocation16 + $0x2b0] sm:$0xf0]  ;;  %v18626_v5 = vpop.f32.mrf.mxu0 }
 0x59d   :  { %10451 = vmatpush.bf16.msrb.mxu1 %v14505_v8  ;;  %v17222_v17 = vld [vmem:[#allocation16 + $0x994] sm:$0xf] }
 0x59e   :  { %10438 = vmatpush.bf16.msrb.mxu0 %v14217_v63  ;;  %v14473_v63 = vor.u32 %v17014_v46, %v14470_v55  ;;  %v15302_v8 = vld [vmem:[#allocation16 + $0x9b0] sm:$0xf0]  ;;  %v18628_v46 = vpop.f32.mrf.mxu2  ;;  %v14409_v55 = vor.u32 %v16998_v3, %v14406_v44 }
 0x59f   :  { %v14374_v59 = vld [vmem:[#allocation16 + $0x270] sm:$0xf0] }
 0x5a0   :  { %10256 = vmatpush.bf16.msrb.mxu3 %v14977_v50  ;;  %10354 = vmatpush.bf16.msrb.mxu2 %v14725_v57  ;;  %v15305_v50 = vor.u32 %v17222_v17, %v15302_v8  ;;  %v16990_v57 = vld [vmem:[#allocation16 + $0x254] sm:$0xf] }
 0x5a1   :  { %10452 = vmatpush.bf16.msrb.mxu1 %v14473_v63  ;;  %v17214_v56 = vld [vmem:[#allocation16 + $0x954] sm:$0xf]  ;;  %v14881_v63 = vor.u32 %v17117_v31, %v14878_v29  ;;  %v14377_v43 = vor.u32 %v16990_v57, %v14374_v59  ;;  %v17413_v29 = vld [vmem:[#allocation16 + $0xf8c] sm:$0xf]  ;;  %v17354_v57 = vld [vmem:[#allocation16 + $0xdac] sm:$0xf0] }
 0x5a2   :  { %10439 = vmatpush.bf16.msrb.mxu0 %v14185_v35  ;;  %v14910_v35 = vld [vmem:[#allocation16 + $0x6a8] sm:$0xf0]  ;;  %v16982_v16 = vld [vmem:[#allocation16 + $0x214] sm:$0xf] }
 0x5a3   :  { %v14913_v38 = vor.u32 %v17125_v32, %v14910_v35  ;;  %v14342_v18 = vld [vmem:[#allocation16 + $0x230] sm:$0xf0]  ;;  %v16094_v32 = vld [vmem:[#allocation16 + $0xfe8] sm:$0xf0] }
 0x5a4   :  { %10257 = vmatpush.bf16.msrb.mxu3 %v14945_v30  ;;  %10355 = vmatpush.bf16.msrb.mxu2 %v14693_v34  ;;  %v18631_v30 = vpop.f32.mrf.mxu1  ;;  %v17421_v34 = vld [vmem:[#allocation16 + $0xfcc] sm:$0xf]  ;;  %v17206_v3 = vld [vmem:[#allocation16 + $0x914] sm:$0xf]  ;;  %v18633_v8 = vpop.f32.mrf.mxu0 }
 0x5a5   :  { %10453 = vmatpush.bf16.msrb.mxu1 %v14441_v45  ;;  %v15844_v45 = vld [vmem:[#allocation16 + $0xdd0] sm:$0xf]  ;;  %v15238_v44 = vld [vmem:[#allocation16 + $0x930] sm:$0xf0]  ;;  %v16097_v17 = vor.u32 %v17421_v34, %v16094_v32 }
 0x5a6   :  { %10440 = vmatpush.bf16.msrb.mxu0 %v14153_v40  ;;  %v14661_v40 = vor.u32 %v17066_v33, %v14660_v6  ;;  %v17294_v6 = vld [vmem:[#allocation16 + $0xbd4] sm:$0xf]  ;;  %v14849_v33 = vor.u32 %v17109_v41, %v14846_v61  ;;  %v15241_v7 = vor.u32 %v17206_v3, %v15238_v44  ;;  %v17346_v34 = vld [vmem:[#allocation16 + $0xd6c] sm:$0xf0] }
 0x5a7   :  { %v17286_v59 = vld [vmem:[#allocation16 + $0xb94] sm:$0xf] }
 0x5a8   :  { %10258 = vmatpush.bf16.msrb.mxu3 %v14913_v38  ;;  %10356 = vmatpush.bf16.msrb.mxu2 %v14661_v40  ;;  %v14597_v38 = vor.u32 %v17050_v15, %v14596_v4  ;;  %v14345_v40 = vor.u32 %v16982_v16, %v14342_v18  ;;  %v15206_v41 = vld [vmem:[#allocation16 + $0x8f0] sm:$0xf0]  ;;  %v17405_v4 = vld [vmem:[#allocation16 + $0xf4c] sm:$0xf]  ;;  %v15780_v18 = vld [vmem:[#allocation16 + $0xd50] sm:$0xf] }
 0x5a9   :  { %10454 = vmatpush.bf16.msrb.mxu1 %v14409_v55  ;;  %v16062_v55 = vld [vmem:[#allocation16 + $0xfa8] sm:$0xf0]  ;;  %v17278_v32 = vld [vmem:[#allocation16 + $0xb54] sm:$0xf]  ;;  %v15781_v44 = vor.u32 %v17346_v34, %v15780_v18  ;;  %v17330_v18 = vld [vmem:[#allocation16 + $0xcec] sm:$0xf0] }
 0x5aa   :  { %10441 = vmatpush.bf16.msrb.mxu0 %v14121_v58  ;;  %v15270_v58 = vld [vmem:[#allocation16 + $0x970] sm:$0xf0]  ;;  %v16065_v61 = vor.u32 %v17413_v29, %v16062_v55  ;;  %v16030_v15 = vld [vmem:[#allocation16 + $0xf68] sm:$0xf0]  ;;  %v15748_v55 = vld [vmem:[#allocation16 + $0xd10] sm:$0xf] }
 0x5ab   :  { %v15273_v35 = vor.u32 %v17214_v56, %v15270_v58  ;;  %v18635_v56 = vpop.f32.mrf.mxu2  ;;  %v17198_v58 = vld [vmem:[#allocation16 + $0x8d4] sm:$0xf] }
 0x5ac   :  { %10259 = vmatpush.bf16.msrb.mxu3 %v14881_v63  ;;  %10357 = vmatpush.bf16.msrb.mxu2 %v14629_v39  ;;  %v15558_v63 = vld [vmem:[#allocation16 + $0xbb0] sm:$0xf0] }
 0x5ad   :  { %10455 = vmatpush.bf16.msrb.mxu1 %v14377_v43  ;;  %v15561_v16 = vor.u32 %v17286_v59, %v15558_v63  ;;  %v15209_v43 = vor.u32 %v17198_v58, %v15206_v41  ;;  %v15142_v59 = vld [vmem:[#allocation16 + $0x870] sm:$0xf0] }
 0x5ae   :  { %10442 = vmatpush.bf16.msrb.mxu0 %v14089_v42  ;;  %v17362_v42 = vld [vmem:[#allocation16 + $0xdec] sm:$0xf0]  ;;  %v10220_v3 = vpop.f32.mrf.mxu0  ;;  %v17262_v34 = vld [vmem:[#allocation16 + $0xad4] sm:$0xf] }
 0x5af   :  { %v15845_v31 = vor.u32 %v17362_v42, %v15844_v45  ;;  %v15526_v45 = vld [vmem:[#allocation16 + $0xb70] sm:$0xf0] }
 0x5b0   :  { %10260 = vmatpush.bf16.msrb.mxu3 %v14849_v33  ;;  %10358 = vmatpush.bf16.msrb.mxu2 %v14597_v38  ;;  %v17190_v42 = vld [vmem:[#allocation16 + $0x894] sm:$0xf]  ;;  %v16033_v33 = vor.u32 %v17405_v4, %v16030_v15  ;;  %v17397_v38 = vld [vmem:[#allocation16 + $0xf0c] sm:$0xf] }
 0x5b1   :  { %10443 = vmatmul.bf16.vlgmr.msrb.gmra.mxu0 %v18411_v13  ;;  %10456 = vmatpush.bf16.msrb.mxu1 %v14345_v40  ;;  %v18643_v40 = vpop.f32.mrf.mxu3 }
 0x5b2   :  { %10491 = vmatpush.bf16.msra.mxu0 %v15337_v51  ;;  %v15590_v51 = vld [vmem:[#allocation16 + $0xbf0] sm:$0xf0] }
 0x5b3   :  { %v15593_v10 = vor.u32 %v17294_v6, %v15590_v51  ;;  %10261 = vmatmul.bf16.vlgmr.msrb.gmra.mxu3 %v18482_v1  ;;  %10359 = vmatmul.bf16.vlgmr.msrb.gmra.mxu2 %v18480_v48  ;;  %v15174_v6 = vld [vmem:[#allocation16 + $0x8b0] sm:$0xf0]  ;;  %v7302_v51 = vperm.slane %v18605_v37, 3  ;;  %v18645_v58 = vpop.f32.mrf.mxu2  ;;  %v16963_v37 = vld [vmem:[#allocation16 + $0x174] sm:$0xf0] }
 0x5b4   :  { %10309 = vmatpush.bf16.msra.mxu3 %v16097_v17  ;;  %10407 = vmatpush.bf16.msra.mxu2 %v15845_v31  ;;  %v15998_v17 = vld [vmem:[#allocation16 + $0xf28] sm:$0xf0]  ;;  %v15529_v31 = vor.u32 %v17278_v32, %v15526_v45  ;;  %v15177_v29 = vor.u32 %v17190_v42, %v15174_v6  ;;  %18898 = vst [vmem:[#allocation31_spill] sm:$0xff] %v18645_v58  ;;  %v15462_v45 = vld [vmem:[#allocation16 + $0xaf0] sm:$0xf0] }
 0x5b5   :  { %10505 = vmatpush.bf16.msra.mxu1 %v15593_v10  ;;  %v17338_v10 = vld [vmem:[#allocation16 + $0xd2c] sm:$0xf0]  ;;  %v16001_v63 = vor.u32 %v17397_v38, %v15998_v17  ;;  %v10221_v4 = vadd.f32 %v10220_v3, %v7302_v51  ;;  %v17174_v42 = vld [vmem:[#allocation16 + $0x814] sm:$0xf]  ;;  %v14316_v38 = vld [vmem:[#allocation16 + $0x1d8] sm:$0xf] }
 0x5b6   :  { %10492 = vmatpush.bf16.msra.mxu0 %v15305_v50  ;;  %v15812_v50 = vld [vmem:[#allocation16 + $0xd90] sm:$0xf]  ;;  %10457 = vmatmul.bf16.vlgmr.msrb.gmra.mxu1 %v18319_v20  ;;  %v15749_v41 = vor.u32 %v17338_v10, %v15748_v55  ;;  %v15110_v6 = vld [vmem:[#allocation16 + $0x830] sm:$0xf0]  ;;  %v16979_v17 = vld [vmem:[#allocation16 + $0x1f4] sm:$0xf0]  ;;  %v15465_v10 = vor.u32 %v17262_v34, %v15462_v45 }
 0x5b7   :  { %v15813_v39 = vor.u32 %v17354_v57, %v15812_v50  ;;  %v15494_v50 = vld [vmem:[#allocation16 + $0xb30] sm:$0xf0]  ;;  %v17381_v3 = vld [vmem:[#allocation16 + $0xe8c] sm:$0xf]  ;;  %v16947_v58 = vld [vmem:[#allocation16 + $0xf4] sm:$0xf0] }
 0x5b8   :  { %10310 = vmatpush.bf16.msra.mxu3 %v16065_v61  ;;  %v17182_v57 = vld [vmem:[#allocation16 + $0x854] sm:$0xf]  ;;  %v17389_v61 = vld [vmem:[#allocation16 + $0xecc] sm:$0xf] }
 0x5b9   :  { %10408 = vmatpush.bf16.msra.mxu2 %v15813_v39  ;;  %10506 = vmatpush.bf16.msra.mxu1 %v15561_v16  ;;  %v15966_v39 = vld [vmem:[#allocation16 + $0xee8] sm:$0xf0]  ;;  %v15145_v16 = vor.u32 %v17182_v57, %v15142_v59  ;;  %v17322_v57 = vld [vmem:[#allocation16 + $0xcac] sm:$0xf0]  ;;  %v10222_v59 = vpop.f32.mrf.mxu0 }
 0x5ba   :  { %10493 = vmatpush.bf16.msra.mxu0 %v15273_v35  ;;  %v18637_v35 = vpop.f32.mrf.mxu1  ;;  %v10223_v34 = vadd.f32 %v10222_v59, %v7302_v51  ;;  %v17365_v51 = vld [vmem:[#allocation16 + $0xe0c] sm:$0xf] }
 0x5bc   :  { %10311 = vmatpush.bf16.msra.mxu3 %v16033_v33 }
 0x5bd   :  { %10409 = vmatpush.bf16.msra.mxu2 %v15781_v44  ;;  %10507 = vmatpush.bf16.msra.mxu1 %v15529_v31  ;;  %v15969_v44 = vor.u32 %v17389_v61, %v15966_v39  ;;  %v15934_v31 = vld [vmem:[#allocation16 + $0xea8] sm:$0xf0]  ;;  %v15430_v61 = vld [vmem:[#allocation16 + $0xab0] sm:$0xf0] }
 0x5be   :  { %10494 = vmatpush.bf16.msra.mxu0 %v15241_v7  ;;  %v17270_v7 = vld [vmem:[#allocation16 + $0xb14] sm:$0xf]  ;;  %v15937_v39 = vor.u32 %v17381_v3, %v15934_v31  ;;  %v14252_v3 = vld [vmem:[#allocation16 + $0x158] sm:$0xf] }
 0x5bf   :  { %v15497_v15 = vor.u32 %v17270_v7, %v15494_v50  ;;  %v15113_v7 = vor.u32 %v17174_v42, %v15110_v6  ;;  %v15684_v50 = vld [vmem:[#allocation16 + $0xc90] sm:$0xf] }
 0x5c0   :  { %10312 = vmatpush.bf16.msra.mxu3 %v16001_v63  ;;  %v17254_v63 = vld [vmem:[#allocation16 + $0xa94] sm:$0xf]  ;;  %v15652_v42 = vld [vmem:[#allocation16 + $0xc50] sm:$0xf] }
 0x5c1   :  { %10410 = vmatpush.bf16.msra.mxu2 %v15749_v41  ;;  %10508 = vmatpush.bf16.msra.mxu1 %v15497_v15  ;;  %v14284_v41 = vld [vmem:[#allocation16 + $0x198] sm:$0xf]  ;;  %v15685_v15 = vor.u32 %v17322_v57, %v15684_v50  ;;  %v17314_v6 = vld [vmem:[#allocation16 + $0xc6c] sm:$0xf0]  ;;  %v17238_v57 = vld [vmem:[#allocation16 + $0xa14] sm:$0xf] }
 0x5c2   :  { %10495 = vmatpush.bf16.msra.mxu0 %v15209_v43  ;;  %v15716_v43 = vld [vmem:[#allocation16 + $0xcd0] sm:$0xf]  ;;  %v10234_v32 = vpop.f32.mrf.mxu1 }
 0x5c3   :  { %v18649_v33 = vadd.f32 %v10234_v32, %v10221_v4  ;;  %v15717_v55 = vor.u32 %v17330_v18, %v15716_v43  ;;  %v14317_v4 = vor.u32 %v16979_v17, %v14316_v38  ;;  %v16971_v43 = vld [vmem:[#allocation16 + $0x1b4] sm:$0xf0]  ;;  %v10136_v18 = vpop.f32.mrf.mxu2  ;;  %v15902_v32 = vld [vmem:[#allocation16 + $0xe68] sm:$0xf0]  ;;  %v17246_v17 = vld [vmem:[#allocation16 + $0xa54] sm:$0xf] }
 0x5c4   :  { %10313 = vmatpush.bf16.msra.mxu3 %v15969_v44  ;;  %v18657_v45 = vadd.f32 %v10136_v18, %v18610_v9  ;;  %v14285_v38 = vor.u32 %v16971_v43, %v14284_v41  ;;  %v15653_v9 = vor.u32 %v17314_v6, %v15652_v42  ;;  %v17306_v50 = vld [vmem:[#allocation16 + $0xc2c] sm:$0xf0]  ;;  %v17102_v43 = vld [vmem:[#allocation16 + $0x5d4] sm:$0xf]  ;;  %v16955_v42 = vld [vmem:[#allocation16 + $0x134] sm:$0xf0] }
 0x5c5   :  { %10411 = vmatpush.bf16.msra.mxu2 %v15717_v55  ;;  %10509 = vmatpush.bf16.msra.mxu1 %v15465_v10  ;;  %v15398_v55 = vld [vmem:[#allocation16 + $0xa70] sm:$0xf0]  ;;  %v15870_v10 = vld [vmem:[#allocation16 + $0xe28] sm:$0xf0]  ;;  %v17170_v41 = vld [vmem:[#allocation16 + $0x7ec] sm:$0xf0] }
 0x5c6   :  { %10496 = vmatpush.bf16.msra.mxu0 %v15177_v29  ;;  %v9982_v29 = vpop.f32.mrf.mxu3  ;;  %v14822_v18 = vld [vmem:[#allocation16 + $0x5f0] sm:$0xf0] }
 0x5c7   :  { %v18652_v47 = vadd.f32 %v9982_v29, %v18613_v26  ;;  %v15433_v26 = vor.u32 %v17254_v63, %v15430_v61  ;;  %v15366_v63 = vld [vmem:[#allocation16 + $0xa30] sm:$0xf0]  ;;  %v15076_v61 = vld [vmem:[#allocation16 + $0x7d0] sm:$0xf]  ;;  %v14825_v25 = vor.u32 %v17102_v43, %v14822_v18  ;;  %v14508_v18 = vld [vmem:[#allocation16 + $0x358] sm:$0xf] }
 0x5c8   :  { %10314 = vmatpush.bf16.msra.mxu3 %v15937_v39  ;;  %v14253_v39 = vor.u32 %v16963_v37, %v14252_v3  ;;  %v17162_v3 = vld [vmem:[#allocation16 + $0x7ac] sm:$0xf0]  ;;  %v14758_v43 = vld [vmem:[#allocation16 + $0x570] sm:$0xf0] }
 0x5c9   :  { %10412 = vmatpush.bf16.msra.mxu2 %v15685_v15  ;;  %10510 = vmatpush.bf16.msra.mxu1 %v15433_v26  ;;  %v15873_v15 = vor.u32 %v17365_v51, %v15870_v10  ;;  %v15077_v26 = vor.u32 %v17170_v41, %v15076_v61  ;;  %v14790_v51 = vld [vmem:[#allocation16 + $0x5b0] sm:$0xf0]  ;;  %v14540_v10 = vld [vmem:[#allocation16 + $0x398] sm:$0xf] }
 0x5ca   :  { %10497 = vmatpush.bf16.msra.mxu0 %v15145_v16  ;;  %v17373_v16 = vld [vmem:[#allocation16 + $0xe4c] sm:$0xf]  ;;  %v10236_v44 = vpop.f32.mrf.mxu1  ;;  %v14541_v61 = vor.u32 %v17035_v21, %v14540_v10  ;;  %v14980_v21 = vld [vmem:[#allocation16 + $0x710] sm:$0xf] }
 0x5cb   :  { %v18659_v31 = vadd.f32 %v10236_v44, %v10223_v34  ;;  %v15905_v29 = vor.u32 %v17373_v16, %v15902_v32  ;;  %v14572_v16 = vld [vmem:[#allocation16 + $0x3d8] sm:$0xf]  ;;  %v10138_v6 = vpop.f32.mrf.mxu2 }
 0x5cc   :  { %v17043_v32 = vld [vmem:[#allocation16 + $0x3f4] sm:$0xf0] }
 0x5cd   :  { %10315 = vmatpush.bf16.msra.mxu3 %v15905_v29  ;;  %v14220_v34 = vld [vmem:[#allocation16 + $0x118] sm:$0xf]  ;;  %10413 = vmatpush.bf16.msra.mxu2 %v15653_v9  ;;  %v14573_v37 = vor.u32 %v17043_v32, %v14572_v16  ;;  %v17094_v29 = vld [vmem:[#allocation16 + $0x594] sm:$0xf] }
 0x5ce   :  { %10498 = vmatpush.bf16.msra.mxu0 %v15113_v7  ;;  %v15620_v7 = vld [vmem:[#allocation16 + $0xc10] sm:$0xf]  ;;  %v18662_v59 = vpop.f32.mrf.mxu3  ;;  %v14188_v9 = vld [vmem:[#allocation16 + $0xd8] sm:$0xf] }
 0x5cf   :  { %18899 = vst [vmem:[#allocation32_spill] sm:$0xff] %v18662_v59  ;;  %v15621_v44 = vor.u32 %v17306_v50, %v15620_v7  ;;  %v14221_v59 = vor.u32 %v16955_v42, %v14220_v34  ;;  %v14793_v50 = vor.u32 %v17094_v29, %v14790_v51  ;;  %v14189_v41 = vor.u32 %v16947_v58, %v14188_v9  ;;  %v17027_v16 = vld [vmem:[#allocation16 + $0x374] sm:$0xf0]  ;;  %v17146_v58 = vld [vmem:[#allocation16 + $0x72c] sm:$0xf0] }
 0x5d0   :  { %v14509_v34 = vor.u32 %v17027_v16, %v14508_v18  ;;  %v14948_v9 = vld [vmem:[#allocation16 + $0x6d0] sm:$0xf]  ;;  %v18676_v18 = vld [vmem:[#allocation19] sm:$0xff] }
 0x5d1   :  { %10499 = vmatmul.bf16.vlgmr.msra.gmra.mxu0 %v18433_v19  ;;  %10316 = vmatpush.bf16.msra.mxu3 %v15873_v15  ;;  %v14156_v15 = vld [vmem:[#allocation16 + $0x98] sm:$0xf] }
 0x5d2   :  { %10547 = vmatpush.bf16.msrb.mxu0 %v14317_v4  ;;  %v15401_v4 = vor.u32 %v17246_v17, %v15398_v55  ;;  %v18665_v17 = vadd.f32 %v10138_v6, %v18615_v62  ;;  %v15369_v55 = vor.u32 %v17238_v57, %v15366_v63  ;;  %10414 = vmatpush.bf16.msra.mxu2 %v15621_v44  ;;  %v15012_v57 = vld [vmem:[#allocation16 + $0x750] sm:$0xf]  ;;  %v17078_v6 = vld [vmem:[#allocation16 + $0x514] sm:$0xf] }
 0x5d3   :  { %v14726_v44 = vld [vmem:[#allocation16 + $0x530] sm:$0xf0] }
 0x5d4   :  { %10511 = vmatpush.bf16.msra.mxu1 %v15401_v4  ;;  %v17154_v4 = vld [vmem:[#allocation16 + $0x76c] sm:$0xf0]  ;;  %10317 = vmatmul.bf16.vlgmr.msra.gmra.mxu3 %v18562_v28  ;;  %v14729_v10 = vor.u32 %v17078_v6, %v14726_v44  ;;  %v18884_v6 = vperm.slane %v18676_v18, 0 }
 0x5d5   :  { %10365 = vmatpush.bf16.msrb.mxu3 %v15077_v26  ;;  %10415 = vmatmul.bf16.vlgmr.msra.gmra.mxu2 %v18538_v14  ;;  %v14476_v26 = vld [vmem:[#allocation16 + $0x318] sm:$0xf] }
 0x5d6   :  { %10548 = vmatpush.bf16.msrb.mxu0 %v14285_v38  ;;  %v15044_v38 = vld [vmem:[#allocation16 + $0x790] sm:$0xf]  ;;  %10463 = vmatpush.bf16.msrb.mxu2 %v14825_v25  ;;  %v10038_v62 = vpop.f32.mrf.mxu3  ;;  %v16939_v25 = vld [vmem:[#allocation16 + $0xb4] sm:$0xf0] }
 0x5d7   :  { %v15045_v7 = vor.u32 %v17162_v3, %v15044_v38  ;;  %v10039_v63 = vadd.f32 %v10038_v62, %v18621_v23  ;;  %v14157_v42 = vor.u32 %v16939_v25, %v14156_v15  ;;  %v17019_v38 = vld [vmem:[#allocation16 + $0x334] sm:$0xf0]  ;;  %v14916_v15 = vld [vmem:[#allocation16 + $0x690] sm:$0xf] }
 0x5d8   :  { %10512 = vmatpush.bf16.msra.mxu1 %v15369_v55  ;;  %v14124_v3 = vld [vmem:[#allocation16 + $0x58] sm:$0xf]  ;;  %v14477_v62 = vor.u32 %v17019_v38, %v14476_v26  ;;  %v17130_v25 = vld [vmem:[#allocation16 + $0x6ac] sm:$0xf0]  ;;  %v10771_v38 = vmax.f32 %v18652_v47, 0.0 }
 0x5d9   :  { %v10053_v32 = vadd.f32 %v18593_v53, %v10039_v63  ;;  %10366 = vmatpush.bf16.msrb.mxu3 %v15045_v7  ;;  %v16931_v53 = vld [vmem:[#allocation16 + $0x74] sm:$0xf0]  ;;  %v17138_v7 = vld [vmem:[#allocation16 + $0x6ec] sm:$0xf0]  ;;  %v14917_v44 = vor.u32 %v17130_v25, %v14916_v15 }
 0x5da   :  { %10549 = vmatpush.bf16.msrb.mxu0 %v14253_v39  ;;  %v17086_v39 = vld [vmem:[#allocation16 + $0x554] sm:$0xf]  ;;  %10464 = vmatpush.bf16.msrb.mxu2 %v14793_v50  ;;  %v14125_v50 = vor.u32 %v16931_v53, %v14124_v3  ;;  %v17011_v63 = vld [vmem:[#allocation16 + $0x2f4] sm:$0xf0]  ;;  %v18885_v3 = vperm.slane %v18676_v18, 1 }
 0x5db   :  { %10513 = vmatmul.bf16.vlgmr.msra.gmra.mxu1 %v18486_v36  ;;  %v14761_v23 = vor.u32 %v17086_v39, %v14758_v43  ;;  %v10067_v55 = vadd.f32 %v18595_v27, %v10053_v32  ;;  %v14444_v27 = vld [vmem:[#allocation16 + $0x2d8] sm:$0xf]  ;;  %v14949_v39 = vor.u32 %v17138_v7, %v14948_v9  ;;  %v18681_v9 = vpop.f32.mrf.mxu0 }
 0x5dc   :  { %10561 = vmatpush.bf16.msrb.mxu1 %v14573_v37  ;;  %v14981_v37 = vor.u32 %v17146_v58, %v14980_v21  ;;  %v15340_v43 = vld [vmem:[#allocation16 + $0x9d8] sm:$0xf]  ;;  %v14445_v32 = vor.u32 %v17011_v63, %v14444_v27  ;;  %v14662_v21 = vld [vmem:[#allocation16 + $0x4b0] sm:$0xf0] }
 0x5dd   :  { %v10081_v29 = vadd.f32 %v18635_v56, %v10067_v55  ;;  %v17235_v56 = vld [vmem:[#allocation16 + $0x9f4] sm:$0xf0] }
 0x5de   :  { %10550 = vmatpush.bf16.msrb.mxu0 %v14221_v59  ;;  %v15013_v59 = vor.u32 %v17154_v4, %v15012_v57  ;;  %10465 = vmatpush.bf16.msrb.mxu2 %v14761_v23  ;;  %v18674_v51 = vpop.f32.mrf.mxu3  ;;  %v17070_v57 = vld [vmem:[#allocation16 + $0x4d4] sm:$0xf]  ;;  %v15341_v58 = vor.u32 %v17235_v56, %v15340_v43  ;;  %v15308_v26 = vld [vmem:[#allocation16 + $0x998] sm:$0xf]  ;;  %v14852_v43 = vld [vmem:[#allocation16 + $0x610] sm:$0xf] }
 0x5df   :  { %v14694_v4 = vld [vmem:[#allocation16 + $0x4f0] sm:$0xf0]  ;;  %v17227_v55 = vld [vmem:[#allocation16 + $0x9b4] sm:$0xf0]  ;;  %v17114_v56 = vld [vmem:[#allocation16 + $0x62c] sm:$0xf0] }
 0x5e0   :  { %10562 = vmatpush.bf16.msrb.mxu1 %v14541_v61  ;;  %10367 = vmatpush.bf16.msrb.mxu3 %v15013_v59  ;;  %v14092_v61 = vld [vmem:[#allocation16 + $0x18] sm:$0xf]  ;;  %v14697_v16 = vor.u32 %v17070_v57, %v14694_v4  ;;  %v17062_v23 = vld [vmem:[#allocation16 + $0x494] sm:$0xf]  ;;  %v15309_v63 = vor.u32 %v17227_v55, %v15308_v26 }
 0x5e1   :  { %v14665_v53 = vor.u32 %v17062_v23, %v14662_v21  ;;  %v14630_v57 = vld [vmem:[#allocation16 + $0x470] sm:$0xf0]  ;;  %v14380_v4 = vld [vmem:[#allocation16 + $0x258] sm:$0xf]  ;;  %v16100_v21 = vld [vmem:[#allocation16 + $0xfd0] sm:$0xf] }
 0x5e2   :  { %10551 = vmatpush.bf16.msrb.mxu0 %v14189_v41  ;;  %v16923_v41 = vld [vmem:[#allocation16 + $0x34] sm:$0xf0]  ;;  %10466 = vmatpush.bf16.msrb.mxu2 %v14729_v10  ;;  %v17122_v10 = vld [vmem:[#allocation16 + $0x66c] sm:$0xf0]  ;;  %v17358_v26 = vld [vmem:[#allocation16 + $0xdd4] sm:$0xf] }
 0x5e3   :  { %v14093_v59 = vor.u32 %v16923_v41, %v14092_v61  ;;  %v16995_v61 = vld [vmem:[#allocation16 + $0x274] sm:$0xf0]  ;;  %v15846_v55 = vld [vmem:[#allocation16 + $0xdf0] sm:$0xf0] }
 0x5e4   :  { %10563 = vmatpush.bf16.msrb.mxu1 %v14509_v34  ;;  %10368 = vmatpush.bf16.msrb.mxu3 %v14981_v37  ;;  %v14412_v34 = vld [vmem:[#allocation16 + $0x298] sm:$0xf]  ;;  %v14884_v37 = vld [vmem:[#allocation16 + $0x650] sm:$0xf]  ;;  %v14381_v23 = vor.u32 %v16995_v61, %v14380_v4  ;;  %v15849_v61 = vor.u32 %v17358_v26, %v15846_v55 }
 0x5e5   :  { %v15276_v47 = vld [vmem:[#allocation16 + $0x958] sm:$0xf] }
 0x5e6   :  { %10552 = vmatpush.bf16.msrb.mxu0 %v14157_v42  ;;  %v17003_v42 = vld [vmem:[#allocation16 + $0x2b4] sm:$0xf0]  ;;  %10467 = vmatpush.bf16.msrb.mxu2 %v14697_v16  ;;  %v10094_v7 = vpop.f32.mrf.mxu3  ;;  %v17046_v16 = vld [vmem:[#allocation16 + $0x414] sm:$0xf] }
 0x5e7   :  { %v10095_v27 = vadd.f32 %v10094_v7, %v10081_v29  ;;  %v17219_v41 = vld [vmem:[#allocation16 + $0x974] sm:$0xf0] }
 0x5e8   :  { %10564 = vmatpush.bf16.msrb.mxu1 %v14477_v62  ;;  %10369 = vmatpush.bf16.msrb.mxu3 %v14949_v39  ;;  %v14413_v62 = vor.u32 %v17003_v42, %v14412_v34  ;;  %v14885_v39 = vor.u32 %v17122_v10, %v14884_v37  ;;  %v16987_v29 = vld [vmem:[#allocation16 + $0x234] sm:$0xf0]  ;;  %v10805_v34 = vmul.f32 %v18884_v6, %v10771_v38  ;;  %v18688_v37 = vpop.f32.mrf.mxu1  ;;  %v17350_v6 = vld [vmem:[#allocation16 + $0xd94] sm:$0xf] }
 0x5e9   :  { %v10772_v15 = vmax.f32 %v10095_v27, 0.0  ;;  %v14853_v10 = vor.u32 %v17114_v56, %v14852_v43  ;;  %v17299_v7 = vld [vmem:[#allocation16 + $0xbf4] sm:$0xf0]  ;;  %v18692_v43 = vpop.f32.mrf.mxu0 }
 0x5ea   :  { %10553 = vmatpush.bf16.msrb.mxu0 %v14125_v50  ;;  %v17054_v50 = vld [vmem:[#allocation16 + $0x454] sm:$0xf]  ;;  %10468 = vmatpush.bf16.msrb.mxu2 %v14665_v53  ;;  %v15596_v53 = vld [vmem:[#allocation16 + $0xbd8] sm:$0xf] }
 0x5eb   :  { %v14633_v25 = vor.u32 %v17054_v50, %v14630_v57  ;;  %v10806_v42 = vmul.f32 %v18885_v3, %v10772_v15  ;;  %v17211_v50 = vld [vmem:[#allocation16 + $0x934] sm:$0xf0]  ;;  %v15814_v3 = vld [vmem:[#allocation16 + $0xdb0] sm:$0xf0] }
 0x5ec   :  { %10565 = vmatpush.bf16.msrb.mxu1 %v14445_v32  ;;  %10370 = vmatpush.bf16.msrb.mxu3 %v14917_v44  ;;  %v14598_v32 = vld [vmem:[#allocation16 + $0x430] sm:$0xf0]  ;;  %v15277_v44 = vor.u32 %v17219_v41, %v15276_v47  ;;  %v17418_v47 = vld [vmem:[#allocation16 + $0xfac] sm:$0xf0]  ;;  %v15597_v41 = vor.u32 %v17299_v7, %v15596_v53  ;;  %v17291_v56 = vld [vmem:[#allocation16 + $0xbb4] sm:$0xf0] }
 0x5ed   :  { %v18690_v57 = vadd.f32 %v10806_v42, %v10805_v34  ;;  %v14601_v4 = vor.u32 %v17046_v16, %v14598_v32  ;;  %v15212_v34 = vld [vmem:[#allocation16 + $0x8d8] sm:$0xf]  ;;  %v15817_v32 = vor.u32 %v17350_v6, %v15814_v3 }
 0x5ee   :  { %10554 = vmatpush.bf16.msrb.mxu0 %v14093_v59  ;;  %v14348_v59 = vld [vmem:[#allocation16 + $0x218] sm:$0xf]  ;;  %10469 = vmatpush.bf16.msrb.mxu2 %v14633_v25  ;;  %v18694_v25 = vpop.f32.mrf.mxu2 }
 0x5ef   :  { %v14349_v27 = vor.u32 %v16987_v29, %v14348_v59  ;;  %v17203_v42 = vld [vmem:[#allocation16 + $0x8f4] sm:$0xf0]  ;;  %v16036_v59 = vld [vmem:[#allocation16 + $0xf50] sm:$0xf] }
 0x5f0   :  { %10566 = vmatpush.bf16.msrb.mxu1 %v14413_v62  ;;  %10371 = vmatpush.bf16.msrb.mxu3 %v14885_v39  ;;  %v15244_v62 = vld [vmem:[#allocation16 + $0x918] sm:$0xf]  ;;  %v18699_v3 = vpop.f32.mrf.mxu1 }
 0x5f1   :  { %10555 = vmatmul.bf16.vlgmr.msrb.gmra.mxu0 %v18411_v13  ;;  %v15245_v15 = vor.u32 %v17211_v50, %v15244_v62  ;;  %v15564_v39 = vld [vmem:[#allocation16 + $0xb98] sm:$0xf]  ;;  %v16004_v62 = vld [vmem:[#allocation16 + $0xf10] sm:$0xf] }
 0x5f2   :  { %10603 = vmatpush.bf16.msra.mxu0 %v15341_v58  ;;  %v17426_v58 = vld [vmem:[#allocation16 + $0xfec] sm:$0xf0]  ;;  %10470 = vmatpush.bf16.msrb.mxu2 %v14601_v4  ;;  %v15565_v29 = vor.u32 %v17291_v56, %v15564_v39  ;;  %v15532_v26 = vld [vmem:[#allocation16 + $0xb58] sm:$0xf]  ;;  %v18701_v56 = vld [vmem:[#allocation17] sm:$0xff] }
 0x5f3   :  { %v16101_v38 = vor.u32 %v17426_v58, %v16100_v21  ;;  %v15213_v21 = vor.u32 %v17203_v42, %v15212_v34  ;;  %v17342_v58 = vld [vmem:[#allocation16 + $0xd54] sm:$0xf]  ;;  %v17283_v55 = vld [vmem:[#allocation16 + $0xb74] sm:$0xf0]  ;;  %v17402_v50 = vld [vmem:[#allocation16 + $0xf2c] sm:$0xf0] }
 0x5f4   :  { %10567 = vmatpush.bf16.msrb.mxu1 %v14381_v23  ;;  %10372 = vmatpush.bf16.msrb.mxu3 %v14853_v10  ;;  %v17410_v23 = vld [vmem:[#allocation16 + $0xf6c] sm:$0xf0]  ;;  %v15180_v53 = vld [vmem:[#allocation16 + $0x898] sm:$0xf]  ;;  %v15533_v4 = vor.u32 %v17283_v55, %v15532_v26  ;;  %v7303_v34 = vperm.slane %v18701_v56, 4  ;;  %v16005_v42 = vor.u32 %v17402_v50, %v16004_v62 }
 0x5f5   :  { %10471 = vmatmul.bf16.vlgmr.msrb.gmra.mxu2 %v18480_v48  ;;  %v17195_v10 = vld [vmem:[#allocation16 + $0x8b4] sm:$0xf0]  ;;  %v16037_v6 = vor.u32 %v17410_v23, %v16036_v59  ;;  %v17394_v59 = vld [vmem:[#allocation16 + $0xeec] sm:$0xf0]  ;;  %v15718_v26 = vld [vmem:[#allocation16 + $0xcf0] sm:$0xf0] }
 0x5f6   :  { %10604 = vmatpush.bf16.msra.mxu0 %v15309_v63  ;;  %v16068_v63 = vld [vmem:[#allocation16 + $0xf90] sm:$0xf]  ;;  %10519 = vmatpush.bf16.msra.mxu2 %v15849_v61  ;;  %v15750_v61 = vld [vmem:[#allocation16 + $0xd30] sm:$0xf0]  ;;  %v17187_v39 = vld [vmem:[#allocation16 + $0x874] sm:$0xf0]  ;;  %v18704_v23 = vpop.f32.mrf.mxu2 }
 0x5f7   :  { %v16069_v16 = vor.u32 %v17418_v47, %v16068_v63  ;;  %10373 = vmatmul.bf16.vlgmr.msrb.gmra.mxu3 %v18482_v1  ;;  %v15500_v63 = vld [vmem:[#allocation16 + $0xb18] sm:$0xf]  ;;  %v10332_v47 = vpop.f32.mrf.mxu0  ;;  %v16975_v62 = vld [vmem:[#allocation16 + $0x1dc] sm:$0xf] }
 0x5f8   :  { %10421 = vmatpush.bf16.msra.mxu3 %v16101_v38  ;;  %10568 = vmatpush.bf16.msrb.mxu1 %v14349_v27  ;;  %v15181_v38 = vor.u32 %v17195_v10, %v15180_v53  ;;  %v17334_v27 = vld [vmem:[#allocation16 + $0xd14] sm:$0xf]  ;;  %v15468_v55 = vld [vmem:[#allocation16 + $0xad8] sm:$0xf]  ;;  %v14318_v50 = vld [vmem:[#allocation16 + $0x1f8] sm:$0xf0] }
 0x5f9   :  { %v17267_v53 = vld [vmem:[#allocation16 + $0xaf4] sm:$0xf0] }
 0x5fa   :  { %10605 = vmatpush.bf16.msra.mxu0 %v15277_v44  ;;  %v15782_v44 = vld [vmem:[#allocation16 + $0xd70] sm:$0xf0]  ;;  %10520 = vmatpush.bf16.msra.mxu2 %v15817_v32  ;;  %v15972_v32 = vld [vmem:[#allocation16 + $0xed0] sm:$0xf]  ;;  %v15116_v10 = vld [vmem:[#allocation16 + $0x818] sm:$0xf] }
 0x5fb   :  { %10569 = vmatmul.bf16.vlgmr.msrb.gmra.mxu1 %v18319_v20  ;;  %v15785_v7 = vor.u32 %v17342_v58, %v15782_v44  ;;  %v17326_v44 = vld [vmem:[#allocation16 + $0xcd4] sm:$0xf] }
 0x5fc   :  { %10617 = vmatpush.bf16.msra.mxu1 %v15597_v41  ;;  %10422 = vmatpush.bf16.msra.mxu3 %v16069_v16  ;;  %v17275_v41 = vld [vmem:[#allocation16 + $0xb34] sm:$0xf0]  ;;  %v15753_v16 = vor.u32 %v17334_v27, %v15750_v61  ;;  %v10346_v27 = vpop.f32.mrf.mxu1  ;;  %v15721_v61 = vor.u32 %v17326_v44, %v15718_v26  ;;  %v15908_v44 = vld [vmem:[#allocation16 + $0xe50] sm:$0xf] }
 0x5fd   :  { %v17378_v26 = vld [vmem:[#allocation16 + $0xe6c] sm:$0xf0] }
 0x5fe   :  { %10606 = vmatpush.bf16.msra.mxu0 %v15245_v15  ;;  %v15148_v15 = vld [vmem:[#allocation16 + $0x858] sm:$0xf]  ;;  %10521 = vmatpush.bf16.msra.mxu2 %v15785_v7  ;;  %v15973_v7 = vor.u32 %v17394_v59, %v15972_v32  ;;  %v16967_v32 = vld [vmem:[#allocation16 + $0x19c] sm:$0xf] }
 0x5ff   :  { %v15149_v58 = vor.u32 %v17187_v39, %v15148_v15  ;;  %v15686_v15 = vld [vmem:[#allocation16 + $0xcb0] sm:$0xf0]  ;;  %v14321_v39 = vor.u32 %v16975_v62, %v14318_v50  ;;  %v14286_v59 = vld [vmem:[#allocation16 + $0x1b8] sm:$0xf0]  ;;  %v10334_v22 = vpop.f32.mrf.mxu0 }
 0x600   :  { %10618 = vmatpush.bf16.msra.mxu1 %v15565_v29  ;;  %10423 = vmatpush.bf16.msra.mxu3 %v16037_v6  ;;  %v18706_v29 = vpop.f32.mrf.mxu3  ;;  %v10333_v6 = vadd.f32 %v10332_v47, %v7303_v34  ;;  %v17259_v47 = vld [vmem:[#allocation16 + $0xab4] sm:$0xf0]  ;;  %v16959_v62 = vld [vmem:[#allocation16 + $0x15c] sm:$0xf]  ;;  %v10335_v50 = vadd.f32 %v10334_v22, %v7303_v34  ;;  %v17166_v34 = vld [vmem:[#allocation16 + $0x7d4] sm:$0xf] }
 0x601   :  { %18900 = vst [vmem:[#allocation33_spill] sm:$0xff] %v18706_v29  ;;  %v17386_v29 = vld [vmem:[#allocation16 + $0xeac] sm:$0xf0]  ;;  %v17243_v22 = vld [vmem:[#allocation16 + $0xa34] sm:$0xf0] }
 0x602   :  { %10607 = vmatpush.bf16.msra.mxu0 %v15213_v21  ;;  %v15501_v21 = vor.u32 %v17275_v41, %v15500_v63  ;;  %10522 = vmatpush.bf16.msra.mxu2 %v15753_v16  ;;  %v15117_v63 = vor.u32 %v17179_v11, %v15116_v10  ;;  %v17318_v41 = vld [vmem:[#allocation16 + $0xc94] sm:$0xf] }
 0x603   :  { %v15689_v16 = vor.u32 %v17318_v41, %v15686_v15  ;;  %v17310_v11 = vld [vmem:[#allocation16 + $0xc54] sm:$0xf]  ;;  %v17370_v41 = vld [vmem:[#allocation16 + $0xe2c] sm:$0xf0] }
 0x604   :  { %10619 = vmatpush.bf16.msra.mxu1 %v15533_v4  ;;  %10424 = vmatpush.bf16.msra.mxu3 %v16005_v42  ;;  %v18708_v4 = vadd.f32 %v10346_v27, %v10333_v6  ;;  %v15941_v42 = vor.u32 %v17386_v29, %v15940_v60  ;;  %v14289_v60 = vor.u32 %v16967_v32, %v14286_v59  ;;  %v15404_v29 = vld [vmem:[#allocation16 + $0xa58] sm:$0xf]  ;;  %v15622_v15 = vld [vmem:[#allocation16 + $0xc30] sm:$0xf0] }
 0x605   :  { %v15909_v27 = vor.u32 %v17378_v26, %v15908_v44  ;;  %v14828_v44 = vld [vmem:[#allocation16 + $0x5d8] sm:$0xf] }
 0x606   :  { %10608 = vmatpush.bf16.msra.mxu0 %v15181_v38  ;;  %v15469_v38 = vor.u32 %v17267_v53, %v15468_v55  ;;  %10523 = vmatpush.bf16.msra.mxu2 %v15721_v61  ;;  %v15654_v55 = vld [vmem:[#allocation16 + $0xc70] sm:$0xf0]  ;;  %v14254_v61 = vld [vmem:[#allocation16 + $0x178] sm:$0xf0]  ;;  %v17107_v26 = vld [vmem:[#allocation16 + $0x5f4] sm:$0xf0] }
 0x607   :  { %v14257_v59 = vor.u32 %v16959_v62, %v14254_v61  ;;  %v14829_v62 = vor.u32 %v17107_v26, %v14828_v44  ;;  %v17158_v61 = vld [vmem:[#allocation16 + $0x794] sm:$0xf]  ;;  %v14764_v44 = vld [vmem:[#allocation16 + $0x558] sm:$0xf] }
 0x608   :  { %10620 = vmatpush.bf16.msra.mxu1 %v15501_v21  ;;  %10425 = vmatpush.bf16.msra.mxu3 %v15973_v7  ;;  %v10150_v6 = vpop.f32.mrf.mxu3  ;;  %v10248_v21 = vpop.f32.mrf.mxu2  ;;  %v17251_v7 = vld [vmem:[#allocation16 + $0xa74] sm:$0xf0] }
 0x609   :  { %v10151_v53 = vadd.f32 %v10150_v6, %v18657_v45  ;;  %v18712_v10 = vadd.f32 %v10248_v21, %v18649_v33  ;;  %v15657_v45 = vor.u32 %v17310_v11, %v15654_v55  ;;  %v17302_v33 = vld [vmem:[#allocation16 + $0xc14] sm:$0xf]  ;;  %v15405_v32 = vor.u32 %v17251_v7, %v15404_v29  ;;  %v14574_v21 = vld [vmem:[#allocation16 + $0x3f8] sm:$0xf0]  ;;  %v17091_v26 = vld [vmem:[#allocation16 + $0x574] sm:$0xf0] }
 0x60a   :  { %10609 = vmatpush.bf16.msra.mxu0 %v15149_v58  ;;  %v15437_v58 = vor.u32 %v17259_v47, %v15436_v54  ;;  %10524 = vmatpush.bf16.msra.mxu2 %v15689_v16  ;;  %v16951_v11 = vld [vmem:[#allocation16 + $0x11c] sm:$0xf] }
 0x60b   :  { %v10165_v54 = vadd.f32 %v18626_v5, %v10151_v53  ;;  %v17039_v5 = vld [vmem:[#allocation16 + $0x3dc] sm:$0xf]  ;;  %v15625_v53 = vor.u32 %v17302_v33, %v15622_v15 }
 0x60c   :  { %10621 = vmatpush.bf16.msra.mxu1 %v15469_v38  ;;  %10426 = vmatpush.bf16.msra.mxu3 %v15941_v42  ;;  %v15876_v38 = vld [vmem:[#allocation16 + $0xe10] sm:$0xf]  ;;  %v15078_v42 = vld [vmem:[#allocation16 + $0x7f0] sm:$0xf0]  ;;  %v14222_v55 = vld [vmem:[#allocation16 + $0x138] sm:$0xf0] }
 0x60d   :  { %v10179_v16 = vadd.f32 %v18631_v30, %v10165_v54  ;;  %v15877_v6 = vor.u32 %v17370_v41, %v15876_v38  ;;  %v14577_v38 = vor.u32 %v17039_v5, %v14574_v21  ;;  %v14225_v41 = vor.u32 %v16951_v11, %v14222_v55  ;;  %v14796_v54 = vld [vmem:[#allocation16 + $0x598] sm:$0xf]  ;;  %v17031_v33 = vld [vmem:[#allocation16 + $0x39c] sm:$0xf] }
 0x60e   :  { %10610 = vmatpush.bf16.msra.mxu0 %v15117_v63  ;;  %v10348_v63 = vpop.f32.mrf.mxu1  ;;  %10525 = vmatpush.bf16.msra.mxu2 %v15657_v45  ;;  %v17099_v45 = vld [vmem:[#allocation16 + $0x5b4] sm:$0xf0]  ;;  %v16943_v15 = vld [vmem:[#allocation16 + $0xdc] sm:$0xf] }
 0x60f   :  { %v18716_v47 = vadd.f32 %v10348_v63, %v10335_v50  ;;  %v15081_v50 = vor.u32 %v17166_v34, %v15078_v42  ;;  %v15046_v63 = vld [vmem:[#allocation16 + $0x7b0] sm:$0xf0]  ;;  %v17023_v5 = vld [vmem:[#allocation16 + $0x35c] sm:$0xf] }
 0x610   :  { %10622 = vmatpush.bf16.msra.mxu1 %v15437_v58  ;;  %10427 = vmatpush.bf16.msra.mxu3 %v15909_v27  ;;  %v18720_v58 = vadd.f32 %v18694_v25, %v10179_v16  ;;  %v10152_v29 = vpop.f32.mrf.mxu3  ;;  %v14542_v25 = vld [vmem:[#allocation16 + $0x3b8] sm:$0xf0]  ;;  %v15014_v34 = vld [vmem:[#allocation16 + $0x770] sm:$0xf0] }
 0x611   :  { %10611 = vmatmul.bf16.vlgmr.msra.gmra.mxu0 %v18433_v19  ;;  %v10153_v30 = vadd.f32 %v10152_v29, %v18665_v17  ;;  %v14797_v17 = vor.u32 %v17099_v45, %v14796_v54  ;;  %v14545_v42 = vor.u32 %v17031_v33, %v14542_v25  ;;  %v14158_v21 = vld [vmem:[#allocation16 + $0xb8] sm:$0xf0]  ;;  %v14982_v29 = vld [vmem:[#allocation16 + $0x730] sm:$0xf0] }
 0x612   :  { %10659 = vmatpush.bf16.msrb.mxu0 %v14321_v39  ;;  %v15372_v39 = vld [vmem:[#allocation16 + $0xa18] sm:$0xf]  ;;  %10526 = vmatpush.bf16.msra.mxu2 %v15625_v53  ;;  %v14765_v53 = vor.u32 %v17091_v26, %v14764_v44  ;;  %v14950_v45 = vld [vmem:[#allocation16 + $0x6f0] sm:$0xf0] }
 0x613   :  { %v15373_v7 = vor.u32 %v17243_v22, %v15372_v39  ;;  %v10167_v39 = vadd.f32 %v18633_v8, %v10153_v30  ;;  %v15049_v22 = vor.u32 %v17158_v61, %v15046_v63  ;;  %v14510_v8 = vld [vmem:[#allocation16 + $0x378] sm:$0xf0]  ;;  %v17126_v26 = vld [vmem:[#allocation16 + $0x694] sm:$0xf] }
 0x614   :  { %10623 = vmatpush.bf16.msra.mxu1 %v15405_v32  ;;  %10428 = vmatpush.bf16.msra.mxu3 %v15877_v6  ;;  %v14190_v32 = vld [vmem:[#allocation16 + $0xf8] sm:$0xf0] }
 0x615   :  { %v10181_v16 = vadd.f32 %v18637_v35, %v10167_v39  ;;  %10527 = vmatmul.bf16.vlgmr.msra.gmra.mxu2 %v18538_v14  ;;  %v16935_v6 = vld [vmem:[#allocation16 + $0x9c] sm:$0xf]  ;;  %v14513_v35 = vor.u32 %v17023_v5, %v14510_v8  ;;  %v14918_v5 = vld [vmem:[#allocation16 + $0x6b0] sm:$0xf0] }
 0x616   :  { %10660 = vmatpush.bf16.msrb.mxu0 %v14289_v60  ;;  %v10250_v60 = vpop.f32.mrf.mxu2  ;;  %10575 = vmatpush.bf16.msrb.mxu2 %v14829_v62  ;;  %v17083_v62 = vld [vmem:[#allocation16 + $0x534] sm:$0xf0]  ;;  %v17015_v61 = vld [vmem:[#allocation16 + $0x31c] sm:$0xf] }
 0x617   :  { %v18724_v27 = vadd.f32 %v10250_v60, %v18659_v31  ;;  %v17150_v31 = vld [vmem:[#allocation16 + $0x754] sm:$0xf]  ;;  %10429 = vmatmul.bf16.vlgmr.msra.gmra.mxu3 %v18562_v28  ;;  %v18732_v55 = vadd.f32 %v18704_v23, %v10181_v16  ;;  %v14161_v60 = vor.u32 %v16935_v6, %v14158_v21  ;;  %v14478_v63 = vld [vmem:[#allocation16 + $0x338] sm:$0xf0]  ;;  %v14668_v6 = vld [vmem:[#allocation16 + $0x498] sm:$0xf] }
 0x618   :  { %10477 = vmatpush.bf16.msrb.mxu3 %v15081_v50  ;;  %10624 = vmatpush.bf16.msra.mxu1 %v15373_v7  ;;  %v15017_v11 = vor.u32 %v17150_v31, %v15014_v34  ;;  %v17142_v50 = vld [vmem:[#allocation16 + $0x714] sm:$0xf]  ;;  %v14732_v7 = vld [vmem:[#allocation16 + $0x518] sm:$0xf]  ;;  %v16927_v30 = vld [vmem:[#allocation16 + $0x5c] sm:$0xf]  ;;  %v14481_v33 = vor.u32 %v17015_v61, %v14478_v63 }
 0x619   :  { %v14733_v54 = vor.u32 %v17083_v62, %v14732_v7  ;;  %v17134_v23 = vld [vmem:[#allocation16 + $0x6d4] sm:$0xf]  ;;  %v17007_v39 = vld [vmem:[#allocation16 + $0x2dc] sm:$0xf]  ;;  %v17067_v21 = vld [vmem:[#allocation16 + $0x4b4] sm:$0xf0] }
 0x61a   :  { %10661 = vmatpush.bf16.msrb.mxu0 %v14257_v59  ;;  %v14193_v59 = vor.u32 %v16943_v15, %v14190_v32  ;;  %10576 = vmatpush.bf16.msrb.mxu2 %v14797_v17  ;;  %v14700_v15 = vld [vmem:[#allocation16 + $0x4d8] sm:$0xf]  ;;  %v16919_v17 = vld [vmem:[#allocation16 + $0x1c] sm:$0xf]  ;;  %v14953_v34 = vor.u32 %v17134_v23, %v14950_v45  ;;  %v10791_v7 = vperm.slane %v18676_v18, 2  ;;  %v14669_v62 = vor.u32 %v17067_v21, %v14668_v6 }
 0x61b   :  { %10625 = vmatmul.bf16.vlgmr.msra.gmra.mxu1 %v18486_v36  ;;  %v17075_v32 = vld [vmem:[#allocation16 + $0x4f4] sm:$0xf0]  ;;  %v14094_v31 = vld [vmem:[#allocation16 + $0x38] sm:$0xf0]  ;;  %v17118_v61 = vld [vmem:[#allocation16 + $0x654] sm:$0xf] }
 0x61c   :  { %10673 = vmatpush.bf16.msrb.mxu1 %v14577_v38  ;;  %10478 = vmatpush.bf16.msrb.mxu3 %v15049_v22  ;;  %v14126_v38 = vld [vmem:[#allocation16 + $0x78] sm:$0xf0]  ;;  %v14701_v44 = vor.u32 %v17075_v32, %v14700_v15  ;;  %v14097_v8 = vor.u32 %v16919_v17, %v14094_v31  ;;  %v14886_v63 = vld [vmem:[#allocation16 + $0x670] sm:$0xf0]  ;;  %v17059_v23 = vld [vmem:[#allocation16 + $0x474] sm:$0xf0] }
 0x61d   :  { %v14129_v25 = vor.u32 %v16927_v30, %v14126_v38  ;;  %v14446_v22 = vld [vmem:[#allocation16 + $0x2f8] sm:$0xf0]  ;;  %v18735_v30 = vpop.f32.mrf.mxu0  ;;  %v10206_v38 = vpop.f32.mrf.mxu3  ;;  %v17110_v17 = vld [vmem:[#allocation16 + $0x614] sm:$0xf] }
 0x61e   :  { %10662 = vmatpush.bf16.msrb.mxu0 %v14225_v41  ;;  %v14985_v41 = vor.u32 %v17142_v50, %v14982_v29  ;;  %10577 = vmatpush.bf16.msrb.mxu2 %v14765_v53  ;;  %v14449_v16 = vor.u32 %v17007_v39, %v14446_v22  ;;  %v16999_v53 = vld [vmem:[#allocation16 + $0x29c] sm:$0xf]  ;;  %v14921_v29 = vor.u32 %v17126_v26, %v14918_v5  ;;  %v14854_v31 = vld [vmem:[#allocation16 + $0x630] sm:$0xf0] }
 0x61f   :  { %v14414_v50 = vld [vmem:[#allocation16 + $0x2b8] sm:$0xf0]  ;;  %v14889_v22 = vor.u32 %v17118_v61, %v14886_v63 }
 0x620   :  { %10674 = vmatpush.bf16.msrb.mxu1 %v14545_v42  ;;  %10479 = vmatpush.bf16.msrb.mxu3 %v15017_v11  ;;  %v17231_v42 = vld [vmem:[#allocation16 + $0x9dc] sm:$0xf] }
 0x621   :  { %v16991_v45 = vld [vmem:[#allocation16 + $0x25c] sm:$0xf] }
 0x622   :  { %10663 = vmatpush.bf16.msrb.mxu0 %v14193_v59  ;;  %v15342_v59 = vld [vmem:[#allocation16 + $0x9f8] sm:$0xf0]  ;;  %10578 = vmatpush.bf16.msrb.mxu2 %v14733_v54  ;;  %v14636_v54 = vld [vmem:[#allocation16 + $0x458] sm:$0xf] }
 0x623   :  { %v15345_v11 = vor.u32 %v17231_v42, %v15342_v59  ;;  %v14382_v15 = vld [vmem:[#allocation16 + $0x278] sm:$0xf0]  ;;  %v14637_v59 = vor.u32 %v17059_v23, %v14636_v54 }
 0x624   :  { %10675 = vmatpush.bf16.msrb.mxu1 %v14513_v35  ;;  %10480 = vmatpush.bf16.msrb.mxu3 %v14985_v41  ;;  %v17223_v35 = vld [vmem:[#allocation16 + $0x99c] sm:$0xf]  ;;  %v14417_v41 = vor.u32 %v16999_v53, %v14414_v50  ;;  %v14385_v5 = vor.u32 %v16991_v45, %v14382_v15  ;;  %v17363_v53 = vld [vmem:[#allocation16 + $0xdf4] sm:$0xf0]  ;;  %v17414_v45 = vld [vmem:[#allocation16 + $0xf94] sm:$0xf] }
 0x625   :  { %v17215_v32 = vld [vmem:[#allocation16 + $0x95c] sm:$0xf] }
 0x626   :  { %10664 = vmatpush.bf16.msrb.mxu0 %v14161_v60  ;;  %v15310_v60 = vld [vmem:[#allocation16 + $0x9b8] sm:$0xf0]  ;;  %10579 = vmatpush.bf16.msrb.mxu2 %v14701_v44  ;;  %v17051_v44 = vld [vmem:[#allocation16 + $0x434] sm:$0xf0] }
 0x627   :  { %v15278_v39 = vld [vmem:[#allocation16 + $0x978] sm:$0xf0] }
 0x628   :  { %10676 = vmatpush.bf16.msrb.mxu1 %v14481_v33  ;;  %10481 = vmatpush.bf16.msrb.mxu3 %v14953_v34  ;;  %v10207_v33 = vadd.f32 %v10206_v38, %v18720_v58  ;;  %v14604_v34 = vld [vmem:[#allocation16 + $0x418] sm:$0xf]  ;;  %v16983_v26 = vld [vmem:[#allocation16 + $0x21c] sm:$0xf]  ;;  %v15281_v21 = vor.u32 %v17215_v32, %v15278_v39 }
 0x629   :  { %v14350_v58 = vld [vmem:[#allocation16 + $0x238] sm:$0xf0]  ;;  %v14605_v63 = vor.u32 %v17051_v44, %v14604_v34  ;;  %v15820_v39 = vld [vmem:[#allocation16 + $0xd98] sm:$0xf] }
 0x62a   :  { %10665 = vmatpush.bf16.msrb.mxu0 %v14129_v25  ;;  %v15313_v25 = vor.u32 %v17223_v35, %v15310_v60  ;;  %v10773_v42 = vmax.f32 %v10207_v33, 0.0  ;;  %10580 = vmatpush.bf16.msrb.mxu2 %v14669_v62  ;;  %v17295_v50 = vld [vmem:[#allocation16 + $0xbdc] sm:$0xf]  ;;  %v14353_v54 = vor.u32 %v16983_v26, %v14350_v58  ;;  %v16070_v33 = vld [vmem:[#allocation16 + $0xfb0] sm:$0xf0] }
 0x62b   :  { %v15598_v35 = vld [vmem:[#allocation16 + $0xbf8] sm:$0xf0]  ;;  %v16073_v44 = vor.u32 %v17414_v45, %v16070_v33  ;;  %v17406_v26 = vld [vmem:[#allocation16 + $0xf54] sm:$0xf] }
 0x62c   :  { %10677 = vmatpush.bf16.msrb.mxu1 %v14449_v16  ;;  %10482 = vmatpush.bf16.msrb.mxu3 %v14921_v29  ;;  %v17422_v16 = vld [vmem:[#allocation16 + $0xfd4] sm:$0xf]  ;;  %v10807_v6 = vmul.f32 %v10791_v7, %v10773_v42  ;;  %v18741_v29 = vpop.f32.mrf.mxu1  ;;  %v17207_v60 = vld [vmem:[#allocation16 + $0x91c] sm:$0xf]  ;;  %v15601_v15 = vor.u32 %v17295_v50, %v15598_v35 }
 0x62d   :  { %v15246_v62 = vld [vmem:[#allocation16 + $0x938] sm:$0xf0] }
 0x62e   :  { %10666 = vmatpush.bf16.msrb.mxu0 %v14097_v8  ;;  %v16102_v8 = vld [vmem:[#allocation16 + $0xff0] sm:$0xf0]  ;;  %v18744_v61 = vadd.f32 %v18690_v57, %v10807_v6  ;;  %10581 = vmatpush.bf16.msrb.mxu2 %v14637_v59  ;;  %v15249_v32 = vor.u32 %v17207_v60, %v15246_v62  ;;  %v18749_v57 = vpop.f32.mrf.mxu0  ;;  %v17199_v34 = vld [vmem:[#allocation16 + $0x8dc] sm:$0xf]  ;;  %v18751_v59 = vpop.f32.mrf.mxu2  ;;  %v17347_v6 = vld [vmem:[#allocation16 + $0xd74] sm:$0xf0] }
 0x62f   :  { %v16105_v38 = vor.u32 %v17422_v16, %v16102_v8  ;;  %v15214_v42 = vld [vmem:[#allocation16 + $0x8f8] sm:$0xf0]  ;;  %v15788_v8 = vld [vmem:[#allocation16 + $0xd58] sm:$0xf]  ;;  %v17398_v62 = vld [vmem:[#allocation16 + $0xf14] sm:$0xf] }
 0x630   :  { %10678 = vmatpush.bf16.msrb.mxu1 %v14417_v41  ;;  %10483 = vmatpush.bf16.msrb.mxu3 %v14889_v22  ;;  %v10208_v41 = vpop.f32.mrf.mxu3  ;;  %v17355_v22 = vld [vmem:[#allocation16 + $0xdb4] sm:$0xf0]  ;;  %v15217_v16 = vor.u32 %v17199_v34, %v15214_v42  ;;  %v15182_v50 = vld [vmem:[#allocation16 + $0x8b8] sm:$0xf0]  ;;  %v15789_v60 = vor.u32 %v17347_v6, %v15788_v8  ;;  %v15974_v34 = vld [vmem:[#allocation16 + $0xef0] sm:$0xf0] }
 0x631   :  { %10667 = vmatmul.bf16.vlgmr.msrb.gmra.mxu0 %v18411_v13  ;;  %v14857_v13 = vor.u32 %v17110_v17, %v14854_v31  ;;  %v17287_v17 = vld [vmem:[#allocation16 + $0xb9c] sm:$0xf] }
 0x632   :  { %10715 = vmatpush.bf16.msra.mxu0 %v15345_v11  ;;  %v15852_v11 = vld [vmem:[#allocation16 + $0xdd8] sm:$0xf]  ;;  %v15566_v31 = vld [vmem:[#allocation16 + $0xbb8] sm:$0xf0]  ;;  %10582 = vmatpush.bf16.msrb.mxu2 %v14605_v63  ;;  %v16006_v63 = vld [vmem:[#allocation16 + $0xf30] sm:$0xf0] }
 0x633   :  { %v15853_v23 = vor.u32 %v17363_v53, %v15852_v11  ;;  %v15569_v58 = vor.u32 %v17287_v17, %v15566_v31  ;;  %v15534_v11 = vld [vmem:[#allocation16 + $0xb78] sm:$0xf0]  ;;  %v17390_v31 = vld [vmem:[#allocation16 + $0xed4] sm:$0xf] }
 0x634   :  { %10679 = vmatpush.bf16.msrb.mxu1 %v14385_v5  ;;  %10484 = vmatpush.bf16.msrb.mxu3 %v14857_v13  ;;  %v16038_v5 = vld [vmem:[#allocation16 + $0xf70] sm:$0xf0]  ;;  %v17191_v53 = vld [vmem:[#allocation16 + $0x89c] sm:$0xf]  ;;  %v18756_v35 = vpop.f32.mrf.mxu1 }
 0x635   :  { %10583 = vmatmul.bf16.vlgmr.msrb.gmra.mxu2 %v18480_v48  ;;  %v16041_v13 = vor.u32 %v17406_v26, %v16038_v5  ;;  %v17271_v45 = vld [vmem:[#allocation16 + $0xb1c] sm:$0xf]  ;;  %v15724_v26 = vld [vmem:[#allocation16 + $0xcd8] sm:$0xf] }
 0x636   :  { %10716 = vmatpush.bf16.msra.mxu0 %v15313_v25  ;;  %v18747_v25 = vadd.f32 %v10208_v41, %v18732_v55  ;;  %10631 = vmatpush.bf16.msra.mxu2 %v15853_v23  ;;  %v15821_v55 = vor.u32 %v17355_v22, %v15820_v39  ;;  %v15185_v41 = vor.u32 %v17191_v53, %v15182_v50  ;;  %v17339_v23 = vld [vmem:[#allocation16 + $0xd34] sm:$0xf0]  ;;  %v10444_v33 = vpop.f32.mrf.mxu0  ;;  %v15150_v39 = vld [vmem:[#allocation16 + $0x878] sm:$0xf0]  ;;  %v18759_v42 = vpop.f32.mrf.mxu2  ;;  %v17382_v50 = vld [vmem:[#allocation16 + $0xe94] sm:$0xf] }
 0x637   :  { %10485 = vmatmul.bf16.vlgmr.msrb.gmra.mxu3 %v18482_v1  ;;  %v16009_v22 = vor.u32 %v17398_v62, %v16006_v63  ;;  %v17331_v5 = vld [vmem:[#allocation16 + $0xcf4] sm:$0xf0]  ;;  %v17175_v8 = vld [vmem:[#allocation16 + $0x81c] sm:$0xf] }
 0x638   :  { %10533 = vmatpush.bf16.msra.mxu3 %v16105_v38  ;;  %10680 = vmatpush.bf16.msrb.mxu1 %v14353_v54  ;;  %v15756_v54 = vld [vmem:[#allocation16 + $0xd18] sm:$0xf]  ;;  %v15118_v6 = vld [vmem:[#allocation16 + $0x838] sm:$0xf0]  ;;  %v15725_v53 = vor.u32 %v17331_v5, %v15724_v26 }
 0x639   :  { %v15757_v17 = vor.u32 %v17339_v23, %v15756_v54  ;;  %v15121_v63 = vor.u32 %v17175_v8, %v15118_v6  ;;  %v17255_v54 = vld [vmem:[#allocation16 + $0xa9c] sm:$0xf]  ;;  %v17366_v6 = vld [vmem:[#allocation16 + $0xe14] sm:$0xf] }
 0x63a   :  { %10717 = vmatpush.bf16.msra.mxu0 %v15281_v21  ;;  %v17279_v21 = vld [vmem:[#allocation16 + $0xb5c] sm:$0xf]  ;;  %10632 = vmatpush.bf16.msra.mxu2 %v15821_v55 }
 0x63b   :  { %10681 = vmatmul.bf16.vlgmr.msrb.gmra.mxu1 %v18319_v20  ;;  %v15537_v38 = vor.u32 %v17279_v21, %v15534_v11  ;;  %v7304_v20 = vperm.slane %v18701_v56, 5  ;;  %v15977_v56 = vor.u32 %v17390_v31, %v15974_v34  ;;  %v15438_v23 = vld [vmem:[#allocation16 + $0xab8] sm:$0xf0]  ;;  %v15660_v34 = vld [vmem:[#allocation16 + $0xc58] sm:$0xf] }
 0x63c   :  { %10729 = vmatpush.bf16.msra.mxu1 %v15601_v15  ;;  %10534 = vmatpush.bf16.msra.mxu3 %v16073_v44  ;;  %v15502_v15 = vld [vmem:[#allocation16 + $0xb38] sm:$0xf0]  ;;  %v10458_v11 = vpop.f32.mrf.mxu1  ;;  %v15441_v31 = vor.u32 %v17255_v54, %v15438_v23 }
 0x63d   :  { %v15505_v44 = vor.u32 %v17271_v45, %v15502_v15  ;;  %v10445_v21 = vadd.f32 %v10444_v33, %v7304_v20  ;;  %v17247_v5 = vld [vmem:[#allocation16 + $0xa5c] sm:$0xf] }
 0x63e   :  { %10718 = vmatpush.bf16.msra.mxu0 %v15249_v32  ;;  %v17183_v32 = vld [vmem:[#allocation16 + $0x85c] sm:$0xf]  ;;  %10633 = vmatpush.bf16.msra.mxu2 %v15789_v60  ;;  %v10446_v33 = vpop.f32.mrf.mxu0 }
 0x63f   :  { %v15153_v55 = vor.u32 %v17183_v32, %v15150_v39  ;;  %v18761_v60 = vadd.f32 %v10458_v11, %v10445_v21  ;;  %v17374_v32 = vld [vmem:[#allocation16 + $0xe54] sm:$0xf]  ;;  %v14830_v54 = vld [vmem:[#allocation16 + $0x5f8] sm:$0xf0] }
 0x640   :  { %10730 = vmatpush.bf16.msra.mxu1 %v15569_v58  ;;  %10535 = vmatpush.bf16.msra.mxu3 %v16041_v13  ;;  %v17263_v58 = vld [vmem:[#allocation16 + $0xadc] sm:$0xf]  ;;  %v15942_v13 = vld [vmem:[#allocation16 + $0xeb0] sm:$0xf0] }
 0x641   :  { %v15945_v45 = vor.u32 %v17382_v50, %v15942_v13  ;;  %v15910_v39 = vld [vmem:[#allocation16 + $0xe70] sm:$0xf0]  ;;  %v15628_v50 = vld [vmem:[#allocation16 + $0xc18] sm:$0xf] }
 0x642   :  { %10719 = vmatpush.bf16.msra.mxu0 %v15217_v16  ;;  %v15470_v16 = vld [vmem:[#allocation16 + $0xaf8] sm:$0xf0]  ;;  %10634 = vmatpush.bf16.msra.mxu2 %v15757_v17  ;;  %v10360_v17 = vpop.f32.mrf.mxu2  ;;  %v15913_v8 = vor.u32 %v17374_v32, %v15910_v39  ;;  %v17307_v13 = vld [vmem:[#allocation16 + $0xc34] sm:$0xf0]  ;;  %v18902_v39 = vperm.slane %v18531_v0, 1 }
 0x643   :  { %v15473_v62 = vor.u32 %v17263_v58, %v15470_v16  ;;  %v18765_v26 = vadd.f32 %v10360_v17, %v18708_v4  ;;  %v15406_v58 = vld [vmem:[#allocation16 + $0xa78] sm:$0xf0]  ;;  %v10447_v16 = vadd.f32 %v10446_v33, %v7304_v20  ;;  %v17171_v20 = vld [vmem:[#allocation16 + $0x7f4] sm:$0xf0] }
 0x644   :  { %10731 = vmatpush.bf16.msra.mxu1 %v15537_v38  ;;  %10536 = vmatpush.bf16.msra.mxu3 %v16009_v22  ;;  %v15692_v38 = vld [vmem:[#allocation16 + $0xc98] sm:$0xf]  ;;  %v10262_v22 = vpop.f32.mrf.mxu3  ;;  %v15409_v4 = vor.u32 %v17247_v5, %v15406_v58  ;;  %v17095_v58 = vld [vmem:[#allocation16 + $0x59c] sm:$0xf] }
 0x646   :  { %10720 = vmatpush.bf16.msra.mxu0 %v15185_v41  ;;  %v17323_v41 = vld [vmem:[#allocation16 + $0xcb4] sm:$0xf0]  ;;  %10635 = vmatpush.bf16.msra.mxu2 %v15725_v53  ;;  %v15878_v53 = vld [vmem:[#allocation16 + $0xe30] sm:$0xf0] }
 0x647   :  { %v15693_v15 = vor.u32 %v17323_v41, %v15692_v38  ;;  %v15374_v38 = vld [vmem:[#allocation16 + $0xa38] sm:$0xf0]  ;;  %v15881_v23 = vor.u32 %v17366_v6, %v15878_v53 }
 0x648   :  { %10732 = vmatpush.bf16.msra.mxu1 %v15505_v44  ;;  %10537 = vmatpush.bf16.msra.mxu3 %v15977_v56  ;;  %v17315_v44 = vld [vmem:[#allocation16 + $0xc74] sm:$0xf0]  ;;  %v10460_v56 = vpop.f32.mrf.mxu1  ;;  %v17103_v41 = vld [vmem:[#allocation16 + $0x5dc] sm:$0xf] }
 0x649   :  { %v15661_v11 = vor.u32 %v17315_v44, %v15660_v34  ;;  %v14833_v34 = vor.u32 %v17103_v41, %v14830_v54  ;;  %v15052_v44 = vld [vmem:[#allocation16 + $0x798] sm:$0xf]  ;;  %v17071_v54 = vld [vmem:[#allocation16 + $0x4dc] sm:$0xf] }
 0x64a   :  { %10721 = vmatpush.bf16.msra.mxu0 %v15153_v55  ;;  %v10263_v55 = vadd.f32 %v10262_v22, %v18712_v10  ;;  %10636 = vmatpush.bf16.msra.mxu2 %v15693_v15  ;;  %v18769_v10 = vadd.f32 %v10460_v56, %v10447_v16  ;;  %v18901_v15 = vperm.slane %v18531_v0, 0  ;;  %v9999_v22 = vadd.f32 %v18589_v2, %v18902_v39  ;;  %v14798_v16 = vld [vmem:[#allocation16 + $0x5b8] sm:$0xf0]  ;;  %v17139_v41 = vld [vmem:[#allocation16 + $0x6f4] sm:$0xf0] }
 0x64b   :  { %v17087_v56 = vld [vmem:[#allocation16 + $0x55c] sm:$0xf]  ;;  %v14924_v39 = vld [vmem:[#allocation16 + $0x698] sm:$0xf] }
 0x64c   :  { %10733 = vmatpush.bf16.msra.mxu1 %v15473_v62  ;;  %10538 = vmatpush.bf16.msra.mxu3 %v15945_v45  ;;  %v10277_v21 = vadd.f32 %v18681_v9, %v10263_v55  ;;  %v17239_v62 = vld [vmem:[#allocation16 + $0xa1c] sm:$0xf]  ;;  %v9887_v32 = vadd.f32 %v18560_v12, %v18901_v15  ;;  %v10264_v17 = vpop.f32.mrf.mxu3  ;;  %v17163_v55 = vld [vmem:[#allocation16 + $0x7b4] sm:$0xf0]  ;;  %v10013_v12 = vadd.f32 %v18591_v49, %v9999_v22 }
 0x64d   :  { %v10265_v5 = vadd.f32 %v10264_v17, %v18724_v27  ;;  %v15053_v2 = vor.u32 %v17163_v55, %v15052_v44  ;;  %v14801_v27 = vor.u32 %v17095_v58, %v14798_v16  ;;  %v17063_v22 = vld [vmem:[#allocation16 + $0x49c] sm:$0xf]  ;;  %v18909_v16 = vld [vmem:[#allocation33_spill] sm:$0xff] }
 0x64e   :  { %10722 = vmatpush.bf16.msra.mxu0 %v15121_v63  ;;  %v15084_v63 = vld [vmem:[#allocation16 + $0x7d8] sm:$0xf]  ;;  %v10291_v9 = vadd.f32 %v18688_v37, %v10277_v21  ;;  %10637 = vmatpush.bf16.msra.mxu2 %v15661_v11  ;;  %v15377_v37 = vor.u32 %v17239_v62, %v15374_v38  ;;  %v10027_v6 = vadd.f32 %v18628_v46, %v10013_v12  ;;  %v14766_v11 = vld [vmem:[#allocation16 + $0x578] sm:$0xf0] }
 0x64f   :  { %v15085_v45 = vor.u32 %v17171_v20, %v15084_v63  ;;  %v10279_v0 = vadd.f32 %v18692_v43, %v10265_v5  ;;  %v15020_v21 = vld [vmem:[#allocation16 + $0x758] sm:$0xf]  ;;  %v17079_v62 = vld [vmem:[#allocation16 + $0x51c] sm:$0xf]  ;;  %v18908_v5 = vld [vmem:[#allocation30_spill] sm:$0xff] }
 0x650   :  { %10734 = vmatpush.bf16.msra.mxu1 %v15441_v31  ;;  %10539 = vmatpush.bf16.msra.mxu3 %v15913_v8  ;;  %v18773_v33 = vadd.f32 %v18751_v59, %v10291_v9  ;;  %v10362_v31 = vpop.f32.mrf.mxu2  ;;  %v9901_v8 = vadd.f32 %v18564_v24, %v9887_v32  ;;  %v10041_v53 = vadd.f32 %v18674_v51, %v10027_v6  ;;  %v14734_v63 = vld [vmem:[#allocation16 + $0x538] sm:$0xf0] }
 0x651   :  { %10723 = vmatmul.bf16.vlgmr.msra.gmra.mxu0 %v18433_v19  ;;  %v15629_v19 = vor.u32 %v17307_v13, %v15628_v50  ;;  %v18783_v59 = vadd.f32 %v10362_v31, %v18716_v47  ;;  %v17155_v47 = vld [vmem:[#allocation16 + $0x774] sm:$0xf0]  ;;  %v10293_v49 = vadd.f32 %v18699_v3, %v10279_v0  ;;  %v14769_v50 = vor.u32 %v17087_v56, %v14766_v11  ;;  %v14702_v9 = vld [vmem:[#allocation16 + $0x4f8] sm:$0xf0] }
 0x652   :  { %v9915_v43 = vadd.f32 %v18608_v52, %v9901_v8  ;;  %v15021_v24 = vor.u32 %v17155_v47, %v15020_v21  ;;  %v14988_v13 = vld [vmem:[#allocation16 + $0x718] sm:$0xf]  ;;  %v18903_v52 = vld [vmem:[#allocation28_spill] sm:$0xff]  ;;  %v14737_v38 = vor.u32 %v17079_v62, %v14734_v63  ;;  %v14705_v32 = vor.u32 %v17071_v54, %v14702_v9  ;;  %v14670_v17 = vld [vmem:[#allocation16 + $0x4b8] sm:$0xf0] }
 0x653   :  { %10638 = vmatpush.bf16.msra.mxu2 %v15629_v19  ;;  %v18796_v46 = vadd.f32 %v18759_v42, %v10293_v49  ;;  %v10055_v20 = vadd.f32 %v18903_v52, %v10041_v53  ;;  %v18904_v42 = vld [vmem:[#allocation26_spill] sm:$0xff]  ;;  %v18905_v19 = vld [vmem:[#allocation29_spill] sm:$0xff]  ;;  %v18906_v31 = vld [vmem:[#allocation27_spill] sm:$0xff]  ;;  %v14673_v0 = vor.u32 %v17063_v22, %v14670_v17  ;;  %v18911_v9 = vperm.slane %v18676_v18, 1 }
 0x654   :  { %10735 = vmatpush.bf16.msra.mxu1 %v15409_v4  ;;  %10540 = vmatpush.bf16.msra.mxu3 %v15881_v23  ;;  %v17147_v4 = vld [vmem:[#allocation16 + $0x734] sm:$0xf0]  ;;  %v9929_v3 = vadd.f32 %v18643_v40, %v9915_v43  ;;  %v14638_v21 = vld [vmem:[#allocation16 + $0x478] sm:$0xf0]  ;;  %v18910_v47 = vld [vmem:[#allocation32_spill] sm:$0xff] }
 0x655   :  { %v14989_v51 = vor.u32 %v17147_v4, %v14988_v13  ;;  %v17131_v40 = vld [vmem:[#allocation16 + $0x6b4] sm:$0xf0]  ;;  %v18808_v49 = vld [vmem:[#allocation19] sm:$0xff]  ;;  %v17047_v63 = vld [vmem:[#allocation16 + $0x41c] sm:$0xf] }
 0x656   :  { %10639 = vmatmul.bf16.vlgmr.msra.gmra.mxu2 %v18538_v14  ;;  %v9943_v23 = vadd.f32 %v18904_v42, %v9929_v3  ;;  %v14925_v55 = vor.u32 %v17131_v40, %v14924_v39  ;;  %v17123_v8 = vld [vmem:[#allocation16 + $0x674] sm:$0xf0]  ;;  %v10792_v43 = vperm.slane %v18808_v49, 3  ;;  %v14606_v3 = vld [vmem:[#allocation16 + $0x438] sm:$0xf0] }
 0x657   :  { %10687 = vmatpush.bf16.msrb.mxu2 %v14833_v34  ;;  %10541 = vmatmul.bf16.vlgmr.msra.gmra.mxu3 %v18562_v28  ;;  %v18907_v34 = vld [vmem:[#allocation31_spill] sm:$0xff]  ;;  %v10318_v6 = vpop.f32.mrf.mxu3 }
 0x658   :  { %10589 = vmatpush.bf16.msrb.mxu3 %v15085_v45  ;;  %10736 = vmatpush.bf16.msra.mxu1 %v15377_v37  ;;  %v10069_v45 = vadd.f32 %v18905_v19, %v10055_v20  ;;  %v9957_v37 = vadd.f32 %v18906_v31, %v9943_v23  ;;  %v10319_v11 = vadd.f32 %v10318_v6, %v18773_v33  ;;  %v17115_v62 = vld [vmem:[#allocation16 + $0x634] sm:$0xf0] }
 0x659   :  { %v16108_v52 = vld [vmem:[#allocation16 + $0xfd8] sm:$0xf]  ;;  %v14609_v19 = vor.u32 %v17047_v63, %v14606_v3 }
 0x65a   :  { %v10083_v44 = vadd.f32 %v18907_v34, %v10069_v45  ;;  %v9971_v58 = vadd.f32 %v18908_v5, %v9957_v37  ;;  %v10774_v13 = vmax.f32 %v10319_v11, 0.0  ;;  %v17427_v20 = vld [vmem:[#allocation16 + $0xff4] sm:$0xf0]  ;;  %v17351_v37 = vld [vmem:[#allocation16 + $0xd9c] sm:$0xf] }
 0x65b   :  { %10737 = vmatmul.bf16.vlgmr.msra.gmra.mxu1 %v18486_v36  ;;  %10688 = vmatpush.bf16.msrb.mxu2 %v14801_v27  ;;  %v14956_v36 = vld [vmem:[#allocation16 + $0x6d8] sm:$0xf]  ;;  %v17055_v27 = vld [vmem:[#allocation16 + $0x45c] sm:$0xf]  ;;  %v16109_v45 = vor.u32 %v17427_v20, %v16108_v52 }
 0x65c   :  { %10590 = vmatpush.bf16.msrb.mxu3 %v15053_v2  ;;  %v14957_v15 = vor.u32 %v17139_v41, %v14956_v36  ;;  %v10097_v12 = vadd.f32 %v18909_v16, %v10083_v44  ;;  %v14892_v2 = vld [vmem:[#allocation16 + $0x658] sm:$0xf]  ;;  %v9985_v56 = vadd.f32 %v18910_v47, %v9971_v58  ;;  %v14641_v4 = vor.u32 %v17055_v27, %v14638_v21  ;;  %v17359_v36 = vld [vmem:[#allocation16 + $0xddc] sm:$0xf]  ;;  %v18822_v44 = vpop.f32.mrf.mxu2 }
 0x65d   :  { %v14893_v53 = vor.u32 %v17123_v8, %v14892_v2  ;;  %v10808_v33 = vmul.f32 %v10792_v43, %v10774_v13  ;;  %v15854_v41 = vld [vmem:[#allocation16 + $0xdf8] sm:$0xf0]  ;;  %v16076_v39 = vld [vmem:[#allocation16 + $0xf98] sm:$0xf] }
 0x65e   :  { %v17419_v40 = vld [vmem:[#allocation16 + $0xfb4] sm:$0xf0]  ;;  %v15822_v34 = vld [vmem:[#allocation16 + $0xdb8] sm:$0xf0] }
 0x65f   :  { %10689 = vmatpush.bf16.msrb.mxu2 %v14769_v50  ;;  %v10780_v50 = vmax.f32 %v10097_v12, 0.0  ;;  %v18815_v23 = vadd.f32 %v18744_v61, %v10808_v33  ;;  %v16077_v5 = vor.u32 %v17419_v40, %v16076_v39  ;;  %v15825_v58 = vor.u32 %v17351_v37, %v15822_v34  ;;  %v16044_v16 = vld [vmem:[#allocation16 + $0xf58] sm:$0xf]  ;;  %v17335_v47 = vld [vmem:[#allocation16 + $0xd1c] sm:$0xf] }
 0x660   :  { %10591 = vmatpush.bf16.msrb.mxu3 %v15021_v24  ;;  %v14860_v24 = vld [vmem:[#allocation16 + $0x618] sm:$0xf]  ;;  %v17327_v13 = vld [vmem:[#allocation16 + $0xcdc] sm:$0xf] }
 0x661   :  { %v14861_v54 = vor.u32 %v17115_v62, %v14860_v24  ;;  %v10814_v42 = vmul.f32 %v18911_v9, %v10780_v50  ;;  %v17411_v12 = vld [vmem:[#allocation16 + $0xf74] sm:$0xf0]  ;;  %v17319_v52 = vld [vmem:[#allocation16 + $0xc9c] sm:$0xf] }
 0x662   :  { %v16045_v8 = vor.u32 %v17411_v12, %v16044_v16  ;;  %v16012_v27 = vld [vmem:[#allocation16 + $0xf18] sm:$0xf]  ;;  %v15694_v20 = vld [vmem:[#allocation16 + $0xcb8] sm:$0xf0] }
 0x663   :  { %10690 = vmatpush.bf16.msrb.mxu2 %v14737_v38  ;;  %v10781_v38 = vmax.f32 %v18747_v25, 0.0  ;;  %v18912_v25 = vperm.slane %v18676_v18, 0  ;;  %v17343_v18 = vld [vmem:[#allocation16 + $0xd5c] sm:$0xf]  ;;  %v17403_v21 = vld [vmem:[#allocation16 + $0xf34] sm:$0xf0] }
 0x664   :  { %10592 = vmatpush.bf16.msrb.mxu3 %v14989_v51  ;;  %v10779_v51 = vmax.f32 %v9985_v56, 0.0  ;;  %v15758_v56 = vld [vmem:[#allocation16 + $0xd38] sm:$0xf0]  ;;  %v16013_v11 = vor.u32 %v17403_v21, %v16012_v27  ;;  %v17395_v24 = vld [vmem:[#allocation16 + $0xef4] sm:$0xf0]  ;;  %v10418_v50 = vpop.f32.mrf.mxu2 }
 0x665   :  { %v10815_v17 = vmul.f32 %v10791_v7, %v10781_v38  ;;  %v15790_v7 = vld [vmem:[#allocation16 + $0xd78] sm:$0xf0]  ;;  %v15948_v63 = vld [vmem:[#allocation16 + $0xe98] sm:$0xf]  ;;  %v15697_v38 = vor.u32 %v17319_v52, %v15694_v20 }
 0x666   :  { %v10813_v22 = vmul.f32 %v18912_v25, %v10779_v51  ;;  %v15793_v6 = vor.u32 %v17343_v18, %v15790_v7  ;;  %v17387_v3 = vld [vmem:[#allocation16 + $0xeb4] sm:$0xf0]  ;;  %v17311_v9 = vld [vmem:[#allocation16 + $0xc5c] sm:$0xf] }
 0x667   :  { %10691 = vmatpush.bf16.msrb.mxu2 %v14705_v32  ;;  %v15857_v32 = vor.u32 %v17359_v36, %v15854_v41  ;;  %v15949_v51 = vor.u32 %v17387_v3, %v15948_v63  ;;  %v15916_v33 = vld [vmem:[#allocation16 + $0xe58] sm:$0xf]  ;;  %v15086_v37 = vld [vmem:[#allocation16 + $0x7f8] sm:$0xf0] }
 0x668   :  { %10593 = vmatpush.bf16.msrb.mxu3 %v14957_v15  ;;  %v10320_v15 = vpop.f32.mrf.mxu3  ;;  %v10830_v61 = vadd.f32 %v10814_v42, %v10813_v22  ;;  %v17379_v36 = vld [vmem:[#allocation16 + $0xe74] sm:$0xf0]  ;;  %v15662_v42 = vld [vmem:[#allocation16 + $0xc78] sm:$0xf0] }
 0x669   :  { %v10321_v31 = vadd.f32 %v10320_v15, %v18796_v46  ;;  %v15917_v15 = vor.u32 %v17379_v36, %v15916_v33  ;;  %v15665_v39 = vor.u32 %v17311_v9, %v15662_v42  ;;  %v15884_v40 = vld [vmem:[#allocation16 + $0xe18] sm:$0xf]  ;;  %v17303_v22 = vld [vmem:[#allocation16 + $0xc1c] sm:$0xf] }
 0x66a   :  { %v17371_v25 = vld [vmem:[#allocation16 + $0xe34] sm:$0xf0]  ;;  %v15054_v16 = vld [vmem:[#allocation16 + $0x7b8] sm:$0xf0] }
 0x66b   :  { %10692 = vmatpush.bf16.msrb.mxu2 %v14673_v0  ;;  %v10831_v0 = vadd.f32 %v10830_v61, %v10815_v17  ;;  %v15630_v17 = vld [vmem:[#allocation16 + $0xc38] sm:$0xf0]  ;;  %v15885_v61 = vor.u32 %v17371_v25, %v15884_v40 }
 0x66c   :  { %10594 = vmatpush.bf16.msrb.mxu3 %v14925_v55  ;;  %v10782_v55 = vmax.f32 %v10321_v31, 0.0  ;;  %v17167_v31 = vld [vmem:[#allocation16 + $0x7dc] sm:$0xf] }
 0x66d   :  { %v17151_v18 = vld [vmem:[#allocation16 + $0x75c] sm:$0xf] }
 0x66e   :  { %v10816_v2 = vmul.f32 %v10792_v43, %v10782_v55  ;;  %v15761_v43 = vor.u32 %v17335_v47, %v15758_v56  ;;  %v15022_v7 = vld [vmem:[#allocation16 + $0x778] sm:$0xf0] }
 0x66f   :  { %10693 = vmatpush.bf16.msrb.mxu2 %v14641_v4  ;;  %v15726_v4 = vld [vmem:[#allocation16 + $0xcf8] sm:$0xf0] }
 0x670   :  { %10595 = vmatpush.bf16.msrb.mxu3 %v14893_v53  ;;  %v18826_v46 = vadd.f32 %v10831_v0, %v10816_v2  ;;  %v15980_v53 = vld [vmem:[#allocation16 + $0xed8] sm:$0xf]  ;;  %v15729_v62 = vor.u32 %v17327_v13, %v15726_v4  ;;  %v17135_v21 = vld [vmem:[#allocation16 + $0x6dc] sm:$0xf] }
 0x671   :  { %v17127_v56 = vld [vmem:[#allocation16 + $0x69c] sm:$0xf] }
 0x672   :  { %v17423_v63 = vld [vmem:[#allocation16 + $0xfdc] sm:$0xf] }
 0x673   :  { %10694 = vmatpush.bf16.msrb.mxu2 %v14609_v19  ;;  %v16110_v3 = vld [vmem:[#allocation16 + $0xff8] sm:$0xf0] }
 0x674   :  { %10596 = vmatpush.bf16.msrb.mxu3 %v14861_v54  ;;  %v17415_v36 = vld [vmem:[#allocation16 + $0xf9c] sm:$0xf] }
 0x675   :  { %v17399_v25 = vld [vmem:[#allocation16 + $0xf1c] sm:$0xf] }
 0x676   :  { %10695 = vmatmul.bf16.vlgmr.msrb.gmra.mxu2 %v18480_v48  ;;  %v15981_v48 = vor.u32 %v17395_v24, %v15980_v53  ;;  %v17119_v53 = vld [vmem:[#allocation16 + $0x65c] sm:$0xf] }
 0x677   :  { %10743 = vmatpush.bf16.msra.mxu2 %v15857_v32  ;;  %10597 = vmatmul.bf16.vlgmr.msrb.gmra.mxu3 %v18482_v1  ;;  %v14894_v24 = vld [vmem:[#allocation16 + $0x678] sm:$0xf0] }
 0x678   :  { %10645 = vmatpush.bf16.msra.mxu3 %v16109_v45  ;;  %v10472_v54 = vpop.f32.mrf.mxu2 }
 0x679   :  { %v18830_v45 = vadd.f32 %v10472_v54, %v18761_v60  ;;  %v15089_v60 = vor.u32 %v17167_v31, %v15086_v37  ;;  %v15982_v31 = vld [vmem:[#allocation16 + $0xef8] sm:$0xf0] }
 0x67a   :  { %v10374_v41 = vpop.f32.mrf.mxu3 }
 0x67b   :  { %10744 = vmatpush.bf16.msra.mxu2 %v15825_v58  ;;  %v10375_v19 = vadd.f32 %v10374_v41, %v18765_v26  ;;  %v15633_v26 = vor.u32 %v17303_v22, %v15630_v17  ;;  %v16078_v41 = vld [vmem:[#allocation16 + $0xfb8] sm:$0xf0] }
 0x67c   :  { %10646 = vmatpush.bf16.msra.mxu3 %v16077_v5  ;;  %v16081_v42 = vor.u32 %v17415_v36, %v16078_v41  ;;  %v17391_v17 = vld [vmem:[#allocation16 + $0xedc] sm:$0xf] }
 0x67d   :  { %v10389_v32 = vadd.f32 %v18735_v30, %v10375_v19  ;;  %v17159_v30 = vld [vmem:[#allocation16 + $0x79c] sm:$0xf]  ;;  %v15985_v37 = vor.u32 %v17391_v17, %v15982_v31 }
 0x67e   :  { %v17407_v19 = vld [vmem:[#allocation16 + $0xf5c] sm:$0xf] }
 0x67f   :  { %10745 = vmatpush.bf16.msra.mxu2 %v15793_v6  ;;  %v10403_v34 = vadd.f32 %v18741_v29, %v10389_v32  ;;  %v15057_v29 = vor.u32 %v17159_v30, %v15054_v16  ;;  %v17143_v6 = vld [vmem:[#allocation16 + $0x71c] sm:$0xf] }
 0x680   :  { %10647 = vmatpush.bf16.msra.mxu3 %v16045_v8  ;;  %v10474_v58 = vpop.f32.mrf.mxu2  ;;  %v15025_v8 = vor.u32 %v17151_v18, %v15022_v7  ;;  %v15886_v30 = vld [vmem:[#allocation16 + $0xe38] sm:$0xf0]  ;;  %v10514_v7 = vpop.f32.mrf.mxu1 }
 0x681   :  { %v10417_v55 = vadd.f32 %v18822_v44, %v10403_v34  ;;  %v18837_v0 = vadd.f32 %v10474_v58, %v18769_v10  ;;  %v14990_v10 = vld [vmem:[#allocation16 + $0x738] sm:$0xf0] }
 0x682   :  { %v10376_v5 = vpop.f32.mrf.mxu3  ;;  %v14993_v27 = vor.u32 %v17143_v6, %v14990_v10  ;;  %v17383_v34 = vld [vmem:[#allocation16 + $0xe9c] sm:$0xf] }
 0x683   :  { %10746 = vmatpush.bf16.msra.mxu2 %v15761_v43  ;;  %v10377_v12 = vadd.f32 %v10376_v5, %v18783_v59  ;;  %v17367_v58 = vld [vmem:[#allocation16 + $0xe1c] sm:$0xf] }
 0x684   :  { %10648 = vmatpush.bf16.msra.mxu3 %v16013_v11  ;;  %v14926_v11 = vld [vmem:[#allocation16 + $0x6b8] sm:$0xf0]  ;;  %v15889_v16 = vor.u32 %v17367_v58, %v15886_v30 }
 0x685   :  { %v10391_v2 = vadd.f32 %v18749_v57, %v10377_v12  ;;  %v14958_v57 = vld [vmem:[#allocation16 + $0x6f8] sm:$0xf0]  ;;  %v14929_v43 = vor.u32 %v17127_v56, %v14926_v11 }
 0x686   :  { %v14961_v47 = vor.u32 %v17135_v21, %v14958_v57  ;;  %v10794_v21 = vperm.slane %v18808_v49, 5 }
 0x687   :  { %10747 = vmatpush.bf16.msra.mxu2 %v15729_v62  ;;  %v10405_v44 = vadd.f32 %v18756_v35, %v10391_v2  ;;  %v14862_v62 = vld [vmem:[#allocation16 + $0x638] sm:$0xf0] }
 0x688   :  { %10649 = vmatpush.bf16.msra.mxu3 %v15981_v48  ;;  %v17111_v48 = vld [vmem:[#allocation16 + $0x61c] sm:$0xf]  ;;  %v10516_v57 = vpop.f32.mrf.mxu1 }
 0x689   :  { %v10419_v59 = vadd.f32 %v10418_v50, %v10405_v44  ;;  %v14897_v50 = vor.u32 %v17119_v53, %v14894_v24  ;;  %v14865_v20 = vor.u32 %v17111_v48, %v14862_v62 }
 0x68b   :  { %10748 = vmatpush.bf16.msra.mxu2 %v15697_v38  ;;  %v16113_v38 = vor.u32 %v17423_v63, %v16110_v3 }
 0x68c   :  { %10650 = vmatpush.bf16.msra.mxu3 %v15949_v51 }
 0x68f   :  { %10749 = vmatpush.bf16.msra.mxu2 %v15665_v39 }
 0x690   :  { %10651 = vmatpush.bf16.msra.mxu3 %v15917_v15  ;;  %v16046_v15 = vld [vmem:[#allocation16 + $0xf78] sm:$0xf0] }
 0x691   :  { %v16049_v40 = vor.u32 %v17407_v19, %v16046_v15 }
 0x693   :  { %10750 = vmatpush.bf16.msra.mxu2 %v15633_v26 }
 0x694   :  { %10652 = vmatpush.bf16.msra.mxu3 %v15885_v61  ;;  %v15950_v61 = vld [vmem:[#allocation16 + $0xeb8] sm:$0xf0] }
 0x695   :  { %v15953_v26 = vor.u32 %v17383_v34, %v15950_v61 }
 0x696   :  { %10751 = vmatmul.bf16.vlgmr.msra.gmra.mxu2 %v18538_v14  ;;  %v10793_v14 = vperm.slane %v18808_v49, 4 }
 0x697   :  { %10653 = vmatmul.bf16.vlgmr.msra.gmra.mxu3 %v18562_v28 }
 0x698   :  { %10701 = vmatpush.bf16.msrb.mxu3 %v15089_v60  ;;  %v17375_v60 = vld [vmem:[#allocation16 + $0xe5c] sm:$0xf] }
 0x69a   :  { %v10430_v35 = vpop.f32.mrf.mxu3 }
 0x69b   :  { %v10431_v13 = vadd.f32 %v10430_v35, %v10417_v55  ;;  %v15918_v55 = vld [vmem:[#allocation16 + $0xe78] sm:$0xf0] }
 0x69c   :  { %10702 = vmatpush.bf16.msrb.mxu3 %v15057_v29  ;;  %v10500_v29 = vpop.f32.mrf.mxu0 }
 0x69d   :  { %v10775_v4 = vmax.f32 %v10431_v13, 0.0 }
 0x69f   :  { %v10809_v52 = vmul.f32 %v10793_v14, %v10775_v4  ;;  %v10570_v4 = vpop.f32.mrf.mxu1 }
 0x6a0   :  { %10703 = vmatpush.bf16.msrb.mxu3 %v15025_v8  ;;  %v10528_v8 = vpop.f32.mrf.mxu2 }
 0x6a1   :  { %v10824_v51 = vadd.f32 %v18815_v23, %v10809_v52  ;;  %v16014_v23 = vld [vmem:[#allocation16 + $0xf38] sm:$0xf0] }
 0x6a2   :  { %v10432_v33 = vpop.f32.mrf.mxu3  ;;  %v16017_v22 = vor.u32 %v17399_v25, %v16014_v23 }
 0x6a3   :  { %v10433_v54 = vadd.f32 %v10432_v33, %v10419_v59 }
 0x6a4   :  { %10704 = vmatpush.bf16.msrb.mxu3 %v14993_v27  ;;  %v10502_v59 = vpop.f32.mrf.mxu0 }
 0x6a5   :  { %v10783_v9 = vmax.f32 %v10433_v54, 0.0 }
 0x6a7   :  { %v10817_v32 = vmul.f32 %v10793_v14, %v10783_v9  ;;  %v10572_v3 = vpop.f32.mrf.mxu1  ;;  %v17450_v9 = vld [vmem:[#allocation17] sm:$0xff] }
 0x6a8   :  { %10705 = vmatpush.bf16.msrb.mxu3 %v14961_v47  ;;  %v7306_v23 = vperm.slane %v17450_v9, 7 }
 0x6a9   :  { %v10833_v39 = vadd.f32 %v18826_v46, %v10817_v32  ;;  %v15921_v46 = vor.u32 %v17375_v60, %v15918_v55 }
 0x6ac   :  { %10706 = vmatpush.bf16.msrb.mxu3 %v14929_v43 }
 0x6b0   :  { %10707 = vmatpush.bf16.msrb.mxu3 %v14897_v50  ;;  %v10556_v50 = vpop.f32.mrf.mxu0 }
 0x6b4   :  { %10708 = vmatpush.bf16.msrb.mxu3 %v14865_v20 }
 0x6b7   :  { %10709 = vmatmul.bf16.vlgmr.msrb.gmra.mxu3 %v18482_v1 }
 0x6b8   :  { %10757 = vmatpush.bf16.msra.mxu3 %v16113_v38  ;;  %v10558_v62 = vpop.f32.mrf.mxu0  ;;  %v10626_v38 = vpop.f32.mrf.mxu1 }
 0x6ba   :  { %v10486_v5 = vpop.f32.mrf.mxu3 }
 0x6bb   :  { %v10487_v1 = vadd.f32 %v10486_v5, %v18830_v45 }
 0x6bc   :  { %10758 = vmatpush.bf16.msra.mxu3 %v16081_v42  ;;  %v7305_v42 = vperm.slane %v17450_v9, 6 }
 0x6bd   :  { %v10501_v18 = vadd.f32 %v10500_v29, %v10487_v1 }
 0x6be   :  { %v10557_v32 = vadd.f32 %v10556_v50, %v7305_v42  ;;  %v10559_v34 = vadd.f32 %v10558_v62, %v7305_v42  ;;  %v10796_v62 = vperm.slane %v18808_v49, 7 }
 0x6bf   :  { %v10515_v44 = vadd.f32 %v10514_v7, %v10501_v18 }
 0x6c0   :  { %10759 = vmatpush.bf16.msra.mxu3 %v16049_v40  ;;  %v10612_v52 = vpop.f32.mrf.mxu0  ;;  %v10628_v54 = vpop.f32.mrf.mxu1  ;;  %v10571_v25 = vadd.f32 %v10570_v4, %v10557_v32  ;;  %v10573_v60 = vadd.f32 %v10572_v3, %v10559_v34 }
 0x6c1   :  { %v10529_v45 = vadd.f32 %v10528_v8, %v10515_v44 }
 0x6c2   :  { %v10488_v12 = vpop.f32.mrf.mxu3 }
 0x6c3   :  { %v10489_v2 = vadd.f32 %v10488_v12, %v18837_v0  ;;  %v10530_v0 = vpop.f32.mrf.mxu2 }
 0x6c4   :  { %10760 = vmatpush.bf16.msra.mxu3 %v16017_v22 }
 0x6c5   :  { %v10503_v6 = vadd.f32 %v10502_v59, %v10489_v2 }
 0x6c7   :  { %v10517_v56 = vadd.f32 %v10516_v57, %v10503_v6 }
 0x6c8   :  { %10761 = vmatpush.bf16.msra.mxu3 %v15985_v37  ;;  %v10614_v41 = vpop.f32.mrf.mxu0 }
 0x6c9   :  { %v10531_v43 = vadd.f32 %v10530_v0, %v10517_v56  ;;  %v10795_v0 = vperm.slane %v18808_v49, 6  ;;  %v17443_v49 = vld [vmem:[#allocation2] ss:$0 sm:$0xff] }
 0x6cb   :  { %v10584_v48 = vpop.f32.mrf.mxu2 }
 0x6cc   :  { %10762 = vmatpush.bf16.msra.mxu3 %v15953_v26  ;;  %v10585_v22 = vadd.f32 %v10584_v48, %v10571_v25 }
 0x6d0   :  { %10763 = vmatpush.bf16.msra.mxu3 %v15921_v46  ;;  %v10668_v19 = vpop.f32.mrf.mxu0 }
 0x6d1   :  { %v10669_v61 = vadd.f32 %v10668_v19, %v7306_v23 }
 0x6d3   :  { %v10586_v20 = vpop.f32.mrf.mxu2 }
 0x6d4   :  { %10764 = vmatpush.bf16.msra.mxu3 %v15889_v16  ;;  %v10587_v46 = vadd.f32 %v10586_v20, %v10573_v60 }
 0x6d7   :  { %10765 = vmatmul.bf16.vlgmr.msra.gmra.mxu3 %v18562_v28 }
 0x6d8   :  { %v10670_v37 = vpop.f32.mrf.mxu0 }
 0x6d9   :  { %v10671_v18 = vadd.f32 %v10670_v37, %v7306_v23 }
 0x6da   :  { %v10542_v10 = vpop.f32.mrf.mxu3 }
 0x6db   :  { %v10543_v27 = vadd.f32 %v10542_v10, %v10529_v45  ;;  %v10640_v36 = vpop.f32.mrf.mxu2 }
 0x6dd   :  { %v10776_v47 = vmax.f32 %v10543_v27, 0.0 }
 0x6df   :  { %v10810_v11 = vmul.f32 %v10794_v21, %v10776_v47 }
 0x6e0   :  { %v10724_v2 = vpop.f32.mrf.mxu0 }
 0x6e1   :  { %v18851_v53 = vadd.f32 %v10824_v51, %v10810_v11 }
 0x6e2   :  { %v10544_v28 = vpop.f32.mrf.mxu3 }
 0x6e3   :  { %v10545_v24 = vadd.f32 %v10544_v28, %v10531_v43  ;;  %v10642_v15 = vpop.f32.mrf.mxu2 }
 0x6e5   :  { %v10784_v35 = vmax.f32 %v10545_v24, 0.0 }
 0x6e7   :  { %v10818_v13 = vmul.f32 %v10794_v21, %v10784_v35 }
 0x6e8   :  { %v10726_v43 = vpop.f32.mrf.mxu0 }
 0x6e9   :  { %v18853_v14 = vadd.f32 %v10833_v39, %v10818_v13  ;;  %v10682_v39 = vpop.f32.mrf.mxu1 }
 0x6ea   :  { %v10683_v55 = vadd.f32 %v10682_v39, %v10669_v61 }
 0x6f1   :  { %v10684_v1 = vpop.f32.mrf.mxu1 }
 0x6f2   :  { %v10685_v7 = vadd.f32 %v10684_v1, %v10671_v18 }
 0x6f9   :  { %v10696_v17 = vpop.f32.mrf.mxu2  ;;  %v10738_v6 = vpop.f32.mrf.mxu1 }
 0x6fa   :  { %v10598_v63 = vpop.f32.mrf.mxu3  ;;  %v10697_v58 = vadd.f32 %v10696_v17, %v10683_v55 }
 0x6fb   :  { %v10599_v31 = vadd.f32 %v10598_v63, %v10585_v22 }
 0x6fd   :  { %v10613_v5 = vadd.f32 %v10612_v52, %v10599_v31 }
 0x6ff   :  { %v10627_v16 = vadd.f32 %v10626_v38, %v10613_v5 }
 0x701   :  { %v10698_v29 = vpop.f32.mrf.mxu2  ;;  %v10641_v8 = vadd.f32 %v10640_v36, %v10627_v16  ;;  %v10740_v63 = vpop.f32.mrf.mxu1 }
 0x702   :  { %v10600_v33 = vpop.f32.mrf.mxu3  ;;  %v10699_v10 = vadd.f32 %v10698_v29, %v10685_v7 }
 0x703   :  { %v10601_v30 = vadd.f32 %v10600_v33, %v10587_v46 }
 0x705   :  { %v10615_v44 = vadd.f32 %v10614_v41, %v10601_v30 }
 0x707   :  { %v10629_v21 = vadd.f32 %v10628_v54, %v10615_v44 }
 0x709   :  { %v10643_v28 = vadd.f32 %v10642_v15, %v10629_v21 }
 0x719   :  { %v10752_v56 = vpop.f32.mrf.mxu2 }
 0x71a   :  { %v10654_v51 = vpop.f32.mrf.mxu3 }
 0x71b   :  { %v10655_v27 = vadd.f32 %v10654_v51, %v10641_v8 }
 0x71d   :  { %v10777_v11 = vmax.f32 %v10655_v27, 0.0 }
 0x71f   :  { %v10811_v50 = vmul.f32 %v10795_v0, %v10777_v11 }
 0x721   :  { %v10826_v33 = vadd.f32 %v18851_v53, %v10811_v50  ;;  %v10754_v36 = vpop.f32.mrf.mxu2 }
 0x722   :  { %v10656_v40 = vpop.f32.mrf.mxu3 }
 0x723   :  { %v10657_v4 = vadd.f32 %v10656_v40, %v10643_v28 }
 0x725   :  { %v10785_v20 = vmax.f32 %v10657_v4, 0.0 }
 0x727   :  { %v10819_v9 = vmul.f32 %v10795_v0, %v10785_v20 }
 0x729   :  { %v10835_v32 = vadd.f32 %v18853_v14, %v10819_v9 }
 0x73a   :  { %v10710_v26 = vpop.f32.mrf.mxu3 }
 0x73b   :  { %v10711_v12 = vadd.f32 %v10710_v26, %v10697_v58 }
 0x73d   :  { %v10725_v59 = vadd.f32 %v10724_v2, %v10711_v12 }
 0x73f   :  { %v10739_v47 = vadd.f32 %v10738_v6, %v10725_v59 }
 0x741   :  { %v10753_v35 = vadd.f32 %v10752_v56, %v10739_v47 }
 0x742   :  { %v10712_v45 = vpop.f32.mrf.mxu3 }
 0x743   :  { %v10713_v57 = vadd.f32 %v10712_v45, %v10699_v10 }
 0x745   :  { %v10727_v24 = vadd.f32 %v10726_v43, %v10713_v57 }
 0x747   :  { %v10741_v52 = vadd.f32 %v10740_v63, %v10727_v24 }
 0x749   :  { %v10755_v41 = vadd.f32 %v10754_v36, %v10741_v52 }
 0x75a   :  { %v10766_v13 = vpop.f32.mrf.mxu3 }
 0x75b   :  { %v10767_v48 = vadd.f32 %v10766_v13, %v10753_v35 }
 0x75d   :  { %v10778_v3 = vmax.f32 %v10767_v48, 0.0 }
 0x75f   :  { %v10812_v38 = vmul.f32 %v10796_v62, %v10778_v3 }
 0x761   :  { %v10827_v51 = vadd.f32 %v10826_v33, %v10812_v38 }
 0x762   :  { %v10768_v54 = vpop.f32.mrf.mxu3 }
 0x763   :  { %v10769_v42 = vadd.f32 %v10768_v54, %v10755_v41  ;;  %10828 = vadd.xlane.f32.xlu0 %v10827_v51 }
 0x765   :  { %v10786_v19 = vmax.f32 %v10769_v42, 0.0 }
 0x767   :  { %v10820_v15 = vmul.f32 %v10796_v62, %v10786_v19 }
 0x769   :  { %v10836_v39 = vadd.f32 %v10835_v32, %v10820_v15 }
 0x76b   :  { %10837 = vadd.xlane.f32.xlu0 %v10836_v39 }
 0x7d6   :  { %v10829_v40 = vpop.xlane.xlu0 %10828 }
 0x7d7   :  { %v10843_v25 = vadd.f32 %v17443_v49, %v10829_v40 }
 0x7d9   :  { %10846 = vst.msk [vmem:[%s18878_s13] sm:$0xff] %vm10845_vm0, %v10843_v25 }
 0x7de   :  { %v10838_v53 = vpop.xlane.xlu0 %10837 }
 0x7df   :  { %v10844_v23 = vadd.f32 %v17443_v49, %v10838_v53 }
 0x7e1   :  { %10847 = vst.msk [vmem:[%s18878_s13 + $0x8] sm:$0xff] %vm10845_vm0, %v10844_v23 }
 0x7e2   :  { %10852 = vsyncpa [#allocation4], 1 }
 0x7e3   :  { %10853 = vsyncpa [#allocation6], 1 }
 0x7e4   :  { %10854 = vsyncpa [#allocation9], 1 }
 0x7e5   :  { %10855 = vsyncpa [#allocation12], 1 }
 0x7e6   :  { %10856 = vsyncpa [#allocation15], 1 }
 0x7e7   :  { %10857 = vsyncpa [#allocation18], 1 }

</bundles_post_ra>
